<compile_context>
chip_gen: v5e
topology: v5e:2x2
jax: 0.10.0
libtpu: 0.0.40
codegen_flags: <defaults>
</compile_context>

<pallas_src>
import jax
import jax.numpy as jnp
from jax.experimental import pallas as pl
from jax.experimental.pallas import tpu as pltpu


def _convnext_block_kernel(x_ref, xp_ref, xn_ref, wdw_ref, bdw_ref, g_ref,
                           beta_ref, w1_ref, b1_ref, w2_ref, b2_ref, o_ref):
    j = pl.program_id(1)
    nt = pl.num_programs(1)

    x = x_ref[0].astype(jnp.float32)                       # (Tt, C)
    tt = x.shape[0]

    # Halo rows: the row just before / just after this tile. At the sequence
    # edges the index_map was clamped, so zero the contribution here.
    xp = xp_ref[0][7:8, :].astype(jnp.float32)             # row  tile_start - 1
    xn = xn_ref[0][0:1, :].astype(jnp.float32)             # row  tile_end
    xp = xp * (j > 0).astype(jnp.float32)
    xn = xn * (j < nt - 1).astype(jnp.float32)

    # Shifted copies along T (sublane axis). Both shifts are non-negative.
    row = jax.lax.broadcasted_iota(jnp.int32, x.shape, 0)
    prev = jnp.where(row == 0, xp, pltpu.roll(x, shift=1, axis=0))           # x[t-1]
    nxt = jnp.where(row == tt - 1, xn, pltpu.roll(x, shift=tt - 1, axis=0))  # x[t+1]

    # Depthwise k=3 conv: per-channel taps broadcast over rows (VPU only).
    wdw = wdw_ref[...]                                     # (3, C) f32
    y = (prev * wdw[0:1, :] + x * wdw[1:2, :] + nxt * wdw[2:3, :]
         + bdw_ref[...])

    # LayerNorm over channels (biased variance, eps=1e-6), one-pass, f32.
    mean = jnp.mean(y, axis=-1, keepdims=True)
    mean_sq = jnp.mean(y * y, axis=-1, keepdims=True)
    var = jnp.maximum(mean_sq - mean * mean, 0.0)
    ln = (y - mean) * jax.lax.rsqrt(var + 1e-6)
    ln = ln * g_ref[...] + beta_ref[...]

    # pw_conv1 -> GELU (bf16) -> pw_conv2 (bf16 MXU matmuls, f32 accumulation).
    h = (jnp.dot(ln.astype(jnp.bfloat16), w1_ref[...],
                 preferred_element_type=jnp.float32) + b1_ref[...])
    h = jax.nn.gelu(h.astype(jnp.bfloat16), approximate=True)
    # TODO(synk): nn.GELU() default is exact erf; tanh approximation used here.
    out = jnp.dot(h, w2_ref[...],
                  preferred_element_type=jnp.float32) + b2_ref[...]

    # Residual add (shortcut = Identity for stride=1, drop_path = Identity).
    o_ref[0] = (out + x).astype(o_ref.dtype)


def convnext_block_forward(x_btc, params, *, t_tile=256):
    """x_btc: (B, T, C). Requires T % t_tile == 0, t_tile % 8 == 0, C % 128 == 0."""
    B, T, C = x_btc.shape
    H = params["w1t"].shape[1]
    t_tile = min(t_tile, T)
    assert T % t_tile == 0 and t_tile % 8 == 0 and C % 128 == 0
    nt = T // t_tile
    tb = t_tile // 8          # tile length in 8-row (sublane) blocks
    nb = T // 8               # total number of 8-row blocks

    act_bytes = x_btc.dtype.itemsize

    # Constant-index parameters: DMA'd once, single-buffered (no wasted copy).
    def const(shape):
        return pl.BlockSpec(shape, lambda b, j: (0,) * len(shape),
                            pipeline_mode=pl.Buffered(1))

    # Explicit VMEM budget (double-buffered activations + single-buffered
    # weights + headroom for the (t_tile, H) intermediate), capped below v7x's
    # 64 MiB physical VMEM.
    est = (2 * 2 * t_tile * C * act_bytes          # x tile + out tile, 2 buffers each
           + 2 * 2 * 8 * C * act_bytes             # two halo blocks, 2 buffers each
           + 2 * C * H * 2                         # w1t + w2t (bf16), single-buffered
           + 16 * C * 4 + 4 * H * 4                # small parameter vectors
           + t_tile * H * 4 + 4 * t_tile * C * 4)  # compiler scratch headroom
    vmem_limit = int(min(max(est + (8 << 20), 32 << 20), 56 << 20))

    grid_spec = pltpu.PrefetchScalarGridSpec(
        num_scalar_prefetch=0,
        grid=(B, nt),
        in_specs=[
            # current T-tile
            pl.BlockSpec((1, t_tile, C), lambda b, j: (b, j, 0)),
            # 8-row halo block whose last row is  j*t_tile - 1   (clamped at front)
            pl.BlockSpec((1, 8, C),
                         lambda b, j: (b, jnp.maximum(j * tb - 1, 0), 0)),
            # 8-row halo block whose first row is (j+1)*t_tile   (clamped at back)
            pl.BlockSpec((1, 8, C),
                         lambda b, j: (b, jnp.minimum((j + 1) * tb, nb - 1), 0)),
            const((3, C)),    # depthwise taps (k=3, per channel)
            const((1, C)),    # depthwise bias
            const((1, C)),    # LayerNorm gamma
            const((1, C)),    # LayerNorm beta
            const((C, H)),    # pw_conv1 weight (transposed), bf16
            const((1, H)),    # pw_conv1 bias
            const((H, C)),    # pw_conv2 weight (transposed), bf16
            const((1, C)),    # pw_conv2 bias
        ],
        out_specs=pl.BlockSpec((1, t_tile, C), lambda b, j: (b, j, 0)),
    )

    return pl.pallas_call(
        _convnext_block_kernel,
        out_shape=jax.ShapeDtypeStruct((B, T, C), x_btc.dtype),
        grid_spec=grid_spec,
        compiler_params=pltpu.CompilerParams(
            dimension_semantics=("parallel", "parallel"),
            vmem_limit_bytes=vmem_limit),
    )(x_btc, x_btc, x_btc,
      params["w_dw"], params["b_dw"], params["gamma"], params["beta"],
      params["w1t"], params["b1"], params["w2t"], params["b2"])


def make_params(key, dim, expansion_ratio=4):
    """Random weights in PyTorch layouts, pre-transposed for the kernel."""
    hidden = expansion_ratio * dim
    ks = jax.random.split(key, 8)
    s = 0.1
    # PyTorch layouts: dw_conv.weight (dim, 1, 3); Linear.weight (out, in).
    w_dw = jax.random.normal(ks[0], (dim, 1, 3), jnp.float32) * s
    b_dw = jax.random.normal(ks[1], (dim,), jnp.float32) * s
    gamma = 1.0 + jax.random.normal(ks[2], (dim,), jnp.float32) * s
    beta = jax.random.normal(ks[3], (dim,), jnp.float32) * s
    w1 = jax.random.normal(ks[4], (hidden, dim), jnp.float32) * s
    b1 = jax.random.normal(ks[5], (hidden,), jnp.float32) * s
    w2 = jax.random.normal(ks[6], (dim, hidden), jnp.float32) * s
    b2 = jax.random.normal(ks[7], (dim,), jnp.float32) * s
    return dict(
        w_dw=jnp.transpose(w_dw[:, 0, :], (1, 0)),           # (3, dim): row k = tap k
        b_dw=b_dw.reshape(1, dim),
        gamma=gamma.reshape(1, dim),
        beta=beta.reshape(1, dim),
        w1t=jnp.transpose(w1).astype(jnp.bfloat16),           # (dim, hidden)
        b1=b1.reshape(1, hidden),
        w2t=jnp.transpose(w2).astype(jnp.bfloat16),           # (hidden, dim)
        b2=b2.reshape(1, dim),
    )


def reference_forward(x_btc, params):
    """Pure-JAX f32 reference mirroring the PyTorch forward (mask=None, stride=1)."""
    x = x_btc.astype(jnp.float32)
    w = params["w_dw"]                                       # (3, C)
    pad = jnp.pad(x, ((0, 0), (1, 1), (0, 0)))
    y = (pad[:, :-2] * w[0] + pad[:, 1:-1] * w[1] + pad[:, 2:] * w[2]
         + params["b_dw"])
    mean = jnp.mean(y, axis=-1, keepdims=True)
    var = jnp.mean(jnp.square(y - mean), axis=-1, keepdims=True)
    ln = (y - mean) / jnp.sqrt(var + 1e-6)
    ln = ln * params["gamma"] + params["beta"]
    h = ln @ params["w1t"].astype(jnp.float32) + params["b1"]
    h = jax.nn.gelu(h, approximate=True)
    out = h @ params["w2t"].astype(jnp.float32) + params["b2"]
    return out + x


if __name__ == "__main__":
    # NOTE: demo shape only — tune t_tile / VMEM at production dims
    # (C = 512-1024, T in the thousands).
    B, dim, T = 2, 128, 512
    key = jax.random.PRNGKey(0)
    kx, kp = jax.random.split(key)

    # PyTorch input layout is (B, C, T); transpose once to (B, T, C) for the kernel.
    x_nct = jax.random.normal(kx, (B, dim, T), jnp.float32)
    x_btc = jnp.transpose(x_nct, (0, 2, 1))
    params = make_params(kp, dim)

    x_bf16 = x_btc.astype(jnp.bfloat16)
    out = convnext_block_forward(x_bf16, params, t_tile=256)
    out = jax.block_until_ready(out)

    ref = reference_forward(x_bf16, params)
    assert out.shape == (B, T, dim)
    err = float(jnp.max(jnp.abs(out.astype(jnp.float32) - ref)))
    assert jnp.allclose(out.astype(jnp.float32), ref, atol=8e-2, rtol=8e-2), err
    print("KERNEL_OK")
</pallas_src>

<mosaic_0001>
module attributes {stable_mosaic.version = 11 : i64} {
  func.func @_convnext_block_kernel(%arg0: i32, %arg1: i32, %arg2: memref<1x256x128xbf16, #tpu.memory_space<vmem>>, %arg3: memref<1x8x128xbf16, #tpu.memory_space<vmem>>, %arg4: memref<1x8x128xbf16, #tpu.memory_space<vmem>>, %arg5: memref<3x128xf32, #tpu.memory_space<vmem>>, %arg6: memref<1x128xf32, #tpu.memory_space<vmem>>, %arg7: memref<1x128xf32, #tpu.memory_space<vmem>>, %arg8: memref<1x128xf32, #tpu.memory_space<vmem>>, %arg9: memref<128x512xbf16, #tpu.memory_space<vmem>>, %arg10: memref<1x512xf32, #tpu.memory_space<vmem>>, %arg11: memref<512x128xbf16, #tpu.memory_space<vmem>>, %arg12: memref<1x128xf32, #tpu.memory_space<vmem>>, %arg13: memref<1x256x128xbf16, #tpu.memory_space<vmem>>) attributes {dimension_semantics = [#tpu.dimension_semantics<parallel>, #tpu.dimension_semantics<parallel>], iteration_bounds = array<i64: 2, 2>, scalar_prefetch = 0 : i64, scratch_operands = 0 : i64, tpu.core_type = #tpu.core_type<tc>, window_params = [{transform_indices = @transform_0, window_bounds = array<i64: 1, 256, 128>}, {transform_indices = @transform_1, window_bounds = array<i64: 1, 8, 128>}, {transform_indices = @transform_2, window_bounds = array<i64: 1, 8, 128>}, {pipeline_mode = #tpu.pipeline_mode<synchronous>, transform_indices = @transform_3, window_bounds = array<i64: 3, 128>}, {pipeline_mode = #tpu.pipeline_mode<synchronous>, transform_indices = @transform_4, window_bounds = array<i64: 1, 128>}, {pipeline_mode = #tpu.pipeline_mode<synchronous>, transform_indices = @transform_5, window_bounds = array<i64: 1, 128>}, {pipeline_mode = #tpu.pipeline_mode<synchronous>, transform_indices = @transform_6, window_bounds = array<i64: 1, 128>}, {pipeline_mode = #tpu.pipeline_mode<synchronous>, transform_indices = @transform_7, window_bounds = array<i64: 128, 512>}, {pipeline_mode = #tpu.pipeline_mode<synchronous>, transform_indices = @transform_8, window_bounds = array<i64: 1, 512>}, {pipeline_mode = #tpu.pipeline_mode<synchronous>, transform_indices = @transform_9, window_bounds = array<i64: 512, 128>}, {pipeline_mode = #tpu.pipeline_mode<synchronous>, transform_indices = @transform_10, window_bounds = array<i64: 1, 128>}, {transform_indices = @transform_11, window_bounds = array<i64: 1, 256, 128>}]} {
    %c0 = arith.constant 0 : index
    %c0_0 = arith.constant 0 : index
    %c0_1 = arith.constant 0 : index
    %0 = vector.load %arg2[%c0, %c0_0, %c0_1] : memref<1x256x128xbf16, #tpu.memory_space<vmem>>, vector<1x256x128xbf16>
    %1 = vector.shape_cast %0 : vector<1x256x128xbf16> to vector<256x128xbf16>
    %2 = arith.extf %1 : vector<256x128xbf16> to vector<256x128xf32>
    %c0_2 = arith.constant 0 : index
    %c0_3 = arith.constant 0 : index
    %c0_4 = arith.constant 0 : index
    %3 = vector.load %arg3[%c0_2, %c0_3, %c0_4] : memref<1x8x128xbf16, #tpu.memory_space<vmem>>, vector<1x8x128xbf16>
    %4 = vector.shape_cast %3 : vector<1x8x128xbf16> to vector<8x128xbf16>
    %5 = vector.extract_strided_slice %4 {offsets = [7, 0], sizes = [1, 128], strides = [1, 1]} : vector<8x128xbf16> to vector<1x128xbf16>
    %6 = arith.extf %5 : vector<1x128xbf16> to vector<1x128xf32>
    %c0_5 = arith.constant 0 : index
    %c0_6 = arith.constant 0 : index
    %c0_7 = arith.constant 0 : index
    %7 = vector.load %arg4[%c0_5, %c0_6, %c0_7] : memref<1x8x128xbf16, #tpu.memory_space<vmem>>, vector<1x8x128xbf16>
    %8 = vector.shape_cast %7 : vector<1x8x128xbf16> to vector<8x128xbf16>
    %9 = vector.extract_strided_slice %8 {offsets = [0, 0], sizes = [1, 128], strides = [1, 1]} : vector<8x128xbf16> to vector<1x128xbf16>
    %10 = arith.extf %9 : vector<1x128xbf16> to vector<1x128xf32>
    %c0_i32 = arith.constant 0 : i32
    %11 = arith.cmpi sgt, %arg1, %c0_i32 : i32
    %12 = arith.extui %11 : i1 to i32
    %13 = arith.sitofp %12 : i32 to f32
    %14 = vector.broadcast %13 : f32 to vector<1x128xf32>
    %15 = arith.mulf %6, %14 : vector<1x128xf32>
    %c1_i32 = arith.constant 1 : i32
    %16 = arith.cmpi slt, %arg1, %c1_i32 : i32
    %17 = arith.extui %16 : i1 to i32
    %18 = arith.sitofp %17 : i32 to f32
    %19 = vector.broadcast %18 : f32 to vector<1x128xf32>
    %20 = arith.mulf %10, %19 : vector<1x128xf32>
    %21 = tpu.iota {dimensions = array<i32: 0>} : vector<256x128xi32>
    %c0_i32_8 = arith.constant 0 : i32
    %22 = vector.broadcast %c0_i32_8 : i32 to vector<256x128xi32>
    %23 = arith.cmpi eq, %21, %22 : vector<256x128xi32>
    %c1_i32_9 = arith.constant 1 : i32
    %24 = tpu.dynamic_rotate %2 by %c1_i32_9 dim 0 : vector<256x128xf32>, i32 -> vector<256x128xf32>
    %25 = vector.shape_cast %15 : vector<1x128xf32> to vector<1x128xf32>
    %26 = vector.broadcast %25 : vector<1x128xf32> to vector<256x128xf32>
    %27 = arith.select %23, %26, %24 : vector<256x128xi1>, vector<256x128xf32>
    %c255_i32 = arith.constant 255 : i32
    %28 = vector.broadcast %c255_i32 : i32 to vector<256x128xi32>
    %29 = arith.cmpi eq, %21, %28 : vector<256x128xi32>
    %c255_i32_10 = arith.constant 255 : i32
    %30 = tpu.dynamic_rotate %2 by %c255_i32_10 dim 0 : vector<256x128xf32>, i32 -> vector<256x128xf32>
    %31 = vector.shape_cast %20 : vector<1x128xf32> to vector<1x128xf32>
    %32 = vector.broadcast %31 : vector<1x128xf32> to vector<256x128xf32>
    %33 = arith.select %29, %32, %30 : vector<256x128xi1>, vector<256x128xf32>
    %c0_11 = arith.constant 0 : index
    %c0_12 = arith.constant 0 : index
    %34 = vector.load %arg5[%c0_11, %c0_12] : memref<3x128xf32, #tpu.memory_space<vmem>>, vector<3x128xf32>
    %35 = vector.extract_strided_slice %34 {offsets = [0, 0], sizes = [1, 128], strides = [1, 1]} : vector<3x128xf32> to vector<1x128xf32>
    %36 = vector.broadcast %35 : vector<1x128xf32> to vector<256x128xf32>
    %37 = arith.mulf %27, %36 : vector<256x128xf32>
    %38 = vector.extract_strided_slice %34 {offsets = [1, 0], sizes = [1, 128], strides = [1, 1]} : vector<3x128xf32> to vector<1x128xf32>
    %39 = vector.broadcast %38 : vector<1x128xf32> to vector<256x128xf32>
    %40 = arith.mulf %2, %39 : vector<256x128xf32>
    %41 = arith.addf %37, %40 : vector<256x128xf32>
    %42 = vector.extract_strided_slice %34 {offsets = [2, 0], sizes = [1, 128], strides = [1, 1]} : vector<3x128xf32> to vector<1x128xf32>
    %43 = vector.broadcast %42 : vector<1x128xf32> to vector<256x128xf32>
    %44 = arith.mulf %33, %43 : vector<256x128xf32>
    %45 = arith.addf %41, %44 : vector<256x128xf32>
    %c0_13 = arith.constant 0 : index
    %c0_14 = arith.constant 0 : index
    %46 = vector.load %arg6[%c0_13, %c0_14] : memref<1x128xf32, #tpu.memory_space<vmem>>, vector<1x128xf32>
    %47 = vector.broadcast %46 : vector<1x128xf32> to vector<256x128xf32>
    %48 = arith.addf %45, %47 : vector<256x128xf32>
    %cst = arith.constant dense<0.000000e+00> : vector<256xf32>
    %49 = vector.multi_reduction <add>, %48, %cst [1] : vector<256x128xf32> to vector<256xf32>
    %50 = vector.shape_cast %49 : vector<256xf32> to vector<256x1xf32>
    %cst_15 = arith.constant 1.280000e+02 : f32
    %51 = vector.broadcast %cst_15 : f32 to vector<256x1xf32>
    %52 = arith.divf %50, %51 : vector<256x1xf32>
    %53 = arith.mulf %48, %48 : vector<256x128xf32>
    %cst_16 = arith.constant dense<0.000000e+00> : vector<256xf32>
    %54 = vector.multi_reduction <add>, %53, %cst_16 [1] : vector<256x128xf32> to vector<256xf32>
    %55 = vector.shape_cast %54 : vector<256xf32> to vector<256x1xf32>
    %cst_17 = arith.constant 1.280000e+02 : f32
    %56 = vector.broadcast %cst_17 : f32 to vector<256x1xf32>
    %57 = arith.divf %55, %56 : vector<256x1xf32>
    %58 = arith.mulf %52, %52 : vector<256x1xf32>
    %59 = arith.subf %57, %58 : vector<256x1xf32>
    %cst_18 = arith.constant 0.000000e+00 : f32
    %60 = vector.broadcast %cst_18 : f32 to vector<256x1xf32>
    %61 = arith.maximumf %59, %60 : vector<256x1xf32>
    %62 = vector.broadcast %52 : vector<256x1xf32> to vector<256x128xf32>
    %63 = arith.subf %48, %62 : vector<256x128xf32>
    %cst_19 = arith.constant 9.99999997E-7 : f32
    %64 = vector.broadcast %cst_19 : f32 to vector<256x1xf32>
    %65 = arith.addf %61, %64 : vector<256x1xf32>
    %66 = math.rsqrt %65 : vector<256x1xf32>
    %67 = vector.broadcast %66 : vector<256x1xf32> to vector<256x128xf32>
    %68 = arith.mulf %63, %67 : vector<256x128xf32>
    %c0_20 = arith.constant 0 : index
    %c0_21 = arith.constant 0 : index
    %69 = vector.load %arg7[%c0_20, %c0_21] : memref<1x128xf32, #tpu.memory_space<vmem>>, vector<1x128xf32>
    %70 = vector.broadcast %69 : vector<1x128xf32> to vector<256x128xf32>
    %71 = arith.mulf %68, %70 : vector<256x128xf32>
    %c0_22 = arith.constant 0 : index
    %c0_23 = arith.constant 0 : index
    %72 = vector.load %arg8[%c0_22, %c0_23] : memref<1x128xf32, #tpu.memory_space<vmem>>, vector<1x128xf32>
    %73 = vector.broadcast %72 : vector<1x128xf32> to vector<256x128xf32>
    %74 = arith.addf %71, %73 : vector<256x128xf32>
    %75 = arith.truncf %74 : vector<256x128xf32> to vector<256x128xbf16>
    %c0_24 = arith.constant 0 : index
    %c0_25 = arith.constant 0 : index
    %76 = vector.load %arg9[%c0_24, %c0_25] : memref<128x512xbf16, #tpu.memory_space<vmem>>, vector<128x512xbf16>
    %cst_26 = arith.constant dense<0.000000e+00> : vector<256x512xf32>
    %77 = tpu.matmul %75, %76, %cst_26 {dimension_numbers = #tpu.dot_dimension_numbers<[1], [0], [0], [1], [0, 0, 1, 1], [], []>} : vector<256x128xbf16>, vector<128x512xbf16>, vector<256x512xf32> -> vector<256x512xf32>
    %c0_27 = arith.constant 0 : index
    %c0_28 = arith.constant 0 : index
    %78 = vector.load %arg10[%c0_27, %c0_28] : memref<1x512xf32, #tpu.memory_space<vmem>>, vector<1x512xf32>
    %79 = vector.broadcast %78 : vector<1x512xf32> to vector<256x512xf32>
    %80 = arith.addf %77, %79 : vector<256x512xf32>
    %81 = arith.truncf %80 : vector<256x512xf32> to vector<256x512xbf16>
    %82 = arith.mulf %81, %81 : vector<256x512xbf16>
    %83 = arith.mulf %81, %82 : vector<256x512xbf16>
    %cst_29 = arith.constant 4.467770e-02 : bf16
    %84 = vector.broadcast %cst_29 : bf16 to vector<256x512xbf16>
    %85 = arith.mulf %84, %83 : vector<256x512xbf16>
    %86 = arith.addf %81, %85 : vector<256x512xbf16>
    %cst_30 = arith.constant 7.968750e-01 : bf16
    %87 = vector.broadcast %cst_30 : bf16 to vector<256x512xbf16>
    %88 = arith.mulf %87, %86 : vector<256x512xbf16>
    %89 = math.tanh %88 : vector<256x512xbf16>
    %cst_31 = arith.constant 1.000000e+00 : bf16
    %90 = vector.broadcast %cst_31 : bf16 to vector<256x512xbf16>
    %91 = arith.addf %90, %89 : vector<256x512xbf16>
    %cst_32 = arith.constant 5.000000e-01 : bf16
    %92 = vector.broadcast %cst_32 : bf16 to vector<256x512xbf16>
    %93 = arith.mulf %92, %91 : vector<256x512xbf16>
    %94 = arith.mulf %81, %93 : vector<256x512xbf16>
    %c0_33 = arith.constant 0 : index
    %c0_34 = arith.constant 0 : index
    %95 = vector.load %arg11[%c0_33, %c0_34] : memref<512x128xbf16, #tpu.memory_space<vmem>>, vector<512x128xbf16>
    %cst_35 = arith.constant dense<0.000000e+00> : vector<256x128xf32>
    %96 = tpu.matmul %94, %95, %cst_35 {dimension_numbers = #tpu.dot_dimension_numbers<[1], [0], [0], [1], [0, 0, 1, 1], [], []>} : vector<256x512xbf16>, vector<512x128xbf16>, vector<256x128xf32> -> vector<256x128xf32>
    %c0_36 = arith.constant 0 : index
    %c0_37 = arith.constant 0 : index
    %97 = vector.load %arg12[%c0_36, %c0_37] : memref<1x128xf32, #tpu.memory_space<vmem>>, vector<1x128xf32>
    %98 = vector.broadcast %97 : vector<1x128xf32> to vector<256x128xf32>
    %99 = arith.addf %96, %98 : vector<256x128xf32>
    %100 = arith.addf %99, %2 : vector<256x128xf32>
    %101 = arith.truncf %100 : vector<256x128xf32> to vector<256x128xbf16>
    %c0_38 = arith.constant 0 : index
    %c0_39 = arith.constant 0 : index
    %c0_40 = arith.constant 0 : index
    %102 = vector.load %arg13[%c0_38, %c0_39, %c0_40] : memref<1x256x128xbf16, #tpu.memory_space<vmem>>, vector<1x256x128xbf16>
    %103 = vector.shape_cast %102 : vector<1x256x128xbf16> to vector<256x128xbf16>
    %104 = vector.shape_cast %101 : vector<256x128xbf16> to vector<1x256x128xbf16>
    tpu.vector_store %arg13[%c0_38, %c0_39, %c0_40], %104 {strides = array<i32>} : memref<1x256x128xbf16, #tpu.memory_space<vmem>>, vector<1x256x128xbf16>,
    return
  }
  func.func @transform_0(%arg0: i32, %arg1: i32) -> (i32, i32, i32) {
    %c0_i32 = arith.constant 0 : i32
    %c0_i32_0 = arith.constant 0 : i32
    return %arg0, %arg1, %c0_i32 : i32, i32, i32
  }
  func.func @transform_1(%arg0: i32, %arg1: i32) -> (i32, i32, i32) {
    %c32_i32 = arith.constant 32 : i32
    %0 = arith.muli %arg1, %c32_i32 : i32
    %c1_i32 = arith.constant 1 : i32
    %1 = arith.subi %0, %c1_i32 : i32
    %c0_i32 = arith.constant 0 : i32
    %2 = arith.maxsi %1, %c0_i32 : i32
    %c0_i32_0 = arith.constant 0 : i32
    %c0_i32_1 = arith.constant 0 : i32
    return %arg0, %2, %c0_i32_0 : i32, i32, i32
  }
  func.func @transform_2(%arg0: i32, %arg1: i32) -> (i32, i32, i32) {
    %c1_i32 = arith.constant 1 : i32
    %0 = arith.addi %arg1, %c1_i32 : i32
    %c32_i32 = arith.constant 32 : i32
    %1 = arith.muli %0, %c32_i32 : i32
    %c63_i32 = arith.constant 63 : i32
    %2 = arith.minsi %1, %c63_i32 : i32
    %c0_i32 = arith.constant 0 : i32
    %c0_i32_0 = arith.constant 0 : i32
    return %arg0, %2, %c0_i32 : i32, i32, i32
  }
  func.func @transform_3(%arg0: i32, %arg1: i32) -> (i32, i32) {
    %c0_i32 = arith.constant 0 : i32
    %c0_i32_0 = arith.constant 0 : i32
    %c0_i32_1 = arith.constant 0 : i32
    return %c0_i32, %c0_i32_0 : i32, i32
  }
  func.func @transform_4(%arg0: i32, %arg1: i32) -> (i32, i32) {
    %c0_i32 = arith.constant 0 : i32
    %c0_i32_0 = arith.constant 0 : i32
    %c0_i32_1 = arith.constant 0 : i32
    return %c0_i32, %c0_i32_0 : i32, i32
  }
  func.func @transform_5(%arg0: i32, %arg1: i32) -> (i32, i32) {
    %c0_i32 = arith.constant 0 : i32
    %c0_i32_0 = arith.constant 0 : i32
    %c0_i32_1 = arith.constant 0 : i32
    return %c0_i32, %c0_i32_0 : i32, i32
  }
  func.func @transform_6(%arg0: i32, %arg1: i32) -> (i32, i32) {
    %c0_i32 = arith.constant 0 : i32
    %c0_i32_0 = arith.constant 0 : i32
    %c0_i32_1 = arith.constant 0 : i32
    return %c0_i32, %c0_i32_0 : i32, i32
  }
  func.func @transform_7(%arg0: i32, %arg1: i32) -> (i32, i32) {
    %c0_i32 = arith.constant 0 : i32
    %c0_i32_0 = arith.constant 0 : i32
    %c0_i32_1 = arith.constant 0 : i32
    return %c0_i32, %c0_i32_0 : i32, i32
  }
  func.func @transform_8(%arg0: i32, %arg1: i32) -> (i32, i32) {
    %c0_i32 = arith.constant 0 : i32
    %c0_i32_0 = arith.constant 0 : i32
    %c0_i32_1 = arith.constant 0 : i32
    return %c0_i32, %c0_i32_0 : i32, i32
  }
  func.func @transform_9(%arg0: i32, %arg1: i32) -> (i32, i32) {
    %c0_i32 = arith.constant 0 : i32
    %c0_i32_0 = arith.constant 0 : i32
    %c0_i32_1 = arith.constant 0 : i32
    return %c0_i32, %c0_i32_0 : i32, i32
  }
  func.func @transform_10(%arg0: i32, %arg1: i32) -> (i32, i32) {
    %c0_i32 = arith.constant 0 : i32
    %c0_i32_0 = arith.constant 0 : i32
    %c0_i32_1 = arith.constant 0 : i32
    return %c0_i32, %c0_i32_0 : i32, i32
  }
  func.func @transform_11(%arg0: i32, %arg1: i32) -> (i32, i32, i32) {
    %c0_i32 = arith.constant 0 : i32
    %c0_i32_0 = arith.constant 0 : i32
    return %arg0, %arg1, %c0_i32 : i32, i32, i32
  }
}

</mosaic_0001>

<bundles_post_ra>
// kernel: tpu_custom_call.1
= control target key start
LH: loop header
LB: loop body
LE: loop exit
PB: predicated region body
PF: predicated region fallthrough
CT: control target
= control target key end

     0   :  { %s11714_s0 = inlined_call_operand.hbm [shape: bf16[2,512,128], index: 0, kind: input, shape index: {}]   ;;  %s11715_s1 = inlined_call_operand.hbm [shape: bf16[2,512,128], index: 1, kind: input, shape index: {}]   ;;  %s11716_s2 = inlined_call_operand.hbm [shape: bf16[2,512,128], index: 2, kind: input, shape index: {}]   ;;  %s11717_s3 = inlined_call_operand.hbm [shape: f32[3,128], index: 3, kind: input, shape index: {}]   ;;  %s11718_s4 = inlined_call_operand.vmem [shape: f32[1,128], index: 4, kind: input, shape index: {}]   ;;  %s11719_s5 = inlined_call_operand.vmem [shape: f32[1,128], index: 5, kind: input, shape index: {}]   ;;  %s11720_s6 = inlined_call_operand.vmem [shape: f32[1,128], index: 6, kind: input, shape index: {}]   ;;  %s11721_s7 = inlined_call_operand.hbm [shape: bf16[128,512], index: 7, kind: input, shape index: {}]   ;;  %s11722_s8 = inlined_call_operand.vmem [shape: f32[1,512], index: 8, kind: input, shape index: {}]   ;;  %s11723_s9 = inlined_call_operand.hbm [shape: bf16[512,128], index: 9, kind: input, shape index: {}]   ;;  %s11724_s10 = inlined_call_operand.vmem [shape: f32[1,128], index: 10, kind: input, shape index: {}]   ;;  %s11725_s11 = inlined_call_operand.hbm [shape: bf16[2,512,128], index: 11, kind: output, shape index: {}]  }
   0x1   :  { %11932 = sst [smem:[#allocation161_spill]] %s11714_s0 }
   0x2   :  { %11933 = sst [smem:[#allocation162_spill]] %s11715_s1 }
   0x3   :  { %11934 = sst [smem:[#allocation163_spill]] %s11716_s2 }
   0x4   :  { %11935 = sst [smem:[#allocation164_spill]] %s11717_s3 }
   0x5   :  { %11936 = sst [smem:[#allocation165_spill]] %s11718_s4 }
   0x6   :  { %11937 = sst [smem:[#allocation166_spill]] %s11719_s5 }
   0x7   :  { %11938 = sst [smem:[#allocation167_spill]] %s11720_s6 }
   0x8   :  { %11939 = sst [smem:[#allocation168_spill]] %s11721_s7 }
   0x9   :  { %11940 = sst [smem:[#allocation169_spill]] %s11722_s8 }
   0xa   :  { %11941 = sst [smem:[#allocation170_spill]] %s11723_s9 }
   0xb   :  { %11942 = sst [smem:[#allocation171_spill]] %s11724_s10 }
   0xc   :  { %11943 = sst [smem:[#allocation172_spill]] %s11725_s11 }
   0xd   :  { %16 = vsyncpa [#allocation3], 0 }
   0xe   :  { %18 = vsyncpa [#allocation3 + $0x1], 0 }
   0xf   :  { %19 = vsyncpa [#allocation6], 0 }
  0x10   :  { %21 = vsyncpa [#allocation6 + $0x1], 0 }
  0x11   :  { %22 = vsyncpa [#allocation9], 0 }
  0x12   :  { %23 = vsyncpa [#allocation12], 0 }
  0x13   :  { %24 = vsyncpa [#allocation4], 0 }
  0x14   :  { %26 = vsyncpa [#allocation4 + $0x1], 0  ;;  %s7853_s17 = smov 0   ;;  %s7855_s18 = smov 0  }
  0x15   :  { %s7857_s19 = smov 0   ;;  %s7859_s20 = smov 0  }
  0x16   :  { %s7861_s21 = smov 0   ;;  %s7863_s22 = smov 0  }
  0x17   :  { %s7865_s23 = smov 0   ;;  %s7867_s24 = smov 0  }
  0x18   :  { %s7869_s25 = smov 0   ;;  %s7871_s26 = smov 0  }
  0x19   :  { %s7873_s27 = smov 0   ;;  %s7875_s28 = smov 0  }
  0x1a   :  { %s7877_s29 = smov 0   ;;  %s7879_s30 = smov 0  }
  0x1b LB: > { %11944 = sst [smem:[#allocation20_spill]] %s7729_s17  ;;  %s7924_s12 = sadd.s32 4294967295, %s7781_s30   ;;  %s7781_s30 = sphi %s7879_s30, %s32_s30   ;;  %s7777_s29 = sphi %s7877_s29, %s12554_s29   ;;  %s7773_s28 = sphi %s7875_s28, %s12553_s28   ;;  %s7769_s27 = sphi %s7873_s27, %s12562_s27   ;;  %s7765_s26 = sphi %s7871_s26, %s12551_s26   ;;  %s7761_s25 = sphi %s7869_s25, %s12550_s25   ;;  %s7757_s24 = sphi %s7867_s24, %s12561_s24   ;;  %s7753_s23 = sphi %s7865_s23, %s12560_s23   ;;  %s7749_s22 = sphi %s7863_s22, %s12559_s22   ;;  %s7745_s21 = sphi %s7861_s21, %s12558_s21   ;;  %s7741_s20 = sphi %s7859_s20, %s12557_s20   ;;  %s7737_s19 = sphi %s7857_s19, %s12556_s19   ;;  %s7733_s18 = sphi %s7855_s18, %s12555_s18   ;;  %s7729_s17 = sphi %s7853_s17, %s12547_s17  }
  0x1c   : > { %11945 = sst [smem:[#allocation21_spill]] %s7733_s18  ;;  %p6398_p0 = scmp.ge.s32.totalorder %s7781_s30, 1 }
  0x1d   : > { %11946 = sst [smem:[#allocation22_spill]] %s7745_s21  ;;  %p11745_p1 = scmp.eq.s32.totalorder %s7924_s12, 0 }
  0x1e   : > { %11947 = sst [smem:[#allocation23_spill]] %s7761_s25  ;;  %p332_p2 = scmp.eq.s32.totalorder %s7924_s12, 3 }
  0x1f   : > { %11948 = sst [smem:[#allocation24_spill]] %s7765_s26  ;;  %p345_p3 = scmp.lt.s32.totalorder %s7781_s30, 5 }
  0x20   : > { %11949 = sst [smem:[#allocation25_spill]] %s7769_s27  ;;  %s7783_s11 = smov [#allocation8]  }
  0x21   : > { %11950 = sst [smem:[#allocation26_spill]] %s7773_s28  ;;  %p7933_p4 = pnand %p6398_p0, %p345_p3 }
  0x22   : > { %11951 = sst [smem:[#allocation27_spill]] %s7777_s29  ;;  %s359_s27 = sshll.u32 %s7783_s11, 4  ;;  %s360_s27 = int_to_ptr.vmem [resolvable:$true] %s359_s27 }
  0x23   : > { %s11952_s3 = sld [smem:[#allocation164_spill]]  ;;  %p6950_p5 = pneg %p7933_p4 }
  0x24   : > { %s11953_s16 = scalar_select %p7933_p4, 1, 0 }
  0x25   : > { %p7941_p6 = pnand %p6950_p5, %p11745_p1  ;;  %s41_s13 = sadd.s32 1, %s7773_s28 }
  0x26   : > { %11954 = sst [smem:[#allocation28_spill]] %s11953_s16  ;;  %s44_s14 = sadd.s32 1, %s7777_s29 }
  0x27   : > { %p42_p7 = scmp.ge.s32.totalorder %s41_s13, 2  ;;  %p61_p8 = scmp.eq.s32.totalorder %s7781_s30, 0 }
  0x28   : > { %s89_s11 = sadd.s32 1, %s7749_s22  ;;  %p96_p11 = scmp.ne.s32.totalorder %s7749_s22, %s7745_s21 }
  0x29   : > { %s357_s15 = sshll.u32 %s11952_s3, 4  ;;  %s7951_s3 = sshll.u32 %s7773_s28, 5  ;;  %s358_s15 = int_to_ptr.hbm [resolvable:$true] %s357_s15 }
  0x2a   : > { %6953 = dma.hbm_to_vmem [thread:$0]  (!%p7941_p6), %s358_s15, 64, %s360_s27, [#allocation9]  }
  0x2b   : > { %s12564_s13 = smov (%p42_p7, %s41_s13), 0  ;;  %s12566_s14 = smov (!%p42_p7, %s44_s14), %s7777_s29 }
  0x2c   : > { %11956 = sst [smem:[#allocation29_spill]] %s12564_s13  ;;  %s49_s8 = ssub.s32 %s7773_s28, %s12564_s13 }
  0x2d   : > { %s6393_s6 = sadd.s32 4294967295, %s7951_s3  ;;  %p46_p9 = scmp.ge.s32.totalorder %s12566_s14, 2 }
  0x2e   : > { %p78_p10 = scmp.gt.s32.totalorder %s6393_s6, 0  ;;  %s6394_s27 = sshll.u32 %s12564_s13, 5 }
  0x2f   : > { %s12568_s14 = smov (%p46_p9, %s12566_s14), 0  ;;  %s6395_s5 = sadd.s32 4294967295, %s6394_s27 }
  0x30   : > { %11957 = sst [smem:[#allocation30_spill]] %s12568_s14  ;;  %s12570_s6 = smov (!%p78_p10, %s6393_s6), 0 }
  0x31   : > { %s7967_s15 = ssub.s32 %s7777_s29, %s12568_s14  ;;  %p82_p12 = scmp.gt.s32.totalorder %s6395_s5, 0 }
  0x32   : > { %11958 = sst [smem:[#allocation31_spill]] %s7967_s15  ;;  %s7970_s28 = sor.u32 %s49_s8, %s7967_s15 }
  0x33   : > { %p51_p13 = scmp.eq.s32.totalorder %s7970_s28, 0  ;;  %p7975_p0 = por %p96_p11, %p61_p8 }
  0x34   : > { %s12572_s5 = smov (!%p82_p12, %s6395_s5), 0  ;;  %p102_p3 = scmp.ne.s32.totalorder %s7745_s21, %s7741_s20 }
  0x35   : > { %s7981_s14 = sadd.s32 32, %s6394_s27  ;;  %s85_s4 = ssub.s32 %s12570_s6, %s12572_s5 }
  0x36   : > { %11960 = sst [smem:[#allocation32_spill]] %s7981_s14  ;;  %p118_p5 = scmp.lt.s32.totalorder %s7981_s14, 63 }
  0x37   : > { %s86_s26 = sor.u32 %s85_s4, %s7967_s15  ;;  %p7987_p7 = por %p102_p3, %p11745_p1 }
  0x38   : > { %p87_p9 = scmp.eq.s32.totalorder %s86_s26, 0  ;;  %p11746_p10 = scmp.lt.s32.totalorder %s7781_s30, 4 }
  0x39   : > { %s11961_s8 = scalar_select %p7987_p7, 1, 0 }
  0x3a   : > { %s7993_s16 = sshll.u32 %s7777_s29, 6  ;;  %s437_s20 = sand.u32 1, %s7781_s30  }
  0x3b   : > { %11962 = sst [smem:[#allocation33_spill]] %s11961_s8  ;;  %s439_s5 = sand.u32 1, %s7749_s22  }
  0x3c   : > { %s7997_s27 = scalar_select %p87_p9, %s7749_s22, %s89_s11  }
  0x3d   : > { %s449_s2 = sadd.s32 %s7993_s16, %s12570_s6  ;;  %s6407_s4 = sshll.u32 %s439_s5, 2 }
  0x3e   : > { %s6411_s15 = sshll.u32 %s449_s2, 2  ;;  %s11963_s1 = sld [smem:[#allocation162_spill]] }
  0x3f   : > { %s441_s18 = scalar_lea.vmem [#allocation5], %s6407_s4  ;;  %p6964_p11 = pnand %p11746_p10, %p7975_p0 }
  0x40   : > { %s455_s14 = sshll.u32 %s441_s18, 4  ;;  %s11964_s7 = sld [smem:[#allocation168_spill]]  ;;  %s456_s14 = int_to_ptr.vmem [resolvable:$true] %s455_s14 }
  0x41   : > { %s7784_s2 = smov [#allocation10]   ;;  %s8013_s0 = scalar_lea.sflag [#allocation6], %s437_s20 }
  0x42   : > { %s379_s6 = sshll.u32 %s7784_s2, 4  ;;  %s11965_s9 = sld [smem:[#allocation170_spill]]  ;;  %s380_s6 = int_to_ptr.vmem [resolvable:$true] %s379_s6 }
  0x43   : > { %s7785_s13 = smov 256   ;;  %s7788_s20 = smov 64  }
  0x44   : > { %s451_s8 = scalar_lea.hbm %s11963_s1, %s6411_s15  ;;  %s7786_s15 = smov 16  }
  0x45   : > { %s453_s26 = sshll.u32 %s451_s8, 4  ;;  %s7787_s8 = smov [#allocation11]   ;;  %s454_s26 = int_to_ptr.hbm [resolvable:$true] %s453_s26 }
  0x46   : > { %s377_s21 = sshll.u32 %s11964_s7, 4  ;;  %s7789_s5 = smov 4   ;;  %s378_s21 = int_to_ptr.hbm [resolvable:$true] %s377_s21 }
  0x47   : > { %6966 = dma.hbm_to_vmem [thread:$0]  (!%p6964_p11), %s454_s26, 64, %s456_s14, %s8013_s0  }
  0x48   : > { %s394_s29 = sshll.u32 %s11965_s9, 4  ;;  %s396_s14 = sshll.u32 %s7787_s8, 4  ;;  %s395_s29 = int_to_ptr.hbm [resolvable:$true] %s394_s29  ;;  %s397_s14 = int_to_ptr.vmem [resolvable:$true] %s396_s14 }
  0x49   : > { %6956 = dma.hbm_to_vmem [thread:$0]  (!%p7941_p6), %s378_s21, 4096, %s380_s6, [#allocation9], %s7785_s13, %s7785_s13, %s7786_s15  }
  0x4a   : > { %6959 = dma.hbm_to_vmem [thread:$0]  (!%p7941_p6), %s395_s29, 4096, %s397_s14, [#allocation12], %s7788_s20, %s7788_s20, %s7789_s5  }
  0x4b   : > { %s6391_s4 = sadd.s32 4294967294, %s7781_s30   ;;  %s53_s26 = sadd.s32 1, %s7761_s25 }
  0x4c   : > { %s8028_s11 = scalar_select %p51_p13, %s7761_s25, %s53_s26  }
  0x4d   : > { %p60_p12 = scmp.ne.s32.totalorder %s7761_s25, %s7757_s24  ;;  %p66_p0 = scmp.ne.s32.totalorder %s7757_s24, %s7753_s23 }
  0x4e   : > { %11966 = sst [smem:[#allocation34_spill]] %s8028_s11  ;;  %p338_p3 = scmp.eq.s32.totalorder %s6391_s4, 3 }
  0x4f   : > { %s413_s21 = sand.u32 1, %s7761_s25   ;;  %p62_p9 = por %p61_p8, %p60_p12 }
  0x50   : > { %p8039_p11 = por %p11745_p1, %p66_p0  ;;  %p8045_p6 = por %p332_p2, %p60_p12 }
  0x51   : > { %s11969_s28 = sld [smem:[#allocation32_spill]]  ;;  %p8049_p13 = por %p338_p3, %p66_p0 }
  0x52   : > { %s6403_s17 = sshll.u32 %s413_s21, 7  ;;  %s11971_s18 = sadd.s32 %s7993_s16, %s7951_s3 }
  0x53   : > { %s11972_s29 = sld [smem:[#allocation21_spill]]  ;;  %s6406_s13 = sshll.u32 %s11971_s18, 2 }
  0x54   : > { %s11973_s14 = sld [smem:[#allocation161_spill]]  ;;  %s417_s1 = scalar_lea.vmem [#allocation2], %s6403_s17 }
  0x55   : > { %s11974_s4 = sld [smem:[#allocation20_spill]]  ;;  %s427_s7 = sshll.u32 %s417_s1, 4  ;;  %s428_s7 = int_to_ptr.vmem [resolvable:$true] %s427_s7 }
  0x56   : > { %s11975_s9 = sld [smem:[#allocation31_spill]]  ;;  %p6961_p2 = pnand %p11746_p10, %p62_p9 }
  0x57   : > { %s414_s25 = scalar_lea.sflag [#allocation3], %s413_s21  ;;  %s6687_s18 = sadd.s32 32, %s7951_s3 }
  0x58   : > { %p114_p12 = scmp.lt.s32.totalorder %s6687_s18, 63  ;;  %s125_s15 = sadd.s32 1, %s7737_s19 }
  0x59   : > { %s12574_s28 = smov (!%p118_p5, %s11969_s28), 63  ;;  %p132_p0 = scmp.ne.s32.totalorder %s7737_s19, %s11972_s29 }
  0x5a   : > { %s424_s26 = scalar_lea.hbm %s11973_s14, %s6406_s13  ;;  %s12576_s18 = smov (!%p114_p12, %s6687_s18), 63 }
  0x5b   : > { %s425_s11 = sshll.u32 %s424_s26, 4  ;;  %p138_p3 = scmp.ne.s32.totalorder %s11972_s29, %s11974_s4  ;;  %s426_s11 = int_to_ptr.hbm [resolvable:$true] %s425_s11 }
  0x5c   : > { %6963 = dma.hbm_to_vmem [thread:$0]  (!%p6961_p2), %s426_s11, 2048, %s428_s7, %s414_s25, %s7788_s20, %s7788_s20, %s7789_s5  }
  0x5d   : > { %s121_s1 = ssub.s32 %s12576_s18, %s12574_s28  ;;  %s464_s17 = sand.u32 1, %s7737_s19  }
  0x5e   : > { %s122_s13 = sor.u32 %s121_s1, %s11975_s9  ;;  %p8074_p1 = por %p132_p0, %p61_p8 }
  0x5f   : > { %p123_p9 = scmp.eq.s32.totalorder %s122_s13, 0  ;;  %p11977_p2 = scmp.eq.s32.totalorder %s7924_s12, 0 }
  0x60   : > { %s6412_s7 = sshll.u32 %s464_s17, 2  ;;  %s474_s25 = sadd.s32 %s7993_s16, %s12576_s18 }
  0x61   : > { %p8080_p10 = por %p138_p3, %p11977_p2  ;;  %s6415_s5 = sshll.u32 %s474_s25, 2 }
  0x62   : > { %s8086_s20 = scalar_select %p123_p9, %s7737_s19, %s125_s15  }
  0x63   : > { %s11979_s9 = sld [smem:[#allocation163_spill]]  ;;  %s466_s29 = scalar_lea.vmem [#allocation7], %s6412_s7 }
  0x64   : > { %s480_s14 = sshll.u32 %s466_s29, 4  ;;  %p11980_p8 = scmp.lt.s32.totalorder %s7781_s30, 4  ;;  %s481_s14 = int_to_ptr.vmem [resolvable:$true] %s480_s14 }
  0x66   : > { %p6967_p5 = pnand %p11980_p8, %p8074_p1 }
  0x67   : > { %489 = sbr.rel (%p7933_p4) target bundleno = 1441 (0x5a1), region = 64 }
  0x69   : > { %s476_s28 = scalar_lea.hbm %s11979_s9, %s6415_s5 }
  0x6a   : > { %s478_s4 = sshll.u32 %s476_s28, 4  ;;  %s479_s4 = int_to_ptr.hbm [resolvable:$true] %s478_s4 }
  0x6b   : > { %6969 = dma.hbm_to_vmem [thread:$0]  (!%p6967_p5), %s479_s4, 64, %s481_s14, %s8013_s0  }
  0x6c   : > { %s8099_s16 = sand.u32 1, %s7757_s24  }
  0x6d   : > { %s6417_s18 = sshll.u32 %s8099_s16, 7  ;;  %s492_s15 = scalar_lea.sflag [#allocation3], %s8099_s16 }
  0x6e   : > { %s8105_s1 = scalar_lea.vmem [#allocation2], %s6417_s18 }
  0x6f   : > { %7704 = dma.done.wait (%p8039_p11), %s492_s15, 2048  }
  0x70   : > { %7706 = vsyncadd (%p8039_p11), %s492_s15, 4294965248  ;;  %s11982_s0 = sld [smem:[#allocation22_spill]]  ;;  %s501_s13 = sand.u32 1, %s7924_s12  }
  0x71   : > { %s502_s25 = scalar_lea.sflag [#allocation6], %s501_s13 }
  0x76   : > { %s503_s8 = sand.u32 1, %s11982_s0  }
  0x77   : > { %s6418_s7 = sshll.u32 %s503_s8, 2 }
  0x78   : > { %s505_s5 = scalar_lea.vmem [#allocation5], %s6418_s7 }
  0x79   : > { %7708 = dma.done.wait (%p7987_p7), %s502_s25, 64  }
  0x7a   : > { %7710 = vsyncadd (%p7987_p7), %s502_s25, 4294967232  ;;  %s11984_s11 = sld [smem:[#allocation21_spill]] }
  0x80   : > { %s513_s21 = sand.u32 1, %s11984_s11  }
  0x81   : > { %s8118_s9 = sshll.u32 %s513_s21, 2 }
  0x82   : > { %s515_s2 = scalar_lea.vmem [#allocation7], %s8118_s9 }
  0x83   : > { %7712 = dma.done.wait (%p8080_p10), %s502_s25, 64  }
  0x84   : > { %7714 = vsyncadd (%p8080_p10), %s502_s25, 4294967232  ;;  %p11985_p1 = scmp.eq.s32.totalorder %s7924_s12, 0 }
  0x86   : > { %7716 = dma.done.wait (%p11985_p1), [#allocation9], 4160   ;;  %p11986_p4 = pmov %p11985_p1 }
  0x87   : > { %p11987_p7 = pmov %p11985_p1 }
  0x88   : > { %7718 = vsyncadd (%p11986_p4), [#allocation9], 4294963136 }
  0x89   : > { %7720 = dma.done.wait (%p11987_p7), [#allocation12], 4096   ;;  %p11988_p11 = pmov %p11985_p1 }
  0x8a   : > { %s11989_s28 = sld [smem:[#allocation24_spill]]  ;;  %v668_v0 = vlaneseq  ;;  %v6757_v2 = vld [vmem:[%s8105_s1] sm:$0xff]   ;;  %v6914_v3 = vld [vmem:[%s8105_s1 + $0x78] sm:$0xff]   ;;  %v961_v10 = vld [vmem:[#allocation8] sm:$0x7] }
  0x8b   : > { %7722 = vsyncadd (%p11988_p11), [#allocation12], 4294963200  ;;  %v654_v4 = vld [vmem:[%s505_s5] sm:$0xf]  ;;  %v8140_v6 = vunpack.c.l.bf16 %v6757_v2  ;;  %v8142_v7 = vunpack.c.h.bf16 %v6757_v2  ;;  %v8144_v8 = vunpack.c.h.bf16 %v6914_v3  ;;  %v8147_v11 = vperm.slane %v961_v10, 0  ;;  %v6900_v14 = vld [vmem:[%s8105_s1 + $0x8] sm:$0xff]  }
  0x8c   : > { %v8134_v1 = vshrl.u32 %v668_v0, 7  ;;  %v655_v9 = vunpack.c.l.bf16 %v654_v4  ;;  %v8149_v12 = vperm.slane %v961_v10, 1  ;;  %v8151_v13 = vperm.slane %v961_v10, 2  ;;  %v6901_v35 = vld [vmem:[%s8105_s1 + $0x10] sm:$0xff]   ;;  %s11995_s4 = sld [smem:[#allocation165_spill]]  ;;  %v6902_v48 = vld [vmem:[%s8105_s1 + $0x18] sm:$0xff]  }
  0x8d   : > { %11990 = vst [vmem:[#allocation35_spill] sm:$0xff] %v8140_v6  ;;  %v733_v16 = vrot.slane %v8140_v6, 7  ;;  %v11748_v17 = vrot.slane %v8144_v8, 7  ;;  %v11747_v18 = vrot.slane %v8140_v6, 1  ;;  %v864_v19 = vrot.slane %v8142_v7, 1  ;;  %s12036_s13 = sld [smem:[#allocation166_spill]] }
  0x8e   : > { %vm701_vm0 = vcmp.eq.s32.totalorder %v8134_v1, 0  ;;  %vm765_vm1 = vcmp.lt.s32.totalorder %v8134_v1, 1  ;;  %11991 = vst [vmem:[#allocation36_spill] sm:$0xff] %v8142_v7  ;;  %vm895_vm2 = vcmp.lt.s32.totalorder %v8134_v1, 7  ;;  %v996_v20 = vmul.f32 %v8140_v6, %v8149_v12  ;;  %s12037_s25 = sld [smem:[#allocation167_spill]] }
  0x8f   : > { %11992 = vst [vmem:[#allocation37_spill] sm:$0xff] %v8144_v8  ;;  %v8160_v21 = vunpack.c.l.bf16 %v6900_v14  ;;  %v8162_v22 = vunpack.c.h.bf16 %v6900_v14  ;;  %v797_v23 = vsel %vm765_vm1, %v11748_v17, %v733_v16  ;;  %v734_v25 = vrot.slane %v8142_v7, 7  ;;  %s12095_s14 = sld [smem:[#allocation169_spill]] }
  0x90   : > { %p658_p12 = scmp.gt.s32.totalorder %s11989_s28, 0  ;;  %v997_v26 = vmul.f32 %v8142_v7, %v8149_v12  ;;  %v926_v27 = vsel %vm895_vm2, %v11747_v18, %v864_v19  ;;  %v8202_v46 = vunpack.c.l.bf16 %v6901_v35  ;;  %v8208_v52 = vunpack.c.h.bf16 %v6901_v35  ;;  %p663_p10 = scmp.lt.s32.totalorder %s11989_s28, 1 }
  0x91   : > { %11993 = vst [vmem:[#allocation38_spill] sm:$0xff] %v8160_v21  ;;  %v735_v28 = vrot.slane %v8160_v21, 7  ;;  %v865_v29 = vrot.slane %v8160_v21, 1  ;;  %v866_v30 = vrot.slane %v8162_v22, 1  ;;  %v1061_v32 = vmul.f32 %v8151_v13, %v926_v27  ;;  %s12423_s9 = sld [smem:[#allocation171_spill]]  ;;  %s6681_s12 = sshll.u32 %s11989_s28, 5 }
  0x92   : > { %s659_s29 = scalar_select %p658_p12, 1, 0  ;;  %11994 = vst [vmem:[#allocation39_spill] sm:$0xff] %v8162_v22  ;;  %v998_v33 = vmul.f32 %v8160_v21, %v8149_v12  ;;  %v796_v34 = vsel %vm765_vm1, %v733_v16, %v734_v25  ;;  %v8199_v44 = vld [vmem:[%s11995_s4] ss:$0 sm:$0xff]  ;;  %v736_v47 = vrot.slane %v8162_v22, 7  ;;  %v999_v51 = vmul.f32 %v8162_v22, %v8149_v12 }
  0x93   : > { %v795_v37 = vsel %vm765_vm1, %v734_v25, %v735_v28  ;;  %v924_v38 = vsel %vm895_vm2, %v865_v29, %v866_v30  ;;  %v925_v39 = vsel %vm895_vm2, %v864_v19, %v865_v29  ;;  %v964_v42 = vmul.f32 %v8147_v11, %v796_v34  ;;  %11996 = vst [vmem:[#allocation40_spill] sm:$0xff] %v8202_v46  ;;  %s12543_s8 = sld [smem:[#allocation172_spill]] }
  0x94   : > { %s660_s3 = scvt.s32.f32 %s659_s29  ;;  %v965_v40 = vmul.f32 %v8147_v11, %v795_v37  ;;  %v1063_v41 = vmul.f32 %v8151_v13, %v924_v38  ;;  %v1062_v45 = vmul.f32 %v8151_v13, %v925_v39  ;;  %11997 = vst [vmem:[#allocation41_spill] sm:$0xff] %v8208_v52  ;;  %v794_v54 = vsel %vm765_vm1, %v735_v28, %v736_v47  ;;  %s12038_s5 = smov %s12037_s25 }
  0x95   : > { %v1029_v50 = vadd.f32 %v997_v26, %v964_v42  ;;  %v867_v55 = vrot.slane %v8202_v46, 1  ;;  %v737_v56 = vrot.slane %v8202_v46, 7  ;;  %v966_v58 = vmul.f32 %v8147_v11, %v794_v54  ;;  %v6904_v54 = vld [vmem:[%s8105_s1 + $0x28] sm:$0xff]  }
  0x96   : > { %v661_v5 = vstv %s660_s3  ;;  %v1030_v49 = vadd.f32 %v998_v33, %v965_v40  ;;  %v868_v59 = vrot.slane %v8208_v52, 1  ;;  %v8216_v60 = vunpack.c.l.bf16 %v6902_v48  ;;  %v6903_v33 = vld [vmem:[%s8105_s1 + $0x20] sm:$0xff]   ;;  %s12540_s3 = sld [smem:[#allocation25_spill]] }
  0x97   : > { %v662_v15 = vmul.f32 %v661_v5, %v655_v9  ;;  %v1094_v62 = vadd.f32 %v1062_v45, %v1029_v50  ;;  %v923_v63 = vsel %vm895_vm2, %v866_v30, %v867_v55  ;;  %v793_v0 = vsel %vm765_vm1, %v736_v47, %v737_v56 }
  0x98   : > { %v1095_v57 = vadd.f32 %v1063_v41, %v1030_v49  ;;  %11998 = vst [vmem:[#allocation42_spill] sm:$0xff] %v8216_v60  ;;  %v1031_v3 = vadd.f32 %v999_v51, %v966_v58  ;;  %v1064_v4 = vmul.f32 %v8151_v13, %v923_v63  ;;  %v967_v9 = vmul.f32 %v8147_v11, %v793_v0 }
  0x99   : > { %v798_v24 = vperm.slane %v662_v15, 7  ;;  %v1000_v10 = vmul.f32 %v8202_v46, %v8149_v12  ;;  %v738_v14 = vrot.slane %v8208_v52, 7  ;;  %v922_v16 = vsel %vm895_vm2, %v867_v55, %v868_v59 }
  0x9a   : > { %v8226_v2 = vadd.f32 %v8199_v44, %v1095_v57  ;;  %v1096_v15 = vadd.f32 %v1064_v4, %v1031_v3  ;;  %v8240_v19 = vadd.f32 %v8199_v44, %v1094_v62  ;;  %v1065_v25 = vmul.f32 %v8151_v13, %v922_v16 }
  0x9b   : > { %v799_v31 = vsel %vm701_vm0, %v798_v24, %v797_v23  ;;  %v869_v23 = vrot.slane %v8216_v60, 1  ;;  %v1032_v24 = vadd.f32 %v1000_v10, %v967_v9  ;;  %v1001_v26 = vmul.f32 %v8208_v52, %v8149_v12 }
  0x9c   : > { %v963_v36 = vmul.f32 %v8147_v11, %v799_v31  ;;  %1165 = vadd.xlane.f32.xlu2 %v8226_v2  ;;  %v8249_v27 = vadd.f32 %v8199_v44, %v1096_v15  ;;  %v8252_v29 = vunpack.c.h.bf16 %v6902_v48  ;;  %v739_v30 = vrot.slane %v8216_v60, 7 }
  0x9d   : > { %v1265_v31 = vmul.f32 %v8240_v19, %v8240_v19  ;;  %v1097_v34 = vadd.f32 %v1065_v25, %v1032_v24  ;;  %v8266_v39 = vunpack.c.l.bf16 %v6903_v33  ;;  %v1266_v41 = vmul.f32 %v8226_v2, %v8226_v2 }
  0x9e   : > { %v1028_v43 = vadd.f32 %v996_v20, %v963_v36  ;;  %v792_v20 = vsel %vm765_vm1, %v737_v56, %v738_v14  ;;  %11999 = vst [vmem:[#allocation43_spill] sm:$0xff] %v8252_v29  ;;  %v791_v37 = vsel %vm765_vm1, %v738_v14, %v739_v30  ;;  %v870_v38 = vrot.slane %v8252_v29, 1 }
  0x9f   : > { %v968_v28 = vmul.f32 %v8147_v11, %v792_v20  ;;  %12000 = vst [vmem:[#allocation44_spill] sm:$0xff] %v8266_v39  ;;  %v740_v40 = vrot.slane %v8252_v29, 7  ;;  %v969_v42 = vmul.f32 %v8147_v11, %v791_v37  ;;  %v8275_v45 = vadd.f32 %v8199_v44, %v1097_v34 }
  0xa0   : > { %v1093_v53 = vadd.f32 %v1061_v32, %v1028_v43  ;;  %v921_v32 = vsel %vm895_vm2, %v868_v59, %v869_v23  ;;  %v1002_v43 = vmul.f32 %v8216_v60, %v8149_v12  ;;  %v920_v48 = vsel %vm895_vm2, %v869_v23, %v870_v38 }
  0xa1   : > { %v1033_v35 = vadd.f32 %v1001_v26, %v968_v28  ;;  %v1066_v36 = vmul.f32 %v8151_v13, %v921_v32  ;;  %v1267_v49 = vmul.f32 %v8249_v27, %v8249_v27  ;;  %v790_v50 = vsel %vm765_vm1, %v739_v30, %v740_v40 }
  0xa2   : > { %v8219_v61 = vadd.f32 %v8199_v44, %v1093_v53  ;;  %v871_v51 = vrot.slane %v8266_v39, 1  ;;  %v8284_v53 = vunpack.c.h.bf16 %v6903_v33  ;;  %v1034_v55 = vadd.f32 %v1002_v43, %v969_v42 }
  0xa3   : > { %v1098_v47 = vadd.f32 %v1066_v36, %v1033_v35  ;;  %v1067_v56 = vmul.f32 %v8151_v13, %v920_v48  ;;  %v970_v58 = vmul.f32 %v8147_v11, %v790_v50  ;;  %v1003_v59 = vmul.f32 %v8252_v29, %v8149_v12  ;;  %v6905_v36 = vld [vmem:[%s8105_s1 + $0x30] sm:$0xff]   ;;  %v6450_v29 = vld [vmem:[#allocation10 + $0x28] sm:$0xf] }
  0xa4   : > { %1161 = vadd.xlane.f32.xlu0 %v8219_v61  ;;  %v1264_v5 = vmul.f32 %v8219_v61, %v8219_v61  ;;  %1167 = vadd.xlane.f32.xlu2 %v8249_v27  ;;  %12001 = vst [vmem:[#allocation45_spill] sm:$0xff] %v8284_v53  ;;  %v919_v62 = vsel %vm895_vm2, %v870_v38, %v871_v51  ;;  %v8297_v63 = vunpack.c.l.bf16 %v6904_v54  ;;  %v742_v0 = vrot.slane %v8284_v53, 7 }
  0xa5   : > { %v8290_v57 = vadd.f32 %v8199_v44, %v1098_v47  ;;  %v741_v3 = vrot.slane %v8266_v39, 7  ;;  %v1099_v4 = vadd.f32 %v1067_v56, %v1034_v55  ;;  %v1035_v9 = vadd.f32 %v1003_v59, %v970_v58 }
  0xa6   : > { %1296 = vadd.xlane.f32.xlu1 %v1264_v5  ;;  %12002 = vst [vmem:[#allocation46_spill] sm:$0xff] %v8297_v63  ;;  %v1068_v10 = vmul.f32 %v8151_v13, %v919_v62  ;;  %v872_v14 = vrot.slane %v8284_v53, 1  ;;  %v1268_v15 = vmul.f32 %v8275_v45, %v8275_v45  ;;  %v873_v20 = vrot.slane %v8297_v63, 1 }
  0xa7   : > { %v1269_v5 = vmul.f32 %v8290_v57, %v8290_v57  ;;  %v788_v16 = vsel %vm765_vm1, %v741_v3, %v742_v0  ;;  %v789_v23 = vsel %vm765_vm1, %v740_v40, %v741_v3  ;;  %v8314_v24 = vadd.f32 %v8199_v44, %v1099_v4 }
  0xa8   : > { %v1004_v25 = vmul.f32 %v8266_v39, %v8149_v12  ;;  %v1100_v26 = vadd.f32 %v1068_v10, %v1035_v9  ;;  %v918_v28 = vsel %vm895_vm2, %v871_v51, %v872_v14  ;;  %v972_v30 = vmul.f32 %v8147_v11, %v788_v16  ;;  %v6906_v16 = vld [vmem:[%s8105_s1 + $0x38] sm:$0xff]   ;;  %v6444_v39 = vld [vmem:[#allocation10 + $0x30] sm:$0xf0] }
  0xa9   : > { %v971_v32 = vmul.f32 %v8147_v11, %v789_v23  ;;  %v917_v33 = vsel %vm895_vm2, %v872_v14, %v873_v20  ;;  %v8326_v34 = vunpack.c.h.bf16 %v6904_v54  ;;  %v743_v35 = vrot.slane %v8297_v63, 7 }
  0xaa   : > { %v1270_v37 = vmul.f32 %v8314_v24, %v8314_v24  ;;  %v1069_v38 = vmul.f32 %v8151_v13, %v918_v28  ;;  %v8334_v42 = vunpack.c.l.bf16 %v6905_v36  ;;  %v8338_v47 = vadd.f32 %v8199_v44, %v1100_v26 }
  0xab   : > { %12003 = vst [vmem:[#allocation47_spill] sm:$0xff] %v8326_v34  ;;  %v744_v43 = vrot.slane %v8326_v34, 7  ;;  %v1036_v48 = vadd.f32 %v1004_v25, %v971_v32  ;;  %v874_v50 = vrot.slane %v8326_v34, 1  ;;  %v1006_v51 = vmul.f32 %v8297_v63, %v8149_v12  ;;  %v6696_v63 = vld [vmem:[#allocation10 + $0x24] sm:$0xf] }
  0xac   : > { %1163 = vadd.xlane.f32.xlu0 %v8240_v19  ;;  %1169 = vadd.xlane.f32.xlu2 %v8275_v45  ;;  %12004 = vst [vmem:[#allocation48_spill] sm:$0xff] %v8334_v42  ;;  %v875_v58 = vrot.slane %v8334_v42, 1  ;;  %v1007_v4 = vmul.f32 %v8326_v34, %v8149_v12  ;;  %v8369_v25 = vunpack.c.h.bf16 %v6905_v36  ;;  %v745_v26 = vrot.slane %v8334_v42, 7 }
  0xad   : > { %v786_v56 = vsel %vm765_vm1, %v743_v35, %v744_v43  ;;  %v1101_v59 = vadd.f32 %v1069_v38, %v1036_v48  ;;  %v916_v62 = vsel %vm895_vm2, %v873_v20, %v874_v50  ;;  %v6907_v48 = vld [vmem:[%s8105_s1 + $0x40] sm:$0xff]  }
  0xae   : > { %1298 = vadd.xlane.f32.xlu1 %v1265_v31  ;;  %v1005_v31 = vmul.f32 %v8284_v53, %v8149_v12  ;;  %v974_v3 = vmul.f32 %v8147_v11, %v786_v56  ;;  %v1071_v10 = vmul.f32 %v8151_v13, %v916_v62  ;;  %v915_v14 = vsel %vm895_vm2, %v874_v50, %v875_v58 }
  0xaf   : > { %v1072_v23 = vmul.f32 %v8151_v13, %v915_v14  ;;  %12005 = vst [vmem:[#allocation49_spill] sm:$0xff] %v8369_v25  ;;  %v876_v36 = vrot.slane %v8369_v25, 1  ;;  %v1008_v50 = vmul.f32 %v8334_v42, %v8149_v12  ;;  %v1009_v56 = vmul.f32 %v8369_v25, %v8149_v12 }
  0xb0   : > { %v1037_v40 = vadd.f32 %v1005_v31, %v972_v30  ;;  %v1039_v20 = vadd.f32 %v1007_v4, %v974_v3  ;;  %v8374_v30 = vunpack.c.l.bf16 %v6906_v16  ;;  %v746_v31 = vrot.slane %v8369_v25, 7 }
  0xb2   : > { %12006 = vst [vmem:[#allocation50_spill] sm:$0xff] %v8374_v30  ;;  %v747_v3 = vrot.slane %v8374_v30, 7 }
  0xb4   : > { %1300 = vadd.xlane.f32.xlu0 %v1266_v41  ;;  %1306 = vadd.xlane.f32.xlu2 %v1269_v5  ;;  %v1070_v41 = vmul.f32 %v8151_v13, %v917_v33  ;;  %v1104_v33 = vadd.f32 %v1072_v23, %v1039_v20 }
  0xb6   : > { %1302 = vadd.xlane.f32.xlu1 %v1267_v49  ;;  %v787_v49 = vsel %vm765_vm1, %v742_v0, %v743_v35  ;;  %v1102_v54 = vadd.f32 %v1070_v41, %v1037_v40  ;;  %v1271_v0 = vmul.f32 %v8338_v47, %v8338_v47  ;;  %v785_v35 = vsel %vm765_vm1, %v744_v43, %v745_v26 }
  0xb7   : > { %v973_v55 = vmul.f32 %v8147_v11, %v787_v49  ;;  %v784_v40 = vsel %vm765_vm1, %v745_v26, %v746_v31  ;;  %v877_v41 = vrot.slane %v8374_v30, 1  ;;  %v975_v49 = vmul.f32 %v8147_v11, %v785_v35 }
  0xb8   : > { %v8359_v5 = vadd.f32 %v8199_v44, %v1102_v54  ;;  %v8394_v43 = vunpack.c.h.bf16 %v6906_v16  ;;  %v914_v54 = vsel %vm895_vm2, %v875_v58, %v876_v36  ;;  %v783_v26 = vsel %vm765_vm1, %v746_v31, %v747_v3 }
  0xb9   : > { %v1038_v9 = vadd.f32 %v1006_v51, %v973_v55  ;;  %v8397_v51 = vadd.f32 %v8199_v44, %v1104_v33  ;;  %v976_v55 = vmul.f32 %v8147_v11, %v784_v40  ;;  %v1040_v4 = vadd.f32 %v1008_v50, %v975_v49 }
  0xba   : > { %v1273_v38 = vmul.f32 %v8359_v5, %v8359_v5  ;;  %12007 = vst [vmem:[#allocation51_spill] sm:$0xff] %v8394_v43  ;;  %v748_v62 = vrot.slane %v8394_v43, 7  ;;  %v1073_v58 = vmul.f32 %v8151_v13, %v914_v54  ;;  %v1011_v35 = vmul.f32 %v8394_v43, %v8149_v12  ;;  %v6908_v54 = vld [vmem:[%s8105_s1 + $0x48] sm:$0xff]  }
  0xbb   : > { %v1103_v28 = vadd.f32 %v1071_v10, %v1038_v9  ;;  %v1275_v9 = vmul.f32 %v8397_v51, %v8397_v51  ;;  %v1041_v10 = vadd.f32 %v1009_v56, %v976_v55  ;;  %v1010_v40 = vmul.f32 %v8374_v30, %v8149_v12  ;;  %v6910_v30 = vld [vmem:[%s8105_s1 + $0x58] sm:$0xff]  }
  0xbc   : > { %1171 = vadd.xlane.f32.xlu0 %v8290_v57  ;;  %1308 = vadd.xlane.f32.xlu2 %v1270_v37  ;;  %v782_v16 = vsel %vm765_vm1, %v747_v3, %v748_v62  ;;  %v8432_v49 = vunpack.c.h.bf16 %v6907_v48 }
  0xbd   : > { %v8383_v37 = vadd.f32 %v8199_v44, %v1103_v28  ;;  %v1105_v28 = vadd.f32 %v1073_v58, %v1040_v4  ;;  %v978_v33 = vmul.f32 %v8147_v11, %v782_v16 }
  0xbe   : > { %1304 = vadd.xlane.f32.xlu1 %v1268_v15  ;;  %v8365_v15 = vadd.f32 %v8199_v44, %v1101_v59  ;;  %v8405_v59 = vunpack.c.l.bf16 %v6907_v48  ;;  %12009 = vst [vmem:[#allocation53_spill] sm:$0xff] %v8432_v49  ;;  %v880_v16 = vrot.slane %v8432_v49, 1 }
  0xbf   : > { %v1274_v23 = vmul.f32 %v8383_v37, %v8383_v37  ;;  %v8437_v55 = vadd.f32 %v8199_v44, %v1105_v28 }
  0xc0   : > { %v1272_v32 = vmul.f32 %v8365_v15, %v8365_v15  ;;  %12008 = vst [vmem:[#allocation52_spill] sm:$0xff] %v8405_v59  ;;  %v879_v20 = vrot.slane %v8405_v59, 1  ;;  %v749_v50 = vrot.slane %v8405_v59, 7  ;;  %v1012_v28 = vmul.f32 %v8405_v59, %v8149_v12  ;;  %v6721_v59 = vld [vmem:[#allocation10 + $0xec] sm:$0xf] }
  0xc1   : > { %v1276_v58 = vmul.f32 %v8437_v55, %v8437_v55 }
  0xc4   : > { %1173 = vadd.xlane.f32.xlu0 %v8314_v24  ;;  %1179 = vadd.xlane.f32.xlu2 %v8359_v5 }
  0xc6   : > { %1175 = vadd.xlane.f32.xlu1 %v8338_v47 }
  0xcc   : > { %1310 = vadd.xlane.f32.xlu0 %v1271_v0  ;;  %1181 = vadd.xlane.f32.xlu2 %v8383_v37  ;;  %v913_v0 = vsel %vm895_vm2, %v876_v36, %v877_v41 }
  0xcd   : > { %v1074_v14 = vmul.f32 %v8151_v13, %v913_v0  ;;  %v1043_v0 = vadd.f32 %v1011_v35, %v978_v33 }
  0xce   : > { %1177 = vadd.xlane.f32.xlu1 %v8365_v15 }
  0xcf   : > { %v1106_v36 = vadd.f32 %v1074_v14, %v1041_v10  ;;  %v781_v14 = vsel %vm765_vm1, %v748_v62, %v749_v50  ;;  %v910_v62 = vsel %vm895_vm2, %v879_v20, %v880_v16 }
  0xd1   : > { %v8443_v4 = vadd.f32 %v8199_v44, %v1106_v36 }
  0xd3   : > { %v1277_v36 = vmul.f32 %v8443_v4, %v8443_v4 }
  0xd4   : > { %1312 = vadd.xlane.f32.xlu0 %v1272_v32  ;;  %v878_v32 = vrot.slane %v8394_v43, 1  ;;  %1318 = vadd.xlane.f32.xlu2 %v1275_v9  ;;  %v8447_v9 = vunpack.c.l.bf16 %v6908_v54  ;;  %v6548_v43 = vld [vmem:[#allocation10 + $0xf8] sm:$0xf0] }
  0xd6   : > { %1314 = vadd.xlane.f32.xlu1 %v1273_v38  ;;  %v977_v38 = vmul.f32 %v8147_v11, %v783_v26  ;;  %v911_v31 = vsel %vm895_vm2, %v878_v32, %v879_v20  ;;  %v912_v56 = vsel %vm895_vm2, %v877_v41, %v878_v32  ;;  %12010 = vst [vmem:[#allocation54_spill] sm:$0xff] %v8447_v9  ;;  %v750_v41 = vrot.slane %v8432_v49, 7 }
  0xd7   : > { %v1076_v3 = vmul.f32 %v8151_v13, %v911_v31  ;;  %v1075_v10 = vmul.f32 %v8151_v13, %v912_v56  ;;  %v979_v26 = vmul.f32 %v8147_v11, %v781_v14  ;;  %v881_v32 = vrot.slane %v8447_v9, 1 }
  0xd8   : > { %v1042_v48 = vadd.f32 %v1010_v40, %v977_v38  ;;  %v780_v35 = vsel %vm765_vm1, %v749_v50, %v750_v41  ;;  %v1013_v40 = vmul.f32 %v8432_v49, %v8149_v12  ;;  %v1077_v56 = vmul.f32 %v8151_v13, %v910_v62  ;;  %v6909_v62 = vld [vmem:[%s8105_s1 + $0x50] sm:$0xff]  }
  0xd9   : > { %v1044_v31 = vadd.f32 %v1012_v28, %v979_v26  ;;  %v980_v20 = vmul.f32 %v8147_v11, %v780_v35  ;;  %v751_v14 = vrot.slane %v8447_v9, 7 }
  0xda   : > { %v1107_v33 = vadd.f32 %v1075_v10, %v1042_v48  ;;  %v8480_v10 = vunpack.c.h.bf16 %v6908_v54 }
  0xdb   : > { %v1045_v48 = vadd.f32 %v1013_v40, %v980_v20  ;;  %v8498_v40 = vunpack.c.l.bf16 %v6909_v62 }
  0xdc   : > { %1183 = vadd.xlane.f32.xlu0 %v8397_v51  ;;  %1320 = vadd.xlane.f32.xlu2 %v1276_v58  ;;  %v8476_v50 = vadd.f32 %v8199_v44, %v1107_v33  ;;  %v1109_v58 = vadd.f32 %v1077_v56, %v1044_v31  ;;  %12011 = vst [vmem:[#allocation55_spill] sm:$0xff] %v8480_v10  ;;  %v882_v26 = vrot.slane %v8480_v10, 1  ;;  %v752_v31 = vrot.slane %v8480_v10, 7 }
  0xdd   : > { %12013 = vst [vmem:[#allocation57_spill] sm:$0xff] %v8498_v40  ;;  %v883_v20 = vrot.slane %v8498_v40, 1 }
  0xde   : > { %1316 = vadd.xlane.f32.xlu1 %v1274_v23  ;;  %v1108_v23 = vadd.f32 %v1076_v3, %v1043_v0  ;;  %v909_v0 = vsel %vm895_vm2, %v880_v16, %v881_v32  ;;  %v1278_v16 = vmul.f32 %v8476_v50, %v8476_v50  ;;  %v8490_v28 = vadd.f32 %v8199_v44, %v1109_v58 }
  0xdf   : > { %v1078_v3 = vmul.f32 %v8151_v13, %v909_v0  ;;  %v778_v0 = vsel %vm765_vm1, %v751_v14, %v752_v31  ;;  %v1015_v58 = vmul.f32 %v8480_v10, %v8149_v12  ;;  %v6540_v10 = vld [vmem:[#allocation10 + $0xf0] sm:$0xf0] }
  0xe0   : > { %v8467_v38 = vadd.f32 %v8199_v44, %v1108_v23  ;;  %v779_v23 = vsel %vm765_vm1, %v750_v41, %v751_v14  ;;  %12012 = vst [vmem:[#allocation56_spill] sm:$0xff] %v8490_v28  ;;  %v908_v41 = vsel %vm895_vm2, %v881_v32, %v882_v26  ;;  %v907_v32 = vsel %vm895_vm2, %v882_v26, %v883_v20 }
  0xe1   : > { %v1110_v33 = vadd.f32 %v1078_v3, %v1045_v48  ;;  %v981_v35 = vmul.f32 %v8147_v11, %v779_v23  ;;  %v982_v3 = vmul.f32 %v8147_v11, %v778_v0  ;;  %v1280_v14 = vmul.f32 %v8490_v28, %v8490_v28 }
  0xe2   : > { %v1279_v54 = vmul.f32 %v8467_v38, %v8467_v38  ;;  %v1080_v0 = vmul.f32 %v8151_v13, %v907_v32  ;;  %v753_v26 = vrot.slane %v8498_v40, 7 }
  0xe3   : > { %v8505_v56 = vadd.f32 %v8199_v44, %v1110_v33  ;;  %v7790_v33 = vmov 128.0  }
  0xe4   : > { %1185 = vadd.xlane.f32.xlu0 %v8437_v55  ;;  %1191 = vadd.xlane.f32.xlu2 %v8467_v38  ;;  %7108 = vrcp.f32 %v7790_v33 }
  0xe5   : > { %12014 = vst [vmem:[#allocation58_spill] sm:$0xff] %v8505_v56  ;;  %v1281_v23 = vmul.f32 %v8505_v56, %v8505_v56 }
  0xe6   : > { %1187 = vadd.xlane.f32.xlu1 %v8443_v4 }
  0xec   : > { %1322 = vadd.xlane.f32.xlu0 %v1277_v36  ;;  %v1014_v36 = vmul.f32 %v8447_v9, %v8149_v12  ;;  %1193 = vadd.xlane.f32.xlu2 %v8490_v28  ;;  %v6723_v9 = vld [vmem:[#allocation10 + $0xf4] sm:$0xf0] }
  0xee   : > { %1189 = vadd.xlane.f32.xlu1 %v8476_v50  ;;  %v1046_v48 = vadd.f32 %v1014_v36, %v981_v35  ;;  %v8522_v36 = vunpack.c.h.bf16 %v6909_v62  ;;  %v1016_v62 = vmul.f32 %v8498_v40, %v8149_v12  ;;  %v6546_v40 = vld [vmem:[#allocation10 + $0xe8] sm:$0xf] }
  0xf0   : > { %12015 = vst [vmem:[#allocation59_spill] sm:$0xff] %v8522_v36 }
  0xf4   : > { %1324 = vadd.xlane.f32.xlu0 %v1278_v16  ;;  %v1079_v16 = vmul.f32 %v8151_v13, %v908_v41  ;;  %1330 = vadd.xlane.f32.xlu2 %v1281_v23  ;;  %v8525_v41 = vpop.eup %7108 }
  0xf5   : > { %v1226_v32 = vmul.f32 128.0, %v8525_v41  ;;  %vm1230_vm3 = vweird.f32 %v8525_v41 }
  0xf6   : > { %1326 = vadd.xlane.f32.xlu1 %v1279_v54  ;;  %v1047_v54 = vadd.f32 %v1015_v58, %v982_v3  ;;  %v1111_v18 = vadd.f32 %v1079_v16, %v1046_v48  ;;  %v777_v3 = vsel %vm765_vm1, %v752_v31, %v753_v26  ;;  %v884_v58 = vrot.slane %v8522_v36, 1  ;;  %v6538_v31 = vld [vmem:[#allocation10 + $0xe0] sm:$0xf] }
  0xf7   : > { %v983_v16 = vmul.f32 %v8147_v11, %v777_v3  ;;  %v1227_v25 = vsub.f32 1.0, %v1226_v32 }
  0xf8   : > { %v1112_v35 = vadd.f32 %v1080_v0, %v1047_v54  ;;  %v8528_v33 = vadd.f32 %v8199_v44, %v1111_v18  ;;  %v906_v18 = vsel %vm895_vm2, %v883_v20, %v884_v58  ;;  %v6720_v54 = vld [vmem:[#allocation10 + $0xe4] sm:$0xf]  ;;  %v11758_v20 = vrot.slane %v8522_v36, 7 }
  0xf9   : > { %v1048_v0 = vadd.f32 %v1016_v62, %v983_v16  ;;  %v1081_v17 = vmul.f32 %v8151_v13, %v906_v18  ;;  %v6543_v49 = vor.u32 %v6720_v54, %v6540_v10  ;;  %v6551_v16 = vor.u32 %v6721_v59, %v6548_v43  ;;  %v6524_v43 = vld [vmem:[#allocation10 + $0xd0] sm:$0xf0]  ;;  %v6530_v59 = vld [vmem:[#allocation10 + $0xc8] sm:$0xf] }
  0xfa   : > { %12016 = vst [vmem:[#allocation60_spill] sm:$0xff] %v8528_v33  ;;  %v1282_v48 = vmul.f32 %v8528_v33, %v8528_v33  ;;  %v8540_v23 = vadd.f32 %v8199_v44, %v1112_v35  ;;  %v6547_v35 = vor.u32 %v6723_v9, %v6546_v40  ;;  %v8549_v18 = vunpack.c.l.bf16 %v6910_v30 }
  0xfb   : > { %v1113_v62 = vadd.f32 %v1081_v17, %v1048_v0  ;;  %2283 = vmatpush.bf16.msra.mxu1 %v6543_v49  ;;  %v776_v9 = vsel %vm765_vm1, %v753_v26, %v11758_v20  ;;  %v1017_v10 = vmul.f32 %v8522_v36, %v8149_v12  ;;  %2461 = vmatpush.bf16.msra.mxu3 %v6551_v16  ;;  %v6719_v49 = vld [vmem:[#allocation10 + $0xd4] sm:$0xf0]  ;;  %v6506_v16 = vld [vmem:[#allocation10 + $0xa0] sm:$0xf] }
  0xfc   : > { %1195 = vadd.xlane.f32.xlu0 %v8505_v56  ;;  %12017 = vst [vmem:[#allocation61_spill] sm:$0xff] %v8540_v23  ;;  %1332 = vadd.xlane.f32.xlu2 %v1282_v48  ;;  %v6716_v48 = vld [vmem:[#allocation10 + $0xc4] sm:$0xf]  ;;  %v1283_v40 = vmul.f32 %v8540_v23, %v8540_v23  ;;  %v984_v32 = vmul.f32 %v8147_v11, %v776_v9  ;;  %v885_v42 = vrot.slane %v8549_v18, 1 }
  0xfd   : > { %12018 = vst [vmem:[#allocation62_spill] sm:$0xff] %v8549_v18  ;;  %2372 = vmatpush.bf16.msra.mxu2 %v6547_v35  ;;  %v6527_v54 = vor.u32 %v6716_v48, %v6524_v43  ;;  %v6531_v0 = vor.u32 %v6719_v49, %v6530_v59  ;;  %v6532_v35 = vld [vmem:[#allocation10 + $0xd8] sm:$0xf0]  ;;  %v8562_v26 = vadd.f32 %v8199_v44, %v1113_v62  ;;  %v6508_v59 = vld [vmem:[#allocation10 + $0xb0] sm:$0xf0] }
  0xfe   : > { %1328 = vadd.xlane.f32.xlu1 %v1280_v14  ;;  %v6722_v14 = vld [vmem:[#allocation10 + $0xec] sm:$0xf0]  ;;  %v1049_v34 = vadd.f32 %v1017_v10, %v984_v32  ;;  %v905_v9 = vsel %vm895_vm2, %v884_v58, %v885_v42  ;;  %v1228_v48 = vmul.f32 %v8525_v41, %v1227_v25  ;;  %v6514_v49 = vld [vmem:[#allocation10 + $0xa8] sm:$0xf]  ;;  %v6715_v62 = vld [vmem:[#allocation10 + $0xb4] sm:$0xf0] }
  0xff   : > { %v6539_v3 = vor.u32 %v6722_v14, %v6538_v31  ;;  %v6522_v31 = vld [vmem:[#allocation10 + $0xc0] sm:$0xf]  ;;  %v6718_v14 = vld [vmem:[#allocation10 + $0xcc] sm:$0xf0]  ;;  %12019 = vst [vmem:[#allocation63_spill] sm:$0xff] %v8562_v26  ;;  %2284 = vmatpush.bf16.msra.mxu1 %v6527_v54  ;;  %v6515_v10 = vor.u32 %v6715_v62, %v6514_v49 }
 0x100   : > { %v6523_v17 = vor.u32 %v6718_v14, %v6522_v31  ;;  %v6714_v31 = vld [vmem:[#allocation10 + $0xac] sm:$0xf0]  ;;  %v6712_v14 = vld [vmem:[#allocation10 + $0xa4] sm:$0xf]  ;;  %v6713_v32 = vld [vmem:[#allocation10 + $0xac] sm:$0xf] }
 0x101   : > { %2194 = vmatpush.bf16.msra.mxu0 %v6539_v3  ;;  %v6717_v3 = vld [vmem:[#allocation10 + $0xcc] sm:$0xf]  ;;  %2373 = vmatpush.bf16.msra.mxu2 %v6531_v0  ;;  %v6507_v43 = vor.u32 %v6714_v31, %v6506_v16  ;;  %v6516_v54 = vld [vmem:[#allocation10 + $0xb8] sm:$0xf0]  ;;  %v6490_v25 = vld [vmem:[#allocation10 + $0x80] sm:$0xf]  ;;  %v1229_v16 = vadd.f32 %v8525_v41, %v1228_v48 }
 0x102   : > { %v6535_v20 = vor.u32 %v6717_v3, %v6532_v35  ;;  %v6511_v3 = vor.u32 %v6712_v14, %v6508_v59  ;;  %v6519_v0 = vor.u32 %v6713_v32, %v6516_v54  ;;  %v6710_v58 = vld [vmem:[#allocation10 + $0x8c] sm:$0xf0]  ;;  %v1284_v14 = vmul.f32 %v8562_v26, %v8562_v26  ;;  %v6498_v59 = vld [vmem:[#allocation10 + $0x88] sm:$0xf] }
 0x103   : > { %v1018_v54 = vmul.f32 %v8549_v18, %v8149_v12 }
 0x104   : > { %1197 = vadd.xlane.f32.xlu0 %v8528_v33  ;;  %2462 = vmatpush.bf16.msra.mxu3 %v6535_v20  ;;  %v6708_v20 = vld [vmem:[#allocation10 + $0x84] sm:$0xf] }
 0x105   : > { %2195 = vmatpush.bf16.msra.mxu0 %v6523_v17  ;;  %v1082_v17 = vmul.f32 %v8151_v13, %v905_v9  ;;  %2285 = vmatpush.bf16.msra.mxu1 %v6511_v3  ;;  %v6491_v9 = vor.u32 %v6710_v58, %v6490_v25  ;;  %v6500_v3 = vld [vmem:[#allocation10 + $0x98] sm:$0xf0]  ;;  %v6474_v58 = vld [vmem:[#allocation10 + $0x60] sm:$0xf] }
 0x106   : > { %1199 = vadd.xlane.f32.xlu1 %v8540_v23  ;;  %2374 = vmatpush.bf16.msra.mxu2 %v6515_v10 }
 0x107   : > { %v1114_v35 = vadd.f32 %v1082_v17, %v1049_v34  ;;  %v6711_v34 = vld [vmem:[#allocation10 + $0x94] sm:$0xf0]  ;;  %v6709_v17 = vld [vmem:[#allocation10 + $0x8c] sm:$0xf] }
 0x108   : > { %2463 = vmatpush.bf16.msra.mxu3 %v6519_v0  ;;  %v6499_v62 = vor.u32 %v6711_v34, %v6498_v59  ;;  %v6503_v32 = vor.u32 %v6709_v17, %v6500_v3  ;;  %v12022_v0 = vrot.slane %v8522_v36, 7  ;;  %v8598_v34 = vsel %vm1230_vm3, %v8525_v41, %v1229_v16  ;;  %v6482_v17 = vld [vmem:[#allocation10 + $0x68] sm:$0xf]  ;;  %v6707_v3 = vld [vmem:[#allocation10 + $0x74] sm:$0xf0]  ;;  %v8602_v36 = vld [vmem:[%s8105_s1 + $0x60] sm:$0xff]  }
 0x109   : > { %2196 = vmatpush.bf16.msra.mxu0 %v6507_v43  ;;  %v8573_v31 = vadd.f32 %v8199_v44, %v1114_v35  ;;  %v6492_v43 = vld [vmem:[#allocation10 + $0x90] sm:$0xf0]  ;;  %v8651_v52 = vunpack.c.h.bf16 %v8602_v36 }
 0x10a   : > { %v6495_v49 = vor.u32 %v6708_v20, %v6492_v43  ;;  %2375 = vmatpush.bf16.msra.mxu2 %v6499_v62  ;;  %v6706_v20 = vld [vmem:[#allocation10 + $0x6c] sm:$0xf0]  ;;  %v6476_v62 = vld [vmem:[#allocation10 + $0x70] sm:$0xf0] }
 0x10b   : > { %12021 = vst [vmem:[#allocation65_spill] sm:$0xff] %v8573_v31  ;;  %1203 = vadd.xlane.f32.xlu2 %v8573_v31  ;;  %v1285_v48 = vmul.f32 %v8573_v31, %v8573_v31 }
 0x10c   : > { %1334 = vadd.xlane.f32.xlu0 %v1283_v40  ;;  %v8569_v40 = vunpack.c.h.bf16 %v6910_v30  ;;  %v755_v30 = vrot.slane %v8549_v18, 7  ;;  %2286 = vmatpush.bf16.msra.mxu1 %v6495_v49  ;;  %v6475_v49 = vor.u32 %v6706_v20, %v6474_v58  ;;  %v6458_v58 = vld [vmem:[#allocation10 + $0x40] sm:$0xf]  ;;  %v6702_v20 = vld [vmem:[#allocation10 + $0x4c] sm:$0xf0]  ;;  %12026 = vst [vmem:[#allocation68_spill] sm:$0xff] %v8651_v52 }
 0x10d   : > { %2197 = vmatpush.bf16.msra.mxu0 %v6491_v9  ;;  %2464 = vmatpush.bf16.msra.mxu3 %v6503_v32  ;;  %v6704_v9 = vld [vmem:[#allocation10 + $0x64] sm:$0xf]  ;;  %v6705_v32 = vld [vmem:[#allocation10 + $0x6c] sm:$0xf] }
 0x10e   : > { %1201 = vadd.xlane.f32.xlu1 %v8562_v26  ;;  %12020 = vst [vmem:[#allocation64_spill] sm:$0xff] %v8569_v40  ;;  %v11760_v10 = vrot.slane %v8569_v40, 1  ;;  %v775_v35 = vsel %vm765_vm1, %v12022_v0, %v755_v30  ;;  %v6484_v0 = vld [vmem:[#allocation10 + $0x78] sm:$0xf0] }
 0x10f   : > { %v985_v43 = vmul.f32 %v8147_v11, %v775_v35  ;;  %v11763_v35 = vrot.slane %v8569_v40, 7  ;;  %v8607_v16 = vpop.xlane.xlu2 %1165 }
 0x110   : > { %v904_v25 = vsel %vm895_vm2, %v885_v42, %v11760_v10  ;;  %v6479_v42 = vor.u32 %v6704_v9, %v6476_v62  ;;  %v6700_v9 = vld [vmem:[#allocation10 + $0x44] sm:$0xf]  ;;  %v6460_v62 = vld [vmem:[#allocation10 + $0x50] sm:$0xf0] }
 0x111   : > { %v1083_v59 = vmul.f32 %v8151_v13, %v904_v25  ;;  %v1050_v10 = vadd.f32 %v1018_v54, %v985_v43  ;;  %2198 = vmatpush.bf16.msra.mxu0 %v6475_v49  ;;  %v6487_v25 = vor.u32 %v6705_v32, %v6484_v0  ;;  %v774_v54 = vsel %vm765_vm1, %v755_v30, %v11763_v35  ;;  %v6442_v35 = vld [vmem:[#allocation10 + $0x20] sm:$0xf] }
 0x112   : > { %2287 = vmatpush.bf16.msra.mxu1 %v6479_v42  ;;  %v6459_v49 = vor.u32 %v6702_v20, %v6458_v58  ;;  %v8620_v32 = vunpack.c.l.bf16 %v8602_v36  ;;  %v6463_v30 = vor.u32 %v6700_v9, %v6460_v62  ;;  %v1019_v58 = vmul.f32 %v8569_v40, %v8149_v12 }
 0x113   : > { %2465 = vmatpush.bf16.msra.mxu3 %v6487_v25  ;;  %v986_v25 = vmul.f32 %v8147_v11, %v774_v54  ;;  %v6447_v62 = vor.u32 %v6696_v63, %v6444_v39  ;;  %v6426_v63 = vld [vmem:[#allocation10] sm:$0xf] }
 0x114   : > { %1336 = vadd.xlane.f32.xlu0 %v1284_v14  ;;  %v6483_v14 = vor.u32 %v6707_v3, %v6482_v17  ;;  %v6466_v17 = vld [vmem:[#allocation10 + $0x48] sm:$0xf]  ;;  %12024 = vst [vmem:[#allocation67_spill] sm:$0xff] %v8620_v32 }
 0x115   : > { %2199 = vmatpush.bf16.msra.mxu0 %v6459_v49  ;;  %v6699_v49 = vld [vmem:[#allocation10 + $0x34] sm:$0xf0] }
 0x116   : > { %1338 = vadd.xlane.f32.xlu1 %v1285_v48  ;;  %2376 = vmatpush.bf16.msra.mxu2 %v6483_v14  ;;  %v1115_v48 = vadd.f32 %v1083_v59, %v1050_v10  ;;  %v6701_v59 = vld [vmem:[#allocation10 + $0x4c] sm:$0xf]  ;;  %v6468_v14 = vld [vmem:[#allocation10 + $0x58] sm:$0xf0]  ;;  %v6451_v54 = vor.u32 %v6699_v49, %v6450_v29  ;;  %v6434_v49 = vld [vmem:[#allocation10 + $0x8] sm:$0xf] }
 0x117   : > { %v1162_v18 = vpop.xlane.xlu0 %1161  ;;  %2288 = vmatpush.bf16.msra.mxu1 %v6463_v30 }
 0x118   : > { %v8605_v41 = vmul.f32 %v8598_v34, %v1162_v18  ;;  %v6703_v18 = vld [vmem:[#allocation10 + $0x54] sm:$0xf0]  ;;  %v8617_v10 = vadd.f32 %v8199_v44, %v1115_v48  ;;  %v6698_v48 = vld [vmem:[#allocation10 + $0x2c] sm:$0xf0] }
 0x119   : > { %v1297_v43 = vpop.xlane.xlu1 %1296  ;;  %v6467_v0 = vor.u32 %v6703_v18, %v6466_v17  ;;  %v6443_v53 = vor.u32 %v6698_v48, %v6442_v35  ;;  %v6697_v17 = vld [vmem:[#allocation10 + $0x2c] sm:$0xf]  ;;  %v6452_v18 = vld [vmem:[#allocation10 + $0x38] sm:$0xf0]  ;;  %v1168_v35 = vpop.xlane.xlu2 %1167  ;;  %v6428_v48 = vld [vmem:[#allocation10 + $0x10] sm:$0xf0] }
 0x11a   : > { %v1392_v3 = vmul.f32 %v8605_v41, %v8605_v41  ;;  %v1360_v42 = vmul.f32 %v1297_v43, %v8598_v34  ;;  %12023 = vst [vmem:[#allocation66_spill] sm:$0xff] %v8617_v10  ;;  %1205 = vadd.xlane.f32.xlu2 %v8617_v10  ;;  %v6471_v43 = vor.u32 %v6701_v59, %v6468_v14 }
 0x11b   : > { %2377 = vmatpush.bf16.msra.mxu2 %v6467_v0  ;;  %2200 = vmatpush.bf16.msra.mxu0 %v6443_v53  ;;  %v6455_v59 = vor.u32 %v6697_v17, %v6452_v18  ;;  %v1051_v14 = vadd.f32 %v1019_v58, %v986_v25  ;;  %v12025_v0 = vrot.slane %v8569_v40, 1  ;;  %v1286_v29 = vmul.f32 %v8617_v10, %v8617_v10  ;;  %v6692_v58 = vld [vmem:[#allocation10 + $0x4] sm:$0xf]  ;;  %v6695_v18 = vld [vmem:[#allocation10 + $0x14] sm:$0xf0] }
 0x11c   : > { %v1424_v20 = vsub.f32 %v1360_v42, %v1392_v3  ;;  %2466 = vmatpush.bf16.msra.mxu3 %v6471_v43  ;;  %v887_v3 = vrot.slane %v8620_v32, 1  ;;  %2289 = vmatpush.bf16.msra.mxu1 %v6447_v62  ;;  %v6693_v62 = vld [vmem:[#allocation10 + $0xc] sm:$0xf] }
 0x11e   : > { %v1456_v9 = vmax.f32 %v1424_v20, 0.0  ;;  %v903_v39 = vsel %vm895_vm2, %v12025_v0, %v887_v3  ;;  %v6694_v20 = vld [vmem:[#allocation10 + $0xc] sm:$0xf0]  ;;  %1340 = vadd.xlane.f32.xlu1 %v1286_v29  ;;  %v757_v29 = vrot.slane %v8620_v32, 7 }
 0x11f   : > { %v1164_v42 = vpop.xlane.xlu0 %1163  ;;  %2378 = vmatpush.bf16.msra.mxu2 %v6451_v54  ;;  %v1084_v53 = vmul.f32 %v8151_v13, %v903_v39  ;;  %v6427_v25 = vor.u32 %v6694_v20, %v6426_v63  ;;  %v6436_v54 = vld [vmem:[#allocation10 + $0x18] sm:$0xf0]  ;;  %v6431_v63 = vor.u32 %v6692_v58, %v6428_v48  ;;  %v1020_v58 = vmul.f32 %v8620_v32, %v8149_v12 }
 0x120   : > { %v8627_v60 = vadd.f32 1e-06, %v1456_v9  ;;  %v8630_v30 = vmul.f32 %v8598_v34, %v1164_v42  ;;  %v8641_v9 = vmul.f32 %v8598_v34, %v8607_v16  ;;  %2467 = vmatpush.bf16.msra.mxu3 %v6455_v59  ;;  %v8647_v42 = vmul.f32 %v8598_v34, %v1168_v35 }
 0x121   : > { %v1299_v43 = vpop.xlane.xlu1 %1298  ;;  %v1116_v39 = vadd.f32 %v1084_v53, %v1051_v14  ;;  %2201 = vmatpush.bf16.msra.mxu0 %v6427_v25  ;;  %v6435_v16 = vor.u32 %v6695_v18, %v6434_v49  ;;  %v6439_v20 = vor.u32 %v6693_v62, %v6436_v54  ;;  %2290 = vmatpush.bf16.msra.mxu1 %v6431_v63  ;;  %v888_v14 = vrot.slane %v8651_v52, 1 }
 0x122   : > { %7110 = vrsqrt.f32 %v8627_v60  ;;  %v1393_v17 = vmul.f32 %v8630_v30, %v8630_v30  ;;  %v1361_v0 = vmul.f32 %v1299_v43, %v8598_v34  ;;  %v1394_v35 = vmul.f32 %v8641_v9, %v8641_v9 }
 0x123   : > { %v8654_v59 = vadd.f32 %v8199_v44, %v1116_v39  ;;  %2379 = vmatpush.bf16.msra.mxu2 %v6435_v16  ;;  %v12028_v44 = vrot.slane %v8569_v40, 7  ;;  %v902_v18 = vsel %vm895_vm2, %v887_v3, %v888_v14  ;;  %vm1558_vm6 = vweird.f32 %v8627_v60 }
 0x124   : > { %v1425_v46 = vsub.f32 %v1361_v0, %v1393_v17  ;;  %2468 = vmatpush.bf16.msra.mxu3 %v6439_v20  ;;  %v1170_v17 = vpop.xlane.xlu2 %1169 }
 0x125   : > { %12027 = vst [vmem:[#allocation69_spill] sm:$0xff] %v8654_v59  ;;  %1207 = vadd.xlane.f32.xlu0 %v8654_v59  ;;  %v1287_v36 = vmul.f32 %v8654_v59, %v8654_v59  ;;  %v773_v25 = vsel %vm765_vm1, %v12028_v44, %v757_v29  ;;  %v1085_v44 = vmul.f32 %v8151_v13, %v902_v18 }
 0x126   : > { %v1457_v43 = vmax.f32 %v1425_v46, 0.0  ;;  %v1395_v46 = vmul.f32 %v8647_v42, %v8647_v42  ;;  %v987_v62 = vmul.f32 %v8147_v11, %v773_v25 }
 0x127   : > { %v1301_v53 = vpop.xlane.xlu0 %1300  ;;  %1342 = vadd.xlane.f32.xlu2 %v1287_v36 }
 0x128   : > { %v8669_v48 = vpop.eup %7110  ;;  %v1362_v49 = vmul.f32 %v1301_v53, %v8598_v34  ;;  %v8679_v0 = vadd.f32 1e-06, %v1457_v43  ;;  %v1052_v20 = vadd.f32 %v1020_v58, %v987_v62  ;;  %v8684_v53 = vld [vmem:[%s8105_s1 + $0x68] sm:$0xff]   ;;  %v8689_v43 = vmul.f32 %v8598_v34, %v1170_v17  ;;  %v8700_v62 = vld [vmem:[%s11995_s4] ss:$0 sm:$0xff] }
 0x129   : > { %v1553_v54 = vmul.f32 %v8669_v48, %v8627_v60  ;;  %v1303_v39 = vpop.xlane.xlu1 %1302  ;;  %v8692_v36 = vunpack.c.l.bf16 %v8684_v53  ;;  %vm1559_vm4 = vweird.f32 %v8669_v48 }
 0x12a   : > { %v1426_v63 = vsub.f32 %v1362_v49, %v1394_v35  ;;  %v1363_v16 = vmul.f32 %v1303_v39, %v8598_v34  ;;  %7112 = vrsqrt.f32 %v8679_v0  ;;  %v1117_v40 = vadd.f32 %v1085_v44, %v1052_v20  ;;  %vm8750_vm7 = vmor %vm1558_vm6, %vm1559_vm4 }
 0x12b   : > { %v1554_v32 = vmul.f32 %v8669_v48, %v1553_v54  ;;  %12029 = vst [vmem:[#allocation70_spill] sm:$0xff] %v8692_v36  ;;  %v11773_v35 = vrot.slane %v8651_v52, 7  ;;  %v11781_v39 = vrot.slane %v8692_v36, 1  ;;  %v1396_v44 = vmul.f32 %v8689_v43, %v8689_v43 }
 0x12c   : > { %v1458_v3 = vmax.f32 %v1426_v63, 0.0  ;;  %v1427_v25 = vsub.f32 %v1363_v16, %v1395_v46  ;;  %v8703_v46 = vadd.f32 %v8700_v62, %v1117_v40  ;;  %v1307_v16 = vpop.xlane.xlu2 %1306  ;;  %v1021_v40 = vmul.f32 %v8651_v52, %v8149_v12 }
 0x12d   : > { %v1555_v58 = vmul.f32 0.5, %v1554_v32  ;;  %v772_v17 = vsel %vm765_vm1, %v757_v29, %v11773_v35  ;;  %v1365_v29 = vmul.f32 %v1307_v16, %v8598_v34  ;;  %vm1568_vm8 = vweird.f32 %v8679_v0 }
 0x12e   : > { %v8695_v49 = vadd.f32 1e-06, %v1458_v3  ;;  %v1459_v18 = vmax.f32 %v1427_v25, 0.0  ;;  %12030 = vst [vmem:[#allocation71_spill] sm:$0xff] %v8703_v46  ;;  %1209 = vadd.xlane.f32.xlu0 %v8703_v46  ;;  %v901_v25 = vsel %vm895_vm2, %v888_v14, %v11781_v39  ;;  %v1288_v14 = vmul.f32 %v8703_v46, %v8703_v46 }
 0x12f   : > { %v1172_v54 = vpop.xlane.xlu0 %1171  ;;  %v1086_v59 = vmul.f32 %v8151_v13, %v901_v25 }
 0x130   : > { %7114 = vrsqrt.f32 %v8695_v49  ;;  %v8711_v32 = vadd.f32 1e-06, %v1459_v18  ;;  %v8714_v63 = vmul.f32 %v8598_v34, %v1172_v54  ;;  %v7113_v20 = vpop.eup %7112  ;;  %v988_v18 = vmul.f32 %v8147_v11, %v772_v17  ;;  %1344 = vadd.xlane.f32.xlu2 %v1288_v14 }
 0x131   : > { %v1305_v3 = vpop.xlane.xlu1 %1304  ;;  %v1556_v54 = vsub.f32 1.5, %v1555_v58  ;;  %v1563_v35 = vmul.f32 %v7113_v20, %v8679_v0  ;;  %vm1569_vm5 = vweird.f32 %v7113_v20  ;;  %vm1578_vm14 = vweird.f32 %v8695_v49 }
 0x132   : > { %7116 = vrsqrt.f32 %v8711_v32  ;;  %v1397_v22 = vmul.f32 %v8714_v63, %v8714_v63  ;;  %v1364_v21 = vmul.f32 %v1305_v3, %v8598_v34  ;;  %v1053_v16 = vadd.f32 %v1021_v40, %v988_v18  ;;  %vm8762_vm9 = vmor %vm1568_vm8, %vm1569_vm5 }
 0x133   : > { %v1564_v7 = vmul.f32 %v7113_v20, %v1563_v35  ;;  %v1557_v58 = vmul.f32 %v8669_v48, %v1556_v54  ;;  %vm1588_vm10 = vweird.f32 %v8711_v32 }
 0x134   : > { %v1429_v10 = vsub.f32 %v1365_v29, %v1397_v22  ;;  %v1428_v31 = vsub.f32 %v1364_v21, %v1396_v44  ;;  %v1118_v26 = vadd.f32 %v1086_v59, %v1053_v16  ;;  %v1309_v59 = vpop.xlane.xlu2 %1308 }
 0x135   : > { %v1565_v39 = vmul.f32 0.5, %v1564_v7  ;;  %v1561_v0 = vsel %vm8750_vm7, %v8669_v48, %v1557_v58  ;;  %v1366_v48 = vmul.f32 %v1309_v59, %v8598_v34 }
 0x136   : > { %v8735_v17 = vpop.eup %7114  ;;  %v1461_v40 = vmax.f32 %v1429_v10, 0.0  ;;  %v1460_v3 = vmax.f32 %v1428_v31, 0.0  ;;  %v8748_v29 = vadd.f32 %v8700_v62, %v1118_v26 }
 0x137   : > { %v1573_v35 = vmul.f32 %v8735_v17, %v8695_v49  ;;  %v1174_v25 = vpop.xlane.xlu0 %1173  ;;  %v1566_v22 = vsub.f32 1.5, %v1565_v39  ;;  %v1488_v39 = vsub.f32 %v8219_v61, %v8605_v41  ;;  %v6747_v41 = vld [vmem:[#allocation11 + $0xb8] sm:$0xff]  ;;  %vm1579_vm12 = vweird.f32 %v8735_v17 }
 0x138   : > { %v8741_v21 = vpop.eup %7116  ;;  %v8745_v44 = vmul.f32 %v8598_v34, %v1174_v25  ;;  %12031 = vst [vmem:[#allocation72_spill] sm:$0xff] %v8748_v29  ;;  %v8757_v10 = vadd.f32 1e-06, %v1461_v40  ;;  %v8767_v16 = vadd.f32 1e-06, %v1460_v3  ;;  %1211 = vadd.xlane.f32.xlu1 %v8748_v29  ;;  %v6731_v40 = vld [vmem:[#allocation11 + $0x38] sm:$0xff]  ;;  %5932 = vmatpush.bf16.msrb.mxu2 %v6747_v41  ;;  %vm8852_vm15 = vmor %vm1578_vm14, %vm1579_vm12 }
 0x139   : > { %v1583_v31 = vmul.f32 %v8741_v21, %v8711_v32  ;;  %v1176_v60 = vpop.xlane.xlu1 %1175  ;;  %v1567_v18 = vmul.f32 %v7113_v20, %v1566_v22  ;;  %v1574_v54 = vmul.f32 %v8735_v17, %v1573_v35  ;;  %v6755_v25 = vld [vmem:[#allocation11 + $0xf8] sm:$0xff]  ;;  %v1489_v35 = vsub.f32 %v8240_v19, %v8630_v30  ;;  %5754 = vmatpush.bf16.msrb.mxu0 %v6731_v40  ;;  %v8789_v19 = vld [vmem:[%s12036_s13] ss:$0 sm:$0xff] }
 0x13a   : > { %7118 = vrsqrt.f32 %v8757_v10  ;;  %v1398_v61 = vmul.f32 %v8745_v44, %v8745_v44  ;;  %v8784_v22 = vmul.f32 %v8598_v34, %v1176_v60  ;;  %v1872_v7 = vmul.f32 %v1561_v0, %v1488_v39  ;;  %6021 = vmatpush.bf16.msrb.mxu3 %v6755_v25  ;;  %v6739_v25 = vld [vmem:[#allocation11 + $0x78] sm:$0xff] }
 0x13b   : > { %v1584_v14 = vmul.f32 %v8741_v21, %v1583_v31  ;;  %v1571_v3 = vsel %vm8762_vm9, %v7113_v20, %v1567_v18  ;;  %7120 = vrsqrt.f32 %v8767_v16  ;;  %v1575_v46 = vmul.f32 0.5, %v1574_v54  ;;  %5843 = vmatpush.bf16.msrb.mxu1 %v6739_v25 }
 0x13c   : > { %v1873_v31 = vmul.f32 %v1571_v3, %v1489_v35  ;;  %v1289_v30 = vmul.f32 %v8748_v29, %v8748_v29  ;;  %v1430_v20 = vsub.f32 %v1366_v48, %v1398_v61  ;;  %v1399_v59 = vmul.f32 %v8784_v22, %v8784_v22  ;;  %v8805_v61 = vld [vmem:[%s12037_s25] ss:$0 sm:$0xff] }
 0x13d   : > { %v1585_v58 = vmul.f32 0.5, %v1584_v14  ;;  %v1576_v14 = vsub.f32 1.5, %v1575_v46  ;;  %v1908_v41 = vmul.f32 %v8789_v19, %v1872_v7  ;;  %v8813_v46 = vunpack.c.h.bf16 %v8684_v53 }
 0x13e   : > { %1346 = vadd.xlane.f32.xlu0 %v1289_v30  ;;  %v1909_v40 = vmul.f32 %v8789_v19, %v1873_v31  ;;  %v1462_v48 = vmax.f32 %v1430_v20, 0.0  ;;  %v1180_v30 = vpop.xlane.xlu2 %1179  ;;  %vm1589_vm11 = vweird.f32 %v8741_v21  ;;  %vm1608_vm0 = vweird.f32 %v8757_v10 }
 0x13f   : > { %v1311_v60 = vpop.xlane.xlu0 %1310  ;;  %v1586_v26 = vsub.f32 1.5, %v1585_v58  ;;  %12039 = vst [vmem:[#allocation73_spill] sm:$0xff] %v8813_v46  ;;  %v8822_v29 = vmul.f32 %v8598_v34, %v1180_v30  ;;  %vm8834_vm13 = vmor %vm1588_vm10, %vm1589_vm11  ;;  %vm1598_vm4 = vweird.f32 %v8767_v16 }
 0x140   : > { %v1367_v18 = vmul.f32 %v1311_v60, %v8598_v34  ;;  %v8796_v39 = vpop.eup %7118  ;;  %v1945_v53 = vadd.f32 %v8805_v61, %v1909_v40  ;;  %v8830_v7 = vadd.f32 1e-06, %v1462_v48  ;;  %v1491_v48 = vsub.f32 %v8249_v27, %v8647_v42 }
 0x141   : > { %v1178_v54 = vpop.xlane.xlu1 %1177  ;;  %v8798_v0 = vpop.eup %7120  ;;  %v1603_v35 = vmul.f32 %v8796_v39, %v8757_v10  ;;  %v1587_v31 = vmul.f32 %v8741_v21, %v1586_v26  ;;  %vm1609_vm3 = vweird.f32 %v8796_v39 }
 0x142   : > { %v1593_v3 = vmul.f32 %v8798_v0, %v8767_v16  ;;  %v1431_v58 = vsub.f32 %v1367_v18, %v1399_v59  ;;  %v8819_v60 = vmul.f32 %v8598_v34, %v1178_v54  ;;  %v1944_v59 = vadd.f32 %v8805_v61, %v1908_v41  ;;  %vm8904_vm6 = vmor %vm1608_vm0, %vm1609_vm3 }
 0x143   : > { %v1577_v18 = vmul.f32 %v8735_v17, %v1576_v14  ;;  %v1604_v25 = vmul.f32 %v8796_v39, %v1603_v35  ;;  %v1591_v14 = vsel %vm8834_vm13, %v8741_v21, %v1587_v31  ;;  %v1401_v35 = vmul.f32 %v8822_v29, %v8822_v29 }
 0x144   : > { %v1463_v20 = vmax.f32 %v1431_v58, 0.0  ;;  %v1594_v26 = vmul.f32 %v8798_v0, %v1593_v3  ;;  %v1400_v41 = vmul.f32 %v8819_v60, %v8819_v60  ;;  %v1976_v58 = vpack.c.bf16 %v1945_v53, %v1944_v59 }
 0x145   : > { %v12044_v31 = vrot.slane %v8692_v36, 7  ;;  %v12045_v53 = vrot.slane %v8651_v52, 7  ;;  %v1581_v27 = vsel %vm8852_vm15, %v8735_v17, %v1577_v18  ;;  %v1605_v42 = vmul.f32 0.5, %v1604_v25 }
 0x146   : > { %v8856_v49 = vadd.f32 1e-06, %v1463_v20  ;;  %2202 = vmatmul.bf16.vlgmr.msra.gmra.mxu0 %v1976_v58  ;;  %2291 = vmatmul.bf16.vlgmr.msra.gmra.mxu1 %v1976_v58  ;;  %v1595_v30 = vmul.f32 0.5, %v1594_v26  ;;  %7122 = vrsqrt.f32 %v8830_v7  ;;  %v1490_v20 = vsub.f32 %v8226_v2, %v8641_v9  ;;  %v1182_v23 = vpop.xlane.xlu2 %1181  ;;  %v8880_v26 = vld [vmem:[%s8105_s1 + $0x70] sm:$0xff]  }
 0x147   : > { %v1313_v54 = vpop.xlane.xlu0 %1312  ;;  %2380 = vmatmul.bf16.vlgmr.msra.gmra.mxu2 %v1976_v58  ;;  %2469 = vmatmul.bf16.vlgmr.msra.gmra.mxu3 %v1976_v58  ;;  %v1606_v58 = vsub.f32 1.5, %v1605_v42  ;;  %v1022_v9 = vmul.f32 %v8692_v36, %v8149_v12  ;;  %v8891_v59 = vunpack.c.l.bf16 %v8880_v26  ;;  %vm1599_vm5 = vweird.f32 %v8798_v0 }
 0x148   : > { %v1368_v40 = vmul.f32 %v1313_v54, %v8598_v34  ;;  %v771_v54 = vsel %vm765_vm1, %v12045_v53, %v12044_v31  ;;  %v12046_v31 = vrot.slane %v8813_v46, 1  ;;  %v12047_v53 = vrot.slane %v8692_v36, 1  ;;  %vm8920_vm7 = vmor %vm1598_vm4, %vm1599_vm5 }
 0x149   : > { %v1315_v32 = vpop.xlane.xlu1 %1314  ;;  %v1874_v18 = vmul.f32 %v1581_v27, %v1490_v20  ;;  %7124 = vrsqrt.f32 %v8856_v49  ;;  %v989_v25 = vmul.f32 %v8147_v11, %v771_v54  ;;  %v1596_v2 = vsub.f32 1.5, %v1595_v30  ;;  %12048 = vst [vmem:[#allocation74_spill] sm:$0xff] %v8891_v59 }
 0x14a   : > { %v1369_v21 = vmul.f32 %v1315_v32, %v8598_v34  ;;  %v1875_v32 = vmul.f32 %v1591_v14, %v1491_v48  ;;  %v1432_v3 = vsub.f32 %v1368_v40, %v1400_v41  ;;  %v900_v17 = vsel %vm895_vm2, %v12047_v53, %v12046_v31 }
 0x14b   : > { %v1087_v14 = vmul.f32 %v8151_v13, %v900_v17  ;;  %v1054_v54 = vadd.f32 %v1022_v9, %v989_v25  ;;  %v1607_v27 = vmul.f32 %v8796_v39, %v1606_v58  ;;  %v1597_v42 = vmul.f32 %v8798_v0, %v1596_v2 }
 0x14c   : > { %v1433_v52 = vsub.f32 %v1369_v21, %v1401_v35  ;;  %v1464_v41 = vmax.f32 %v1432_v3, 0.0  ;;  %v1911_v40 = vmul.f32 %v8789_v19, %v1875_v32  ;;  %v8886_v35 = vpop.eup %7122  ;;  %v1910_v21 = vmul.f32 %v8789_v19, %v1874_v18 }
 0x14d   : > { %v11791_v3 = vrot.slane %v8813_v46, 7  ;;  %v8900_v10 = vmul.f32 %v8598_v34, %v1182_v23  ;;  %v1613_v32 = vmul.f32 %v8886_v35, %v8830_v7  ;;  %v1119_v17 = vadd.f32 %v1087_v14, %v1054_v54 }
 0x14e   : > { %v1465_v48 = vmax.f32 %v1433_v52, 0.0  ;;  %v8910_v31 = vadd.f32 1e-06, %v1464_v41  ;;  %v1947_v53 = vadd.f32 %v8805_v61, %v1911_v40  ;;  %v1492_v18 = vsub.f32 %v8275_v45, %v8689_v43  ;;  %v1319_v54 = vpop.xlane.xlu2 %1318 }
 0x14f   : > { %v1184_v52 = vpop.xlane.xlu0 %1183  ;;  %v8902_v30 = vpop.eup %7124  ;;  %v11790_v25 = vrot.slane %v8891_v59, 1  ;;  %v1946_v41 = vadd.f32 %v8805_v61, %v1910_v21  ;;  %v8929_v40 = vadd.f32 %v8700_v62, %v1119_v17  ;;  %v12054_v45 = vrot.slane %v8692_v36, 7  ;;  %v6738_v36 = vld [vmem:[#allocation11 + $0x70] sm:$0xff] }
 0x150   : > { %v8915_v23 = vadd.f32 1e-06, %v1465_v48  ;;  %v8925_v2 = vmul.f32 %v8598_v34, %v1184_v52  ;;  %v1611_v16 = vsel %vm8904_vm6, %v8796_v39, %v1607_v27  ;;  %v1601_v14 = vsel %vm8920_vm7, %v8798_v0, %v1597_v42  ;;  %5844 = vmatpush.bf16.msrb.mxu1 %v6738_v36 }
 0x151   : > { %v1317_v9 = vpop.xlane.xlu1 %1316  ;;  %12053 = vst [vmem:[#allocation75_spill] sm:$0xff] %v8929_v40  ;;  %v770_v43 = vsel %vm765_vm1, %v12054_v45, %v11791_v3  ;;  %v1623_v48 = vmul.f32 %v8902_v30, %v8856_v49  ;;  %v1402_v21 = vmul.f32 %v8900_v10, %v8900_v10  ;;  %v1614_v52 = vmul.f32 %v8886_v35, %v1613_v32  ;;  %v6746_v45 = vld [vmem:[#allocation11 + $0xb0] sm:$0xff] }
 0x152   : > { %7126 = vrsqrt.f32 %v8910_v31  ;;  %v1977_v17 = vpack.c.bf16 %v1947_v53, %v1946_v41  ;;  %1213 = vadd.xlane.f32.xlu1 %v8929_v40  ;;  %v12055_v39 = vrot.slane %v8813_v46, 1  ;;  %v1370_v27 = vmul.f32 %v1317_v9, %v8598_v34  ;;  %v6754_v3 = vld [vmem:[#allocation11 + $0xf0] sm:$0xff]  ;;  %5933 = vmatpush.bf16.msrb.mxu2 %v6746_v45 }
 0x153   : > { %7128 = vrsqrt.f32 %v8915_v23  ;;  %v990_v42 = vmul.f32 %v8147_v11, %v770_v43  ;;  %v1023_v20 = vmul.f32 %v8813_v46, %v8149_v12  ;;  %v1493_v32 = vsub.f32 %v8290_v57, %v8714_v63  ;;  %v6730_v43 = vld [vmem:[#allocation11 + $0x30] sm:$0xff]  ;;  %6022 = vmatpush.bf16.msrb.mxu3 %v6754_v3 }
 0x154   : > { %v899_v0 = vsel %vm895_vm2, %v12055_v39, %v11790_v25  ;;  %v1403_v53 = vmul.f32 %v8925_v2, %v8925_v2  ;;  %v1371_v58 = vmul.f32 %v1319_v54, %v8598_v34  ;;  %v1624_v41 = vmul.f32 %v8902_v30, %v1623_v48  ;;  %5755 = vmatpush.bf16.msrb.mxu0 %v6730_v43 }
 0x155   : > { %v1088_v9 = vmul.f32 %v8151_v13, %v899_v0  ;;  %v1877_v39 = vmul.f32 %v1611_v16, %v1493_v32  ;;  %v1876_v25 = vmul.f32 %v1601_v14, %v1492_v18  ;;  %v1615_v57 = vmul.f32 0.5, %v1614_v52 }
 0x156   : > { %2207 = vmatmul.bf16.gmra.mxu0 %v1977_v17  ;;  %2296 = vmatmul.bf16.gmra.mxu1 %v1977_v17  ;;  %v1434_v63 = vsub.f32 %v1370_v27, %v1402_v21  ;;  %v1055_v33 = vadd.f32 %v1023_v20, %v990_v42  ;;  %v1290_v54 = vmul.f32 %v8929_v40, %v8929_v40  ;;  %v1625_v16 = vmul.f32 0.5, %v1624_v41  ;;  %v1321_v3 = vpop.xlane.xlu2 %1320 }
 0x157   : > { %2385 = vmatmul.bf16.gmra.mxu2 %v1977_v17  ;;  %2474 = vmatmul.bf16.gmra.mxu3 %v1977_v17  ;;  %v1435_v48 = vsub.f32 %v1371_v58, %v1403_v53  ;;  %v1186_v17 = vpop.xlane.xlu0 %1185  ;;  %v1912_v14 = vmul.f32 %v8789_v19, %v1876_v25  ;;  %v1913_v21 = vmul.f32 %v8789_v19, %v1877_v39  ;;  %v1616_v52 = vsub.f32 1.5, %v1615_v57 }
 0x158   : > { %v8970_v56 = vpop.eup %7126  ;;  %v1120_v18 = vadd.f32 %v1088_v9, %v1055_v33  ;;  %1348 = vadd.xlane.f32.xlu0 %v1290_v54  ;;  %v1466_v42 = vmax.f32 %v1434_v63, 0.0  ;;  %vm1618_vm8 = vweird.f32 %v8830_v7  ;;  %v1626_v53 = vsub.f32 1.5, %v1625_v16 }
 0x159   : > { %v8972_v0 = vpop.eup %7128  ;;  %v1633_v27 = vmul.f32 %v8970_v56, %v8910_v31  ;;  %v1188_v32 = vpop.xlane.xlu1 %1187  ;;  %v1467_v33 = vmax.f32 %v1435_v48, 0.0  ;;  %vm1628_vm9 = vweird.f32 %v8856_v49  ;;  %v8986_v25 = vmul.f32 %v8598_v34, %v1186_v17 }
 0x15a   : > { %v8979_v20 = vadd.f32 %v8700_v62, %v1120_v18  ;;  %v1643_v36 = vmul.f32 %v8972_v0, %v8915_v23  ;;  %vm1619_vm10 = vweird.f32 %v8886_v35  ;;  %v1948_v41 = vadd.f32 %v8805_v61, %v1912_v14 }
 0x15b   : > { %v1949_v9 = vadd.f32 %v8805_v61, %v1913_v21  ;;  %v8995_v45 = vunpack.c.h.bf16 %v8880_v26  ;;  %v1617_v43 = vmul.f32 %v8886_v35, %v1616_v52  ;;  %vm1629_vm11 = vweird.f32 %v8902_v30  ;;  %vm9009_vm12 = vmor %vm1618_vm8, %vm1619_vm10 }
 0x15c   : > { %12056 = vst [vmem:[#allocation76_spill] sm:$0xff] %v8979_v20  ;;  %1215 = vadd.xlane.f32.xlu2 %v8979_v20  ;;  %v1291_v58 = vmul.f32 %v8979_v20, %v8979_v20  ;;  %v1634_v39 = vmul.f32 %v8970_v56, %v1633_v27  ;;  %v9000_v57 = vadd.f32 1e-06, %v1466_v42  ;;  %v1644_v63 = vmul.f32 %v8972_v0, %v1643_v36  ;;  %vm9022_vm13 = vmor %vm1628_vm9, %vm1629_vm11 }
 0x15d   : > { %12057 = vst [vmem:[#allocation77_spill] sm:$0xff] %v8995_v45  ;;  %v9003_v54 = vadd.f32 1e-06, %v1467_v33  ;;  %v761_v48 = vrot.slane %v8891_v59, 7  ;;  %v892_v17 = vrot.slane %v8995_v45, 1  ;;  %v1627_v16 = vmul.f32 %v8902_v30, %v1626_v53 }
 0x15e   : > { %1350 = vadd.xlane.f32.xlu1 %v1291_v58  ;;  %v1404_v18 = vmul.f32 %v8986_v25, %v8986_v25  ;;  %v9017_v14 = vmul.f32 %v8598_v34, %v1188_v32  ;;  %v1372_v21 = vmul.f32 %v1321_v3, %v8598_v34  ;;  %v1978_v27 = vpack.c.bf16 %v1949_v9, %v1948_v41 }
 0x15f   : > { %v1323_v7 = vpop.xlane.xlu0 %1322  ;;  %v12062_v42 = vrot.slane %v8813_v46, 7  ;;  %v12063_v33 = vrot.slane %v8891_v59, 1  ;;  %v1024_v49 = vmul.f32 %v8891_v59, %v8149_v12  ;;  %v1494_v3 = vsub.f32 %v8314_v24, %v8745_v44  ;;  %v1192_v59 = vpop.xlane.xlu2 %1191 }
 0x160   : > { %v1635_v53 = vmul.f32 0.5, %v1634_v39  ;;  %7130 = vrsqrt.f32 %v9000_v57  ;;  %v1645_v9 = vmul.f32 0.5, %v1644_v63  ;;  %v1621_v24 = vsel %vm9009_vm12, %v8886_v35, %v1617_v43 }
 0x161   : > { %v769_v36 = vsel %vm765_vm1, %v12062_v42, %v761_v48  ;;  %v898_v32 = vsel %vm895_vm2, %v12063_v33, %v892_v17  ;;  %v1190_v41 = vpop.xlane.xlu1 %1189  ;;  %7132 = vrsqrt.f32 %v9003_v54  ;;  %v7431_v33 = vld [vmem:[%s8105_s1 + $0x78] sm:$0xff]   ;;  %v1631_v44 = vsel %vm9022_vm13, %v8902_v30, %v1627_v16  ;;  %s9108_s1 = scalar_select %p663_p10, 1, 0 }
 0x162   : > { %v991_v58 = vmul.f32 %v8147_v11, %v769_v36  ;;  %v1089_v42 = vmul.f32 %v8151_v13, %v898_v32  ;;  %v9043_v46 = vunpack.c.l.bf16 %v7431_v33  ;;  %v762_v63 = vrot.slane %v8995_v45, 7 }
 0x163   : > { %v1405_v36 = vmul.f32 %v9017_v14, %v9017_v14  ;;  %v1436_v32 = vsub.f32 %v1372_v21, %v1404_v18  ;;  %v1373_v33 = vmul.f32 %v1323_v7, %v8598_v34  ;;  %v1025_v26 = vmul.f32 %v8995_v45, %v8149_v12  ;;  %s665_s11 = scvt.s32.f32 %s9108_s1  ;;  %v6729_v45 = vld [vmem:[#allocation11 + $0x28] sm:$0xff]  ;;  %s6207_s1 = scalar_lea.sflag [#allocation4], %s8099_s16 }
 0x164   : > { %12064 = vst [vmem:[#allocation78_spill] sm:$0xff] %v9043_v46  ;;  %v1056_v39 = vadd.f32 %v1024_v49, %v991_v58  ;;  %v1495_v35 = vsub.f32 %v8338_v47, %v8784_v22  ;;  %v768_v30 = vsel %vm765_vm1, %v761_v48, %v762_v63  ;;  %v893_v16 = vrot.slane %v9043_v46, 1  ;;  %5756 = vmatpush.bf16.msrb.mxu0 %v6729_v45 }
 0x165   : > { %v1878_v52 = vmul.f32 %v1621_v24, %v1494_v3  ;;  %v1646_v49 = vsub.f32 1.5, %v1645_v9  ;;  %v992_v18 = vmul.f32 %v8147_v11, %v768_v30  ;;  %vm1638_vm14 = vweird.f32 %v8910_v31 }
 0x166   : > { %2212 = vmatmul.bf16.gmra.mxu0 %v1978_v27  ;;  %2301 = vmatmul.bf16.gmra.mxu1 %v1978_v27  ;;  %v1121_v43 = vadd.f32 %v1089_v42, %v1056_v39  ;;  %v9063_v21 = vpop.eup %7130  ;;  %v1879_v7 = vmul.f32 %v1631_v44, %v1495_v35  ;;  %v897_v47 = vsel %vm895_vm2, %v892_v17, %v893_v16  ;;  %vm1639_vm15 = vweird.f32 %v8970_v56 }
 0x167   : > { %2390 = vmatmul.bf16.gmra.mxu2 %v1978_v27  ;;  %2479 = vmatmul.bf16.gmra.mxu3 %v1978_v27  ;;  %v1636_v27 = vsub.f32 1.5, %v1635_v53  ;;  %v9074_v22 = vpop.eup %7132  ;;  %v1468_v48 = vmax.f32 %v1436_v32, 0.0  ;;  %v1437_v3 = vsub.f32 %v1373_v33, %v1405_v36  ;;  %v1057_v53 = vadd.f32 %v1025_v26, %v992_v18  ;;  %v1325_v9 = vpop.xlane.xlu0 %1324  ;;  %vm9098_vm4 = vmor %vm1638_vm14, %vm1639_vm15 }
 0x168   : > { %v9067_v58 = vadd.f32 %v8700_v62, %v1121_v43  ;;  %vm1648_vm0 = vweird.f32 %v8915_v23  ;;  %vm1649_vm3 = vweird.f32 %v8972_v0  ;;  %v1090_v42 = vmul.f32 %v8151_v13, %v897_v47  ;;  %v9092_v32 = vpop.xlane.xlu2 %1193 }
 0x169   : > { %v9084_v24 = vmul.f32 %v8970_v56, %v1636_v27  ;;  %v9087_v44 = vmul.f32 %v8972_v0, %v1646_v49  ;;  %v1653_v39 = vmul.f32 %v9063_v21, %v9000_v57  ;;  %v1914_v36 = vmul.f32 %v8789_v19, %v1878_v52  ;;  %v1327_v43 = vpop.xlane.xlu1 %1326  ;;  %vm9118_vm5 = vmor %vm1648_vm0, %vm1649_vm3 }
 0x16a   : > { %12065 = vst [vmem:[#allocation79_spill] sm:$0xff] %v9067_v58  ;;  %1217 = vadd.xlane.f32.xlu2 %v9067_v58  ;;  %v1292_v17 = vmul.f32 %v9067_v58, %v9067_v58  ;;  %v1663_v26 = vmul.f32 %v9074_v22, %v9003_v54  ;;  %v1122_v35 = vadd.f32 %v1090_v42, %v1057_v53  ;;  %v763_v52 = vrot.slane %v9043_v46, 7 }
 0x16b   : > { %v1915_v30 = vmul.f32 %v8789_v19, %v1879_v7  ;;  %v9122_v18 = vadd.f32 1e-06, %v1468_v48  ;;  %v1469_v7 = vmax.f32 %v1437_v3, 0.0  ;;  %v9125_v47 = vmul.f32 %v8598_v34, %v1190_v41 }
 0x16c   : > { %1352 = vadd.xlane.f32.xlu1 %v1292_v17  ;;  %v9128_v53 = vadd.f32 %v8700_v62, %v1122_v35  ;;  %v767_v23 = vsel %vm765_vm1, %v762_v63, %v763_v52  ;;  %v1641_v17 = vsel %vm9098_vm4, %v8970_v56, %v9084_v24  ;;  %v9138_v48 = vmul.f32 %v8598_v34, %v1192_v59  ;;  %v656_v59 = vld [vmem:[%s515_s2] sm:$0xf]  ;;  %s11436_s2 = scalar_lea.vmem [#allocation13], %s6417_s18 }
 0x16d   : > { %v1951_v42 = vadd.f32 %v8805_v61, %v1915_v30  ;;  %v1950_v3 = vadd.f32 %v8805_v61, %v1914_v36  ;;  %v894_v41 = vrot.slane %v8144_v8, 1  ;;  %v1651_v35 = vsel %vm9118_vm5, %v8972_v0, %v9087_v44  ;;  %s6221_s28 = sshll.u32 %s11436_s2, 4  ;;  %s6222_s28 = int_to_ptr.vmem [resolvable:$true] %s6221_s28 }
 0x16e   : > { %12070 = vst [vmem:[#allocation80_spill] sm:$0xff] %v9128_v53  ;;  %v1664_v30 = vmul.f32 %v9074_v22, %v1663_v26  ;;  %v1654_v63 = vmul.f32 %v9063_v21, %v1653_v39  ;;  %1219 = vadd.xlane.f32.xlu0 %v9128_v53  ;;  %v1293_v56 = vmul.f32 %v9128_v53, %v9128_v53  ;;  %7134 = vrsqrt.f32 %v9122_v18  ;;  %v6753_v53 = vld [vmem:[#allocation11 + $0xe8] sm:$0xff] }
 0x16f   : > { %v9155_v24 = vadd.f32 1e-06, %v1469_v7  ;;  %v1979_v36 = vpack.c.bf16 %v1951_v42, %v1950_v3  ;;  %v993_v33 = vmul.f32 %v8147_v11, %v767_v23  ;;  %v9158_v0 = vpop.xlane.xlu0 %1195  ;;  %v1406_v44 = vmul.f32 %v9125_v47, %v9125_v47  ;;  %6023 = vmatpush.bf16.msrb.mxu3 %v6753_v53 }
 0x170   : > { %v1374_v39 = vmul.f32 %v1325_v9, %v8598_v34  ;;  %v1375_v26 = vmul.f32 %v1327_v43, %v8598_v34  ;;  %v896_v49 = vsel %vm895_vm2, %v893_v16, %v894_v41  ;;  %v1407_v7 = vmul.f32 %v9138_v48, %v9138_v48  ;;  %v6745_v16 = vld [vmem:[#allocation11 + $0xa8] sm:$0xff] }
 0x171   : > { %v1026_v42 = vmul.f32 %v9043_v46, %v8149_v12  ;;  %v1091_v23 = vmul.f32 %v8151_v13, %v896_v49  ;;  %v657_v3 = vunpack.c.l.bf16 %v656_v59  ;;  %v1655_v9 = vmul.f32 0.5, %v1654_v63  ;;  %v9174_v31 = vpop.xlane.xlu1 %1328  ;;  %v9181_v63 = vpop.xlane.xlu2 %1330  ;;  %v6737_v59 = vld [vmem:[#allocation11 + $0x68] sm:$0xff]  ;;  %5934 = vmatpush.bf16.msrb.mxu2 %v6745_v16 }
 0x172   : > { %1354 = vadd.xlane.f32.xlu2 %v1293_v56  ;;  %v1665_v56 = vmul.f32 0.5, %v1664_v30  ;;  %v666_v43 = vstv %s665_s11  ;;  %v700_v27 = vadd.s32 248, %v8134_v1  ;;  %7136 = vrsqrt.f32 %v9155_v24  ;;  %5845 = vmatpush.bf16.msrb.mxu1 %v6737_v59 }
 0x173   : > { %v1058_v58 = vadd.f32 %v1026_v42, %v993_v33  ;;  %v667_v20 = vmul.f32 %v666_v43, %v657_v3  ;;  %v12071_v46 = vrot.slane %v8144_v8, 7  ;;  %v12072_v49 = vrot.slane %v8140_v6, 1 }
 0x174   : > { %vm862_vm6 = vcmp.eq.s32.totalorder %v700_v27, 255  ;;  %v9188_v33 = vpop.eup %7134  ;;  %v1439_v42 = vsub.f32 %v1375_v26, %v1407_v7  ;;  %v12074_v1 = vsub.f32 %v8359_v5, %v8822_v29  ;;  %v1666_v45 = vsub.f32 1.5, %v1665_v56 }
 0x175   : > { %v766_v30 = vsel %vm765_vm1, %v763_v52, %v12071_v46  ;;  %v927_v40 = vsel %vm895_vm2, %v894_v41, %v12072_v49  ;;  %v1123_v3 = vadd.f32 %v1091_v23, %v1058_v58  ;;  %v928_v43 = vperm.slane %v667_v20, 0 }
 0x176   : > { %2217 = vmatmul.bf16.gmra.mxu0 %v1979_v36  ;;  %2306 = vmatmul.bf16.gmra.mxu1 %v1979_v36  ;;  %v994_v28 = vmul.f32 %v8147_v11, %v766_v30  ;;  %v1027_v46 = vmul.f32 %v8144_v8, %v8149_v12  ;;  %v12073_v52 = vsub.f32 %v8365_v15, %v8819_v60  ;;  %vm1658_vm1 = vweird.f32 %v9000_v57 }
 0x177   : > { %2395 = vmatmul.bf16.gmra.mxu2 %v1979_v36  ;;  %2484 = vmatmul.bf16.gmra.mxu3 %v1979_v36  ;;  %v1438_v36 = vsub.f32 %v1374_v39, %v1406_v44  ;;  %v1881_v11 = vmul.f32 %v1651_v35, %v12074_v1  ;;  %v1656_v41 = vsub.f32 1.5, %v1655_v9  ;;  %v9200_v58 = vadd.f32 %v8700_v62, %v1123_v3  ;;  %v9203_v12 = vpop.xlane.xlu0 %1197 }
 0x178   : > { %v1880_v44 = vmul.f32 %v1641_v17, %v12073_v52  ;;  %v960_v20 = vsel %vm862_vm6, %v928_v43, %v927_v40  ;;  %vm1659_vm2 = vweird.f32 %v9063_v21  ;;  %v1059_v15 = vadd.f32 %v1027_v46, %v994_v28  ;;  %v9207_v17 = vpop.eup %7136 }
 0x179   : > { %v1470_v53 = vmax.f32 %v1438_v36, 0.0  ;;  %v1092_v60 = vmul.f32 %v8151_v13, %v960_v20  ;;  %vm1668_vm7 = vweird.f32 %v9003_v54  ;;  %vm1669_vm8 = vweird.f32 %v9074_v22  ;;  %1221 = vadd.xlane.f32.xlu0 %v9200_v58  ;;  %v1200_v35 = vpop.xlane.xlu1 %1199  ;;  %vm9223_vm9 = vmor %vm1658_vm1, %vm1659_vm2  ;;  %v9228_v23 = vpop.xlane.xlu2 %1332 }
 0x17a   : > { %v1471_v5 = vmax.f32 %v1439_v42, 0.0  ;;  %v1294_v29 = vmul.f32 %v9200_v58, %v9200_v58  ;;  %v1673_v40 = vmul.f32 %v9188_v33, %v9122_v18  ;;  %v1916_v28 = vmul.f32 %v8789_v19, %v1880_v44  ;;  %vm9232_vm10 = vmor %vm1668_vm7, %vm1669_vm8 }
 0x17b   : > { %v1124_v27 = vadd.f32 %v1092_v60, %v1059_v15  ;;  %v1667_v13 = vmul.f32 %v9074_v22, %v1666_v45  ;;  %v1657_v39 = vmul.f32 %v9063_v21, %v1656_v41  ;;  %v1917_v7 = vmul.f32 %v8789_v19, %v1881_v11  ;;  %v6728_v15 = vld [vmem:[#allocation11 + $0x20] sm:$0xff] }
 0x17c   : > { %1356 = vadd.xlane.f32.xlu2 %v1294_v29  ;;  %v1683_v9 = vmul.f32 %v9207_v17, %v9155_v24  ;;  %v9238_v16 = vadd.f32 1e-06, %v1470_v53  ;;  %v9242_v57 = vmul.f32 %v8598_v34, %v9092_v32  ;;  %v9247_v59 = vadd.f32 1e-06, %v1471_v5  ;;  %v6744_v53 = vld [vmem:[#allocation11 + $0xa0] sm:$0xff]  ;;  %5757 = vmatpush.bf16.msrb.mxu0 %v6728_v15 }
 0x17d   : > { %v9245_v30 = vadd.f32 %v8700_v62, %v1124_v27  ;;  %v9251_v54 = vmul.f32 %v8598_v34, %v9158_v0  ;;  %v1952_v36 = vadd.f32 %v8805_v61, %v1916_v28  ;;  %v1953_v49 = vadd.f32 %v8805_v61, %v1917_v7  ;;  %v6752_v60 = vld [vmem:[#allocation11 + $0xe0] sm:$0xff]  ;;  %5935 = vmatpush.bf16.msrb.mxu2 %v6744_v53 }
 0x17e   : > { %v1498_v42 = vsub.f32 %v8383_v37, %v8900_v10  ;;  %v1674_v3 = vmul.f32 %v9188_v33, %v1673_v40  ;;  %v1499_v32 = vsub.f32 %v8397_v51, %v8925_v2  ;;  %v1671_v0 = vsel %vm9232_vm10, %v9074_v22, %v1667_v13  ;;  %6024 = vmatpush.bf16.msrb.mxu3 %v6752_v60 }
 0x17f   : > { %1223 = vadd.xlane.f32.xlu1 %v9245_v30  ;;  %v1295_v62 = vmul.f32 %v9245_v30, %v9245_v30  ;;  %v1661_v43 = vsel %vm9223_vm9, %v9063_v21, %v1657_v39  ;;  %v1980_v46 = vpack.c.bf16 %v1953_v49, %v1952_v36  ;;  %v1684_v37 = vmul.f32 %v9207_v17, %v1683_v9  ;;  %v1335_v21 = vpop.xlane.xlu0 %1334 }
 0x180   : > { %7138 = vrsqrt.f32 %v9238_v16  ;;  %v1408_v10 = vmul.f32 %v9242_v57, %v9242_v57  ;;  %v1376_v52 = vmul.f32 %v9174_v31, %v8598_v34  ;;  %v1409_v51 = vmul.f32 %v9251_v54, %v9251_v54 }
 0x181   : > { %7140 = vrsqrt.f32 %v9247_v59  ;;  %1358 = vadd.xlane.f32.xlu0 %v1295_v62  ;;  %v1377_v2 = vmul.f32 %v9181_v63, %v8598_v34  ;;  %v1675_v22 = vmul.f32 0.5, %v1674_v3  ;;  %v1202_v44 = vpop.xlane.xlu1 %1201  ;;  %v1883_v1 = vmul.f32 %v1671_v0, %v1499_v32  ;;  %v1204_v45 = vpop.xlane.xlu2 %1203  ;;  %v6736_v63 = vld [vmem:[#allocation11 + $0x60] sm:$0xff] }
 0x182   : > { %v1882_v11 = vmul.f32 %v1661_v43, %v1498_v42  ;;  %v1685_v31 = vmul.f32 0.5, %v1684_v37  ;;  %v1440_v41 = vsub.f32 %v1376_v52, %v1408_v10  ;;  %v9286_v27 = vmul.f32 %v8598_v34, %v9203_v12  ;;  %5846 = vmatpush.bf16.msrb.mxu1 %v6736_v63 }
 0x183   : > { %v1441_v20 = vsub.f32 %v1377_v2, %v1409_v51  ;;  %v1676_v29 = vsub.f32 1.5, %v1675_v22  ;;  %v1919_v13 = vmul.f32 %v8789_v19, %v1883_v1  ;;  %v9291_v7 = vmul.f32 %v8598_v34, %v1200_v35 }
 0x184   : > { %v1918_v28 = vmul.f32 %v8789_v19, %v1882_v11  ;;  %v1686_v39 = vsub.f32 1.5, %v1685_v31  ;;  %v1472_v26 = vmax.f32 %v1440_v41, 0.0  ;;  %vm1678_vm11 = vweird.f32 %v9122_v18 }
 0x185   : > { %vm1679_vm12 = vweird.f32 %v9188_v33  ;;  %v1473_v56 = vmax.f32 %v1441_v20, 0.0  ;;  %v1677_v36 = vmul.f32 %v9188_v33, %v1676_v29  ;;  %vm1688_vm13 = vweird.f32 %v9155_v24 }
 0x186   : > { %2222 = vmatmul.bf16.gmra.mxu0 %v1980_v46  ;;  %2311 = vmatmul.bf16.gmra.mxu1 %v1980_v46  ;;  %v9280_v5 = vpop.eup %7138  ;;  %vm1689_vm14 = vweird.f32 %v9207_v17  ;;  %v1410_v49 = vmul.f32 %v9286_v27, %v9286_v27  ;;  %v1378_v42 = vmul.f32 %v9228_v23, %v8598_v34  ;;  %v1954_v3 = vadd.f32 %v8805_v61, %v1918_v28  ;;  %vm9310_vm15 = vmor %vm1678_vm11, %vm1679_vm12 }
 0x187   : > { %2400 = vmatmul.bf16.gmra.mxu2 %v1980_v46  ;;  %2489 = vmatmul.bf16.gmra.mxu3 %v1980_v46  ;;  %v9282_v40 = vpop.eup %7140  ;;  %v1693_v12 = vmul.f32 %v9280_v5, %v9238_v16  ;;  %v1337_v9 = vpop.xlane.xlu0 %1336  ;;  %v1955_v62 = vadd.f32 %v8805_v61, %v1919_v13  ;;  %v1687_v0 = vmul.f32 %v9207_v17, %v1686_v39  ;;  %v9315_v43 = vadd.f32 1e-06, %v1472_v26  ;;  %vm9320_vm0 = vmor %vm1688_vm13, %vm1689_vm14 }
 0x188   : > { %v1703_v35 = vmul.f32 %v9282_v40, %v9247_v59  ;;  %v1411_v46 = vmul.f32 %v9291_v7, %v9291_v7  ;;  %v1379_v23 = vmul.f32 %v1335_v21, %v8598_v34  ;;  %v9325_v52 = vadd.f32 1e-06, %v1473_v56 }
 0x189   : > { %v1339_v37 = vpop.xlane.xlu1 %1338  ;;  %v1694_v18 = vmul.f32 %v9280_v5, %v1693_v12  ;;  %v1500_v51 = vsub.f32 %v8437_v55, %v8986_v25  ;;  %v1501_v22 = vsub.f32 %v8443_v4, %v9017_v14  ;;  %v1681_v21 = vsel %vm9310_vm15, %v9188_v33, %v1677_v36 }
 0x18a   : > { %v1704_v2 = vmul.f32 %v9282_v40, %v1703_v35  ;;  %v1442_v1 = vsub.f32 %v1378_v42, %v1410_v49  ;;  %v1981_v11 = vpack.c.bf16 %v1955_v62, %v1954_v3  ;;  %v1691_v31 = vsel %vm9320_vm0, %v9207_v17, %v1687_v0 }
 0x18b   : > { %7142 = vrsqrt.f32 %v9315_v43  ;;  %v1443_v41 = vsub.f32 %v1379_v23, %v1411_v46  ;;  %v9340_v55 = vmul.f32 %v8598_v34, %v1202_v44  ;;  %v1695_v25 = vmul.f32 0.5, %v1694_v18 }
 0x18c   : > { %7144 = vrsqrt.f32 %v9325_v52  ;;  %v1884_v14 = vmul.f32 %v1681_v21, %v1500_v51  ;;  %v1705_v20 = vmul.f32 0.5, %v1704_v2  ;;  %v9344_v33 = vmul.f32 %v8598_v34, %v1204_v45 }
 0x18d   : > { %v1206_v32 = vpop.xlane.xlu2 %1205  ;;  %v1885_v53 = vmul.f32 %v1691_v31, %v1501_v22  ;;  %v1474_v17 = vmax.f32 %v1442_v1, 0.0  ;;  %v1475_v44 = vmax.f32 %v1443_v41, 0.0  ;;  %v1412_v60 = vmul.f32 %v9340_v55, %v9340_v55  ;;  %v12092_v1 = vld [vmem:[#allocation58_spill] sm:$0xff] }
 0x18e   : > { %v9347_v15 = vmul.f32 %v8598_v34, %v1206_v32  ;;  %v1380_v29 = vmul.f32 %v1337_v9, %v8598_v34  ;;  %v1696_v13 = vsub.f32 1.5, %v1695_v25  ;;  %v1706_v26 = vsub.f32 1.5, %v1705_v20 }
 0x18f   : > { %v1413_v12 = vmul.f32 %v9344_v33, %v9344_v33  ;;  %v1381_v56 = vmul.f32 %v1339_v37, %v8598_v34  ;;  %v1920_v36 = vmul.f32 %v8789_v19, %v1884_v14  ;;  %v9363_v49 = vadd.f32 1e-06, %v1474_v17 }
 0x190   : > { %v1921_v9 = vmul.f32 %v8789_v19, %v1885_v53  ;;  %v1414_v42 = vmul.f32 %v9347_v15, %v9347_v15  ;;  %v9369_v62 = vadd.f32 1e-06, %v1475_v44  ;;  %v1444_v32 = vsub.f32 %v1380_v29, %v1412_v60 }
 0x191   : > { %v1341_v28 = vpop.xlane.xlu1 %1340  ;;  %v9355_v45 = vpop.eup %7142  ;;  %vm1698_vm3 = vweird.f32 %v9238_v16  ;;  %vm1699_vm4 = vweird.f32 %v9280_v5  ;;  %vm1708_vm5 = vweird.f32 %v9247_v59  ;;  %v1697_v46 = vmul.f32 %v9280_v5, %v1696_v13 }
 0x192   : > { %v9361_v35 = vpop.eup %7144  ;;  %v1382_v3 = vmul.f32 %v1341_v28, %v8598_v34  ;;  %v1713_v19 = vmul.f32 %v9355_v45, %v9315_v43  ;;  %vm1709_vm6 = vweird.f32 %v9282_v40  ;;  %v1445_v37 = vsub.f32 %v1381_v56, %v1413_v12  ;;  %vm9386_vm1 = vmor %vm1698_vm3, %vm1699_vm4  ;;  %v9434_v12 = vld [vmem:[%s12036_s13] ss:$0 sm:$0xff] }
 0x193   : > { %v1723_v23 = vmul.f32 %v9361_v35, %v9325_v52  ;;  %7146 = vrsqrt.f32 %v9363_v49  ;;  %v1956_v10 = vadd.f32 %v8805_v61, %v1920_v36  ;;  %v1957_v16 = vadd.f32 %v8805_v61, %v1921_v9  ;;  %vm9394_vm2 = vmor %vm1708_vm5, %vm1709_vm6 }
 0x194   : > { %v1446_v18 = vsub.f32 %v1382_v3, %v1414_v42  ;;  %v1707_v2 = vmul.f32 %v9282_v40, %v1706_v26  ;;  %7148 = vrsqrt.f32 %v9369_v62  ;;  %v1476_v22 = vmax.f32 %v1444_v32, 0.0 }
 0x195   : > { %v1502_v61 = vsub.f32 %v8476_v50, %v9125_v47  ;;  %v1477_v31 = vmax.f32 %v1445_v37, 0.0  ;;  %v1503_v41 = vsub.f32 %v8467_v38, %v9138_v48  ;;  %v1724_v25 = vmul.f32 %v9361_v35, %v1723_v23  ;;  %v12089_v37 = vld [vmem:[#allocation56_spill] sm:$0xff] }
 0x196   : > { %2227 = vmatmul.bf16.gmra.mxu0 %v1981_v11  ;;  %2316 = vmatmul.bf16.gmra.mxu1 %v1981_v11  ;;  %v1478_v14 = vmax.f32 %v1446_v18, 0.0  ;;  %v1701_v59 = vsel %vm9386_vm1, %v9280_v5, %v1697_v46  ;;  %v1711_v20 = vsel %vm9394_vm2, %v9282_v40, %v1707_v2  ;;  %v9410_v53 = vadd.f32 1e-06, %v1476_v22 }
 0x197   : > { %2405 = vmatmul.bf16.gmra.mxu2 %v1981_v11  ;;  %2494 = vmatmul.bf16.gmra.mxu3 %v1981_v11  ;;  %v1714_v11 = vmul.f32 %v9355_v45, %v1713_v19  ;;  %v9416_v48 = vadd.f32 1e-06, %v1477_v31  ;;  %v1886_v44 = vmul.f32 %v1701_v59, %v1502_v61  ;;  %v1887_v60 = vmul.f32 %v1711_v20, %v1503_v41 }
 0x198   : > { %v1208_v4 = vpop.xlane.xlu0 %1207  ;;  %v1725_v5 = vmul.f32 0.5, %v1724_v25  ;;  %v9418_v29 = vadd.f32 1e-06, %v1478_v14  ;;  %7150 = vrsqrt.f32 %v9410_v53  ;;  %vm1718_vm7 = vweird.f32 %v9315_v43 }
 0x199   : > { %v9353_v63 = vmul.f32 %v8598_v34, %v1208_v4  ;;  %v1982_v4 = vpack.c.bf16 %v1957_v16, %v1956_v10  ;;  %v9412_v50 = vpop.eup %7146  ;;  %v1715_v47 = vmul.f32 0.5, %v1714_v11  ;;  %vm1719_vm8 = vweird.f32 %v9355_v45 }
 0x19a   : > { %v1343_v39 = vpop.xlane.xlu2 %1342  ;;  %v9414_v38 = vpop.eup %7148  ;;  %v1733_v40 = vmul.f32 %v9412_v50, %v9363_v49  ;;  %7152 = vrsqrt.f32 %v9416_v48  ;;  %v1726_v26 = vsub.f32 1.5, %v1725_v5  ;;  %v1922_v56 = vmul.f32 %v9434_v12, %v1886_v44  ;;  %vm9448_vm11 = vmor %vm1718_vm7, %vm1719_vm8  ;;  %v12094_v44 = vld [vmem:[#allocation61_spill] sm:$0xff] }
 0x19b   : > { %v1415_v24 = vmul.f32 %v9353_v63, %v9353_v63  ;;  %v1383_v0 = vmul.f32 %v1343_v39, %v8598_v34  ;;  %v1716_v13 = vsub.f32 1.5, %v1715_v47  ;;  %v1743_v39 = vmul.f32 %v9414_v38, %v9369_v62 }
 0x19c   : > { %7154 = vrsqrt.f32 %v9418_v29  ;;  %v1923_v36 = vmul.f32 %v9434_v12, %v1887_v60  ;;  %v1734_v9 = vmul.f32 %v9412_v50, %v1733_v40  ;;  %vm1728_vm9 = vweird.f32 %v9325_v52  ;;  %v9456_v52 = vld [vmem:[%s12038_s5] ss:$0 sm:$0xff] }
 0x19d   : > { %v1447_v21 = vsub.f32 %v1383_v0, %v1415_v24  ;;  %vm1729_vm10 = vweird.f32 %v9361_v35  ;;  %v1717_v42 = vmul.f32 %v9355_v45, %v1716_v13  ;;  %v1744_v3 = vmul.f32 %v9414_v38, %v1743_v39  ;;  %v9505_v40 = vld [vmem:[%s12095_s14] sm:$0xf]  ;;  %s6682_s14 = sshll.u32 %s12540_s3, 6  ;;  %s7639_s3 = scalar_lea.hbm %s12543_s8, 512 }
 0x19e   : > { %v9444_v32 = vpop.eup %7150  ;;  %v1727_v0 = vmul.f32 %v9361_v35, %v1726_v26  ;;  %v1958_v19 = vadd.f32 %v9456_v52, %v1922_v56  ;;  %v1959_v46 = vadd.f32 %v9456_v52, %v1923_v36  ;;  %v1504_v43 = vsub.f32 %v12089_v37, %v9242_v57  ;;  %vm9464_vm12 = vmor %vm1728_vm9, %vm1729_vm10  ;;  %v12100_v36 = vld [vmem:[#allocation63_spill] sm:$0xff]  ;;  %s6218_s26 = sadd.s32 %s6682_s14, %s6681_s12 }
 0x19f   : > { %v1479_v17 = vmax.f32 %v1447_v21, 0.0  ;;  %v1735_v16 = vmul.f32 0.5, %v1734_v9  ;;  %v1721_v51 = vsel %vm9448_vm11, %v9355_v45, %v1717_v42  ;;  %v1745_v2 = vmul.f32 0.5, %v1744_v3  ;;  %v12101_v42 = vld [vmem:[#allocation65_spill] sm:$0xff]  ;;  %s6683_s15 = sshll.u32 %s6218_s26, 2 }
 0x1a0   : > { %v9460_v23 = vpop.eup %7152  ;;  %v1753_v22 = vmul.f32 %v9444_v32, %v9410_v53  ;;  %v1505_v57 = vsub.f32 %v12092_v1, %v9251_v54  ;;  %v1731_v11 = vsel %vm9464_vm12, %v9361_v35, %v1727_v0  ;;  %v1983_v31 = vpack.c.bf16 %v1959_v46, %v1958_v19  ;;  %v12093_v35 = vld [vmem:[#allocation60_spill] sm:$0xff]  ;;  %s6220_s7 = scalar_lea.hbm %s12543_s8, %s6683_s15 }
 0x1a1   : > { %v9423_v28 = vadd.f32 1e-06, %v1479_v17  ;;  %v1763_v61 = vmul.f32 %v9460_v23, %v9416_v48  ;;  %v1210_v41 = vpop.xlane.xlu0 %1209  ;;  %v1888_v25 = vmul.f32 %v1721_v51, %v1504_v43  ;;  %v1736_v45 = vsub.f32 1.5, %v1735_v16  ;;  %s6223_s25 = sshll.u32 %s6220_s7, 4  ;;  %s6224_s25 = int_to_ptr.hbm [resolvable:$true] %s6223_s25 }
 0x1a2   : > { %v9468_v18 = vpop.eup %7154  ;;  %v1754_v14 = vmul.f32 %v9444_v32, %v1753_v22  ;;  %v1889_v20 = vmul.f32 %v1731_v11, %v1505_v57  ;;  %vm1738_vm13 = vweird.f32 %v9363_v49  ;;  %vm1739_vm14 = vweird.f32 %v9412_v50  ;;  %s7633_s11 = sshra.s32 %s6224_s25, 4  ;;  %s7634_s11 = int_to_ptr.hbm [resolvable:$true] %s7633_s11 }
 0x1a3   : > { %7156 = vrsqrt.f32 %v9423_v28  ;;  %v1773_v54 = vmul.f32 %v9468_v18, %v9418_v29  ;;  %v1506_v17 = vsub.f32 %v12093_v35, %v9286_v27  ;;  %vm1748_vm15 = vweird.f32 %v9369_v62  ;;  %vm9508_vm3 = vmor %vm1738_vm13, %vm1739_vm14  ;;  %v1345_v57 = vpop.xlane.xlu2 %1344  ;;  %s7635_s21 = scalar_lea.hbm %s7634_s11, 128  ;;  %p7640_p2 = scmp.lt.s32.totalorder %s7634_s11, %s12543_s8 }
 0x1a4   : > { %vm1749_vm0 = vweird.f32 %v9414_v38  ;;  %v1764_v47 = vmul.f32 %v9460_v23, %v1763_v61  ;;  %v1507_v60 = vsub.f32 %v12094_v44, %v9291_v7  ;;  %v1737_v5 = vmul.f32 %v9412_v50, %v1736_v45  ;;  %p7636_p0 = scmp.ne.s32.totalorder %s7634_s11, %s7635_s21  ;;  %p7641_p8 = scmp.lt.s32.totalorder %s7639_s3, %s7635_s21 }
 0x1a5   : > { %v9500_v49 = vmul.f32 %v8598_v34, %v1210_v41  ;;  %v1924_v27 = vmul.f32 %v9434_v12, %v1888_v25  ;;  %v1755_v39 = vmul.f32 0.5, %v1754_v14  ;;  %v1774_v26 = vmul.f32 %v9468_v18, %v1773_v54  ;;  %vm9515_vm4 = vmor %vm1748_vm15, %vm1749_vm0 }
 0x1a6   : > { %2232 = vmatmul.bf16.gmra.mxu0 %v1982_v4  ;;  %2321 = vmatmul.bf16.gmra.mxu1 %v1982_v4  ;;  %v1508_v9 = vsub.f32 %v12100_v36, %v9340_v55  ;;  %v1509_v3 = vsub.f32 %v12101_v42, %v9344_v33  ;;  %vm1758_vm5 = vweird.f32 %v9410_v53  ;;  %v1925_v24 = vmul.f32 %v9434_v12, %v1889_v20  ;;  %p7637_p3 = pnand %p7636_p0, %p8045_p6  ;;  %p7642_p5 = por %p7641_p8, %p7640_p2 }
 0x1a7   : > { %2410 = vmatmul.bf16.gmra.mxu2 %v1982_v4  ;;  %2499 = vmatmul.bf16.gmra.mxu3 %v1982_v4  ;;  %v1746_v4 = vsub.f32 1.5, %v1745_v2  ;;  %vm1759_vm6 = vweird.f32 %v9444_v32  ;;  %v1765_v0 = vmul.f32 0.5, %v1764_v47  ;;  %vm1768_vm1 = vweird.f32 %v9416_v48 }
 0x1a8   : > { %v9528_v19 = vperm.slane %v9505_v40, 0  ;;  %v1741_v37 = vsel %vm9508_vm3, %v9412_v50, %v1737_v5  ;;  %v1416_v43 = vmul.f32 %v9500_v49, %v9500_v49  ;;  %v1960_v16 = vadd.f32 %v9456_v52, %v1924_v27  ;;  %vm9559_vm10 = vmor %vm1758_vm5, %vm1759_vm6  ;;  %p7638_p9 = pneg %p7637_p3 }
 0x1a9   : > { %v9475_v21 = vpop.eup %7156  ;;  %v1747_v13 = vmul.f32 %v9414_v38, %v1746_v4  ;;  %v1756_v2 = vsub.f32 1.5, %v1755_v39  ;;  %v1775_v1 = vmul.f32 0.5, %v1774_v26  ;;  %v1384_v61 = vmul.f32 %v1345_v57, %v8598_v34 }
 0x1aa   : > { %v1783_v59 = vmul.f32 %v9475_v21, %v9423_v28  ;;  %v1961_v41 = vadd.f32 %v9456_v52, %v1925_v24  ;;  %v1890_v25 = vmul.f32 %v1741_v37, %v1506_v17  ;;  %v1766_v45 = vsub.f32 1.5, %v1765_v0  ;;  %v12106_v0 = vld [vmem:[#allocation66_spill] sm:$0xff]  ;;  %p7643_p1 = pnand %p7642_p5, %p7638_p9 }
 0x1ab   : > { %v1212_v46 = vpop.xlane.xlu1 %1211  ;;  %v1751_v51 = vsel %vm9515_vm4, %v9414_v38, %v1747_v13  ;;  %vm1769_vm2 = vweird.f32 %v9460_v23  ;;  %v9549_v38 = vperm.slane %v9505_v40, 1  ;;  %vm1778_vm7 = vweird.f32 %v9418_v29 }
 0x1ac   : > { %v1784_v7 = vmul.f32 %v9475_v21, %v1783_v59  ;;  %v9536_v10 = vmul.f32 %v8598_v34, %v1212_v46  ;;  %v1891_v4 = vmul.f32 %v1751_v51, %v1507_v60  ;;  %v1448_v14 = vsub.f32 %v1384_v61, %v1416_v43  ;;  %vm9571_vm12 = vmor %vm1768_vm1, %vm1769_vm2  ;;  %v12109_v51 = vld [vmem:[#allocation69_spill] sm:$0xff]  ;;  %v6727_v61 = vld [vmem:[#allocation11 + $0x18] sm:$0xff] }
 0x1ad   : > { %v1757_v54 = vmul.f32 %v9444_v32, %v1756_v2  ;;  %vm1788_vm8 = vweird.f32 %v9423_v28  ;;  %v1776_v35 = vsub.f32 1.5, %v1775_v1  ;;  %vm1779_vm9 = vweird.f32 %v9468_v18  ;;  %5758 = vmatpush.bf16.msrb.mxu0 %v6727_v61 }
 0x1ae   : > { %v1785_v22 = vmul.f32 0.5, %v1784_v7  ;;  %v1417_v50 = vmul.f32 %v9536_v10, %v9536_v10  ;;  %v1480_v44 = vmax.f32 %v1448_v14, 0.0  ;;  %v1984_v27 = vpack.c.bf16 %v1961_v41, %v1960_v16  ;;  %vm9589_vm13 = vmor %vm1778_vm7, %vm1779_vm9 }
 0x1af   : > { %v1767_v62 = vmul.f32 %v9460_v23, %v1766_v45  ;;  %vm1789_vm11 = vweird.f32 %v9475_v21  ;;  %v1926_v56 = vmul.f32 %v9434_v12, %v1890_v25  ;;  %v1927_v24 = vmul.f32 %v9434_v12, %v1891_v4 }
 0x1b0   : > { %v1786_v20 = vsub.f32 1.5, %v1785_v22  ;;  %v9575_v53 = vadd.f32 1e-06, %v1480_v44  ;;  %v1510_v46 = vsub.f32 %v12106_v0, %v9347_v15  ;;  %v1777_v43 = vmul.f32 %v9468_v18, %v1776_v35  ;;  %vm9599_vm14 = vmor %vm1788_vm8, %vm1789_vm11 }
 0x1b1   : > { %v1347_v11 = vpop.xlane.xlu0 %1346  ;;  %v1511_v2 = vsub.f32 %v12109_v51, %v9353_v63  ;;  %v9605_v29 = vperm.slane %v9505_v40, 2  ;;  %v9608_v22 = vperm.slane %v9505_v40, 3  ;;  %v1761_v63 = vsel %vm9559_vm10, %v9444_v32, %v1757_v54  ;;  %v6743_v40 = vld [vmem:[#allocation11 + $0x98] sm:$0xff] }
 0x1b2   : > { %v1787_v37 = vmul.f32 %v9475_v21, %v1786_v20  ;;  %7158 = vrsqrt.f32 %v9575_v53  ;;  %v1771_v57 = vsel %vm9571_vm12, %v9460_v23, %v1767_v62  ;;  %v1962_v41 = vadd.f32 %v9456_v52, %v1926_v56  ;;  %5936 = vmatpush.bf16.msrb.mxu2 %v6743_v40 }
 0x1b3   : > { %v1963_v32 = vadd.f32 %v9456_v52, %v1927_v24  ;;  %v1781_v45 = vsel %vm9589_vm13, %v9468_v18, %v1777_v43  ;;  %v9638_v54 = vmul.f32 %v1761_v63, %v1508_v9  ;;  %vm1798_vm15 = vweird.f32 %v9575_v53  ;;  %v6735_v43 = vld [vmem:[#allocation11 + $0x58] sm:$0xff] }
 0x1b4   : > { %v1791_v25 = vsel %vm9599_vm14, %v9475_v21, %v1787_v37  ;;  %5847 = vmatpush.bf16.msrb.mxu1 %v6735_v43 }
 0x1b5   : > { %v9651_v9 = vmul.f32 %v1791_v25, %v1511_v2  ;;  %v1985_v60 = vpack.c.bf16 %v1963_v32, %v1962_v41 }
 0x1b6   : > { %2237 = vmatmul.bf16.gmra.mxu0 %v1983_v31  ;;  %2326 = vmatmul.bf16.gmra.mxu1 %v1983_v31 }
 0x1b7   : > { %2415 = vmatmul.bf16.gmra.mxu2 %v1983_v31  ;;  %2504 = vmatmul.bf16.gmra.mxu3 %v1983_v31  ;;  %v1385_v31 = vmul.f32 %v1347_v11, %v8598_v34  ;;  %v12113_v11 = vld [vmem:[#allocation71_spill] sm:$0xff] }
 0x1b8   : > { %v9649_v36 = vpop.eup %7158 }
 0x1b9   : > { %v1449_v59 = vsub.f32 %v1385_v31, %v1417_v50  ;;  %v1512_v50 = vsub.f32 %v12113_v11, %v9500_v49  ;;  %v6751_v31 = vld [vmem:[#allocation11 + $0xd8] sm:$0xff]  ;;  %v1793_v42 = vmul.f32 %v9649_v36, %v9575_v53  ;;  %vm1799_vm0 = vweird.f32 %v9649_v36 }
 0x1ba   : > { %6025 = vmatpush.bf16.msrb.mxu3 %v6751_v31  ;;  %vm9697_vm3 = vmor %vm1798_vm15, %vm1799_vm0 }
 0x1bb   : > { %v1481_v5 = vmax.f32 %v1449_v59, 0.0  ;;  %v1794_v37 = vmul.f32 %v9649_v36, %v1793_v42 }
 0x1bd   : > { %v9577_v26 = vadd.f32 1e-06, %v1481_v5  ;;  %v9653_v5 = vmul.f32 %v1781_v45, %v1510_v46  ;;  %v1795_v63 = vmul.f32 0.5, %v1794_v37 }
 0x1bf   : > { %7160 = vrsqrt.f32 %v9577_v26  ;;  %vm1808_vm4 = vweird.f32 %v9577_v26 }
 0x1c3   : > { %v2203_v17 = vpop.f32.mrf.mxu0  ;;  %v2292_v47 = vpop.f32.mrf.mxu1 }
 0x1c4   : > { %v2204_v13 = vadd.f32 %v2203_v17, %v9528_v19  ;;  %v2293_v39 = vadd.f32 %v2292_v47, %v9549_v38  ;;  %v9645_v17 = vmul.f32 %v1771_v57, %v1509_v3 }
 0x1c5   : > { %v9655_v62 = vpop.eup %7160  ;;  %v1214_v3 = vpop.xlane.xlu1 %1213 }
 0x1c6   : > { %v2550_v16 = vpack.c.bf16 %v2293_v39, %v2204_v13  ;;  %2242 = vmatmul.bf16.gmra.mxu0 %v1984_v27  ;;  %2331 = vmatmul.bf16.gmra.mxu1 %v1984_v27  ;;  %v1803_v39 = vmul.f32 %v9655_v62, %v9577_v26  ;;  %v9667_v24 = vmul.f32 %v8598_v34, %v1214_v3  ;;  %vm1809_vm5 = vweird.f32 %v9655_v62 }
 0x1c7   : > { %2420 = vmatmul.bf16.gmra.mxu2 %v1984_v27  ;;  %2509 = vmatmul.bf16.gmra.mxu3 %v1984_v27  ;;  %vm9725_vm6 = vmor %vm1808_vm4, %vm1809_vm5 }
 0x1c8   : > { %v9613_v1 = vunpack.c.l.bf16 %v2550_v16  ;;  %v9615_v28 = vunpack.c.h.bf16 %v2550_v16  ;;  %v1804_v16 = vmul.f32 %v9655_v62, %v1803_v39 }
 0x1ca   : > { %12112 = vst [vmem:[#allocation56_spill] sm:$0xff] %v9615_v28  ;;  %v2742_v23 = vmul.f32 %v9613_v1, %v9613_v1  ;;  %v2743_v4 = vmul.f32 %v9615_v28, %v9615_v28  ;;  %v2381_v14 = vpop.f32.mrf.mxu2  ;;  %v2470_v59 = vpop.f32.mrf.mxu3  ;;  %v1805_v41 = vmul.f32 0.5, %v1804_v16  ;;  %v12121_v16 = vld [vmem:[#allocation75_spill] sm:$0xff] }
 0x1cb   : > { %v2382_v21 = vadd.f32 %v2381_v14, %v9605_v29  ;;  %v2471_v20 = vadd.f32 %v2470_v59, %v9608_v22  ;;  %v2205_v18 = vpop.f32.mrf.mxu0  ;;  %v2294_v35 = vpop.f32.mrf.mxu1  ;;  %v1796_v14 = vsub.f32 1.5, %v1795_v63 }
 0x1cc   : > { %v2870_v47 = vpack.c.bf16 %v2743_v4, %v2742_v23  ;;  %v2206_v44 = vadd.f32 %v2205_v18, %v9528_v19  ;;  %v2295_v55 = vadd.f32 %v2294_v35, %v9549_v38 }
 0x1cd   : > { %v2551_v27 = vpack.c.bf16 %v2471_v20, %v2382_v21  ;;  %v1806_v21 = vsub.f32 1.5, %v1805_v41 }
 0x1ce   : > { %v2934_v13 = vunpack.c.l.bf16 %v2870_v47  ;;  %v2935_v33 = vunpack.c.h.bf16 %v2870_v47  ;;  %v2552_v48 = vpack.c.bf16 %v2295_v55, %v2206_v44  ;;  %v12118_v55 = vld [vmem:[#allocation72_spill] sm:$0xff] }
 0x1cf   : > { %v9662_v7 = vunpack.c.l.bf16 %v2551_v27  ;;  %v9664_v56 = vunpack.c.h.bf16 %v2551_v27  ;;  %v1513_v27 = vsub.f32 %v12118_v55, %v9536_v10  ;;  %v1807_v37 = vmul.f32 %v9655_v62, %v1806_v21 }
 0x1d0   : > { %v3062_v0 = vmul.f32 %v2934_v13, %v9613_v1  ;;  %v3063_v46 = vmul.f32 %v2935_v33, %v9615_v28  ;;  %v9678_v57 = vunpack.c.l.bf16 %v2552_v48  ;;  %v9680_v40 = vunpack.c.h.bf16 %v2552_v48 }
 0x1d1   : > { %12114 = vst [vmem:[#allocation58_spill] sm:$0xff] %v9662_v7  ;;  %v2744_v51 = vmul.f32 %v9662_v7, %v9662_v7  ;;  %v2745_v2 = vmul.f32 %v9664_v56, %v9664_v56  ;;  %v9691_v13 = vmul.f32 %v9649_v36, %v1796_v14  ;;  %v1351_v55 = vpop.xlane.xlu1 %1350 }
 0x1d2   : > { %12115 = vst [vmem:[#allocation60_spill] sm:$0xff] %v9664_v56  ;;  %v3190_v15 = vpack.c.bf16 %v3063_v46, %v3062_v0  ;;  %v2383_v61 = vpop.f32.mrf.mxu2  ;;  %v2472_v31 = vpop.f32.mrf.mxu3  ;;  %v2746_v59 = vmul.f32 %v9678_v57, %v9678_v57  ;;  %v2747_v35 = vmul.f32 %v9680_v40, %v9680_v40  ;;  %v9707_v46 = vmul.f32 %v9667_v24, %v9667_v24 }
 0x1d3   : > { %12116 = vst [vmem:[#allocation61_spill] sm:$0xff] %v9678_v57  ;;  %v2871_v32 = vpack.c.bf16 %v2745_v2, %v2744_v51  ;;  %v2384_v25 = vadd.f32 %v2383_v61, %v9605_v29  ;;  %v2473_v45 = vadd.f32 %v2472_v31, %v9608_v22  ;;  %v1801_v63 = vsel %vm9697_vm3, %v9649_v36, %v9691_v13  ;;  %v1216_v31 = vpop.xlane.xlu2 %1215  ;;  %v2297_v21 = vpop.f32.mrf.mxu1 }
 0x1d4   : > { %12117 = vst [vmem:[#allocation63_spill] sm:$0xff] %v9680_v40  ;;  %v3254_v23 = vunpack.c.l.bf16 %v3190_v15  ;;  %v3255_v4 = vunpack.c.h.bf16 %v3190_v15  ;;  %v2872_v39 = vpack.c.bf16 %v2747_v35, %v2746_v59 }
 0x1d5   : > { %v2936_v20 = vunpack.c.l.bf16 %v2871_v32  ;;  %v2937_v18 = vunpack.c.h.bf16 %v2871_v32  ;;  %v2553_v53 = vpack.c.bf16 %v2473_v45, %v2384_v25 }
 0x1d6   : > { %v3382_v47 = vmul.f32 0.044677734, %v3254_v23  ;;  %v3383_v44 = vmul.f32 0.044677734, %v3255_v4  ;;  %2247 = vmatmul.bf16.gmra.mxu0 %v1985_v60  ;;  %2336 = vmatmul.bf16.gmra.mxu1 %v1985_v60  ;;  %v2938_v48 = vunpack.c.l.bf16 %v2872_v39  ;;  %v2939_v61 = vunpack.c.h.bf16 %v2872_v39  ;;  %v2208_v23 = vpop.f32.mrf.mxu0 }
 0x1d7   : > { %v3064_v42 = vmul.f32 %v2936_v20, %v9662_v7  ;;  %v3065_v3 = vmul.f32 %v2937_v18, %v9664_v56  ;;  %2425 = vmatmul.bf16.gmra.mxu2 %v1985_v60  ;;  %2514 = vmatmul.bf16.gmra.mxu3 %v1985_v60  ;;  %v9717_v45 = vunpack.c.l.bf16 %v2553_v53  ;;  %v9730_v59 = vunpack.c.h.bf16 %v2553_v53  ;;  %v1349_v20 = vpop.xlane.xlu0 %1348 }
 0x1d8   : > { %v3510_v0 = vpack.c.bf16 %v3383_v44, %v3382_v47  ;;  %v3066_v25 = vmul.f32 %v2938_v48, %v9678_v57  ;;  %v3067_v36 = vmul.f32 %v2939_v61, %v9680_v40  ;;  %v9735_v44 = vmul.f32 %v8598_v34, %v1216_v31 }
 0x1d9   : > { %v3191_v43 = vpack.c.bf16 %v3065_v3, %v3064_v42  ;;  %12122 = vst [vmem:[#allocation65_spill] sm:$0xff] %v9717_v45  ;;  %v2748_v47 = vmul.f32 %v9717_v45, %v9717_v45  ;;  %v2749_v33 = vmul.f32 %v9730_v59, %v9730_v59  ;;  %v2209_v42 = vadd.f32 %v2208_v23, %v9528_v19 }
 0x1da   : > { %v3574_v2 = vunpack.c.l.bf16 %v3510_v0  ;;  %v3575_v15 = vunpack.c.h.bf16 %v3510_v0  ;;  %12125 = vst [vmem:[#allocation66_spill] sm:$0xff] %v9730_v59  ;;  %v3192_v26 = vpack.c.bf16 %v3067_v36, %v3066_v25  ;;  %v1811_v3 = vsel %vm9725_vm6, %v9655_v62, %v1807_v37 }
 0x1db   : > { %v3256_v41 = vunpack.c.l.bf16 %v3191_v43  ;;  %v3257_v32 = vunpack.c.h.bf16 %v3191_v43  ;;  %v2298_v0 = vadd.f32 %v2297_v21, %v9549_v38  ;;  %v1386_v53 = vmul.f32 %v1349_v20, %v8598_v34 }
 0x1dc   : > { %v3702_v4 = vadd.f32 %v3574_v2, %v9613_v1  ;;  %v3703_v60 = vadd.f32 %v3575_v15, %v9615_v28  ;;  %v3258_v2 = vunpack.c.l.bf16 %v3192_v26  ;;  %v3259_v15 = vunpack.c.h.bf16 %v3192_v26 }
 0x1dd   : > { %v3384_v18 = vmul.f32 0.044677734, %v3256_v41  ;;  %v3385_v35 = vmul.f32 0.044677734, %v3257_v32  ;;  %v2873_v41 = vpack.c.bf16 %v2749_v33, %v2748_v47  ;;  %v2554_v32 = vpack.c.bf16 %v2298_v0, %v2209_v42 }
 0x1de   : > { %v3830_v13 = vpack.c.bf16 %v3703_v60, %v3702_v4  ;;  %v3386_v23 = vmul.f32 0.044677734, %v3258_v2  ;;  %v3387_v60 = vmul.f32 0.044677734, %v3259_v15  ;;  %v9750_v21 = vmul.f32 %v1801_v63, %v1512_v50 }
 0x1df   : > { %v3511_v39 = vpack.c.bf16 %v3385_v35, %v3384_v18  ;;  %v2940_v37 = vunpack.c.l.bf16 %v2873_v41  ;;  %v2941_v36 = vunpack.c.h.bf16 %v2873_v41  ;;  %v9752_v18 = vunpack.c.l.bf16 %v2554_v32 }
 0x1e0   : > { %v3894_v43 = vunpack.c.l.bf16 %v3830_v13  ;;  %v3895_v48 = vunpack.c.h.bf16 %v3830_v13  ;;  %v3512_v20 = vpack.c.bf16 %v3387_v60, %v3386_v23  ;;  %v9754_v35 = vunpack.c.h.bf16 %v2554_v32  ;;  %v12128_v23 = vld [vmem:[#allocation76_spill] sm:$0xff] }
 0x1e1   : > { %v3576_v61 = vunpack.c.l.bf16 %v3511_v39  ;;  %v3577_v31 = vunpack.c.h.bf16 %v3511_v39  ;;  %12126 = vst [vmem:[#allocation69_spill] sm:$0xff] %v9752_v18  ;;  %v3068_v26 = vmul.f32 %v2940_v37, %v9717_v45  ;;  %v3069_v33 = vmul.f32 %v2941_v36, %v9730_v59 }
 0x1e2   : > { %v4022_v25 = vmul.f32 0.796875, %v3894_v43  ;;  %v4023_v4 = vmul.f32 0.796875, %v3895_v48  ;;  %12127 = vst [vmem:[#allocation71_spill] sm:$0xff] %v9754_v35  ;;  %v9761_v42 = vmul.f32 %v1811_v3, %v1513_v27  ;;  %v3578_v39 = vunpack.c.l.bf16 %v3512_v20 }
 0x1e3   : > { %v3704_v14 = vadd.f32 %v3576_v61, %v9662_v7  ;;  %v3705_v62 = vadd.f32 %v3577_v31, %v9664_v56  ;;  %v3579_v49 = vunpack.c.h.bf16 %v3512_v20  ;;  %v1450_v11 = vsub.f32 %v1386_v53, %v9707_v46 }
 0x1e4   : > { %v4150_v47 = vpack.c.bf16 %v4023_v4, %v4022_v25  ;;  %v3193_v0 = vpack.c.bf16 %v3069_v33, %v3068_v26  ;;  %v2750_v43 = vmul.f32 %v9752_v18, %v9752_v18  ;;  %v3706_v48 = vadd.f32 %v3578_v39, %v9678_v57 }
 0x1e5   : > { %v3831_v13 = vpack.c.bf16 %v3705_v62, %v3704_v14  ;;  %v3707_v2 = vadd.f32 %v3579_v49, %v9680_v40  ;;  %v1419_v15 = vmul.f32 %v9735_v44, %v9735_v44  ;;  %v2751_v10 = vmul.f32 %v9754_v35, %v9754_v35 }
 0x1e6   : > { %v4214_v27 = vunpack.c.l.bf16 %v4150_v47  ;;  %v3260_v53 = vunpack.c.l.bf16 %v3193_v0  ;;  %v3261_v31 = vunpack.c.h.bf16 %v3193_v0  ;;  %v1482_v32 = vmax.f32 %v1450_v11, 0.0  ;;  %v2475_v0 = vpop.f32.mrf.mxu3 }
 0x1e7   : > { %v3896_v50 = vunpack.c.l.bf16 %v3831_v13  ;;  %v3897_v63 = vunpack.c.h.bf16 %v3831_v13  ;;  %v3832_v61 = vpack.c.bf16 %v3707_v2, %v3706_v48  ;;  %v2874_v41 = vpack.c.bf16 %v2751_v10, %v2750_v43  ;;  %v2386_v13 = vpop.f32.mrf.mxu2 }
 0x1e8   : > { %v3388_v4 = vmul.f32 0.044677734, %v3260_v53  ;;  %v1387_v14 = vmul.f32 %v1351_v55, %v8598_v34  ;;  %v3389_v36 = vmul.f32 0.044677734, %v3261_v31  ;;  %v4215_v26 = vunpack.c.h.bf16 %v4150_v47  ;;  %v2210_v31 = vpop.f32.mrf.mxu0 }
 0x1e9   : > { %v4024_v3 = vmul.f32 0.796875, %v3896_v50  ;;  %v4025_v46 = vmul.f32 0.796875, %v3897_v63  ;;  %v3898_v62 = vunpack.c.l.bf16 %v3832_v61  ;;  %v3899_v37 = vunpack.c.h.bf16 %v3832_v61 }
 0x1ea   : > { %v2942_v20 = vunpack.c.l.bf16 %v2874_v41  ;;  %7162 = vtanh.f32 %v4214_v27  ;;  %v2943_v33 = vunpack.c.h.bf16 %v2874_v41  ;;  %v9775_v39 = vadd.f32 1e-06, %v1482_v32  ;;  %v2299_v41 = vpop.f32.mrf.mxu1 }
 0x1eb   : > { %v4151_v25 = vpack.c.bf16 %v4025_v46, %v4024_v3  ;;  %v4026_v49 = vmul.f32 0.796875, %v3898_v62  ;;  %v4027_v50 = vmul.f32 0.796875, %v3899_v37  ;;  %v3513_v11 = vpack.c.bf16 %v3389_v36, %v3388_v4 }
 0x1ec   : > { %v3070_v63 = vmul.f32 %v2942_v20, %v9752_v18  ;;  %v3071_v48 = vmul.f32 %v2943_v33, %v9754_v35  ;;  %v1451_v2 = vsub.f32 %v1387_v14, %v1419_v15  ;;  %v2387_v10 = vadd.f32 %v2386_v13, %v9605_v29 }
 0x1ed   : > { %v4216_v43 = vunpack.c.l.bf16 %v4151_v25  ;;  %v4217_v55 = vunpack.c.h.bf16 %v4151_v25  ;;  %v4152_v3 = vpack.c.bf16 %v4027_v50, %v4026_v49  ;;  %v3580_v46 = vunpack.c.l.bf16 %v3513_v11 }
 0x1ee   : > { %v3581_v47 = vunpack.c.h.bf16 %v3513_v11  ;;  %v3194_v27 = vpack.c.bf16 %v3071_v48, %v3070_v63  ;;  %7164 = vrsqrt.f32 %v9775_v39  ;;  %v1483_v53 = vmax.f32 %v1451_v2, 0.0 }
 0x1ef   : > { %v2476_v61 = vadd.f32 %v2475_v0, %v9608_v22  ;;  %7166 = vtanh.f32 %v4215_v26  ;;  %v4218_v32 = vunpack.c.l.bf16 %v4152_v3  ;;  %v3708_v4 = vadd.f32 %v3580_v46, %v9717_v45  ;;  %v1218_v46 = vpop.xlane.xlu2 %1217 }
 0x1f0   : > { %v3709_v15 = vadd.f32 %v3581_v47, %v9730_v59  ;;  %v9784_v14 = vpop.eup %7162  ;;  %v3262_v25 = vunpack.c.l.bf16 %v3194_v27  ;;  %v3263_v62 = vunpack.c.h.bf16 %v3194_v27  ;;  %v9786_v37 = vadd.f32 1e-06, %v1483_v53 }
 0x1f1   : > { %v2555_v36 = vpack.c.bf16 %v2476_v61, %v2387_v10  ;;  %7168 = vtanh.f32 %v4216_v43  ;;  %v2211_v13 = vadd.f32 %v2210_v31, %v9528_v19  ;;  %v2300_v33 = vadd.f32 %v2299_v41, %v9549_v38 }
 0x1f2   : > { %v3833_v20 = vpack.c.bf16 %v3709_v15, %v3708_v4  ;;  %7170 = vtanh.f32 %v4217_v55  ;;  %v4219_v26 = vunpack.c.h.bf16 %v4152_v3  ;;  %v3390_v49 = vmul.f32 0.044677734, %v3262_v25 }
 0x1f3   : > { %v3391_v50 = vmul.f32 0.044677734, %v3263_v62  ;;  %vm1818_vm1 = vweird.f32 %v9775_v39  ;;  %7172 = vrsqrt.f32 %v9786_v37  ;;  %v9792_v0 = vunpack.c.l.bf16 %v2555_v36 }
 0x1f4   : > { %v3900_v11 = vunpack.c.l.bf16 %v3833_v20  ;;  %v3901_v63 = vunpack.c.h.bf16 %v3833_v20  ;;  %v9794_v48 = vpop.eup %7164  ;;  %7174 = vtanh.f32 %v4218_v32  ;;  %v9796_v2 = vunpack.c.h.bf16 %v2555_v36 }
 0x1f5   : > { %12129 = vst [vmem:[#allocation72_spill] sm:$0xff] %v9792_v0  ;;  %v3514_v43 = vpack.c.bf16 %v3391_v50, %v3390_v49  ;;  %v2556_v10 = vpack.c.bf16 %v2300_v33, %v2211_v13  ;;  %v9798_v55 = vpop.eup %7166  ;;  %v1813_v27 = vmul.f32 %v9794_v48, %v9775_v39  ;;  %v9803_v53 = vmul.f32 %v8598_v34, %v1218_v46 }
 0x1f6   : > { %12130 = vst [vmem:[#allocation75_spill] sm:$0xff] %v9796_v2  ;;  %v4028_v3 = vmul.f32 0.796875, %v3900_v11  ;;  %v4029_v47 = vmul.f32 0.796875, %v3901_v63  ;;  %v2752_v41 = vmul.f32 %v9792_v0, %v9792_v0  ;;  %v2753_v32 = vmul.f32 %v9796_v2, %v9796_v2 }
 0x1f7   : > { %v3582_v61 = vunpack.c.l.bf16 %v3514_v43  ;;  %v3583_v31 = vunpack.c.h.bf16 %v3514_v43  ;;  %v9809_v4 = vpop.eup %7168  ;;  %v1814_v25 = vmul.f32 %v9794_v48, %v1813_v27  ;;  %v9812_v62 = vunpack.c.l.bf16 %v2556_v10 }
 0x1f8   : > { %v4153_v15 = vpack.c.bf16 %v4029_v47, %v4028_v3  ;;  %v9814_v36 = vunpack.c.h.bf16 %v2556_v10  ;;  %v9816_v20 = vpop.eup %7170  ;;  %7176 = vtanh.f32 %v4219_v26  ;;  %v2875_v49 = vpack.c.bf16 %v2753_v32, %v2752_v41 }
 0x1f9   : > { %12131 = vst [vmem:[#allocation76_spill] sm:$0xff] %v9812_v62  ;;  %v3710_v13 = vadd.f32 %v3582_v61, %v9752_v18  ;;  %v3711_v33 = vadd.f32 %v3583_v31, %v9754_v35  ;;  %v9820_v50 = vpop.eup %7172  ;;  %v1815_v11 = vmul.f32 0.5, %v1814_v25  ;;  %vm1819_vm2 = vweird.f32 %v9794_v48  ;;  %v2477_v18 = vpop.f32.mrf.mxu3 }
 0x1fa   : > { %12132 = vst [vmem:[#allocation81_spill] sm:$0xff] %v9814_v36  ;;  %vm1828_vm7 = vweird.f32 %v9786_v37  ;;  %v2754_v63 = vmul.f32 %v9812_v62, %v9812_v62  ;;  %v9826_v43 = vpop.eup %7174  ;;  %v1823_v26 = vmul.f32 %v9820_v50, %v9786_v37  ;;  %v2944_v46 = vunpack.c.l.bf16 %v2875_v49  ;;  %vm9842_vm8 = vmor %vm1818_vm1, %vm1819_vm2  ;;  %v12138_v37 = vld [vmem:[#allocation79_spill] sm:$0xff] }
 0x1fb   : > { %v3834_v10 = vpack.c.bf16 %v3711_v33, %v3710_v13  ;;  %v9832_v3 = vmul.f32 %v9803_v53, %v9803_v53  ;;  %v4220_v47 = vunpack.c.l.bf16 %v4153_v15  ;;  %v1816_v27 = vsub.f32 1.5, %v1815_v11 }
 0x1fc   : > { %v2945_v61 = vunpack.c.h.bf16 %v2875_v49  ;;  %v2755_v31 = vmul.f32 %v9814_v36, %v9814_v36  ;;  %v4221_v41 = vunpack.c.h.bf16 %v4153_v15  ;;  %v1824_v60 = vmul.f32 %v9820_v50, %v1823_v26  ;;  %v2388_v15 = vpop.f32.mrf.mxu2 }
 0x1fd   : > { %v3902_v32 = vunpack.c.l.bf16 %v3834_v10  ;;  %v3903_v25 = vunpack.c.h.bf16 %v3834_v10  ;;  %v1817_v13 = vmul.f32 %v9794_v48, %v1816_v27  ;;  %v3072_v49 = vmul.f32 %v2944_v46, %v9792_v0 }
 0x1fe   : > { %v3073_v11 = vmul.f32 %v2945_v61, %v9796_v2  ;;  %v2876_v51 = vpack.c.bf16 %v2755_v31, %v2754_v63  ;;  %v9848_v8 = vpop.eup %7176  ;;  %v1825_v6 = vmul.f32 0.5, %v1824_v60  ;;  %vm1829_vm9 = vweird.f32 %v9820_v50  ;;  %v1220_v31 = vpop.xlane.xlu0 %1219 }
 0x1ff   : > { %v4030_v10 = vmul.f32 0.796875, %v3902_v32  ;;  %v4031_v26 = vmul.f32 0.796875, %v3903_v25  ;;  %7178 = vtanh.f32 %v4220_v47  ;;  %v1821_v46 = vsel %vm9842_vm8, %v9794_v48, %v1817_v13  ;;  %vm9867_vm10 = vmor %vm1828_vm7, %vm1829_vm9 }
 0x200   : > { %v3195_v27 = vpack.c.bf16 %v3073_v11, %v3072_v49  ;;  %v2946_v39 = vunpack.c.l.bf16 %v2876_v51  ;;  %v2947_v35 = vunpack.c.h.bf16 %v2876_v51  ;;  %v1826_v63 = vsub.f32 1.5, %v1825_v6 }
 0x201   : > { %v9851_v59 = vpack.c.bf16 %v4031_v26, %v4030_v10  ;;  %v2389_v61 = vadd.f32 %v2388_v15, %v9605_v29  ;;  %7180 = vtanh.f32 %v4221_v41  ;;  %v2478_v48 = vadd.f32 %v2477_v18, %v9608_v22  ;;  %v2213_v41 = vpop.f32.mrf.mxu0 }
 0x202   : > { %v3264_v32 = vunpack.c.l.bf16 %v3195_v27  ;;  %v3265_v25 = vunpack.c.h.bf16 %v3195_v27  ;;  %v3074_v60 = vmul.f32 %v2946_v39, %v9812_v62  ;;  %v3075_v47 = vmul.f32 %v2947_v35, %v9814_v36 }
 0x203   : > { %v4222_v51 = vunpack.c.l.bf16 %v9851_v59  ;;  %v9861_v49 = vmul.f32 %v9820_v50, %v1826_v63  ;;  %v9873_v35 = vmul.f32 %v8598_v34, %v1220_v31  ;;  %v4223_v15 = vunpack.c.h.bf16 %v9851_v59  ;;  %v2302_v59 = vpop.f32.mrf.mxu1 }
 0x204   : > { %v3392_v13 = vmul.f32 0.044677734, %v3264_v32  ;;  %v3393_v33 = vmul.f32 0.044677734, %v3265_v25  ;;  %v3196_v11 = vpack.c.bf16 %v3075_v47, %v3074_v60  ;;  %v12137_v10 = vsub.f32 %v12121_v16, %v9667_v24 }
 0x205   : > { %v2557_v39 = vpack.c.bf16 %v2478_v48, %v2389_v61  ;;  %v9883_v63 = vpop.eup %7178  ;;  %7182 = vtanh.f32 %v4222_v51  ;;  %v2214_v16 = vadd.f32 %v2213_v41, %v9528_v19  ;;  %v1353_v61 = vpop.xlane.xlu1 %1352 }
 0x206   : > { %v9879_v26 = vmul.f32 %v1821_v46, %v12137_v10  ;;  %v3515_v31 = vpack.c.bf16 %v3393_v33, %v3392_v13  ;;  %v3266_v32 = vunpack.c.l.bf16 %v3196_v11  ;;  %v3267_v25 = vunpack.c.h.bf16 %v3196_v11  ;;  %v1355_v46 = vpop.xlane.xlu2 %1354 }
 0x207   : > { %v9889_v60 = vunpack.c.l.bf16 %v2557_v39  ;;  %v9891_v24 = vunpack.c.h.bf16 %v2557_v39  ;;  %v1421_v10 = vmul.f32 %v9873_v35, %v9873_v35  ;;  %v9896_v27 = vpop.eup %7180  ;;  %v2303_v39 = vadd.f32 %v2302_v59, %v9549_v38 }
 0x208   : > { %v3584_v47 = vunpack.c.l.bf16 %v3515_v31  ;;  %v3585_v48 = vunpack.c.h.bf16 %v3515_v31  ;;  %v3394_v51 = vmul.f32 0.044677734, %v3266_v32  ;;  %v3395_v13 = vmul.f32 0.044677734, %v3267_v25 }
 0x209   : > { %12139 = vst [vmem:[#allocation79_spill] sm:$0xff] %v9889_v60  ;;  %v2756_v33 = vmul.f32 %v9889_v60, %v9889_v60  ;;  %v2757_v11 = vmul.f32 %v9891_v24, %v9891_v24  ;;  %v1389_v31 = vmul.f32 %v1355_v46, %v8598_v34  ;;  %v1388_v32 = vmul.f32 %v1353_v61, %v8598_v34 }
 0x20a   : > { %12140 = vst [vmem:[#allocation82_spill] sm:$0xff] %v9891_v24  ;;  %v3712_v41 = vadd.f32 %v3584_v47, %v9792_v0  ;;  %v3713_v18 = vadd.f32 %v3585_v48, %v9796_v2  ;;  %v3516_v56 = vpack.c.bf16 %v3395_v13, %v3394_v51  ;;  %v2558_v7 = vpack.c.bf16 %v2303_v39, %v2214_v16 }
 0x20b   : > { %v2877_v45 = vpack.c.bf16 %v2757_v11, %v2756_v33  ;;  %v1928_v25 = vmul.f32 %v9434_v12, %v9638_v54  ;;  %v9909_v40 = vpop.eup %7182  ;;  %v1453_v57 = vsub.f32 %v1389_v31, %v1421_v10  ;;  %v1452_v59 = vsub.f32 %v1388_v32, %v9832_v3  ;;  %v6742_v33 = vld [vmem:[#allocation11 + $0x90] sm:$0xff] }
 0x20c   : > { %12141 = vst [vmem:[#allocation83_spill] sm:$0xff] %v9909_v40  ;;  %v3835_v28 = vpack.c.bf16 %v3713_v18, %v3712_v41  ;;  %v1929_v47 = vmul.f32 %v9434_v12, %v9645_v17  ;;  %v3586_v48 = vunpack.c.l.bf16 %v3516_v56  ;;  %v3587_v2 = vunpack.c.h.bf16 %v3516_v56  ;;  %v6726_v12 = vld [vmem:[#allocation11 + $0x10] sm:$0xff]  ;;  %5937 = vmatpush.bf16.msrb.mxu2 %v6742_v33 }
 0x20d   : > { %v2948_v46 = vunpack.c.l.bf16 %v2877_v45  ;;  %v2949_v0 = vunpack.c.h.bf16 %v2877_v45  ;;  %v9914_v13 = vunpack.c.l.bf16 %v2558_v7  ;;  %v9916_v16 = vunpack.c.h.bf16 %v2558_v7  ;;  %v6750_v17 = vld [vmem:[#allocation11 + $0xd0] sm:$0xff]  ;;  %5759 = vmatpush.bf16.msrb.mxu0 %v6726_v12 }
 0x20e   : > { %v3904_v61 = vunpack.c.l.bf16 %v3835_v28  ;;  %v3905_v51 = vunpack.c.h.bf16 %v3835_v28  ;;  %v3714_v54 = vadd.f32 %v3586_v48, %v9812_v62  ;;  %v3715_v18 = vadd.f32 %v3587_v2, %v9814_v36  ;;  %6026 = vmatpush.bf16.msrb.mxu3 %v6750_v17 }
 0x20f   : > { %12142 = vst [vmem:[#allocation84_spill] sm:$0xff] %v9914_v13  ;;  %v3076_v10 = vmul.f32 %v2948_v46, %v9889_v60  ;;  %v3077_v3 = vmul.f32 %v2949_v0, %v9891_v24  ;;  %v2758_v28 = vmul.f32 %v9914_v13, %v9914_v13  ;;  %v2759_v7 = vmul.f32 %v9916_v16, %v9916_v16 }
 0x210   : > { %12143 = vst [vmem:[#allocation85_spill] sm:$0xff] %v9916_v16  ;;  %v4032_v56 = vmul.f32 0.796875, %v3904_v61  ;;  %v4033_v11 = vmul.f32 0.796875, %v3905_v51  ;;  %7184 = vtanh.f32 %v4223_v15  ;;  %v3836_v45 = vpack.c.bf16 %v3715_v18, %v3714_v54 }
 0x211   : > { %v3197_v39 = vpack.c.bf16 %v3077_v3, %v3076_v10  ;;  %v1485_v41 = vmax.f32 %v1453_v57, 0.0  ;;  %v2878_v31 = vpack.c.bf16 %v2759_v7, %v2758_v28  ;;  %v1484_v0 = vmax.f32 %v1452_v59, 0.0  ;;  %v2391_v7 = vpop.f32.mrf.mxu2 }
 0x212   : > { %v4155_v2 = vpack.c.bf16 %v4033_v11, %v4032_v56  ;;  %v1964_v32 = vadd.f32 %v9456_v52, %v1928_v25  ;;  %v3906_v48 = vunpack.c.l.bf16 %v3836_v45  ;;  %v3907_v46 = vunpack.c.h.bf16 %v3836_v45 }
 0x213   : > { %v3268_v61 = vunpack.c.l.bf16 %v3197_v39  ;;  %v3269_v51 = vunpack.c.h.bf16 %v3197_v39  ;;  %v2950_v62 = vunpack.c.l.bf16 %v2878_v31  ;;  %v2951_v40 = vunpack.c.h.bf16 %v2878_v31  ;;  %v12146_v31 = vld [vmem:[#allocation80_spill] sm:$0xff] }
 0x214   : > { %v4224_v36 = vunpack.c.l.bf16 %v4155_v2  ;;  %v1965_v15 = vadd.f32 %v9456_v52, %v1929_v47  ;;  %v4034_v54 = vmul.f32 0.796875, %v3906_v48  ;;  %v4035_v18 = vmul.f32 0.796875, %v3907_v46 }
 0x215   : > { %v3396_v57 = vmul.f32 0.044677734, %v3268_v61  ;;  %v3397_v10 = vmul.f32 0.044677734, %v3269_v51  ;;  %v4225_v3 = vunpack.c.h.bf16 %v4155_v2  ;;  %v3078_v33 = vmul.f32 %v2950_v62, %v9914_v13  ;;  %v2480_v2 = vpop.f32.mrf.mxu3 }
 0x216   : > { %v3079_v59 = vmul.f32 %v2951_v40, %v9916_v16  ;;  %v9930_v25 = vadd.f32 1e-06, %v1485_v41  ;;  %v9932_v12 = vpop.eup %7184  ;;  %7186 = vtanh.f32 %v4224_v36  ;;  %v4156_v17 = vpack.c.bf16 %v4035_v18, %v4034_v54  ;;  %v2304_v54 = vpop.f32.mrf.mxu1 }
 0x217   : > { %v3517_v56 = vpack.c.bf16 %v3397_v10, %v3396_v57  ;;  %v9934_v11 = vadd.f32 1e-06, %v1484_v0  ;;  %v12144_v52 = vsub.f32 %v12128_v23, %v9735_v44  ;;  %v12145_v47 = vsel %vm9867_vm10, %v9820_v50, %v9861_v49 }
 0x218   : > { %v3198_v40 = vpack.c.bf16 %v3079_v59, %v3078_v33  ;;  %7188 = vrsqrt.f32 %v9930_v25  ;;  %v1986_v28 = vpack.c.bf16 %v1965_v15, %v1964_v32  ;;  %v4226_v36 = vunpack.c.l.bf16 %v4156_v17  ;;  %v2215_v15 = vpop.f32.mrf.mxu0  ;;  %v9964_v33 = vld [vmem:[%s12036_s13] ss:$0 sm:$0xff] }
 0x219   : > { %v9944_v62 = vmul.f32 %v12145_v47, %v12144_v52  ;;  %v4227_v45 = vunpack.c.h.bf16 %v4156_v17  ;;  %v3588_v39 = vunpack.c.l.bf16 %v3517_v56  ;;  %v3589_v41 = vunpack.c.h.bf16 %v3517_v56 }
 0x21a   : > { %v3270_v23 = vunpack.c.l.bf16 %v3198_v40  ;;  %v3271_v6 = vunpack.c.h.bf16 %v3198_v40  ;;  %7190 = vrsqrt.f32 %v9934_v11  ;;  %2252 = vmatmul.bf16.gmra.mxu0 %v1986_v28  ;;  %2341 = vmatmul.bf16.gmra.mxu1 %v1986_v28  ;;  %v2392_v0 = vadd.f32 %v2391_v7, %v9605_v29 }
 0x21b   : > { %7192 = vtanh.f32 %v4225_v3  ;;  %v3716_v50 = vadd.f32 %v3588_v39, %v9889_v60  ;;  %v3717_v49 = vadd.f32 %v3589_v41, %v9891_v24  ;;  %2430 = vmatmul.bf16.gmra.mxu2 %v1986_v28  ;;  %2519 = vmatmul.bf16.gmra.mxu3 %v1986_v28  ;;  %v2481_v46 = vadd.f32 %v2480_v2, %v9608_v22 }
 0x21c   : > { %7194 = vtanh.f32 %v4226_v36  ;;  %v3398_v32 = vmul.f32 0.044677734, %v3270_v23  ;;  %v3399_v48 = vmul.f32 0.044677734, %v3271_v6  ;;  %v9954_v61 = vpop.eup %7186  ;;  %vm1848_vm11 = vweird.f32 %v9930_v25 }
 0x21d   : > { %7196 = vtanh.f32 %v4227_v45  ;;  %v3837_v51 = vpack.c.bf16 %v3717_v49, %v3716_v50  ;;  %vm1838_vm12 = vweird.f32 %v9934_v11  ;;  %v2559_v10 = vpack.c.bf16 %v2481_v46, %v2392_v0 }
 0x21e   : > { %v9958_v18 = vpop.eup %7188  ;;  %v3518_v57 = vpack.c.bf16 %v3399_v48, %v3398_v32  ;;  %v2216_v3 = vadd.f32 %v2215_v15, %v9528_v19  ;;  %v9968_v59 = vmul.f32 %v9964_v33, %v9653_v5  ;;  %v2305_v47 = vadd.f32 %v2304_v54, %v9549_v38  ;;  %v2393_v54 = vpop.f32.mrf.mxu2 }
 0x21f   : > { %v3908_v17 = vunpack.c.l.bf16 %v3837_v51  ;;  %v3909_v56 = vunpack.c.h.bf16 %v3837_v51  ;;  %v1843_v52 = vmul.f32 %v9958_v18, %v9930_v25  ;;  %v9975_v36 = vunpack.c.l.bf16 %v2559_v10 }
 0x220   : > { %v9973_v40 = vpop.eup %7190  ;;  %v3590_v28 = vunpack.c.l.bf16 %v3518_v57  ;;  %v3591_v7 = vunpack.c.h.bf16 %v3518_v57  ;;  %v9977_v45 = vunpack.c.h.bf16 %v2559_v10  ;;  %vm1849_vm13 = vweird.f32 %v9958_v18  ;;  %v6734_v10 = vld [vmem:[#allocation11 + $0x50] sm:$0xff] }
 0x221   : > { %12147 = vst [vmem:[#allocation80_spill] sm:$0xff] %v9975_v36  ;;  %v9979_v39 = vpop.eup %7192  ;;  %v4036_v41 = vmul.f32 0.796875, %v3908_v17  ;;  %v4037_v5 = vmul.f32 0.796875, %v3909_v56  ;;  %v1844_v2 = vmul.f32 %v9958_v18, %v1843_v52  ;;  %v1833_v23 = vmul.f32 %v9973_v40, %v9934_v11  ;;  %v2482_v56 = vpop.f32.mrf.mxu3  ;;  %vm10006_vm15 = vmor %vm1848_vm11, %vm1849_vm13  ;;  %5848 = vmatpush.bf16.msrb.mxu1 %v6734_v10 }
 0x222   : > { %12148 = vst [vmem:[#allocation86_spill] sm:$0xff] %v9977_v45  ;;  %v9984_v6 = vpop.eup %7194  ;;  %v3718_v50 = vadd.f32 %v3590_v28, %v9914_v13  ;;  %v3719_v49 = vadd.f32 %v3591_v7, %v9916_v16  ;;  %v2760_v0 = vmul.f32 %v9975_v36, %v9975_v36  ;;  %v2761_v15 = vmul.f32 %v9977_v45, %v9977_v45 }
 0x223   : > { %12149 = vst [vmem:[#allocation87_spill] sm:$0xff] %v9979_v39  ;;  %v9991_v32 = vpop.eup %7196  ;;  %v4157_v48 = vpack.c.bf16 %v4037_v5, %v4036_v41  ;;  %v1845_v46 = vmul.f32 0.5, %v1844_v2  ;;  %v1834_v51 = vmul.f32 %v9973_v40, %v1833_v23  ;;  %vm1839_vm14 = vweird.f32 %v9973_v40 }
 0x224   : > { %v3838_v57 = vpack.c.bf16 %v3719_v49, %v3718_v50  ;;  %v2560_v17 = vpack.c.bf16 %v2305_v47, %v2216_v3  ;;  %v9999_v52 = vmul.f32 %v9964_v33, %v9651_v9  ;;  %v2394_v5 = vadd.f32 %v2393_v54, %v9605_v29  ;;  %v1222_v9 = vpop.xlane.xlu0 %1221  ;;  %vm10020_vm0 = vmor %vm1838_vm12, %vm1839_vm14 }
 0x225   : > { %v4228_v28 = vunpack.c.l.bf16 %v4157_v48  ;;  %v1846_v7 = vsub.f32 1.5, %v1845_v46  ;;  %v1835_v41 = vmul.f32 0.5, %v1834_v51  ;;  %v2879_v3 = vpack.c.bf16 %v2761_v15, %v2760_v0 }
 0x226   : > { %v3910_v2 = vunpack.c.l.bf16 %v3838_v57  ;;  %v3911_v23 = vunpack.c.h.bf16 %v3838_v57  ;;  %v10010_v47 = vunpack.c.l.bf16 %v2560_v17  ;;  %v10013_v51 = vunpack.c.h.bf16 %v2560_v17 }
 0x227   : > { %v1847_v49 = vmul.f32 %v9958_v18, %v1846_v7  ;;  %v1836_v46 = vsub.f32 1.5, %v1835_v41  ;;  %v2483_v54 = vadd.f32 %v2482_v56, %v9608_v22  ;;  %v4229_v57 = vunpack.c.h.bf16 %v4157_v48 }
 0x228   : > { %12152 = vst [vmem:[#allocation88_spill] sm:$0xff] %v10010_v47  ;;  %v4038_v44 = vmul.f32 0.796875, %v3910_v2  ;;  %v4039_v16 = vmul.f32 0.796875, %v3911_v23  ;;  %v2952_v0 = vunpack.c.l.bf16 %v2879_v3  ;;  %v2953_v17 = vunpack.c.h.bf16 %v2879_v3 }
 0x229   : > { %12153 = vst [vmem:[#allocation89_spill] sm:$0xff] %v10013_v51  ;;  %v1851_v15 = vsel %vm10006_vm15, %v9958_v18, %v1847_v49  ;;  %v1837_v10 = vmul.f32 %v9973_v40, %v1836_v46  ;;  %v2762_v48 = vmul.f32 %v10010_v47, %v10010_v47  ;;  %7198 = vtanh.f32 %v4228_v28 }
 0x22a   : > { %v4158_v56 = vpack.c.bf16 %v4039_v16, %v4038_v44  ;;  %v3080_v7 = vmul.f32 %v2952_v0, %v9975_v36  ;;  %v2763_v11 = vmul.f32 %v10013_v51, %v10013_v51  ;;  %v3081_v2 = vmul.f32 %v2953_v17, %v9977_v45 }
 0x22b   : > { %v1841_v41 = vsel %vm10020_vm0, %v9973_v40, %v1837_v10  ;;  %v10038_v18 = vmul.f32 %v8598_v34, %v1222_v9  ;;  %v2561_v23 = vpack.c.bf16 %v2483_v54, %v2394_v5  ;;  %7200 = vtanh.f32 %v4229_v57  ;;  %v2218_v9 = vpop.f32.mrf.mxu0  ;;  %v1224_v57 = vpop.xlane.xlu1 %1223 }
 0x22c   : > { %v4230_v50 = vunpack.c.l.bf16 %v4158_v56  ;;  %v12156_v16 = vsub.f32 %v12146_v31, %v9873_v35  ;;  %v2880_v28 = vpack.c.bf16 %v2763_v11, %v2762_v48  ;;  %v4231_v3 = vunpack.c.h.bf16 %v4158_v56  ;;  %v2307_v31 = vpop.f32.mrf.mxu1 }
 0x22d   : > { %v12157_v49 = vsub.f32 %v12138_v37, %v9803_v53  ;;  %v3199_v40 = vpack.c.bf16 %v3081_v2, %v3080_v7  ;;  %v10050_v25 = vunpack.c.l.bf16 %v2561_v23  ;;  %v10054_v54 = vmul.f32 %v10038_v18, %v10038_v18  ;;  %v1357_v37 = vpop.xlane.xlu2 %1356 }
 0x22e   : > { %v10043_v44 = vmul.f32 %v1851_v15, %v12156_v16  ;;  %v2954_v0 = vunpack.c.l.bf16 %v2880_v28  ;;  %v2955_v5 = vunpack.c.h.bf16 %v2880_v28  ;;  %v10056_v35 = vunpack.c.h.bf16 %v2561_v23 }
 0x22f   : > { %v10048_v46 = vmul.f32 %v1841_v41, %v12157_v49  ;;  %12158 = vst [vmem:[#allocation90_spill] sm:$0xff] %v10050_v25  ;;  %7202 = vtanh.f32 %v4230_v50  ;;  %v3272_v15 = vunpack.c.l.bf16 %v3199_v40  ;;  %v3273_v10 = vunpack.c.h.bf16 %v3199_v40  ;;  %v10060_v17 = vpop.eup %7198  ;;  %v1359_v41 = vpop.xlane.xlu0 %1358 }
 0x230   : > { %12159 = vst [vmem:[#allocation91_spill] sm:$0xff] %v10056_v35  ;;  %v2764_v53 = vmul.f32 %v10050_v25, %v10050_v25  ;;  %v3082_v48 = vmul.f32 %v2954_v0, %v10010_v47  ;;  %v3083_v56 = vmul.f32 %v2955_v5, %v10013_v51  ;;  %v2765_v7 = vmul.f32 %v10056_v35, %v10056_v35 }
 0x231   : > { %12160 = vst [vmem:[#allocation92_spill] sm:$0xff] %v10060_v17  ;;  %v2219_v11 = vadd.f32 %v2218_v9, %v9528_v19  ;;  %v3400_v2 = vmul.f32 0.044677734, %v3272_v15  ;;  %v3401_v23 = vmul.f32 0.044677734, %v3273_v10  ;;  %v2308_v50 = vadd.f32 %v2307_v31, %v9549_v38  ;;  %v10071_v28 = vpop.eup %7200 }
 0x232   : > { %v10069_v16 = vmul.f32 %v8598_v34, %v1224_v57  ;;  %12161 = vst [vmem:[#allocation93_spill] sm:$0xff] %v10071_v28  ;;  %7204 = vtanh.f32 %v4231_v3  ;;  %v3200_v49 = vpack.c.bf16 %v3083_v56, %v3082_v48  ;;  %v2881_v40 = vpack.c.bf16 %v2765_v7, %v2764_v53 }
 0x233   : > { %v1390_v0 = vmul.f32 %v1357_v37, %v8598_v34  ;;  %v3519_v5 = vpack.c.bf16 %v3401_v23, %v3400_v2  ;;  %v2562_v13 = vpack.c.bf16 %v2308_v50, %v2219_v11  ;;  %v1391_v15 = vmul.f32 %v1359_v41, %v8598_v34 }
 0x234   : > { %v1423_v9 = vmul.f32 %v10069_v16, %v10069_v16  ;;  %v3274_v10 = vunpack.c.l.bf16 %v3200_v49  ;;  %v3275_v24 = vunpack.c.h.bf16 %v3200_v49  ;;  %v2956_v31 = vunpack.c.l.bf16 %v2881_v40 }
 0x235   : > { %v2957_v60 = vunpack.c.h.bf16 %v2881_v40  ;;  %v10077_v57 = vpop.eup %7202  ;;  %v3592_v17 = vunpack.c.l.bf16 %v3519_v5  ;;  %v3593_v28 = vunpack.c.h.bf16 %v3519_v5  ;;  %v10079_v3 = vunpack.c.l.bf16 %v2562_v13 }
 0x236   : > { %12162 = vst [vmem:[#allocation94_spill] sm:$0xff] %v10077_v57  ;;  %v10081_v53 = vunpack.c.h.bf16 %v2562_v13  ;;  %v3402_v37 = vmul.f32 0.044677734, %v3274_v10  ;;  %v3403_v48 = vmul.f32 0.044677734, %v3275_v24  ;;  %v3084_v56 = vmul.f32 %v2956_v31, %v10050_v25 }
 0x237   : > { %12163 = vst [vmem:[#allocation95_spill] sm:$0xff] %v10079_v3  ;;  %v3085_v7 = vmul.f32 %v2957_v60, %v10056_v35  ;;  %v3720_v34 = vadd.f32 %v3592_v17, %v9975_v36  ;;  %v3721_v11 = vadd.f32 %v3593_v28, %v9977_v45  ;;  %v2766_v41 = vmul.f32 %v10079_v3, %v10079_v3  ;;  %v10097_v60 = vld [vmem:[%s12038_s5] ss:$0 sm:$0xff] }
 0x238   : > { %12164 = vst [vmem:[#allocation96_spill] sm:$0xff] %v10081_v53  ;;  %v2767_v2 = vmul.f32 %v10081_v53, %v10081_v53  ;;  %v10091_v23 = vpop.eup %7204  ;;  %v3520_v13 = vpack.c.bf16 %v3403_v48, %v3402_v37  ;;  %v1454_v24 = vsub.f32 %v1390_v0, %v10054_v54  ;;  %v1966_v17 = vadd.f32 %v10097_v60, %v9968_v59 }
 0x239   : > { %12165 = vst [vmem:[#allocation97_spill] sm:$0xff] %v10091_v23  ;;  %v3201_v50 = vpack.c.bf16 %v3085_v7, %v3084_v56  ;;  %v3839_v28 = vpack.c.bf16 %v3721_v11, %v3720_v34  ;;  %v1455_v40 = vsub.f32 %v1391_v15, %v1423_v9  ;;  %v1967_v5 = vadd.f32 %v10097_v60, %v9999_v52  ;;  %v2396_v34 = vpop.f32.mrf.mxu2 }
 0x23a   : > { %v2882_v49 = vpack.c.bf16 %v2767_v2, %v2766_v41  ;;  %v3594_v10 = vunpack.c.l.bf16 %v3520_v13  ;;  %v3595_v31 = vunpack.c.h.bf16 %v3520_v13  ;;  %v1486_v13 = vmax.f32 %v1454_v24, 0.0 }
 0x23b   : > { %v3276_v37 = vunpack.c.l.bf16 %v3201_v50  ;;  %v3277_v48 = vunpack.c.h.bf16 %v3201_v50  ;;  %v3912_v56 = vunpack.c.l.bf16 %v3839_v28  ;;  %v3913_v54 = vunpack.c.h.bf16 %v3839_v28 }
 0x23c   : > { %v2958_v0 = vunpack.c.l.bf16 %v2882_v49  ;;  %v2959_v7 = vunpack.c.h.bf16 %v2882_v49  ;;  %v3722_v45 = vadd.f32 %v3594_v10, %v10010_v47  ;;  %v3723_v36 = vadd.f32 %v3595_v31, %v10013_v51  ;;  %v2485_v51 = vpop.f32.mrf.mxu3 }
 0x23d   : > { %v3404_v23 = vmul.f32 0.044677734, %v3276_v37  ;;  %v3405_v59 = vmul.f32 0.044677734, %v3277_v48  ;;  %v4040_v11 = vmul.f32 0.796875, %v3912_v56  ;;  %v4041_v9 = vmul.f32 0.796875, %v3913_v54 }
 0x23e   : > { %v3086_v15 = vmul.f32 %v2958_v0, %v10079_v3  ;;  %v3087_v52 = vmul.f32 %v2959_v7, %v10081_v53  ;;  %v3840_v41 = vpack.c.bf16 %v3723_v36, %v3722_v45  ;;  %v1487_v50 = vmax.f32 %v1455_v40, 0.0 }
 0x23f   : > { %v3521_v2 = vpack.c.bf16 %v3405_v59, %v3404_v23  ;;  %v4159_v28 = vpack.c.bf16 %v4041_v9, %v4040_v11  ;;  %v1987_v49 = vpack.c.bf16 %v1967_v5, %v1966_v17  ;;  %v2397_v10 = vadd.f32 %v2396_v34, %v9605_v29 }
 0x240   : > { %v3202_v57 = vpack.c.bf16 %v3087_v52, %v3086_v15  ;;  %v3914_v47 = vunpack.c.l.bf16 %v3840_v41  ;;  %v3915_v31 = vunpack.c.h.bf16 %v3840_v41  ;;  %v10110_v5 = vadd.f32 1e-06, %v1486_v13 }
 0x241   : > { %v3596_v37 = vunpack.c.l.bf16 %v3521_v2  ;;  %v3597_v48 = vunpack.c.h.bf16 %v3521_v2  ;;  %v4232_v56 = vunpack.c.l.bf16 %v4159_v28  ;;  %v4233_v54 = vunpack.c.h.bf16 %v4159_v28  ;;  %2257 = vmatmul.bf16.gmra.mxu0 %v1987_v49  ;;  %2346 = vmatmul.bf16.gmra.mxu1 %v1987_v49 }
 0x242   : > { %v3278_v39 = vunpack.c.l.bf16 %v3202_v57  ;;  %v3279_v0 = vunpack.c.h.bf16 %v3202_v57  ;;  %v4042_v36 = vmul.f32 0.796875, %v3914_v47  ;;  %v4043_v45 = vmul.f32 0.796875, %v3915_v31  ;;  %2435 = vmatmul.bf16.gmra.mxu2 %v1987_v49  ;;  %2524 = vmatmul.bf16.gmra.mxu3 %v1987_v49 }
 0x243   : > { %v3724_v23 = vadd.f32 %v3596_v37, %v10050_v25  ;;  %v3725_v24 = vadd.f32 %v3597_v48, %v10056_v35  ;;  %7206 = vtanh.f32 %v4232_v56  ;;  %v10112_v34 = vadd.f32 1e-06, %v1487_v50  ;;  %v2220_v50 = vpop.f32.mrf.mxu0  ;;  %v2309_v37 = vpop.f32.mrf.mxu1 }
 0x244   : > { %v3406_v17 = vmul.f32 0.044677734, %v3278_v39  ;;  %v3407_v40 = vmul.f32 0.044677734, %v3279_v0  ;;  %7208 = vtanh.f32 %v4233_v54  ;;  %v4160_v7 = vpack.c.bf16 %v4043_v45, %v4042_v36 }
 0x245   : > { %v3841_v59 = vpack.c.bf16 %v3725_v24, %v3724_v23  ;;  %7210 = vrsqrt.f32 %v10110_v5  ;;  %v2486_v11 = vadd.f32 %v2485_v51, %v9608_v22  ;;  %vm1858_vm3 = vweird.f32 %v10110_v5  ;;  %v2398_v23 = vpop.f32.mrf.mxu2  ;;  %v2487_v24 = vpop.f32.mrf.mxu3 }
 0x246   : > { %v3522_v57 = vpack.c.bf16 %v3407_v40, %v3406_v17  ;;  %v4234_v9 = vunpack.c.l.bf16 %v4160_v7  ;;  %v4235_v15 = vunpack.c.h.bf16 %v4160_v7  ;;  %7212 = vrsqrt.f32 %v10112_v34 }
 0x247   : > { %v3916_v52 = vunpack.c.l.bf16 %v3841_v59  ;;  %v3917_v39 = vunpack.c.h.bf16 %v3841_v59  ;;  %v2563_v31 = vpack.c.bf16 %v2486_v11, %v2397_v10  ;;  %vm1868_vm4 = vweird.f32 %v10112_v34 }
 0x248   : > { %v3598_v41 = vunpack.c.l.bf16 %v3522_v57  ;;  %v3599_v2 = vunpack.c.h.bf16 %v3522_v57  ;;  %7214 = vtanh.f32 %v4234_v9  ;;  %v2221_v10 = vadd.f32 %v2220_v50, %v9528_v19 }
 0x249   : > { %v4044_v28 = vmul.f32 0.796875, %v3916_v52  ;;  %v4045_v49 = vmul.f32 0.796875, %v3917_v39  ;;  %v10121_v48 = vpop.eup %7206  ;;  %7216 = vtanh.f32 %v4235_v15  ;;  %v10129_v36 = vunpack.c.l.bf16 %v2563_v31 }
 0x24a   : > { %v3726_v51 = vadd.f32 %v3598_v41, %v10079_v3  ;;  %v3727_v56 = vadd.f32 %v3599_v2, %v10081_v53  ;;  %v10126_v54 = vpop.eup %7208  ;;  %v10131_v45 = vunpack.c.h.bf16 %v2563_v31  ;;  %v2310_v7 = vadd.f32 %v2309_v37, %v9549_v38 }
 0x24b   : > { %12166 = vst [vmem:[#allocation98_spill] sm:$0xff] %v10126_v54  ;;  %v4161_v0 = vpack.c.bf16 %v4045_v49, %v4044_v28  ;;  %v10134_v17 = vpop.eup %7210  ;;  %v2399_v59 = vadd.f32 %v2398_v23, %v9605_v29  ;;  %v2488_v57 = vadd.f32 %v2487_v24, %v9608_v22  ;;  %v10143_v52 = vmul.f32 %v9964_v33, %v9750_v21 }
 0x24c   : > { %12167 = vst [vmem:[#allocation99_spill] sm:$0xff] %v10129_v36  ;;  %v3842_v40 = vpack.c.bf16 %v3727_v56, %v3726_v51  ;;  %v1853_v15 = vmul.f32 %v10134_v17, %v10110_v5  ;;  %v10145_v39 = vpop.eup %7212  ;;  %v2768_v50 = vmul.f32 %v10129_v36, %v10129_v36  ;;  %v2769_v28 = vmul.f32 %v10131_v45, %v10131_v45 }
 0x24d   : > { %12168 = vst [vmem:[#allocation100_spill] sm:$0xff] %v10131_v45  ;;  %v4236_v11 = vunpack.c.l.bf16 %v4161_v0  ;;  %v4237_v9 = vunpack.c.h.bf16 %v4161_v0  ;;  %vm1859_vm5 = vweird.f32 %v10134_v17  ;;  %v1863_v21 = vmul.f32 %v10145_v39, %v10112_v34 }
 0x24e   : > { %v3918_v41 = vunpack.c.l.bf16 %v3842_v40  ;;  %v3919_v2 = vunpack.c.h.bf16 %v3842_v40  ;;  %v10151_v49 = vpop.eup %7214  ;;  %v1854_v31 = vmul.f32 %v10134_v17, %v1853_v15  ;;  %vm1869_vm6 = vweird.f32 %v10145_v39  ;;  %vm10169_vm1 = vmor %vm1858_vm3, %vm1859_vm5 }
 0x24f   : > { %7218 = vtanh.f32 %v4236_v11  ;;  %v10157_v37 = vpop.eup %7216  ;;  %v2883_v0 = vpack.c.bf16 %v2769_v28, %v2768_v50  ;;  %v1864_v24 = vmul.f32 %v10145_v39, %v1863_v21  ;;  %v2564_v40 = vpack.c.bf16 %v2310_v7, %v2221_v10  ;;  %vm10186_vm2 = vmor %vm1868_vm4, %vm1869_vm6 }
 0x250   : > { %v4046_v51 = vmul.f32 0.796875, %v3918_v41  ;;  %v4047_v56 = vmul.f32 0.796875, %v3919_v2  ;;  %7220 = vtanh.f32 %v4237_v9  ;;  %v1855_v23 = vmul.f32 0.5, %v1854_v31  ;;  %v2223_v41 = vpop.f32.mrf.mxu0 }
 0x251   : > { %v2960_v13 = vunpack.c.l.bf16 %v2883_v0  ;;  %v2961_v15 = vunpack.c.h.bf16 %v2883_v0  ;;  %v2565_v47 = vpack.c.bf16 %v2488_v57, %v2399_v59  ;;  %v1865_v3 = vmul.f32 0.5, %v1864_v24 }
 0x252   : > { %v4162_v11 = vpack.c.bf16 %v4047_v56, %v4046_v51  ;;  %v1856_v53 = vsub.f32 1.5, %v1855_v23  ;;  %v10161_v35 = vunpack.c.l.bf16 %v2564_v40  ;;  %v10163_v25 = vunpack.c.h.bf16 %v2564_v40  ;;  %v2312_v23 = vpop.f32.mrf.mxu1 }
 0x253   : > { %v3088_v10 = vmul.f32 %v2960_v13, %v10129_v36  ;;  %v3089_v7 = vmul.f32 %v2961_v15, %v10131_v45  ;;  %v1866_v50 = vsub.f32 1.5, %v1865_v3  ;;  %v10190_v21 = vunpack.c.l.bf16 %v2565_v47 }
 0x254   : > { %12169 = vst [vmem:[#allocation101_spill] sm:$0xff] %v10161_v35  ;;  %v4238_v2 = vunpack.c.l.bf16 %v4162_v11  ;;  %v4239_v54 = vunpack.c.h.bf16 %v4162_v11  ;;  %v1857_v57 = vmul.f32 %v10134_v17, %v1856_v53  ;;  %v2770_v28 = vmul.f32 %v10161_v35, %v10161_v35 }
 0x255   : > { %12170 = vst [vmem:[#allocation102_spill] sm:$0xff] %v10163_v25  ;;  %v10175_v59 = vpop.eup %7218  ;;  %v2771_v31 = vmul.f32 %v10163_v25, %v10163_v25  ;;  %v3203_v13 = vpack.c.bf16 %v3089_v7, %v3088_v10  ;;  %v10192_v51 = vunpack.c.h.bf16 %v2565_v47  ;;  %v2224_v3 = vadd.f32 %v2223_v41, %v9528_v19 }
 0x256   : > { %12175 = vst [vmem:[#allocation103_spill] sm:$0xff] %v10190_v21  ;;  %v10195_v53 = vpop.eup %7220  ;;  %7222 = vtanh.f32 %v4238_v2  ;;  %v1861_v56 = vsel %vm10169_vm1, %v10134_v17, %v1857_v57  ;;  %v1867_v34 = vmul.f32 %v10145_v39, %v1866_v50  ;;  %v2772_v47 = vmul.f32 %v10190_v21, %v10190_v21 }
 0x257   : > { %12176 = vst [vmem:[#allocation104_spill] sm:$0xff] %v10192_v51  ;;  %v2884_v0 = vpack.c.bf16 %v2771_v31, %v2770_v28  ;;  %7224 = vtanh.f32 %v4239_v54  ;;  %v3280_v24 = vunpack.c.l.bf16 %v3203_v13  ;;  %v3281_v40 = vunpack.c.h.bf16 %v3203_v13 }
 0x258   : > { %v1871_v11 = vsel %vm10186_vm2, %v10145_v39, %v1867_v34  ;;  %v2773_v2 = vmul.f32 %v10192_v51, %v10192_v51  ;;  %v12177_v17 = vsub.f32 %v9200_v58, %v10038_v18  ;;  %v2313_v7 = vadd.f32 %v2312_v23, %v9549_v38 }
 0x259   : > { %v2962_v15 = vunpack.c.l.bf16 %v2884_v0  ;;  %v2963_v41 = vunpack.c.h.bf16 %v2884_v0  ;;  %v3408_v54 = vmul.f32 0.044677734, %v3280_v24  ;;  %v3409_v10 = vmul.f32 0.044677734, %v3281_v40 }
 0x25a   : > { %v10211_v9 = vmul.f32 %v1861_v56, %v12177_v17  ;;  %v2885_v28 = vpack.c.bf16 %v2773_v2, %v2772_v47  ;;  %v1933_v39 = vmul.f32 %v9964_v33, %v9761_v42  ;;  %v12178_v31 = vsub.f32 %v9245_v30, %v10069_v16  ;;  %v6725_v2 = vld [vmem:[#allocation11 + $0x8] sm:$0xff] }
 0x25b   : > { %v3090_v57 = vmul.f32 %v2962_v15, %v10161_v35  ;;  %v3091_v50 = vmul.f32 %v2963_v41, %v10163_v25  ;;  %v3523_v58 = vpack.c.bf16 %v3409_v10, %v3408_v54  ;;  %v2566_v18 = vpack.c.bf16 %v2313_v7, %v2224_v3  ;;  %v6741_v41 = vld [vmem:[#allocation11 + $0x88] sm:$0xff]  ;;  %v2401_v54 = vpop.f32.mrf.mxu2  ;;  %5760 = vmatpush.bf16.msrb.mxu0 %v6725_v2 }
 0x25c   : > { %v10221_v5 = vmul.f32 %v1871_v11, %v12178_v31  ;;  %v1968_v13 = vadd.f32 %v10097_v60, %v10143_v52  ;;  %v10225_v56 = vpop.eup %7222  ;;  %v2964_v0 = vunpack.c.l.bf16 %v2885_v28  ;;  %v2965_v23 = vunpack.c.h.bf16 %v2885_v28  ;;  %v6749_v17 = vld [vmem:[#allocation11 + $0xc8] sm:$0xff]  ;;  %v2490_v28 = vpop.f32.mrf.mxu3  ;;  %5938 = vmatpush.bf16.msrb.mxu2 %v6741_v41 }
 0x25d   : > { %12179 = vst [vmem:[#allocation105_spill] sm:$0xff] %v10225_v56  ;;  %v3204_v34 = vpack.c.bf16 %v3091_v50, %v3090_v57  ;;  %v1969_v24 = vadd.f32 %v10097_v60, %v1933_v39  ;;  %v10228_v40 = vpop.eup %7224  ;;  %v3600_v42 = vunpack.c.l.bf16 %v3523_v58  ;;  %v3601_v47 = vunpack.c.h.bf16 %v3523_v58  ;;  %6027 = vmatpush.bf16.msrb.mxu3 %v6749_v17 }
 0x25e   : > { %12180 = vst [vmem:[#allocation106_spill] sm:$0xff] %v10228_v40  ;;  %v10230_v15 = vunpack.c.l.bf16 %v2566_v18  ;;  %v10232_v30 = vunpack.c.h.bf16 %v2566_v18  ;;  %v3092_v11 = vmul.f32 %v2964_v0, %v10190_v21  ;;  %v3093_v52 = vmul.f32 %v2965_v23, %v10192_v51 }
 0x25f   : > { %v3282_v16 = vunpack.c.l.bf16 %v3204_v34  ;;  %v3283_v3 = vunpack.c.h.bf16 %v3204_v34  ;;  %v3728_v10 = vadd.f32 %v3600_v42, %v10129_v36  ;;  %v3729_v7 = vadd.f32 %v3601_v47, %v10131_v45 }
 0x260   : > { %12181 = vst [vmem:[#allocation107_spill] sm:$0xff] %v10230_v15  ;;  %v2774_v57 = vmul.f32 %v10230_v15, %v10230_v15  ;;  %v2775_v50 = vmul.f32 %v10232_v30, %v10232_v30  ;;  %v3205_v58 = vpack.c.bf16 %v3093_v52, %v3092_v11  ;;  %v1988_v18 = vpack.c.bf16 %v1969_v24, %v1968_v13 }
 0x261   : > { %12182 = vst [vmem:[#allocation108_spill] sm:$0xff] %v10232_v30  ;;  %v3410_v39 = vmul.f32 0.044677734, %v3282_v16  ;;  %v3411_v31 = vmul.f32 0.044677734, %v3283_v3  ;;  %v3843_v34 = vpack.c.bf16 %v3729_v7, %v3728_v10  ;;  %v2402_v23 = vadd.f32 %v2401_v54, %v9605_v29 }
 0x262   : > { %v2886_v0 = vpack.c.bf16 %v2775_v50, %v2774_v57  ;;  %v10245_v42 = vmul.f32 %v9964_v33, %v9879_v26  ;;  %v3284_v45 = vunpack.c.l.bf16 %v3205_v58  ;;  %v3285_v36 = vunpack.c.h.bf16 %v3205_v58  ;;  %2262 = vmatmul.bf16.gmra.mxu0 %v1988_v18  ;;  %2351 = vmatmul.bf16.gmra.mxu1 %v1988_v18  ;;  %v2225_v57 = vpop.f32.mrf.mxu0  ;;  %v2314_v50 = vpop.f32.mrf.mxu1 }
 0x263   : > { %v3524_v47 = vpack.c.bf16 %v3411_v31, %v3410_v39  ;;  %v2491_v16 = vadd.f32 %v2490_v28, %v9608_v22  ;;  %v3920_v3 = vunpack.c.l.bf16 %v3843_v34  ;;  %v3921_v13 = vunpack.c.h.bf16 %v3843_v34  ;;  %2440 = vmatmul.bf16.gmra.mxu2 %v1988_v18  ;;  %2529 = vmatmul.bf16.gmra.mxu3 %v1988_v18 }
 0x264   : > { %v2966_v24 = vunpack.c.l.bf16 %v2886_v0  ;;  %v2967_v11 = vunpack.c.h.bf16 %v2886_v0  ;;  %v3412_v2 = vmul.f32 0.044677734, %v3284_v45  ;;  %v3413_v17 = vmul.f32 0.044677734, %v3285_v36 }
 0x265   : > { %v3602_v52 = vunpack.c.l.bf16 %v3524_v47  ;;  %v3603_v41 = vunpack.c.h.bf16 %v3524_v47  ;;  %v4048_v54 = vmul.f32 0.796875, %v3920_v3  ;;  %v4049_v26 = vmul.f32 0.796875, %v3921_v13 }
 0x266   : > { %v3094_v10 = vmul.f32 %v2966_v24, %v10230_v15  ;;  %v3095_v7 = vmul.f32 %v2967_v11, %v10232_v30  ;;  %v3525_v31 = vpack.c.bf16 %v3413_v17, %v3412_v2  ;;  %v2567_v58 = vpack.c.bf16 %v2491_v16, %v2402_v23 }
 0x267   : > { %v3730_v28 = vadd.f32 %v3602_v52, %v10161_v35  ;;  %v3731_v39 = vadd.f32 %v3603_v41, %v10163_v25  ;;  %v4163_v34 = vpack.c.bf16 %v4049_v26, %v4048_v54  ;;  %v2226_v0 = vadd.f32 %v2225_v57, %v9528_v19 }
 0x268   : > { %v3206_v18 = vpack.c.bf16 %v3095_v7, %v3094_v10  ;;  %v2315_v36 = vadd.f32 %v2314_v50, %v9549_v38  ;;  %v3604_v47 = vunpack.c.l.bf16 %v3525_v31  ;;  %v3605_v3 = vunpack.c.h.bf16 %v3525_v31 }
 0x269   : > { %v3844_v45 = vpack.c.bf16 %v3731_v39, %v3730_v28  ;;  %v10254_v13 = vunpack.c.l.bf16 %v2567_v58  ;;  %v4240_v24 = vunpack.c.l.bf16 %v4163_v34  ;;  %v4241_v11 = vunpack.c.h.bf16 %v4163_v34  ;;  %v6733_v39 = vld [vmem:[#allocation11 + $0x48] sm:$0xff] }
 0x26a   : > { %v3286_v40 = vunpack.c.l.bf16 %v3206_v18  ;;  %v3287_v56 = vunpack.c.h.bf16 %v3206_v18  ;;  %v3732_v41 = vadd.f32 %v3604_v47, %v10190_v21  ;;  %v3733_v23 = vadd.f32 %v3605_v3, %v10192_v51  ;;  %5849 = vmatpush.bf16.msrb.mxu1 %v6733_v39 }
 0x26b   : > { %12183 = vst [vmem:[#allocation109_spill] sm:$0xff] %v10254_v13  ;;  %v3922_v52 = vunpack.c.l.bf16 %v3844_v45  ;;  %v3923_v35 = vunpack.c.h.bf16 %v3844_v45  ;;  %v10258_v17 = vunpack.c.h.bf16 %v2567_v58  ;;  %v10262_v54 = vmul.f32 %v9964_v33, %v9944_v62 }
 0x26c   : > { %v3414_v16 = vmul.f32 0.044677734, %v3286_v40  ;;  %v3415_v2 = vmul.f32 0.044677734, %v3287_v56  ;;  %7226 = vtanh.f32 %v4240_v24  ;;  %v3845_v7 = vpack.c.bf16 %v3733_v23, %v3732_v41 }
 0x26d   : > { %12184 = vst [vmem:[#allocation110_spill] sm:$0xff] %v10258_v17  ;;  %v4050_v26 = vmul.f32 0.796875, %v3922_v52  ;;  %v4051_v10 = vmul.f32 0.796875, %v3923_v35  ;;  %v2776_v50 = vmul.f32 %v10254_v13, %v10254_v13  ;;  %v2777_v28 = vmul.f32 %v10258_v17, %v10258_v17  ;;  %v2403_v35 = vpop.f32.mrf.mxu2 }
 0x26e   : > { %v3526_v57 = vpack.c.bf16 %v3415_v2, %v3414_v16  ;;  %v2568_v40 = vpack.c.bf16 %v2315_v36, %v2226_v0  ;;  %7228 = vtanh.f32 %v4241_v11  ;;  %v3924_v31 = vunpack.c.l.bf16 %v3845_v7  ;;  %v2492_v11 = vpop.f32.mrf.mxu3 }
 0x26f   : > { %v4164_v56 = vpack.c.bf16 %v4051_v10, %v4050_v26  ;;  %v3925_v58 = vunpack.c.h.bf16 %v3845_v7  ;;  %v2887_v18 = vpack.c.bf16 %v2777_v28, %v2776_v50  ;;  %v2404_v7 = vadd.f32 %v2403_v35, %v9605_v29 }
 0x270   : > { %v3606_v34 = vunpack.c.l.bf16 %v3526_v57  ;;  %v3607_v62 = vunpack.c.h.bf16 %v3526_v57  ;;  %v10268_v45 = vunpack.c.l.bf16 %v2568_v40  ;;  %v4052_v24 = vmul.f32 0.796875, %v3924_v31  ;;  %v2228_v57 = vpop.f32.mrf.mxu0 }
 0x271   : > { %v4242_v47 = vunpack.c.l.bf16 %v4164_v56  ;;  %v4243_v3 = vunpack.c.h.bf16 %v4164_v56  ;;  %v4053_v52 = vmul.f32 0.796875, %v3925_v58  ;;  %v2968_v0 = vunpack.c.l.bf16 %v2887_v18  ;;  %v2317_v56 = vpop.f32.mrf.mxu1 }
 0x272   : > { %12185 = vst [vmem:[#allocation111_spill] sm:$0xff] %v10268_v45  ;;  %v3734_v41 = vadd.f32 %v3606_v34, %v10230_v15  ;;  %v3735_v23 = vadd.f32 %v3607_v62, %v10232_v30  ;;  %v2969_v36 = vunpack.c.h.bf16 %v2887_v18  ;;  %v10272_v16 = vpop.eup %7226  ;;  %v10274_v26 = vunpack.c.h.bf16 %v2568_v40 }
 0x273   : > { %v4165_v2 = vpack.c.bf16 %v4053_v52, %v4052_v24  ;;  %v2778_v10 = vmul.f32 %v10268_v45, %v10268_v45  ;;  %7230 = vtanh.f32 %v4242_v47  ;;  %v3096_v28 = vmul.f32 %v2968_v0, %v10254_v13 }
 0x274   : > { %12186 = vst [vmem:[#allocation112_spill] sm:$0xff] %v10274_v26  ;;  %v3846_v50 = vpack.c.bf16 %v3735_v23, %v3734_v41  ;;  %v3097_v39 = vmul.f32 %v2969_v36, %v10258_v17  ;;  %v10281_v31 = vpop.eup %7228  ;;  %7232 = vtanh.f32 %v4243_v3  ;;  %v2779_v40 = vmul.f32 %v10274_v26, %v10274_v26 }
 0x275   : > { %v4244_v58 = vunpack.c.l.bf16 %v4165_v2  ;;  %v2493_v34 = vadd.f32 %v2492_v11, %v9608_v22  ;;  %v2229_v47 = vadd.f32 %v2228_v57, %v9528_v19  ;;  %v4245_v24 = vunpack.c.h.bf16 %v4165_v2 }
 0x276   : > { %v3926_v62 = vunpack.c.l.bf16 %v3846_v50  ;;  %v3927_v18 = vunpack.c.h.bf16 %v3846_v50  ;;  %v3207_v35 = vpack.c.bf16 %v3097_v39, %v3096_v28  ;;  %v2888_v52 = vpack.c.bf16 %v2779_v40, %v2778_v10 }
 0x277   : > { %v2569_v41 = vpack.c.bf16 %v2493_v34, %v2404_v7  ;;  %v2318_v23 = vadd.f32 %v2317_v56, %v9549_v38  ;;  %7234 = vtanh.f32 %v4244_v58 }
 0x278   : > { %v4054_v0 = vmul.f32 0.796875, %v3926_v62  ;;  %v4055_v36 = vmul.f32 0.796875, %v3927_v18  ;;  %v3288_v3 = vunpack.c.l.bf16 %v3207_v35  ;;  %v3289_v30 = vunpack.c.h.bf16 %v3207_v35 }
 0x279   : > { %v2970_v15 = vunpack.c.l.bf16 %v2888_v52  ;;  %v2971_v51 = vunpack.c.h.bf16 %v2888_v52  ;;  %v10288_v21 = vunpack.c.l.bf16 %v2569_v41  ;;  %v10290_v11 = vpop.eup %7230  ;;  %v10292_v39 = vunpack.c.h.bf16 %v2569_v41 }
 0x27a   : > { %v4166_v50 = vpack.c.bf16 %v4055_v36, %v4054_v0  ;;  %v3416_v28 = vmul.f32 0.044677734, %v3288_v3  ;;  %v2570_v2 = vpack.c.bf16 %v2318_v23, %v2229_v47  ;;  %v10294_v10 = vpop.eup %7232  ;;  %v3417_v7 = vmul.f32 0.044677734, %v3289_v30 }
 0x27b   : > { %12187 = vst [vmem:[#allocation113_spill] sm:$0xff] %v10288_v21  ;;  %v3098_v57 = vmul.f32 %v2970_v15, %v10268_v45  ;;  %v3099_v56 = vmul.f32 %v2971_v51, %v10274_v26  ;;  %v2780_v58 = vmul.f32 %v10288_v21, %v10288_v21  ;;  %7236 = vtanh.f32 %v4245_v24 }
 0x27c   : > { %12188 = vst [vmem:[#allocation114_spill] sm:$0xff] %v10292_v39  ;;  %v4246_v40 = vunpack.c.l.bf16 %v4166_v50  ;;  %v2781_v34 = vmul.f32 %v10292_v39, %v10292_v39  ;;  %v10302_v62 = vunpack.c.l.bf16 %v2570_v2  ;;  %v3527_v18 = vpack.c.bf16 %v3417_v7, %v3416_v28  ;;  %v2406_v7 = vpop.f32.mrf.mxu2 }
 0x27d   : > { %v3208_v35 = vpack.c.bf16 %v3099_v56, %v3098_v57  ;;  %v10304_v47 = vunpack.c.h.bf16 %v2570_v2  ;;  %v1970_v30 = vadd.f32 %v10097_v60, %v10245_v42  ;;  %v10308_v15 = vpop.eup %7234  ;;  %v4247_v51 = vunpack.c.h.bf16 %v4166_v50  ;;  %v2495_v57 = vpop.f32.mrf.mxu3 }
 0x27e   : > { %12189 = vst [vmem:[#allocation115_spill] sm:$0xff] %v10302_v62  ;;  %v2889_v52 = vpack.c.bf16 %v2781_v34, %v2780_v58  ;;  %v2782_v24 = vmul.f32 %v10302_v62, %v10302_v62  ;;  %v1971_v41 = vadd.f32 %v10097_v60, %v10262_v54  ;;  %7238 = vtanh.f32 %v4246_v40 }
 0x27f   : > { %12190 = vst [vmem:[#allocation116_spill] sm:$0xff] %v10304_v47  ;;  %v3608_v23 = vunpack.c.l.bf16 %v3527_v18  ;;  %v3609_v0 = vunpack.c.h.bf16 %v3527_v18  ;;  %v3290_v36 = vunpack.c.l.bf16 %v3208_v35  ;;  %v3291_v3 = vunpack.c.h.bf16 %v3208_v35 }
 0x280   : > { %12191 = vst [vmem:[#allocation117_spill] sm:$0xff] %v10308_v15  ;;  %v2972_v28 = vunpack.c.l.bf16 %v2889_v52  ;;  %v2973_v2 = vunpack.c.h.bf16 %v2889_v52  ;;  %v2783_v42 = vmul.f32 %v10304_v47, %v10304_v47  ;;  %v1989_v34 = vpack.c.bf16 %v1971_v41, %v1970_v30 }
 0x281   : > { %v3736_v50 = vadd.f32 %v3608_v23, %v10254_v13  ;;  %v3737_v56 = vadd.f32 %v3609_v0, %v10258_v17  ;;  %v3418_v58 = vmul.f32 0.044677734, %v3290_v36  ;;  %v10318_v25 = vpop.eup %7236  ;;  %v3419_v54 = vmul.f32 0.044677734, %v3291_v3 }
 0x282   : > { %v3100_v40 = vmul.f32 %v2972_v28, %v10288_v21  ;;  %v3101_v18 = vmul.f32 %v2973_v2, %v10292_v39  ;;  %v2890_v35 = vpack.c.bf16 %v2783_v42, %v2782_v24  ;;  %7240 = vtanh.f32 %v4247_v51  ;;  %2267 = vmatmul.bf16.gmra.mxu0 %v1989_v34  ;;  %2356 = vmatmul.bf16.gmra.mxu1 %v1989_v34 }
 0x283   : > { %v3847_v52 = vpack.c.bf16 %v3737_v56, %v3736_v50  ;;  %v2407_v15 = vadd.f32 %v2406_v7, %v9605_v29  ;;  %v2496_v23 = vadd.f32 %v2495_v57, %v9608_v22  ;;  %v3528_v13 = vpack.c.bf16 %v3419_v54, %v3418_v58  ;;  %2445 = vmatmul.bf16.gmra.mxu2 %v1989_v34  ;;  %v2230_v57 = vpop.f32.mrf.mxu0 }
 0x284   : > { %v3209_v0 = vpack.c.bf16 %v3101_v18, %v3100_v40  ;;  %v2974_v36 = vunpack.c.l.bf16 %v2890_v35  ;;  %v2975_v30 = vunpack.c.h.bf16 %v2890_v35  ;;  %2534 = vmatmul.bf16.gmra.mxu3 %v1989_v34  ;;  %v10324_v41 = vpop.eup %7238  ;;  %v10328_v51 = vmul.f32 %v9964_v33, %v10048_v46  ;;  %v2319_v40 = vpop.f32.mrf.mxu1 }
 0x285   : > { %12192 = vst [vmem:[#allocation118_spill] sm:$0xff] %v10324_v41  ;;  %v3928_v3 = vunpack.c.l.bf16 %v3847_v52  ;;  %v3929_v28 = vunpack.c.h.bf16 %v3847_v52  ;;  %v2571_v2 = vpack.c.bf16 %v2496_v23, %v2407_v15  ;;  %v3610_v24 = vunpack.c.l.bf16 %v3528_v13 }
 0x286   : > { %v3611_v42 = vunpack.c.h.bf16 %v3528_v13  ;;  %v3292_v7 = vunpack.c.l.bf16 %v3209_v0  ;;  %v3293_v50 = vunpack.c.h.bf16 %v3209_v0  ;;  %v3102_v54 = vmul.f32 %v2974_v36, %v10302_v62 }
 0x287   : > { %v4056_v56 = vmul.f32 0.796875, %v3928_v3  ;;  %v4057_v58 = vmul.f32 0.796875, %v3929_v28  ;;  %v3103_v34 = vmul.f32 %v2975_v30, %v10304_v47  ;;  %v3738_v18 = vadd.f32 %v3610_v24, %v10268_v45 }
 0x288   : > { %v3739_v15 = vadd.f32 %v3611_v42, %v10274_v26  ;;  %v3420_v35 = vmul.f32 0.044677734, %v3292_v7  ;;  %v3421_v52 = vmul.f32 0.044677734, %v3293_v50  ;;  %v10334_v33 = vpop.eup %7240  ;;  %v10336_v23 = vunpack.c.l.bf16 %v2571_v2 }
 0x289   : > { %12193 = vst [vmem:[#allocation119_spill] sm:$0xff] %v10334_v33  ;;  %v4167_v46 = vpack.c.bf16 %v4057_v58, %v4056_v56  ;;  %v3210_v13 = vpack.c.bf16 %v3103_v34, %v3102_v54  ;;  %v10338_v0 = vunpack.c.h.bf16 %v2571_v2  ;;  %v2231_v36 = vadd.f32 %v2230_v57, %v9528_v19  ;;  %v2408_v54 = vpop.f32.mrf.mxu2  ;;  %v2497_v34 = vpop.f32.mrf.mxu3 }
 0x28a   : > { %12194 = vst [vmem:[#allocation120_spill] sm:$0xff] %v10336_v23  ;;  %v3848_v3 = vpack.c.bf16 %v3739_v15, %v3738_v18  ;;  %v3529_v28 = vpack.c.bf16 %v3421_v52, %v3420_v35  ;;  %v2320_v30 = vadd.f32 %v2319_v40, %v9549_v38  ;;  %v2784_v2 = vmul.f32 %v10336_v23, %v10336_v23 }
 0x28b   : > { %12195 = vst [vmem:[#allocation121_spill] sm:$0xff] %v10338_v0  ;;  %v4248_v17 = vunpack.c.l.bf16 %v4167_v46  ;;  %v4249_v24 = vunpack.c.h.bf16 %v4167_v46  ;;  %v3294_v45 = vunpack.c.l.bf16 %v3210_v13  ;;  %v3295_v42 = vunpack.c.h.bf16 %v3210_v13  ;;  %v2233_v15 = vpop.f32.mrf.mxu0 }
 0x28c   : > { %v3930_v7 = vunpack.c.l.bf16 %v3848_v3  ;;  %v3931_v50 = vunpack.c.h.bf16 %v3848_v3  ;;  %v3612_v26 = vunpack.c.l.bf16 %v3529_v28  ;;  %v3613_v33 = vunpack.c.h.bf16 %v3529_v28 }
 0x28d   : > { %7242 = vtanh.f32 %v4248_v17  ;;  %v3422_v56 = vmul.f32 0.044677734, %v3294_v45  ;;  %v3423_v58 = vmul.f32 0.044677734, %v3295_v42  ;;  %v2785_v46 = vmul.f32 %v10338_v0, %v10338_v0 }
 0x28e   : > { %7244 = vtanh.f32 %v4249_v24  ;;  %v4058_v57 = vmul.f32 0.796875, %v3930_v7  ;;  %v4059_v18 = vmul.f32 0.796875, %v3931_v50  ;;  %v3740_v40 = vadd.f32 %v3612_v26, %v10288_v21 }
 0x28f   : > { %v3741_v35 = vadd.f32 %v3613_v33, %v10292_v39  ;;  %v3530_v52 = vpack.c.bf16 %v3423_v58, %v3422_v56  ;;  %v2572_v17 = vpack.c.bf16 %v2320_v30, %v2231_v36  ;;  %v2409_v13 = vadd.f32 %v2408_v54, %v9605_v29 }
 0x290   : > { %v4168_v45 = vpack.c.bf16 %v4059_v18, %v4058_v57  ;;  %v2498_v3 = vadd.f32 %v2497_v34, %v9608_v22  ;;  %v2234_v28 = vadd.f32 %v2233_v15, %v9528_v19  ;;  %v2891_v50 = vpack.c.bf16 %v2785_v46, %v2784_v2 }
 0x291   : > { %v3849_v24 = vpack.c.bf16 %v3741_v35, %v3740_v40  ;;  %v3614_v42 = vunpack.c.l.bf16 %v3530_v52  ;;  %v3615_v7 = vunpack.c.h.bf16 %v3530_v52  ;;  %v10351_v41 = vunpack.c.l.bf16 %v2572_v17  ;;  %v2322_v40 = vpop.f32.mrf.mxu1 }
 0x292   : > { %v4250_v26 = vunpack.c.l.bf16 %v4168_v45  ;;  %v4251_v21 = vunpack.c.h.bf16 %v4168_v45  ;;  %v10353_v33 = vunpack.c.h.bf16 %v2572_v17  ;;  %v2976_v57 = vunpack.c.l.bf16 %v2891_v50 }
 0x293   : > { %12196 = vst [vmem:[#allocation122_spill] sm:$0xff] %v10351_v41  ;;  %v10355_v56 = vpop.eup %7242  ;;  %v3932_v36 = vunpack.c.l.bf16 %v3849_v24  ;;  %v3933_v30 = vunpack.c.h.bf16 %v3849_v24  ;;  %v3742_v58 = vadd.f32 %v3614_v42, %v10302_v62  ;;  %v3743_v54 = vadd.f32 %v3615_v7, %v10304_v47 }
 0x294   : > { %12197 = vst [vmem:[#allocation123_spill] sm:$0xff] %v10353_v33  ;;  %v10359_v34 = vpop.eup %7244  ;;  %7246 = vtanh.f32 %v4250_v26  ;;  %v2977_v18 = vunpack.c.h.bf16 %v2891_v50  ;;  %v2786_v2 = vmul.f32 %v10351_v41, %v10351_v41  ;;  %v3104_v46 = vmul.f32 %v2976_v57, %v10336_v23 }
 0x295   : > { %12198 = vst [vmem:[#allocation124_spill] sm:$0xff] %v10355_v56  ;;  %7248 = vtanh.f32 %v4251_v21  ;;  %v4060_v15 = vmul.f32 0.796875, %v3932_v36  ;;  %v4061_v35 = vmul.f32 0.796875, %v3933_v30  ;;  %v3850_v52 = vpack.c.bf16 %v3743_v54, %v3742_v58 }
 0x296   : > { %12199 = vst [vmem:[#allocation125_spill] sm:$0xff] %v10359_v34  ;;  %v3105_v17 = vmul.f32 %v2977_v18, %v10338_v0  ;;  %v2787_v45 = vmul.f32 %v10353_v33, %v10353_v33  ;;  %v2573_v24 = vpack.c.bf16 %v2498_v3, %v2409_v13  ;;  %v2323_v50 = vadd.f32 %v2322_v40, %v9549_v38 }
 0x297   : > { %v4169_v42 = vpack.c.bf16 %v4061_v35, %v4060_v15  ;;  %v3934_v7 = vunpack.c.l.bf16 %v3850_v52  ;;  %v3935_v26 = vunpack.c.h.bf16 %v3850_v52 }
 0x298   : > { %v3211_v47 = vpack.c.bf16 %v3105_v17, %v3104_v46  ;;  %v2892_v62 = vpack.c.bf16 %v2787_v45, %v2786_v2  ;;  %v10368_v39 = vunpack.c.l.bf16 %v2573_v24  ;;  %v10370_v21 = vunpack.c.h.bf16 %v2573_v24 }
 0x299   : > { %v4252_v36 = vunpack.c.l.bf16 %v4169_v42  ;;  %v4253_v30 = vunpack.c.h.bf16 %v4169_v42  ;;  %v4062_v58 = vmul.f32 0.796875, %v3934_v7  ;;  %v4063_v54 = vmul.f32 0.796875, %v3935_v26  ;;  %v10385_v26 = vld [vmem:[%s12036_s13] ss:$0 sm:$0xff] }
 0x29a   : > { %12200 = vst [vmem:[#allocation126_spill] sm:$0xff] %v10368_v39  ;;  %v10372_v57 = vpop.eup %7246  ;;  %v3296_v18 = vunpack.c.l.bf16 %v3211_v47  ;;  %v3297_v34 = vunpack.c.h.bf16 %v3211_v47  ;;  %v2978_v13 = vunpack.c.l.bf16 %v2892_v62  ;;  %v2979_v3 = vunpack.c.h.bf16 %v2892_v62 }
 0x29b   : > { %12201 = vst [vmem:[#allocation127_spill] sm:$0xff] %v10370_v21  ;;  %v10374_v15 = vpop.eup %7248  ;;  %7250 = vtanh.f32 %v4252_v36  ;;  %v4170_v40 = vpack.c.bf16 %v4063_v54, %v4062_v58  ;;  %v2788_v2 = vmul.f32 %v10368_v39, %v10368_v39  ;;  %v2789_v35 = vmul.f32 %v10370_v21, %v10370_v21 }
 0x29c   : > { %12202 = vst [vmem:[#allocation128_spill] sm:$0xff] %v10372_v57  ;;  %7252 = vtanh.f32 %v4253_v30  ;;  %v3424_v52 = vmul.f32 0.044677734, %v3296_v18  ;;  %v3425_v46 = vmul.f32 0.044677734, %v3297_v34  ;;  %v3106_v17 = vmul.f32 %v2978_v13, %v10351_v41 }
 0x29d   : > { %12203 = vst [vmem:[#allocation129_spill] sm:$0xff] %v10374_v15  ;;  %v4254_v45 = vunpack.c.l.bf16 %v4170_v40  ;;  %v4255_v24 = vunpack.c.h.bf16 %v4170_v40  ;;  %v3107_v47 = vmul.f32 %v2979_v3, %v10353_v33  ;;  %v2893_v62 = vpack.c.bf16 %v2789_v35, %v2788_v2 }
 0x29e   : > { %v3531_v42 = vpack.c.bf16 %v3425_v46, %v3424_v52  ;;  %v2574_v7 = vpack.c.bf16 %v2323_v50, %v2234_v28  ;;  %v1937_v36 = vmul.f32 %v10385_v26, %v10043_v44  ;;  %v1972_v34 = vadd.f32 %v10097_v60, %v10328_v51 }
 0x29f   : > { %7254 = vtanh.f32 %v4254_v45  ;;  %v3212_v30 = vpack.c.bf16 %v3107_v47, %v3106_v17  ;;  %v2980_v58 = vunpack.c.l.bf16 %v2893_v62  ;;  %v2981_v54 = vunpack.c.h.bf16 %v2893_v62 }
 0x2a0   : > { %7256 = vtanh.f32 %v4255_v24  ;;  %v3616_v18 = vunpack.c.l.bf16 %v3531_v42  ;;  %v3617_v13 = vunpack.c.h.bf16 %v3531_v42  ;;  %v10391_v3 = vunpack.c.l.bf16 %v2574_v7  ;;  %v6740_v42 = vld [vmem:[#allocation11 + $0x80] sm:$0xff] }
 0x2a1   : > { %v10393_v28 = vpop.eup %7250  ;;  %v3298_v50 = vunpack.c.l.bf16 %v3212_v30  ;;  %v3299_v40 = vunpack.c.h.bf16 %v3212_v30  ;;  %v3108_v2 = vmul.f32 %v2980_v58, %v10368_v39  ;;  %v3109_v44 = vmul.f32 %v2981_v54, %v10370_v21  ;;  %v6724_v30 = vld [vmem:[#allocation11] sm:$0xff]  ;;  %v2411_v54 = vpop.f32.mrf.mxu2  ;;  %5939 = vmatpush.bf16.msrb.mxu2 %v6740_v42 }
 0x2a2   : > { %12204 = vst [vmem:[#allocation130_spill] sm:$0xff] %v10391_v3  ;;  %v10397_v35 = vpop.eup %7252  ;;  %v3744_v51 = vadd.f32 %v3616_v18, %v10336_v23  ;;  %v3745_v52 = vadd.f32 %v3617_v13, %v10338_v0  ;;  %v10401_v46 = vunpack.c.h.bf16 %v2574_v7  ;;  %v2790_v17 = vmul.f32 %v10391_v3, %v10391_v3  ;;  %v6748_v58 = vld [vmem:[#allocation11 + $0xc0] sm:$0xff]  ;;  %5761 = vmatpush.bf16.msrb.mxu0 %v6724_v30 }
 0x2a3   : > { %12205 = vst [vmem:[#allocation131_spill] sm:$0xff] %v10393_v28  ;;  %v3426_v45 = vmul.f32 0.044677734, %v3298_v50  ;;  %v3427_v24 = vmul.f32 0.044677734, %v3299_v40  ;;  %v3213_v47 = vpack.c.bf16 %v3109_v44, %v3108_v2  ;;  %v1973_v62 = vadd.f32 %v10097_v60, %v1937_v36  ;;  %v2500_v28 = vpop.f32.mrf.mxu3  ;;  %6028 = vmatpush.bf16.msrb.mxu3 %v6748_v58 }
 0x2a4   : > { %12206 = vst [vmem:[#allocation132_spill] sm:$0xff] %v10397_v35  ;;  %v3851_v35 = vpack.c.bf16 %v3745_v52, %v3744_v51  ;;  %v2791_v18 = vmul.f32 %v10401_v46, %v10401_v46  ;;  %v2412_v7 = vadd.f32 %v2411_v54, %v9605_v29  ;;  %v2501_v13 = vadd.f32 %v2500_v28, %v9608_v22 }
 0x2a5   : > { %12207 = vst [vmem:[#allocation133_spill] sm:$0xff] %v10401_v46  ;;  %v10410_v0 = vpop.eup %7254  ;;  %v3532_v50 = vpack.c.bf16 %v3427_v24, %v3426_v45  ;;  %v3300_v40 = vunpack.c.l.bf16 %v3213_v47  ;;  %v3301_v2 = vunpack.c.h.bf16 %v3213_v47  ;;  %v1990_v44 = vpack.c.bf16 %v1973_v62, %v1972_v34 }
 0x2a6   : > { %v10412_v60 = vpop.eup %7256  ;;  %v3936_v36 = vunpack.c.l.bf16 %v3851_v35  ;;  %v3937_v23 = vunpack.c.h.bf16 %v3851_v35  ;;  %v2894_v51 = vpack.c.bf16 %v2791_v18, %v2790_v17  ;;  %v2575_v52 = vpack.c.bf16 %v2501_v13, %v2412_v7 }
 0x2a7   : > { %12208 = vst [vmem:[#allocation134_spill] sm:$0xff] %v10412_v60  ;;  %v3618_v56 = vunpack.c.l.bf16 %v3532_v50  ;;  %v3619_v15 = vunpack.c.h.bf16 %v3532_v50  ;;  %v3428_v54 = vmul.f32 0.044677734, %v3300_v40  ;;  %v3429_v57 = vmul.f32 0.044677734, %v3301_v2  ;;  %2272 = vmatmul.bf16.gmra.mxu0 %v1990_v44  ;;  %2361 = vmatmul.bf16.gmra.mxu1 %v1990_v44 }
 0x2a8   : > { %v4064_v28 = vmul.f32 0.796875, %v3936_v36  ;;  %v4065_v45 = vmul.f32 0.796875, %v3937_v23  ;;  %v2982_v24 = vunpack.c.l.bf16 %v2894_v51  ;;  %v2983_v47 = vunpack.c.h.bf16 %v2894_v51  ;;  %2450 = vmatmul.bf16.gmra.mxu2 %v1990_v44  ;;  %2539 = vmatmul.bf16.gmra.mxu3 %v1990_v44  ;;  %v2235_v44 = vpop.f32.mrf.mxu0 }
 0x2a9   : > { %v3746_v34 = vadd.f32 %v3618_v56, %v10351_v41  ;;  %v3747_v62 = vadd.f32 %v3619_v15, %v10353_v33  ;;  %v3533_v35 = vpack.c.bf16 %v3429_v57, %v3428_v54  ;;  %v10416_v17 = vunpack.c.l.bf16 %v2575_v52  ;;  %v6732_v15 = vld [vmem:[#allocation11 + $0x40] sm:$0xff] }
 0x2aa   : > { %v4171_v42 = vpack.c.bf16 %v4065_v45, %v4064_v28  ;;  %v3110_v30 = vmul.f32 %v2982_v24, %v10391_v3  ;;  %v3111_v58 = vmul.f32 %v2983_v47, %v10401_v46  ;;  %v10420_v18 = vunpack.c.h.bf16 %v2575_v52  ;;  %5850 = vmatpush.bf16.msrb.mxu1 %v6732_v15  ;;  %v2324_v47 = vpop.f32.mrf.mxu1 }
 0x2ab   : > { %12209 = vst [vmem:[#allocation135_spill] sm:$0xff] %v10416_v17  ;;  %v3852_v7 = vpack.c.bf16 %v3747_v62, %v3746_v34  ;;  %v3620_v23 = vunpack.c.l.bf16 %v3533_v35  ;;  %v3621_v13 = vunpack.c.h.bf16 %v3533_v35  ;;  %v2792_v50 = vmul.f32 %v10416_v17, %v10416_v17 }
 0x2ac   : > { %12210 = vst [vmem:[#allocation136_spill] sm:$0xff] %v10420_v18  ;;  %v4256_v40 = vunpack.c.l.bf16 %v4171_v42  ;;  %v4257_v56 = vunpack.c.h.bf16 %v4171_v42  ;;  %v3214_v2 = vpack.c.bf16 %v3111_v58, %v3110_v30  ;;  %v2793_v57 = vmul.f32 %v10420_v18, %v10420_v18 }
 0x2ad   : > { %v3938_v36 = vunpack.c.l.bf16 %v3852_v7  ;;  %v3939_v51 = vunpack.c.h.bf16 %v3852_v7  ;;  %v3748_v54 = vadd.f32 %v3620_v23, %v10368_v39  ;;  %v3749_v52 = vadd.f32 %v3621_v13, %v10370_v21 }
 0x2ae   : > { %7258 = vtanh.f32 %v4256_v40  ;;  %v3302_v28 = vunpack.c.l.bf16 %v3214_v2  ;;  %v3303_v45 = vunpack.c.h.bf16 %v3214_v2  ;;  %v2895_v24 = vpack.c.bf16 %v2793_v57, %v2792_v50  ;;  %v2502_v57 = vpop.f32.mrf.mxu3 }
 0x2af   : > { %7260 = vtanh.f32 %v4257_v56  ;;  %v4066_v34 = vmul.f32 0.796875, %v3938_v36  ;;  %v4067_v62 = vmul.f32 0.796875, %v3939_v51  ;;  %v3853_v35 = vpack.c.bf16 %v3749_v52, %v3748_v54  ;;  %v2413_v56 = vpop.f32.mrf.mxu2 }
 0x2b0   : > { %v3430_v42 = vmul.f32 0.044677734, %v3302_v28  ;;  %v3431_v30 = vmul.f32 0.044677734, %v3303_v45  ;;  %v2984_v58 = vunpack.c.l.bf16 %v2895_v24  ;;  %v2985_v33 = vunpack.c.h.bf16 %v2895_v24 }
 0x2b1   : > { %v4172_v41 = vpack.c.bf16 %v4067_v62, %v4066_v34  ;;  %v3940_v7 = vunpack.c.l.bf16 %v3853_v35  ;;  %v3941_v60 = vunpack.c.h.bf16 %v3853_v35  ;;  %v2236_v23 = vadd.f32 %v2235_v44, %v9528_v19 }
 0x2b2   : > { %v3534_v13 = vpack.c.bf16 %v3431_v30, %v3430_v42  ;;  %v3112_v40 = vmul.f32 %v2984_v58, %v10416_v17  ;;  %v3113_v50 = vmul.f32 %v2985_v33, %v10420_v18  ;;  %v2325_v2 = vadd.f32 %v2324_v47, %v9549_v38  ;;  %v2238_v42 = vpop.f32.mrf.mxu0 }
 0x2b3   : > { %v4258_v15 = vunpack.c.l.bf16 %v4172_v41  ;;  %v4259_v36 = vunpack.c.h.bf16 %v4172_v41  ;;  %v4068_v51 = vmul.f32 0.796875, %v3940_v7  ;;  %v4069_v54 = vmul.f32 0.796875, %v3941_v60 }
 0x2b4   : > { %v10432_v52 = vpop.eup %7258  ;;  %v3622_v28 = vunpack.c.l.bf16 %v3534_v13  ;;  %v3623_v45 = vunpack.c.h.bf16 %v3534_v13  ;;  %v3215_v24 = vpack.c.bf16 %v3113_v50, %v3112_v40  ;;  %v2576_v34 = vpack.c.bf16 %v2325_v2, %v2236_v23 }
 0x2b5   : > { %v10434_v44 = vpop.eup %7260  ;;  %7262 = vtanh.f32 %v4258_v15  ;;  %v4173_v62 = vpack.c.bf16 %v4069_v54, %v4068_v51  ;;  %v2414_v33 = vadd.f32 %v2413_v56, %v9605_v29  ;;  %v2503_v47 = vadd.f32 %v2502_v57, %v9608_v22  ;;  %v2327_v56 = vpop.f32.mrf.mxu1 }
 0x2b6   : > { %12211 = vst [vmem:[#allocation137_spill] sm:$0xff] %v10434_v44  ;;  %7264 = vtanh.f32 %v4259_v36  ;;  %v3750_v35 = vadd.f32 %v3622_v28, %v10391_v3  ;;  %v3751_v41 = vadd.f32 %v3623_v45, %v10401_v46  ;;  %v3304_v60 = vunpack.c.l.bf16 %v3215_v24 }
 0x2b7   : > { %v4260_v30 = vunpack.c.l.bf16 %v4173_v62  ;;  %v4261_v58 = vunpack.c.h.bf16 %v4173_v62  ;;  %v3305_v7 = vunpack.c.h.bf16 %v3215_v24  ;;  %v10440_v13 = vunpack.c.l.bf16 %v2576_v34 }
 0x2b8   : > { %v3854_v23 = vpack.c.bf16 %v3751_v41, %v3750_v35  ;;  %v3432_v40 = vmul.f32 0.044677734, %v3304_v60  ;;  %v10442_v50 = vunpack.c.h.bf16 %v2576_v34  ;;  %v2577_v2 = vpack.c.bf16 %v2503_v47, %v2414_v33 }
 0x2b9   : > { %12212 = vst [vmem:[#allocation138_spill] sm:$0xff] %v10440_v13  ;;  %7266 = vtanh.f32 %v4260_v30  ;;  %v3433_v57 = vmul.f32 0.044677734, %v3305_v7  ;;  %v2794_v15 = vmul.f32 %v10440_v13, %v10440_v13  ;;  %v2239_v36 = vadd.f32 %v2238_v42, %v9528_v19 }
 0x2ba   : > { %12213 = vst [vmem:[#allocation139_spill] sm:$0xff] %v10442_v50  ;;  %7268 = vtanh.f32 %v4261_v58  ;;  %v3942_v51 = vunpack.c.l.bf16 %v3854_v23  ;;  %v3943_v54 = vunpack.c.h.bf16 %v3854_v23  ;;  %v2795_v28 = vmul.f32 %v10442_v50, %v10442_v50 }
 0x2bb   : > { %v10449_v45 = vpop.eup %7262  ;;  %v3535_v24 = vpack.c.bf16 %v3433_v57, %v3432_v40  ;;  %v10451_v34 = vunpack.c.l.bf16 %v2577_v2  ;;  %v10453_v62 = vunpack.c.h.bf16 %v2577_v2  ;;  %v2328_v33 = vadd.f32 %v2327_v56, %v9549_v38 }
 0x2bc   : > { %v10456_v47 = vpop.eup %7264  ;;  %v4070_v35 = vmul.f32 0.796875, %v3942_v51  ;;  %v4071_v41 = vmul.f32 0.796875, %v3943_v54  ;;  %v2896_v60 = vpack.c.bf16 %v2795_v28, %v2794_v15  ;;  %v1938_v42 = vmul.f32 %v10385_v26, %v10211_v9 }
 0x2bd   : > { %12214 = vst [vmem:[#allocation140_spill] sm:$0xff] %v10451_v34  ;;  %v3624_v30 = vunpack.c.l.bf16 %v3535_v24  ;;  %v3625_v58 = vunpack.c.h.bf16 %v3535_v24  ;;  %v2796_v7 = vmul.f32 %v10451_v34, %v10451_v34  ;;  %v2797_v23 = vmul.f32 %v10453_v62, %v10453_v62 }
 0x2be   : > { %12215 = vst [vmem:[#allocation141_spill] sm:$0xff] %v10453_v62  ;;  %v4174_v40 = vpack.c.bf16 %v4071_v41, %v4070_v35  ;;  %v2986_v2 = vunpack.c.l.bf16 %v2896_v60  ;;  %v2987_v57 = vunpack.c.h.bf16 %v2896_v60  ;;  %v2578_v56 = vpack.c.bf16 %v2328_v33, %v2239_v36 }
 0x2bf   : > { %v10464_v46 = vpop.eup %7266  ;;  %v3752_v51 = vadd.f32 %v3624_v30, %v10416_v17  ;;  %v3753_v15 = vadd.f32 %v3625_v58, %v10420_v18  ;;  %v2897_v54 = vpack.c.bf16 %v2797_v23, %v2796_v7  ;;  %v1939_v9 = vmul.f32 %v10385_v26, %v10221_v5  ;;  %v7437_v5 = vld [vmem:[%s12038_s5] ss:$0 sm:$0xff] }
 0x2c0   : > { %12216 = vst [vmem:[#allocation142_spill] sm:$0xff] %v10464_v46  ;;  %v10470_v28 = vpop.eup %7268  ;;  %v4262_v24 = vunpack.c.l.bf16 %v4174_v40  ;;  %v4263_v3 = vunpack.c.h.bf16 %v4174_v40  ;;  %v3114_v21 = vmul.f32 %v2986_v2, %v10440_v13  ;;  %v3115_v35 = vmul.f32 %v2987_v57, %v10442_v50 }
 0x2c1   : > { %12217 = vst [vmem:[#allocation143_spill] sm:$0xff] %v10470_v28  ;;  %v3855_v41 = vpack.c.bf16 %v3753_v15, %v3752_v51  ;;  %v2988_v36 = vunpack.c.l.bf16 %v2897_v54  ;;  %v2989_v33 = vunpack.c.h.bf16 %v2897_v54  ;;  %v10474_v60 = vunpack.c.l.bf16 %v2578_v56 }
 0x2c2   : > { %7270 = vtanh.f32 %v4262_v24  ;;  %v3216_v30 = vpack.c.bf16 %v3115_v35, %v3114_v21  ;;  %v10476_v58 = vunpack.c.h.bf16 %v2578_v56  ;;  %v1974_v26 = vadd.f32 %v7437_v5, %v1938_v42  ;;  %v2416_v21 = vpop.f32.mrf.mxu2  ;;  %v2505_v56 = vpop.f32.mrf.mxu3 }
 0x2c3   : > { %12218 = vst [vmem:[#allocation144_spill] sm:$0xff] %v10474_v60  ;;  %7272 = vtanh.f32 %v4263_v3  ;;  %v3944_v7 = vunpack.c.l.bf16 %v3855_v41  ;;  %v3945_v23 = vunpack.c.h.bf16 %v3855_v41  ;;  %v3116_v40 = vmul.f32 %v2988_v36, %v10451_v34 }
 0x2c4   : > { %12219 = vst [vmem:[#allocation145_spill] sm:$0xff] %v10476_v58  ;;  %v3306_v2 = vunpack.c.l.bf16 %v3216_v30  ;;  %v3307_v57 = vunpack.c.h.bf16 %v3216_v30  ;;  %v3117_v51 = vmul.f32 %v2989_v33, %v10453_v62  ;;  %v2798_v15 = vmul.f32 %v10474_v60, %v10474_v60 }
 0x2c5   : > { %v4072_v54 = vmul.f32 0.796875, %v3944_v7  ;;  %v4073_v24 = vmul.f32 0.796875, %v3945_v23  ;;  %v2799_v35 = vmul.f32 %v10476_v58, %v10476_v58  ;;  %v1975_v42 = vadd.f32 %v7437_v5, %v1939_v9 }
 0x2c6   : > { %v3434_v3 = vmul.f32 0.044677734, %v3306_v2  ;;  %v3435_v18 = vmul.f32 0.044677734, %v3307_v57  ;;  %v3217_v41 = vpack.c.bf16 %v3117_v51, %v3116_v40  ;;  %v2417_v36 = vadd.f32 %v2416_v21, %v9605_v29 }
 0x2c7   : > { %v4175_v17 = vpack.c.bf16 %v4073_v24, %v4072_v54  ;;  %v2898_v30 = vpack.c.bf16 %v2799_v35, %v2798_v15  ;;  %v1991_v39 = vpack.c.bf16 %v1975_v42, %v1974_v26  ;;  %v2506_v33 = vadd.f32 %v2505_v56, %v9608_v22  ;;  %v2240_v24 = vpop.f32.mrf.mxu0  ;;  %v2329_v35 = vpop.f32.mrf.mxu1 }
 0x2c8   : > { %v10489_v28 = vpop.eup %7270  ;;  %v3536_v46 = vpack.c.bf16 %v3435_v18, %v3434_v3  ;;  %v3308_v44 = vunpack.c.l.bf16 %v3217_v41  ;;  %v3309_v7 = vunpack.c.h.bf16 %v3217_v41  ;;  %v10493_v23 = vpack.c.bf16 %v9798_v55, %v9784_v14 }
 0x2c9   : > { %v10495_v9 = vpop.eup %7272  ;;  %v4264_v5 = vunpack.c.l.bf16 %v4175_v17  ;;  %v4265_v40 = vunpack.c.h.bf16 %v4175_v17  ;;  %v2990_v2 = vunpack.c.l.bf16 %v2898_v30  ;;  %v2991_v57 = vunpack.c.h.bf16 %v2898_v30  ;;  %2277 = vmatmul.bf16.gmra.mxu0 %v1991_v39  ;;  %2366 = vmatmul.bf16.gmra.mxu1 %v1991_v39 }
 0x2ca   : > { %v3626_v26 = vunpack.c.l.bf16 %v3536_v46  ;;  %v3627_v51 = vunpack.c.h.bf16 %v3536_v46  ;;  %v3436_v15 = vmul.f32 0.044677734, %v3308_v44  ;;  %v3437_v21 = vmul.f32 0.044677734, %v3309_v7  ;;  %2455 = vmatmul.bf16.gmra.mxu2 %v1991_v39  ;;  %2544 = vmatmul.bf16.gmra.mxu3 %v1991_v39 }
 0x2cb   : > { %7274 = vtanh.f32 %v4264_v5  ;;  %v3118_v18 = vmul.f32 %v2990_v2, %v10474_v60  ;;  %v3119_v14 = vmul.f32 %v2991_v57, %v10476_v58  ;;  %v2579_v55 = vpack.c.bf16 %v2506_v33, %v2417_v36 }
 0x2cc   : > { %7276 = vtanh.f32 %v4265_v40  ;;  %v3754_v56 = vadd.f32 %v3626_v26, %v10440_v13  ;;  %v3755_v17 = vadd.f32 %v3627_v51, %v10442_v50  ;;  %v3537_v54 = vpack.c.bf16 %v3437_v21, %v3436_v15 }
 0x2cd   : > { %v3218_v42 = vpack.c.bf16 %v3119_v14, %v3118_v18  ;;  %v10501_v46 = vunpack.c.l.bf16 %v2579_v55  ;;  %v10503_v44 = vunpack.c.h.bf16 %v2579_v55  ;;  %v2241_v39 = vadd.f32 %v2240_v24, %v9528_v19 }
 0x2ce   : > { %v3856_v3 = vpack.c.bf16 %v3755_v17, %v3754_v56  ;;  %v3628_v41 = vunpack.c.l.bf16 %v3537_v54  ;;  %v3629_v30 = vunpack.c.h.bf16 %v3537_v54  ;;  %v2330_v36 = vadd.f32 %v2329_v35, %v9549_v38 }
 0x2cf   : > { %12220 = vst [vmem:[#allocation146_spill] sm:$0xff] %v10501_v46  ;;  %v3310_v33 = vunpack.c.l.bf16 %v3218_v42  ;;  %v3311_v7 = vunpack.c.h.bf16 %v3218_v42  ;;  %v2800_v5 = vmul.f32 %v10501_v46, %v10501_v46  ;;  %v2801_v40 = vmul.f32 %v10503_v44, %v10503_v44 }
 0x2d0   : > { %12221 = vst [vmem:[#allocation147_spill] sm:$0xff] %v10503_v44  ;;  %v3946_v2 = vunpack.c.l.bf16 %v3856_v3  ;;  %v3947_v57 = vunpack.c.h.bf16 %v3856_v3  ;;  %v3756_v26 = vadd.f32 %v3628_v41, %v10451_v34  ;;  %v3757_v51 = vadd.f32 %v3629_v30, %v10453_v62 }
 0x2d1   : > { %v10513_v15 = vpop.eup %7274  ;;  %v3438_v21 = vmul.f32 0.044677734, %v3310_v33  ;;  %v3439_v18 = vmul.f32 0.044677734, %v3311_v7  ;;  %v2899_v14 = vpack.c.bf16 %v2801_v40, %v2800_v5  ;;  %v2580_v55 = vpack.c.bf16 %v2330_v36, %v2241_v39 }
 0x2d2   : > { %12222 = vst [vmem:[#allocation148_spill] sm:$0xff] %v10513_v15  ;;  %v10515_v56 = vpop.eup %7276  ;;  %v4074_v17 = vmul.f32 0.796875, %v3946_v2  ;;  %v4075_v54 = vmul.f32 0.796875, %v3947_v57  ;;  %v3857_v24 = vpack.c.bf16 %v3757_v51, %v3756_v26  ;;  %v10519_v35 = vpack.c.bf16 %v9848_v8, %v9826_v43  ;;  %v2418_v2 = vpop.f32.mrf.mxu2 }
 0x2d3   : > { %12223 = vst [vmem:[#allocation149_spill] sm:$0xff] %v10515_v56  ;;  %v3538_v42 = vpack.c.bf16 %v3439_v18, %v3438_v21  ;;  %v2992_v3 = vunpack.c.l.bf16 %v2899_v14  ;;  %v2993_v41 = vunpack.c.h.bf16 %v2899_v14  ;;  %v10521_v34 = vunpack.c.l.bf16 %v2580_v55 }
 0x2d4   : > { %v4176_v30 = vpack.c.bf16 %v4075_v54, %v4074_v17  ;;  %v3948_v62 = vunpack.c.l.bf16 %v3857_v24  ;;  %v3949_v33 = vunpack.c.h.bf16 %v3857_v24  ;;  %v10523_v7 = vunpack.c.h.bf16 %v2580_v55  ;;  %v2507_v55 = vpop.f32.mrf.mxu3 }
 0x2d5   : > { %12224 = vst [vmem:[#allocation150_spill] sm:$0xff] %v10521_v34  ;;  %v3630_v39 = vunpack.c.l.bf16 %v3538_v42  ;;  %v3631_v36 = vunpack.c.h.bf16 %v3538_v42  ;;  %v3120_v5 = vmul.f32 %v2992_v3, %v10501_v46  ;;  %v3121_v40 = vmul.f32 %v2993_v41, %v10503_v44 }
 0x2d6   : > { %12225 = vst [vmem:[#allocation151_spill] sm:$0xff] %v10523_v7  ;;  %v4266_v57 = vunpack.c.l.bf16 %v4176_v30  ;;  %v4267_v8 = vunpack.c.h.bf16 %v4176_v30  ;;  %v4076_v43 = vmul.f32 0.796875, %v3948_v62  ;;  %v4077_v26 = vmul.f32 0.796875, %v3949_v33 }
 0x2d7   : > { %v3758_v51 = vadd.f32 %v3630_v39, %v10474_v60  ;;  %v3759_v21 = vadd.f32 %v3631_v36, %v10476_v58  ;;  %v3219_v18 = vpack.c.bf16 %v3121_v40, %v3120_v5  ;;  %v2802_v14 = vmul.f32 %v10521_v34, %v10521_v34  ;;  %v2243_v60 = vpop.f32.mrf.mxu0 }
 0x2d8   : > { %7278 = vtanh.f32 %v4266_v57  ;;  %v4177_v17 = vpack.c.bf16 %v4077_v26, %v4076_v43  ;;  %v2803_v54 = vmul.f32 %v10523_v7, %v10523_v7  ;;  %v2419_v24 = vadd.f32 %v2418_v2, %v9605_v29 }
 0x2d9   : > { %7280 = vtanh.f32 %v4267_v8  ;;  %v3858_v42 = vpack.c.bf16 %v3759_v21, %v3758_v51  ;;  %v3312_v62 = vunpack.c.l.bf16 %v3219_v18  ;;  %v3313_v3 = vunpack.c.h.bf16 %v3219_v18  ;;  %v2332_v21 = vpop.f32.mrf.mxu1 }
 0x2da   : > { %v4268_v41 = vunpack.c.l.bf16 %v4177_v17  ;;  %v4269_v30 = vunpack.c.h.bf16 %v4177_v17  ;;  %v2900_v33 = vpack.c.bf16 %v2803_v54, %v2802_v14  ;;  %v2508_v39 = vadd.f32 %v2507_v55, %v9608_v22 }
 0x2db   : > { %v3950_v36 = vunpack.c.l.bf16 %v3858_v42  ;;  %v3951_v5 = vunpack.c.h.bf16 %v3858_v42  ;;  %v3440_v40 = vmul.f32 0.044677734, %v3312_v62  ;;  %v3441_v58 = vmul.f32 0.044677734, %v3313_v3 }
 0x2dc   : > { %7282 = vtanh.f32 %v4268_v41  ;;  %v2994_v57 = vunpack.c.l.bf16 %v2900_v33  ;;  %v2995_v43 = vunpack.c.h.bf16 %v2900_v33  ;;  %v2581_v26 = vpack.c.bf16 %v2508_v39, %v2419_v24 }
 0x2dd   : > { %7284 = vtanh.f32 %v4269_v30  ;;  %v4078_v2 = vmul.f32 0.796875, %v3950_v36  ;;  %v4079_v8 = vmul.f32 0.796875, %v3951_v5  ;;  %v3539_v51 = vpack.c.bf16 %v3441_v58, %v3440_v40 }
 0x2de   : > { %v10535_v18 = vpop.eup %7278  ;;  %v3122_v14 = vmul.f32 %v2994_v57, %v10521_v34  ;;  %v3123_v55 = vmul.f32 %v2995_v43, %v10523_v7  ;;  %v10539_v17 = vunpack.c.l.bf16 %v2581_v26  ;;  %v10541_v54 = vunpack.c.h.bf16 %v2581_v26 }
 0x2df   : > { %12226 = vst [vmem:[#allocation152_spill] sm:$0xff] %v10535_v18  ;;  %v10543_v42 = vpop.eup %7280  ;;  %v4178_v62 = vpack.c.bf16 %v4079_v8, %v4078_v2  ;;  %v3632_v24 = vunpack.c.l.bf16 %v3539_v51  ;;  %v3633_v3 = vunpack.c.h.bf16 %v3539_v51  ;;  %v2244_v41 = vadd.f32 %v2243_v60, %v9528_v19 }
 0x2e0   : > { %12227 = vst [vmem:[#allocation153_spill] sm:$0xff] %v10539_v17  ;;  %v3220_v30 = vpack.c.bf16 %v3123_v55, %v3122_v14  ;;  %v2804_v58 = vmul.f32 %v10539_v17, %v10539_v17  ;;  %v2805_v33 = vmul.f32 %v10541_v54, %v10541_v54  ;;  %v2333_v39 = vadd.f32 %v2332_v21, %v9549_v38 }
 0x2e1   : > { %12228 = vst [vmem:[#allocation154_spill] sm:$0xff] %v10541_v54  ;;  %v4270_v36 = vunpack.c.l.bf16 %v4178_v62  ;;  %v4271_v5 = vunpack.c.h.bf16 %v4178_v62  ;;  %v3760_v40 = vadd.f32 %v3632_v24, %v10501_v46  ;;  %v3761_v57 = vadd.f32 %v3633_v3, %v10503_v44 }
 0x2e2   : > { %12229 = vst [vmem:[#allocation155_spill] sm:$0xff] %v10543_v42  ;;  %v10553_v43 = vpop.eup %7282  ;;  %v3314_v26 = vunpack.c.l.bf16 %v3220_v30  ;;  %v3315_v2 = vunpack.c.h.bf16 %v3220_v30  ;;  %v2901_v60 = vpack.c.bf16 %v2805_v33, %v2804_v58  ;;  %v2582_v8 = vpack.c.bf16 %v2333_v39, %v2244_v41 }
 0x2e3   : > { %12230 = vst [vmem:[#allocation156_spill] sm:$0xff] %v10553_v43  ;;  %v10555_v51 = vpop.eup %7284  ;;  %7286 = vtanh.f32 %v4270_v36  ;;  %v3859_v14 = vpack.c.bf16 %v3761_v57, %v3760_v40  ;;  %v4534_v55 = vunpack.c.l.bf16 %v10493_v23  ;;  %v4535_v21 = vunpack.c.h.bf16 %v10493_v23 }
 0x2e4   : > { %12231 = vst [vmem:[#allocation157_spill] sm:$0xff] %v10555_v51  ;;  %7288 = vtanh.f32 %v4271_v5  ;;  %v3442_v62 = vmul.f32 0.044677734, %v3314_v26  ;;  %v3443_v50 = vmul.f32 0.044677734, %v3315_v2  ;;  %v2996_v24 = vunpack.c.l.bf16 %v2901_v60 }
 0x2e5   : > { %v3952_v46 = vunpack.c.l.bf16 %v3859_v14  ;;  %v3953_v3 = vunpack.c.h.bf16 %v3859_v14  ;;  %v2997_v44 = vunpack.c.h.bf16 %v2901_v60  ;;  %v10559_v13 = vunpack.c.l.bf16 %v2582_v8 }
 0x2e6   : > { %v3540_v30 = vpack.c.bf16 %v3443_v50, %v3442_v62  ;;  %v3124_v41 = vmul.f32 %v2996_v24, %v10539_v17  ;;  %v10562_v58 = vunpack.c.h.bf16 %v2582_v8  ;;  %v4538_v33 = vunpack.c.l.bf16 %v10519_v35 }
 0x2e7   : > { %12232 = vst [vmem:[#allocation158_spill] sm:$0xff] %v10559_v13  ;;  %v4080_v39 = vmul.f32 0.796875, %v3952_v46  ;;  %v4081_v36 = vmul.f32 0.796875, %v3953_v3  ;;  %v3125_v23 = vmul.f32 %v2997_v44, %v10541_v54  ;;  %v2806_v5 = vmul.f32 %v10559_v13, %v10559_v13 }
 0x2e8   : > { %12233 = vst [vmem:[#allocation159_spill] sm:$0xff] %v10562_v58  ;;  %v3634_v40 = vunpack.c.l.bf16 %v3540_v30  ;;  %v3635_v57 = vunpack.c.h.bf16 %v3540_v30  ;;  %v2807_v26 = vmul.f32 %v10562_v58, %v10562_v58  ;;  %v4539_v50 = vunpack.c.h.bf16 %v10519_v35 }
 0x2e9   : > { %v10571_v2 = vpop.eup %7286  ;;  %v4179_v60 = vpack.c.bf16 %v4081_v36, %v4080_v39  ;;  %v3221_v8 = vpack.c.bf16 %v3125_v23, %v3124_v41  ;;  %v4662_v14 = vadd.f32 1.0, %v4534_v55  ;;  %v4663_v62 = vadd.f32 1.0, %v4535_v21 }
 0x2ea   : > { %12234 = vst [vmem:[#allocation160_spill] sm:$0xff] %v10571_v2  ;;  %v10573_v46 = vpop.eup %7288  ;;  %v3762_v44 = vadd.f32 %v3634_v40, %v10521_v34  ;;  %v3763_v24 = vadd.f32 %v3635_v57, %v10523_v7  ;;  %v2902_v3 = vpack.c.bf16 %v2807_v26, %v2806_v5  ;;  %v4666_v51 = vadd.f32 1.0, %v4538_v33 }
 0x2eb   : > { %v4272_v30 = vunpack.c.l.bf16 %v4179_v60  ;;  %v4273_v43 = vunpack.c.h.bf16 %v4179_v60  ;;  %v3316_v56 = vunpack.c.l.bf16 %v3221_v8  ;;  %v3317_v15 = vunpack.c.h.bf16 %v3221_v8 }
 0x2ec   : > { %v3860_v42 = vpack.c.bf16 %v3763_v24, %v3762_v44  ;;  %v2998_v35 = vunpack.c.l.bf16 %v2902_v3  ;;  %v2999_v18 = vunpack.c.h.bf16 %v2902_v3  ;;  %v4667_v2 = vadd.f32 1.0, %v4539_v50 }
 0x2ed   : > { %7290 = vtanh.f32 %v4272_v30  ;;  %v3444_v41 = vmul.f32 0.044677734, %v3316_v56  ;;  %v3445_v55 = vmul.f32 0.044677734, %v3317_v15  ;;  %v4790_v21 = vpack.c.bf16 %v4663_v62, %v4662_v14 }
 0x2ee   : > { %7292 = vtanh.f32 %v4273_v43  ;;  %v3954_v39 = vunpack.c.l.bf16 %v3860_v42  ;;  %v3955_v36 = vunpack.c.h.bf16 %v3860_v42  ;;  %v3126_v23 = vmul.f32 %v2998_v35, %v10559_v13 }
 0x2ef   : > { %v3541_v40 = vpack.c.bf16 %v3445_v55, %v3444_v41  ;;  %v3127_v33 = vmul.f32 %v2999_v18, %v10562_v58  ;;  %v4792_v5 = vpack.c.bf16 %v4667_v2, %v4666_v51  ;;  %v4854_v57 = vunpack.c.l.bf16 %v4790_v21 }
 0x2f0   : > { %v4082_v26 = vmul.f32 0.796875, %v3954_v39  ;;  %v4083_v60 = vmul.f32 0.796875, %v3955_v36  ;;  %v4855_v8 = vunpack.c.h.bf16 %v4790_v21  ;;  %v4471_v50 = vpack.c.bf16 %v9816_v20, %v9809_v4 }
 0x2f1   : > { %v3636_v44 = vunpack.c.l.bf16 %v3541_v40  ;;  %v3637_v56 = vunpack.c.h.bf16 %v3541_v40  ;;  %v3222_v15 = vpack.c.bf16 %v3127_v33, %v3126_v23  ;;  %v4858_v14 = vunpack.c.l.bf16 %v4792_v5 }
 0x2f2   : > { %v4180_v43 = vpack.c.bf16 %v4083_v60, %v4082_v26  ;;  %v4859_v62 = vunpack.c.h.bf16 %v4792_v5  ;;  %v4982_v42 = vmul.f32 0.5, %v4854_v57  ;;  %v4983_v24 = vmul.f32 0.5, %v4855_v8 }
 0x2f3   : > { %v10581_v3 = vpop.eup %7290  ;;  %v3764_v18 = vadd.f32 %v3636_v44, %v10539_v17  ;;  %v3765_v51 = vadd.f32 %v3637_v56, %v10541_v54  ;;  %v3318_v2 = vunpack.c.l.bf16 %v3222_v15  ;;  %v3319_v30 = vunpack.c.h.bf16 %v3222_v15 }
 0x2f4   : > { %v10585_v35 = vpop.eup %7292  ;;  %v4274_v41 = vunpack.c.l.bf16 %v4180_v43  ;;  %v4275_v4 = vunpack.c.h.bf16 %v4180_v43  ;;  %v4986_v20 = vmul.f32 0.5, %v4858_v14  ;;  %v4987_v55 = vmul.f32 0.5, %v4859_v62 }
 0x2f5   : > { %v3861_v21 = vpack.c.bf16 %v3765_v51, %v3764_v18  ;;  %v3446_v39 = vmul.f32 0.044677734, %v3318_v2  ;;  %v3447_v36 = vmul.f32 0.044677734, %v3319_v30  ;;  %v5110_v23 = vpack.c.bf16 %v4983_v24, %v4982_v42  ;;  %v12235_v24 = vld [vmem:[#allocation61_spill] sm:$0xff]  ;;  %v12236_v2 = vld [vmem:[#allocation56_spill] sm:$0xff] }
 0x2f6   : > { %7294 = vtanh.f32 %v4274_v41  ;;  %v5112_v40 = vpack.c.bf16 %v4987_v55, %v4986_v20  ;;  %v4473_v33 = vpack.c.bf16 %v9896_v27, %v9883_v63  ;;  %v4536_v5 = vunpack.c.l.bf16 %v4471_v50  ;;  %v12237_v27 = vld [vmem:[#allocation63_spill] sm:$0xff] }
 0x2f7   : > { %7296 = vtanh.f32 %v4275_v4  ;;  %v3956_v57 = vunpack.c.l.bf16 %v3861_v21  ;;  %v3957_v26 = vunpack.c.h.bf16 %v3861_v21  ;;  %v3542_v60 = vpack.c.bf16 %v3447_v36, %v3446_v39  ;;  %v2421_v21 = vpop.f32.mrf.mxu2 }
 0x2f8   : > { %v5174_v8 = vunpack.c.l.bf16 %v5110_v23  ;;  %v5178_v44 = vunpack.c.l.bf16 %v5112_v40  ;;  %v5175_v56 = vunpack.c.h.bf16 %v5110_v23  ;;  %v5179_v15 = vunpack.c.h.bf16 %v5112_v40 }
 0x2f9   : > { %v4084_v14 = vmul.f32 0.796875, %v3956_v57  ;;  %v4085_v43 = vmul.f32 0.796875, %v3957_v26  ;;  %v3638_v62 = vunpack.c.l.bf16 %v3542_v60  ;;  %v3639_v18 = vunpack.c.h.bf16 %v3542_v60 }
 0x2fa   : > { %v5302_v42 = vmul.f32 %v5174_v8, %v9613_v1  ;;  %v5306_v51 = vmul.f32 %v5178_v44, %v12235_v24  ;;  %v5303_v30 = vmul.f32 %v5175_v56, %v12236_v2  ;;  %v5307_v63 = vmul.f32 %v5179_v15, %v12237_v27  ;;  %v2510_v1 = vpop.f32.mrf.mxu3 }
 0x2fb   : > { %v4181_v41 = vpack.c.bf16 %v4085_v43, %v4084_v14  ;;  %v3766_v4 = vadd.f32 %v3638_v62, %v10559_v13  ;;  %v3767_v20 = vadd.f32 %v3639_v18, %v10562_v58  ;;  %v4537_v55 = vunpack.c.h.bf16 %v4471_v50 }
 0x2fc   : > { %v10595_v39 = vpop.eup %7294  ;;  %v5430_v36 = vpack.c.bf16 %v5306_v51, %v5302_v42  ;;  %v5431_v23 = vpack.c.bf16 %v5307_v63, %v5303_v30  ;;  %v4540_v40 = vunpack.c.l.bf16 %v4473_v33  ;;  %v4541_v57 = vunpack.c.h.bf16 %v4473_v33  ;;  %v12238_v51 = vld [vmem:[#allocation83_spill] sm:$0xff] }
 0x2fd   : > { %v10597_v26 = vpop.eup %7296  ;;  %v4276_v60 = vunpack.c.l.bf16 %v4181_v41  ;;  %v4277_v8 = vunpack.c.h.bf16 %v4181_v41  ;;  %v3862_v44 = vpack.c.bf16 %v3767_v20, %v3766_v4  ;;  %v4664_v56 = vadd.f32 1.0, %v4536_v5 }
 0x2fe   : > { %5762 = vmatmul.bf16.vlgmr.msrb.gmra.mxu0 %v5430_v36  ;;  %5851 = vmatmul.bf16.vlgmr.msrb.gmra.mxu1 %v5431_v23  ;;  %v4665_v15 = vadd.f32 1.0, %v4537_v55  ;;  %v4668_v14 = vadd.f32 1.0, %v4540_v40  ;;  %v4669_v43 = vadd.f32 1.0, %v4541_v57  ;;  %v2422_v50 = vadd.f32 %v2421_v21, %v9605_v29 }
 0x2ff   : > { %7298 = vtanh.f32 %v4276_v60  ;;  %v3958_v62 = vunpack.c.l.bf16 %v3862_v44  ;;  %v3959_v18 = vunpack.c.h.bf16 %v3862_v44  ;;  %v2511_v42 = vadd.f32 %v2510_v1, %v9608_v22  ;;  %v2334_v44 = vpop.f32.mrf.mxu1 }
 0x300   : > { %7300 = vtanh.f32 %v4277_v8  ;;  %v4791_v33 = vpack.c.bf16 %v4665_v15, %v4664_v56  ;;  %v4793_v24 = vpack.c.bf16 %v4669_v43, %v4668_v14  ;;  %v4474_v2 = vpack.c.bf16 %v9932_v12, %v12238_v51  ;;  %v2245_v8 = vpop.f32.mrf.mxu0 }
 0x301   : > { %v4086_v30 = vmul.f32 0.796875, %v3958_v62  ;;  %v4087_v5 = vmul.f32 0.796875, %v3959_v18  ;;  %v2583_v27 = vpack.c.bf16 %v2511_v42, %v2422_v50  ;;  %v4476_v63 = vpack.c.bf16 %v9991_v32, %v9984_v6 }
 0x302   : > { %v4856_v41 = vunpack.c.l.bf16 %v4791_v33  ;;  %v4857_v4 = vunpack.c.h.bf16 %v4791_v33  ;;  %v4860_v20 = vunpack.c.l.bf16 %v4793_v24  ;;  %v4861_v55 = vunpack.c.h.bf16 %v4793_v24 }
 0x303   : > { %v4182_v21 = vpack.c.bf16 %v4087_v5, %v4086_v30  ;;  %v10605_v36 = vunpack.c.l.bf16 %v2583_v27  ;;  %v10607_v23 = vunpack.c.h.bf16 %v2583_v27  ;;  %v4542_v40 = vunpack.c.l.bf16 %v4474_v2 }
 0x304   : > { %v4984_v57 = vmul.f32 0.5, %v4856_v41  ;;  %v4985_v1 = vmul.f32 0.5, %v4857_v4  ;;  %v4988_v60 = vmul.f32 0.5, %v4860_v20  ;;  %v4989_v12 = vmul.f32 0.5, %v4861_v55 }
 0x305   : > { %12239 = vst [vmem:[#allocation61_spill] sm:$0xff] %v10605_v36  ;;  %v10609_v56 = vpop.eup %7298  ;;  %v4278_v15 = vunpack.c.l.bf16 %v4182_v21  ;;  %v4279_v6 = vunpack.c.h.bf16 %v4182_v21  ;;  %v2808_v32 = vmul.f32 %v10605_v36, %v10605_v36  ;;  %v2809_v14 = vmul.f32 %v10607_v23, %v10607_v23  ;;  %v12241_v21 = vld [vmem:[#allocation58_spill] sm:$0xff] }
 0x306   : > { %12240 = vst [vmem:[#allocation56_spill] sm:$0xff] %v10607_v23  ;;  %v10615_v43 = vpop.eup %7300  ;;  %v5111_v50 = vpack.c.bf16 %v4985_v1, %v4984_v57  ;;  %v5113_v62 = vpack.c.bf16 %v4989_v12, %v4988_v60  ;;  %v2246_v18 = vadd.f32 %v2245_v8, %v9528_v19  ;;  %v2335_v42 = vadd.f32 %v2334_v44, %v9549_v38  ;;  %v12242_v57 = vld [vmem:[#allocation65_spill] sm:$0xff]  ;;  %v12243_v60 = vld [vmem:[#allocation60_spill] sm:$0xff]  ;;  %v12244_v44 = vld [vmem:[#allocation66_spill] sm:$0xff] }
 0x307   : > { %7302 = vtanh.f32 %v4278_v15  ;;  %v2903_v33 = vpack.c.bf16 %v2809_v14, %v2808_v32  ;;  %v4543_v24 = vunpack.c.h.bf16 %v4474_v2  ;;  %v4546_v51 = vunpack.c.l.bf16 %v4476_v63 }
 0x308   : > { %7304 = vtanh.f32 %v4279_v6  ;;  %v5176_v30 = vunpack.c.l.bf16 %v5111_v50  ;;  %v5180_v5 = vunpack.c.l.bf16 %v5113_v62  ;;  %v5177_v27 = vunpack.c.h.bf16 %v5111_v50 }
 0x309   : > { %v5181_v41 = vunpack.c.h.bf16 %v5113_v62  ;;  %v3000_v4 = vunpack.c.l.bf16 %v2903_v33  ;;  %v3001_v20 = vunpack.c.h.bf16 %v2903_v33  ;;  %v2584_v55 = vpack.c.bf16 %v2335_v42, %v2246_v18 }
 0x30a   : > { %v5304_v58 = vmul.f32 %v5176_v30, %v12241_v21  ;;  %v5308_v1 = vmul.f32 %v5180_v5, %v12242_v57  ;;  %v5305_v12 = vmul.f32 %v5177_v27, %v12243_v60  ;;  %v4547_v8 = vunpack.c.h.bf16 %v4476_v63  ;;  %v2423_v5 = vpop.f32.mrf.mxu2  ;;  %v2512_v27 = vpop.f32.mrf.mxu3 }
 0x30b   : > { %v5309_v15 = vmul.f32 %v5181_v41, %v12244_v44  ;;  %v3128_v2 = vmul.f32 %v3000_v4, %v10605_v36  ;;  %v3129_v6 = vmul.f32 %v3001_v20, %v10607_v23  ;;  %v10625_v32 = vunpack.c.l.bf16 %v2584_v55 }
 0x30c   : > { %v5432_v14 = vpack.c.bf16 %v5308_v1, %v5304_v58  ;;  %v10627_v50 = vunpack.c.h.bf16 %v2584_v55  ;;  %v4670_v62 = vadd.f32 1.0, %v4542_v40  ;;  %v4671_v18 = vadd.f32 1.0, %v4543_v24  ;;  %v12249_v1 = vld [vmem:[#allocation87_spill] sm:$0xff] }
 0x30d   : > { %12245 = vst [vmem:[#allocation63_spill] sm:$0xff] %v10625_v32  ;;  %v10629_v42 = vpop.eup %7302  ;;  %v5433_v33 = vpack.c.bf16 %v5309_v15, %v5305_v12  ;;  %v3223_v30 = vpack.c.bf16 %v3129_v6, %v3128_v2  ;;  %v2810_v63 = vmul.f32 %v10625_v32, %v10625_v32  ;;  %v4674_v41 = vadd.f32 1.0, %v4546_v51  ;;  %v12250_v15 = vld [vmem:[#allocation92_spill] sm:$0xff]  ;;  %v12251_v2 = vld [vmem:[#allocation93_spill] sm:$0xff] }
 0x30e   : > { %12246 = vst [vmem:[#allocation83_spill] sm:$0xff] %v10627_v50  ;;  %v10633_v4 = vpop.eup %7304  ;;  %5940 = vmatmul.bf16.vlgmr.msrb.gmra.mxu2 %v5432_v14  ;;  %v2811_v58 = vmul.f32 %v10627_v50, %v10627_v50  ;;  %v2424_v20 = vadd.f32 %v2423_v5, %v9605_v29  ;;  %v2513_v40 = vadd.f32 %v2512_v27, %v9608_v22  ;;  %v4675_v24 = vadd.f32 1.0, %v4547_v8 }
 0x30f   : > { %12247 = vst [vmem:[#allocation58_spill] sm:$0xff] %v10629_v42  ;;  %6029 = vmatmul.bf16.vlgmr.msrb.gmra.mxu3 %v5433_v33  ;;  %v3320_v55 = vunpack.c.l.bf16 %v3223_v30  ;;  %v3321_v21 = vunpack.c.h.bf16 %v3223_v30  ;;  %v4794_v57 = vpack.c.bf16 %v4671_v18, %v4670_v62  ;;  %v10641_v60 = vpack.c.bf16 %v12249_v1, %v9954_v61 }
 0x310   : > { %12248 = vst [vmem:[#allocation65_spill] sm:$0xff] %v10633_v4  ;;  %v2904_v51 = vpack.c.bf16 %v2811_v58, %v2810_v63  ;;  %v2585_v12 = vpack.c.bf16 %v2513_v40, %v2424_v20  ;;  %v4796_v44 = vpack.c.bf16 %v4675_v24, %v4674_v41  ;;  %v10645_v6 = vpack.c.bf16 %v12251_v2, %v12250_v15  ;;  %v2248_v24 = vpop.f32.mrf.mxu0 }
 0x311   : > { %v3448_v14 = vmul.f32 0.044677734, %v3320_v55  ;;  %v3449_v5 = vmul.f32 0.044677734, %v3321_v21  ;;  %v4862_v13 = vunpack.c.l.bf16 %v4794_v57  ;;  %v4863_v27 = vunpack.c.h.bf16 %v4794_v57  ;;  %v2337_v55 = vpop.f32.mrf.mxu1 }
 0x312   : > { %v3002_v8 = vunpack.c.l.bf16 %v2904_v51  ;;  %v3003_v33 = vunpack.c.h.bf16 %v2904_v51  ;;  %v10647_v54 = vunpack.c.l.bf16 %v2585_v12  ;;  %v10649_v62 = vunpack.c.h.bf16 %v2585_v12 }
 0x313   : > { %v3543_v18 = vpack.c.bf16 %v3449_v5, %v3448_v14  ;;  %v4866_v61 = vunpack.c.l.bf16 %v4796_v44  ;;  %v4867_v30 = vunpack.c.h.bf16 %v4796_v44  ;;  %v4990_v63 = vmul.f32 0.5, %v4862_v13 }
 0x314   : > { %12252 = vst [vmem:[#allocation60_spill] sm:$0xff] %v10647_v54  ;;  %v3130_v41 = vmul.f32 %v3002_v8, %v10625_v32  ;;  %v3131_v58 = vmul.f32 %v3003_v33, %v10627_v50  ;;  %v2812_v20 = vmul.f32 %v10647_v54, %v10647_v54  ;;  %v2813_v40 = vmul.f32 %v10649_v62, %v10649_v62 }
 0x315   : > { %12253 = vst [vmem:[#allocation66_spill] sm:$0xff] %v10649_v62  ;;  %v3640_v21 = vunpack.c.l.bf16 %v3543_v18  ;;  %v3641_v57 = vunpack.c.h.bf16 %v3543_v18  ;;  %v2249_v1 = vadd.f32 %v2248_v24, %v9528_v19  ;;  %v2338_v51 = vadd.f32 %v2337_v55, %v9549_v38 }
 0x316   : > { %v3224_v12 = vpack.c.bf16 %v3131_v58, %v3130_v41  ;;  %v2905_v13 = vpack.c.bf16 %v2813_v40, %v2812_v20  ;;  %v4991_v44 = vmul.f32 0.5, %v4863_v27  ;;  %v4994_v15 = vmul.f32 0.5, %v4866_v61 }
 0x317   : > { %v3768_v2 = vadd.f32 %v3640_v21, %v10605_v36  ;;  %v3769_v14 = vadd.f32 %v3641_v57, %v10607_v23  ;;  %v2586_v5 = vpack.c.bf16 %v2338_v51, %v2249_v1  ;;  %v4995_v8 = vmul.f32 0.5, %v4867_v30 }
 0x318   : > { %v3322_v33 = vunpack.c.l.bf16 %v3224_v12  ;;  %v3323_v17 = vunpack.c.h.bf16 %v3224_v12  ;;  %v3004_v4 = vunpack.c.l.bf16 %v2905_v13  ;;  %v3005_v42 = vunpack.c.h.bf16 %v2905_v13 }
 0x319   : > { %v3863_v7 = vpack.c.bf16 %v3769_v14, %v3768_v2  ;;  %v10661_v18 = vunpack.c.l.bf16 %v2586_v5  ;;  %v10663_v24 = vunpack.c.h.bf16 %v2586_v5  ;;  %v5114_v55 = vpack.c.bf16 %v4991_v44, %v4990_v63 }
 0x31a   : > { %v3450_v41 = vmul.f32 0.044677734, %v3322_v33  ;;  %v3451_v58 = vmul.f32 0.044677734, %v3323_v17  ;;  %v3132_v27 = vmul.f32 %v3004_v4, %v10647_v54  ;;  %v3133_v61 = vmul.f32 %v3005_v42, %v10649_v62 }
 0x31b   : > { %12254 = vst [vmem:[#allocation87_spill] sm:$0xff] %v10661_v18  ;;  %v3960_v20 = vunpack.c.l.bf16 %v3863_v7  ;;  %v3961_v40 = vunpack.c.h.bf16 %v3863_v7  ;;  %v2814_v30 = vmul.f32 %v10661_v18, %v10661_v18  ;;  %v2815_v21 = vmul.f32 %v10663_v24, %v10663_v24 }
 0x31c   : > { %12255 = vst [vmem:[#allocation92_spill] sm:$0xff] %v10663_v24  ;;  %v3544_v57 = vpack.c.bf16 %v3451_v58, %v3450_v41  ;;  %v3225_v1 = vpack.c.bf16 %v3133_v61, %v3132_v27  ;;  %v5116_v51 = vpack.c.bf16 %v4995_v8, %v4994_v15  ;;  %v5182_v12 = vunpack.c.l.bf16 %v5114_v55 }
 0x31d   : > { %v4088_v13 = vmul.f32 0.796875, %v3960_v20  ;;  %v4089_v63 = vmul.f32 0.796875, %v3961_v40  ;;  %v2906_v44 = vpack.c.bf16 %v2815_v21, %v2814_v30  ;;  %v5183_v17 = vunpack.c.h.bf16 %v5114_v55  ;;  %v12256_v40 = vld [vmem:[#allocation69_spill] sm:$0xff]  ;;  %v12257_v21 = vld [vmem:[#allocation76_spill] sm:$0xff] }
 0x31e   : > { %v3642_v2 = vunpack.c.l.bf16 %v3544_v57  ;;  %v3643_v4 = vunpack.c.h.bf16 %v3544_v57  ;;  %v3324_v14 = vunpack.c.l.bf16 %v3225_v1  ;;  %v3325_v42 = vunpack.c.h.bf16 %v3225_v1 }
 0x31f   : > { %v4183_v5 = vpack.c.bf16 %v4089_v63, %v4088_v13  ;;  %v3006_v7 = vunpack.c.l.bf16 %v2906_v44  ;;  %v3007_v33 = vunpack.c.h.bf16 %v2906_v44  ;;  %v5186_v23 = vunpack.c.l.bf16 %v5116_v51  ;;  %v12258_v63 = vld [vmem:[#allocation71_spill] sm:$0xff] }
 0x320   : > { %v3770_v36 = vadd.f32 %v3642_v2, %v10625_v32  ;;  %v3771_v34 = vadd.f32 %v3643_v4, %v10627_v50  ;;  %v3452_v41 = vmul.f32 0.044677734, %v3324_v14  ;;  %v3453_v58 = vmul.f32 0.044677734, %v3325_v42 }
 0x321   : > { %v4280_v15 = vunpack.c.l.bf16 %v4183_v5  ;;  %v4281_v8 = vunpack.c.h.bf16 %v4183_v5  ;;  %v3134_v27 = vmul.f32 %v3006_v7, %v10661_v18  ;;  %v3135_v55 = vmul.f32 %v3007_v33, %v10663_v24 }
 0x322   : > { %v3864_v61 = vpack.c.bf16 %v3771_v34, %v3770_v36  ;;  %v3545_v20 = vpack.c.bf16 %v3453_v58, %v3452_v41  ;;  %v5310_v30 = vmul.f32 %v5182_v12, %v12256_v40  ;;  %v5314_v57 = vmul.f32 %v5186_v23, %v12257_v21  ;;  %v12259_v12 = vld [vmem:[#allocation81_spill] sm:$0xff] }
 0x323   : > { %7306 = vtanh.f32 %v4280_v15  ;;  %v3226_v1 = vpack.c.bf16 %v3135_v55, %v3134_v27  ;;  %v5187_v13 = vunpack.c.h.bf16 %v5116_v51  ;;  %v5311_v44 = vmul.f32 %v5183_v17, %v12258_v63 }
 0x324   : > { %7308 = vtanh.f32 %v4281_v8  ;;  %v3962_v2 = vunpack.c.l.bf16 %v3864_v61  ;;  %v3963_v4 = vunpack.c.h.bf16 %v3864_v61  ;;  %v3644_v14 = vunpack.c.l.bf16 %v3545_v20 }
 0x325   : > { %v3645_v42 = vunpack.c.h.bf16 %v3545_v20  ;;  %v3326_v5 = vunpack.c.l.bf16 %v3226_v1  ;;  %v3327_v7 = vunpack.c.h.bf16 %v3226_v1  ;;  %v5434_v50 = vpack.c.bf16 %v5314_v57, %v5310_v30  ;;  %v2426_v57 = vpop.f32.mrf.mxu2 }
 0x326   : > { %v4090_v33 = vmul.f32 0.796875, %v3962_v2  ;;  %v4091_v34 = vmul.f32 0.796875, %v3963_v4  ;;  %v3772_v36 = vadd.f32 %v3644_v14, %v10647_v54  ;;  %v5315_v41 = vmul.f32 %v5187_v13, %v12259_v12 }
 0x327   : > { %v3773_v23 = vadd.f32 %v3645_v42, %v10649_v62  ;;  %v3454_v58 = vmul.f32 0.044677734, %v3326_v5  ;;  %v3455_v51 = vmul.f32 0.044677734, %v3327_v7  ;;  %5767 = vmatmul.bf16.gmra.mxu0 %v5434_v50  ;;  %v4544_v17 = vunpack.c.l.bf16 %v10641_v60 }
 0x328   : > { %v4184_v15 = vpack.c.bf16 %v4091_v34, %v4090_v33  ;;  %v5435_v8 = vpack.c.bf16 %v5315_v41, %v5311_v44  ;;  %v4545_v27 = vunpack.c.h.bf16 %v10641_v60  ;;  %v4548_v55 = vunpack.c.l.bf16 %v10645_v6  ;;  %v2515_v33 = vpop.f32.mrf.mxu3 }
 0x329   : > { %v10684_v61 = vpop.eup %7306  ;;  %v3865_v20 = vpack.c.bf16 %v3773_v23, %v3772_v36  ;;  %v3546_v40 = vpack.c.bf16 %v3455_v51, %v3454_v58  ;;  %v4549_v30 = vunpack.c.h.bf16 %v10645_v6  ;;  %v4672_v21 = vadd.f32 1.0, %v4544_v17 }
 0x32a   : > { %v10687_v1 = vpop.eup %7308  ;;  %v4282_v13 = vunpack.c.l.bf16 %v4184_v15  ;;  %v4283_v50 = vunpack.c.h.bf16 %v4184_v15  ;;  %5856 = vmatmul.bf16.gmra.mxu1 %v5435_v8  ;;  %v4673_v63 = vadd.f32 1.0, %v4545_v27  ;;  %v4676_v2 = vadd.f32 1.0, %v4548_v55  ;;  %v12260_v15 = vld [vmem:[#allocation94_spill] sm:$0xff]  ;;  %v12261_v8 = vld [vmem:[#allocation97_spill] sm:$0xff] }
 0x32b   : > { %v3964_v44 = vunpack.c.l.bf16 %v3865_v20  ;;  %v3965_v4 = vunpack.c.h.bf16 %v3865_v20  ;;  %v3646_v60 = vunpack.c.l.bf16 %v3546_v40  ;;  %v3647_v14 = vunpack.c.h.bf16 %v3546_v40 }
 0x32c   : > { %7310 = vtanh.f32 %v4282_v13  ;;  %v4677_v42 = vadd.f32 1.0, %v4549_v30  ;;  %v4795_v5 = vpack.c.bf16 %v4673_v63, %v4672_v21  ;;  %v2427_v7 = vadd.f32 %v2426_v57, %v9605_v29 }
 0x32d   : > { %7312 = vtanh.f32 %v4283_v50  ;;  %v4092_v6 = vmul.f32 0.796875, %v3964_v44  ;;  %v4093_v34 = vmul.f32 0.796875, %v3965_v4  ;;  %v3774_v36 = vadd.f32 %v3646_v60, %v10661_v18 }
 0x32e   : > { %v3775_v12 = vadd.f32 %v3647_v14, %v10663_v24  ;;  %v4797_v41 = vpack.c.bf16 %v4677_v42, %v4676_v2  ;;  %v4864_v23 = vunpack.c.l.bf16 %v4795_v5  ;;  %v4865_v58 = vunpack.c.h.bf16 %v4795_v5 }
 0x32f   : > { %v4185_v51 = vpack.c.bf16 %v4093_v34, %v4092_v6  ;;  %v2516_v17 = vadd.f32 %v2515_v33, %v9608_v22  ;;  %v10695_v27 = vpack.c.bf16 %v12261_v8, %v12260_v15  ;;  %v10699_v55 = vpack.c.bf16 %v10157_v37, %v10151_v49 }
 0x330   : > { %v3866_v20 = vpack.c.bf16 %v3775_v12, %v3774_v36  ;;  %v4868_v40 = vunpack.c.l.bf16 %v4797_v41  ;;  %v4869_v30 = vunpack.c.h.bf16 %v4797_v41  ;;  %v4992_v21 = vmul.f32 0.5, %v4864_v23  ;;  %v2250_v36 = vpop.f32.mrf.mxu0 }
 0x331   : > { %v4284_v57 = vunpack.c.l.bf16 %v4185_v51  ;;  %v4285_v13 = vunpack.c.h.bf16 %v4185_v51  ;;  %v4993_v50 = vmul.f32 0.5, %v4865_v58  ;;  %v2587_v63 = vpack.c.bf16 %v2516_v17, %v2427_v7  ;;  %v2339_v7 = vpop.f32.mrf.mxu1 }
 0x332   : > { %v10701_v2 = vpop.eup %7310  ;;  %v3966_v44 = vunpack.c.l.bf16 %v3866_v20  ;;  %v3967_v4 = vunpack.c.h.bf16 %v3866_v20  ;;  %v4996_v60 = vmul.f32 0.5, %v4868_v40  ;;  %v4997_v14 = vmul.f32 0.5, %v4869_v30  ;;  %v12264_v20 = vld [vmem:[#allocation72_spill] sm:$0xff]  ;;  %v12265_v30 = vld [vmem:[#allocation75_spill] sm:$0xff] }
 0x333   : > { %v10703_v42 = vpop.eup %7312  ;;  %7314 = vtanh.f32 %v4284_v57  ;;  %v5115_v5 = vpack.c.bf16 %v4993_v50, %v4992_v21  ;;  %v10705_v49 = vunpack.c.l.bf16 %v2587_v63  ;;  %v10707_v37 = vunpack.c.h.bf16 %v2587_v63 }
 0x334   : > { %7316 = vtanh.f32 %v4285_v13  ;;  %v4094_v33 = vmul.f32 0.796875, %v3966_v44  ;;  %v4095_v6 = vmul.f32 0.796875, %v3967_v4  ;;  %v5117_v34 = vpack.c.bf16 %v4997_v14, %v4996_v60  ;;  %v12266_v44 = vld [vmem:[#allocation79_spill] sm:$0xff]  ;;  %v12267_v60 = vld [vmem:[#allocation82_spill] sm:$0xff] }
 0x335   : > { %12262 = vst [vmem:[#allocation93_spill] sm:$0xff] %v10705_v49  ;;  %v5184_v12 = vunpack.c.l.bf16 %v5115_v5  ;;  %v5185_v41 = vunpack.c.h.bf16 %v5115_v5  ;;  %v2816_v23 = vmul.f32 %v10705_v49, %v10705_v49  ;;  %v2817_v58 = vmul.f32 %v10707_v37, %v10707_v37 }
 0x336   : > { %12263 = vst [vmem:[#allocation69_spill] sm:$0xff] %v10707_v37  ;;  %v4186_v51 = vpack.c.bf16 %v4095_v6, %v4094_v33  ;;  %v5188_v17 = vunpack.c.l.bf16 %v5117_v34  ;;  %v5189_v15 = vunpack.c.h.bf16 %v5117_v34  ;;  %v2251_v8 = vadd.f32 %v2250_v36, %v9528_v19 }
 0x337   : > { %v5312_v40 = vmul.f32 %v5184_v12, %v12264_v20  ;;  %v5313_v21 = vmul.f32 %v5185_v41, %v12265_v30  ;;  %v2907_v57 = vpack.c.bf16 %v2817_v58, %v2816_v23  ;;  %v2340_v13 = vadd.f32 %v2339_v7, %v9549_v38  ;;  %v2428_v30 = vpop.f32.mrf.mxu2 }
 0x338   : > { %v4286_v50 = vunpack.c.l.bf16 %v4186_v51  ;;  %v4287_v63 = vunpack.c.h.bf16 %v4186_v51  ;;  %v5316_v4 = vmul.f32 %v5188_v17, %v12266_v44  ;;  %v5317_v14 = vmul.f32 %v5189_v15, %v12267_v60 }
 0x339   : > { %v10719_v5 = vpop.eup %7314  ;;  %v3008_v33 = vunpack.c.l.bf16 %v2907_v57  ;;  %v3009_v6 = vunpack.c.h.bf16 %v2907_v57  ;;  %v2588_v34 = vpack.c.bf16 %v2340_v13, %v2251_v8  ;;  %v4550_v36 = vunpack.c.l.bf16 %v10695_v27  ;;  %v12271_v13 = vld [vmem:[#allocation98_spill] sm:$0xff] }
 0x33a   : > { %v10722_v24 = vpop.eup %7316  ;;  %7318 = vtanh.f32 %v4286_v50  ;;  %v5436_v12 = vpack.c.bf16 %v5316_v4, %v5312_v40  ;;  %v5437_v41 = vpack.c.bf16 %v5317_v14, %v5313_v21  ;;  %v4551_v7 = vunpack.c.h.bf16 %v10695_v27  ;;  %v2517_v21 = vpop.f32.mrf.mxu3 }
 0x33b   : > { %12268 = vst [vmem:[#allocation76_spill] sm:$0xff] %v10722_v24  ;;  %7320 = vtanh.f32 %v4287_v63  ;;  %v3136_v23 = vmul.f32 %v3008_v33, %v10705_v49  ;;  %v3137_v58 = vmul.f32 %v3009_v6, %v10707_v37  ;;  %v10727_v51 = vunpack.c.l.bf16 %v2588_v34 }
 0x33c   : > { %5945 = vmatmul.bf16.gmra.mxu2 %v5436_v12  ;;  %6034 = vmatmul.bf16.gmra.mxu3 %v5437_v41  ;;  %v10729_v17 = vunpack.c.h.bf16 %v2588_v34  ;;  %v4554_v15 = vunpack.c.l.bf16 %v10699_v55  ;;  %v4555_v8 = vunpack.c.h.bf16 %v10699_v55  ;;  %v4678_v20 = vadd.f32 1.0, %v4550_v36 }
 0x33d   : > { %12269 = vst [vmem:[#allocation71_spill] sm:$0xff] %v10727_v51  ;;  %v3227_v40 = vpack.c.bf16 %v3137_v58, %v3136_v23  ;;  %v2818_v27 = vmul.f32 %v10727_v51, %v10727_v51  ;;  %v4679_v57 = vadd.f32 1.0, %v4551_v7  ;;  %v10737_v50 = vpack.c.bf16 %v12271_v13, %v10121_v48 }
 0x33e   : > { %12270 = vst [vmem:[#allocation81_spill] sm:$0xff] %v10729_v17  ;;  %v2819_v63 = vmul.f32 %v10729_v17, %v10729_v17  ;;  %v2429_v44 = vadd.f32 %v2428_v30, %v9605_v29  ;;  %v2518_v4 = vadd.f32 %v2517_v21, %v9608_v22  ;;  %v4682_v55 = vadd.f32 1.0, %v4554_v15 }
 0x33f   : > { %v3328_v60 = vunpack.c.l.bf16 %v3227_v40  ;;  %v3329_v14 = vunpack.c.h.bf16 %v3227_v40  ;;  %v4683_v33 = vadd.f32 1.0, %v4555_v8  ;;  %v4798_v6 = vpack.c.bf16 %v4679_v57, %v4678_v20 }
 0x340   : > { %v10743_v34 = vpop.eup %7318  ;;  %v2908_v36 = vpack.c.bf16 %v2819_v63, %v2818_v27  ;;  %v2589_v12 = vpack.c.bf16 %v2518_v4, %v2429_v44  ;;  %v10747_v48 = vpack.c.bf16 %v10195_v53, %v10175_v59 }
 0x341   : > { %12272 = vst [vmem:[#allocation94_spill] sm:$0xff] %v10743_v34  ;;  %v10750_v7 = vpop.eup %7320  ;;  %v3456_v23 = vmul.f32 0.044677734, %v3328_v60  ;;  %v3457_v58 = vmul.f32 0.044677734, %v3329_v14  ;;  %v4800_v30 = vpack.c.bf16 %v4683_v33, %v4682_v55  ;;  %v4870_v15 = vunpack.c.l.bf16 %v4798_v6  ;;  %v2253_v55 = vpop.f32.mrf.mxu0 }
 0x342   : > { %12273 = vst [vmem:[#allocation97_spill] sm:$0xff] %v10750_v7  ;;  %v3010_v21 = vunpack.c.l.bf16 %v2908_v36  ;;  %v3011_v40 = vunpack.c.h.bf16 %v2908_v36  ;;  %v10752_v8 = vunpack.c.l.bf16 %v2589_v12  ;;  %v10754_v20 = vunpack.c.h.bf16 %v2589_v12  ;;  %v2342_v60 = vpop.f32.mrf.mxu1 }
 0x343   : > { %v3547_v27 = vpack.c.bf16 %v3457_v58, %v3456_v23  ;;  %v4871_v57 = vunpack.c.h.bf16 %v4798_v6  ;;  %v4874_v13 = vunpack.c.l.bf16 %v4800_v30  ;;  %v4875_v63 = vunpack.c.h.bf16 %v4800_v30 }
 0x344   : > { %12274 = vst [vmem:[#allocation72_spill] sm:$0xff] %v10752_v8  ;;  %v3138_v59 = vmul.f32 %v3010_v21, %v10727_v51  ;;  %v3139_v53 = vmul.f32 %v3011_v40, %v10729_v17  ;;  %v2820_v44 = vmul.f32 %v10752_v8, %v10752_v8  ;;  %v2821_v4 = vmul.f32 %v10754_v20, %v10754_v20 }
 0x345   : > { %12275 = vst [vmem:[#allocation75_spill] sm:$0xff] %v10754_v20  ;;  %v3648_v14 = vunpack.c.l.bf16 %v3547_v27  ;;  %v3649_v33 = vunpack.c.h.bf16 %v3547_v27  ;;  %v2254_v36 = vadd.f32 %v2253_v55, %v9528_v19  ;;  %v2343_v6 = vadd.f32 %v2342_v60, %v9549_v38 }
 0x346   : > { %v3228_v12 = vpack.c.bf16 %v3139_v53, %v3138_v59  ;;  %v2909_v23 = vpack.c.bf16 %v2821_v4, %v2820_v44  ;;  %v4998_v58 = vmul.f32 0.5, %v4870_v15  ;;  %v4999_v30 = vmul.f32 0.5, %v4871_v57 }
 0x347   : > { %v3776_v21 = vadd.f32 %v3648_v14, %v10705_v49  ;;  %v3777_v40 = vadd.f32 %v3649_v33, %v10707_v37  ;;  %v2590_v41 = vpack.c.bf16 %v2343_v6, %v2254_v36  ;;  %v5002_v18 = vmul.f32 0.5, %v4874_v13 }
 0x348   : > { %v3330_v62 = vunpack.c.l.bf16 %v3228_v12  ;;  %v3331_v54 = vunpack.c.h.bf16 %v3228_v12  ;;  %v3012_v7 = vunpack.c.l.bf16 %v2909_v23  ;;  %v3013_v34 = vunpack.c.h.bf16 %v2909_v23 }
 0x349   : > { %v3867_v32 = vpack.c.bf16 %v3777_v40, %v3776_v21  ;;  %v10766_v27 = vunpack.c.l.bf16 %v2590_v41  ;;  %v10768_v55 = vunpack.c.h.bf16 %v2590_v41  ;;  %v5003_v60 = vmul.f32 0.5, %v4875_v63 }
 0x34a   : > { %v3458_v59 = vmul.f32 0.044677734, %v3330_v62  ;;  %v3459_v53 = vmul.f32 0.044677734, %v3331_v54  ;;  %v3140_v15 = vmul.f32 %v3012_v7, %v10752_v8  ;;  %v3141_v57 = vmul.f32 %v3013_v34, %v10754_v20 }
 0x34b   : > { %12276 = vst [vmem:[#allocation79_spill] sm:$0xff] %v10766_v27  ;;  %v3968_v44 = vunpack.c.l.bf16 %v3867_v32  ;;  %v3969_v4 = vunpack.c.h.bf16 %v3867_v32  ;;  %v2822_v13 = vmul.f32 %v10766_v27, %v10766_v27  ;;  %v2823_v14 = vmul.f32 %v10768_v55, %v10768_v55 }
 0x34c   : > { %12277 = vst [vmem:[#allocation82_spill] sm:$0xff] %v10768_v55  ;;  %v3548_v33 = vpack.c.bf16 %v3459_v53, %v3458_v59  ;;  %v3229_v36 = vpack.c.bf16 %v3141_v57, %v3140_v15  ;;  %v5118_v6 = vpack.c.bf16 %v4999_v30, %v4998_v58  ;;  %v5120_v41 = vpack.c.bf16 %v5003_v60, %v5002_v18 }
 0x34d   : > { %v4096_v12 = vmul.f32 0.796875, %v3968_v44  ;;  %v4097_v63 = vmul.f32 0.796875, %v3969_v4  ;;  %v2910_v62 = vpack.c.bf16 %v2823_v14, %v2822_v13  ;;  %v4553_v54 = vunpack.c.h.bf16 %v10737_v50  ;;  %v12278_v13 = vld [vmem:[#allocation84_spill] sm:$0xff] }
 0x34e   : > { %v3650_v7 = vunpack.c.l.bf16 %v3548_v33  ;;  %v3651_v23 = vunpack.c.h.bf16 %v3548_v33  ;;  %v3332_v34 = vunpack.c.l.bf16 %v3229_v36  ;;  %v3333_v21 = vunpack.c.h.bf16 %v3229_v36 }
 0x34f   : > { %v4187_v32 = vpack.c.bf16 %v4097_v63, %v4096_v12  ;;  %v3014_v40 = vunpack.c.l.bf16 %v2910_v62  ;;  %v3015_v37 = vunpack.c.h.bf16 %v2910_v62  ;;  %v5190_v49 = vunpack.c.l.bf16 %v5118_v6 }
 0x350   : > { %v3778_v24 = vadd.f32 %v3650_v7, %v10727_v51  ;;  %v3779_v59 = vadd.f32 %v3651_v23, %v10729_v17  ;;  %v3460_v53 = vmul.f32 0.044677734, %v3332_v34  ;;  %v3461_v58 = vmul.f32 0.044677734, %v3333_v21 }
 0x351   : > { %v4288_v18 = vunpack.c.l.bf16 %v4187_v32  ;;  %v4289_v30 = vunpack.c.h.bf16 %v4187_v32  ;;  %v3142_v60 = vmul.f32 %v3014_v40, %v10766_v27  ;;  %v3143_v15 = vmul.f32 %v3015_v37, %v10768_v55  ;;  %v12279_v32 = vld [vmem:[#allocation88_spill] sm:$0xff] }
 0x352   : > { %v3868_v57 = vpack.c.bf16 %v3779_v59, %v3778_v24  ;;  %v3549_v44 = vpack.c.bf16 %v3461_v58, %v3460_v53  ;;  %v5194_v4 = vunpack.c.l.bf16 %v5120_v41  ;;  %v5318_v14 = vmul.f32 %v5190_v49, %v12278_v13  ;;  %v12280_v59 = vld [vmem:[#allocation85_spill] sm:$0xff] }
 0x353   : > { %7322 = vtanh.f32 %v4288_v18  ;;  %v3230_v33 = vpack.c.bf16 %v3143_v15, %v3142_v60  ;;  %v5191_v36 = vunpack.c.h.bf16 %v5118_v6  ;;  %v5195_v12 = vunpack.c.h.bf16 %v5120_v41 }
 0x354   : > { %7324 = vtanh.f32 %v4289_v30  ;;  %v3970_v63 = vunpack.c.l.bf16 %v3868_v57  ;;  %v3971_v62 = vunpack.c.h.bf16 %v3868_v57  ;;  %v3652_v7 = vunpack.c.l.bf16 %v3549_v44  ;;  %v12281_v30 = vld [vmem:[#allocation89_spill] sm:$0xff] }
 0x355   : > { %v3653_v23 = vunpack.c.h.bf16 %v3549_v44  ;;  %v3334_v34 = vunpack.c.l.bf16 %v3230_v33  ;;  %v3335_v21 = vunpack.c.h.bf16 %v3230_v33  ;;  %v5322_v40 = vmul.f32 %v5194_v4, %v12279_v32 }
 0x356   : > { %v4098_v17 = vmul.f32 0.796875, %v3970_v63  ;;  %v4099_v37 = vmul.f32 0.796875, %v3971_v62  ;;  %v3780_v24 = vadd.f32 %v3652_v7, %v10752_v8  ;;  %v5319_v53 = vmul.f32 %v5191_v36, %v12280_v59  ;;  %v2431_v62 = vpop.f32.mrf.mxu2 }
 0x357   : > { %v3781_v49 = vadd.f32 %v3653_v23, %v10754_v20  ;;  %v3462_v58 = vmul.f32 0.044677734, %v3334_v34  ;;  %v3463_v6 = vmul.f32 0.044677734, %v3335_v21  ;;  %v5438_v41 = vpack.c.bf16 %v5322_v40, %v5318_v14 }
 0x358   : > { %v4188_v18 = vpack.c.bf16 %v4099_v37, %v4098_v17  ;;  %v5323_v60 = vmul.f32 %v5195_v12, %v12281_v30  ;;  %v4556_v15 = vunpack.c.l.bf16 %v10747_v48  ;;  %v4557_v57 = vunpack.c.h.bf16 %v10747_v48 }
 0x359   : > { %v10789_v44 = vpop.eup %7322  ;;  %v3869_v4 = vpack.c.bf16 %v3781_v49, %v3780_v24  ;;  %v3550_v13 = vpack.c.bf16 %v3463_v6, %v3462_v58  ;;  %5772 = vmatmul.bf16.gmra.mxu0 %v5438_v41  ;;  %v12282_v33 = vunpack.c.l.bf16 %v10737_v50  ;;  %v4681_v63 = vadd.f32 1.0, %v4553_v54  ;;  %v2520_v50 = vpop.f32.mrf.mxu3 }
 0x35a   : > { %v10793_v7 = vpop.eup %7324  ;;  %v4290_v14 = vunpack.c.l.bf16 %v4188_v18  ;;  %v4291_v17 = vunpack.c.h.bf16 %v4188_v18  ;;  %v5439_v23 = vpack.c.bf16 %v5323_v60, %v5319_v53  ;;  %v4684_v12 = vadd.f32 1.0, %v4556_v15  ;;  %v12283_v60 = vld [vmem:[#allocation105_spill] sm:$0xff]  ;;  %v12284_v15 = vld [vmem:[#allocation106_spill] sm:$0xff] }
 0x35b   : > { %v4680_v36 = vadd.f32 1.0, %v12282_v33  ;;  %v3972_v34 = vunpack.c.l.bf16 %v3869_v4  ;;  %v3973_v21 = vunpack.c.h.bf16 %v3869_v4  ;;  %v3654_v32 = vunpack.c.l.bf16 %v3550_v13 }
 0x35c   : > { %v3655_v48 = vunpack.c.h.bf16 %v3550_v13  ;;  %7326 = vtanh.f32 %v4290_v14  ;;  %5861 = vmatmul.bf16.gmra.mxu1 %v5439_v23  ;;  %v4685_v40 = vadd.f32 1.0, %v4557_v57  ;;  %v2432_v24 = vadd.f32 %v2431_v62, %v9605_v29 }
 0x35d   : > { %v4799_v37 = vpack.c.bf16 %v4681_v63, %v4680_v36  ;;  %7328 = vtanh.f32 %v4291_v17  ;;  %v4100_v54 = vmul.f32 0.796875, %v3972_v34  ;;  %v4101_v59 = vmul.f32 0.796875, %v3973_v21 }
 0x35e   : > { %v3782_v49 = vadd.f32 %v3654_v32, %v10766_v27  ;;  %v3783_v58 = vadd.f32 %v3655_v48, %v10768_v55  ;;  %v4801_v53 = vpack.c.bf16 %v4685_v40, %v4684_v12  ;;  %v2521_v30 = vadd.f32 %v2520_v50, %v9608_v22 }
 0x35f   : > { %v4872_v6 = vunpack.c.l.bf16 %v4799_v37  ;;  %v4873_v41 = vunpack.c.h.bf16 %v4799_v37  ;;  %v4189_v18 = vpack.c.bf16 %v4101_v59, %v4100_v54  ;;  %v10801_v57 = vpack.c.bf16 %v12284_v15, %v12283_v60 }
 0x360   : > { %v10805_v4 = vpack.c.bf16 %v10294_v10, %v10290_v11  ;;  %v3870_v13 = vpack.c.bf16 %v3783_v58, %v3782_v49  ;;  %v4876_v33 = vunpack.c.l.bf16 %v4801_v53  ;;  %v4877_v36 = vunpack.c.h.bf16 %v4801_v53  ;;  %v2255_v49 = vpop.f32.mrf.mxu0 }
 0x361   : > { %v5000_v63 = vmul.f32 0.5, %v4872_v6  ;;  %v4292_v62 = vunpack.c.l.bf16 %v4189_v18  ;;  %v4293_v14 = vunpack.c.h.bf16 %v4189_v18  ;;  %v5001_v17 = vmul.f32 0.5, %v4873_v41 }
 0x362   : > { %v2591_v23 = vpack.c.bf16 %v2521_v30, %v2432_v24  ;;  %v10807_v12 = vpop.eup %7326  ;;  %v3974_v34 = vunpack.c.l.bf16 %v3870_v13  ;;  %v3975_v21 = vunpack.c.h.bf16 %v3870_v13  ;;  %v5004_v32 = vmul.f32 0.5, %v4876_v33  ;;  %v2344_v24 = vpop.f32.mrf.mxu1  ;;  %v12287_v13 = vld [vmem:[#allocation80_spill] sm:$0xff] }
 0x363   : > { %v5005_v48 = vmul.f32 0.5, %v4877_v36  ;;  %v10809_v40 = vpop.eup %7328  ;;  %7330 = vtanh.f32 %v4292_v62  ;;  %v5119_v37 = vpack.c.bf16 %v5001_v17, %v5000_v63  ;;  %v2256_v15 = vadd.f32 %v2255_v49, %v9528_v19  ;;  %v12288_v36 = vld [vmem:[#allocation86_spill] sm:$0xff] }
 0x364   : > { %v10811_v11 = vunpack.c.l.bf16 %v2591_v23  ;;  %v10813_v10 = vunpack.c.h.bf16 %v2591_v23  ;;  %7332 = vtanh.f32 %v4293_v14  ;;  %v4102_v50 = vmul.f32 0.796875, %v3974_v34  ;;  %v12289_v34 = vld [vmem:[#allocation90_spill] sm:$0xff] }
 0x365   : > { %v4103_v54 = vmul.f32 0.796875, %v3975_v21  ;;  %v5121_v59 = vpack.c.bf16 %v5005_v48, %v5004_v32  ;;  %v5192_v58 = vunpack.c.l.bf16 %v5119_v37  ;;  %v5193_v53 = vunpack.c.h.bf16 %v5119_v37  ;;  %v12290_v32 = vld [vmem:[#allocation91_spill] sm:$0xff] }
 0x366   : > { %12285 = vst [vmem:[#allocation98_spill] sm:$0xff] %v10811_v11  ;;  %v2824_v6 = vmul.f32 %v10811_v11, %v10811_v11  ;;  %v2825_v41 = vmul.f32 %v10813_v10, %v10813_v10  ;;  %v2345_v14 = vadd.f32 %v2344_v24, %v9549_v38  ;;  %v4558_v49 = vunpack.c.l.bf16 %v10801_v57 }
 0x367   : > { %12286 = vst [vmem:[#allocation84_spill] sm:$0xff] %v10813_v10  ;;  %v4190_v18 = vpack.c.bf16 %v4103_v54, %v4102_v50  ;;  %v5196_v30 = vunpack.c.l.bf16 %v5121_v59  ;;  %v5197_v60 = vunpack.c.h.bf16 %v5121_v59  ;;  %v5320_v33 = vmul.f32 %v5192_v58, %v12287_v13 }
 0x368   : > { %v5321_v63 = vmul.f32 %v5193_v53, %v12288_v36  ;;  %v2911_v62 = vpack.c.bf16 %v2825_v41, %v2824_v6  ;;  %v2592_v59 = vpack.c.bf16 %v2345_v14, %v2256_v15  ;;  %v4559_v24 = vunpack.c.h.bf16 %v10801_v57  ;;  %v2433_v36 = vpop.f32.mrf.mxu2 }
 0x369   : > { %v4294_v17 = vunpack.c.l.bf16 %v4190_v18  ;;  %v4295_v23 = vunpack.c.h.bf16 %v4190_v18  ;;  %v5324_v21 = vmul.f32 %v5196_v30, %v12289_v34  ;;  %v5325_v48 = vmul.f32 %v5197_v60, %v12290_v32  ;;  %v10825_v37 = vpop.eup %7330 }
 0x36a   : > { %v3016_v50 = vunpack.c.l.bf16 %v2911_v62  ;;  %v3017_v54 = vunpack.c.h.bf16 %v2911_v62  ;;  %v10828_v55 = vpop.eup %7332  ;;  %v10833_v18 = vunpack.c.l.bf16 %v2592_v59  ;;  %v10835_v30 = vunpack.c.h.bf16 %v2592_v59 }
 0x36b   : > { %12291 = vst [vmem:[#allocation88_spill] sm:$0xff] %v10828_v55  ;;  %7334 = vtanh.f32 %v4294_v17  ;;  %v5440_v58 = vpack.c.bf16 %v5324_v21, %v5320_v33  ;;  %v5441_v53 = vpack.c.bf16 %v5325_v48, %v5321_v63  ;;  %v4562_v60 = vunpack.c.l.bf16 %v10805_v4  ;;  %v2522_v63 = vpop.f32.mrf.mxu3 }
 0x36c   : > { %7336 = vtanh.f32 %v4295_v23  ;;  %v3144_v6 = vmul.f32 %v3016_v50, %v10811_v11  ;;  %v3145_v41 = vmul.f32 %v3017_v54, %v10813_v10  ;;  %12292 = vst [vmem:[#allocation85_spill] sm:$0xff] %v10833_v18  ;;  %v4563_v15 = vunpack.c.h.bf16 %v10805_v4 }
 0x36d   : > { %5950 = vmatmul.bf16.gmra.mxu2 %v5440_v58  ;;  %6039 = vmatmul.bf16.gmra.mxu3 %v5441_v53  ;;  %12293 = vst [vmem:[#allocation89_spill] sm:$0xff] %v10835_v30  ;;  %v4686_v13 = vadd.f32 1.0, %v4558_v49  ;;  %v2826_v57 = vmul.f32 %v10833_v18, %v10833_v18  ;;  %v4687_v62 = vadd.f32 1.0, %v4559_v24  ;;  %v10843_v14 = vpack.c.bf16 %v10281_v31, %v10272_v16  ;;  %v12295_v58 = vld [vmem:[#allocation117_spill] sm:$0xff] }
 0x36e   : > { %v3231_v33 = vpack.c.bf16 %v3145_v41, %v3144_v6  ;;  %v2827_v17 = vmul.f32 %v10835_v30, %v10835_v30  ;;  %v2434_v23 = vadd.f32 %v2433_v36, %v9605_v29  ;;  %v2523_v34 = vadd.f32 %v2522_v63, %v9608_v22 }
 0x36f   : > { %v4690_v4 = vadd.f32 1.0, %v4562_v60  ;;  %v4691_v48 = vadd.f32 1.0, %v4563_v15  ;;  %v4802_v50 = vpack.c.bf16 %v4687_v62, %v4686_v13  ;;  %v10853_v16 = vpack.c.bf16 %v10318_v25, %v12295_v58 }
 0x370   : > { %v3336_v21 = vunpack.c.l.bf16 %v3231_v33  ;;  %v3337_v32 = vunpack.c.h.bf16 %v3231_v33  ;;  %v2912_v59 = vpack.c.bf16 %v2827_v17, %v2826_v57  ;;  %v2593_v49 = vpack.c.bf16 %v2523_v34, %v2434_v23 }
 0x371   : > { %v10849_v54 = vpop.eup %7334  ;;  %v4804_v41 = vpack.c.bf16 %v4691_v48, %v4690_v4  ;;  %v4878_v60 = vunpack.c.l.bf16 %v4802_v50  ;;  %v4879_v63 = vunpack.c.h.bf16 %v4802_v50 }
 0x372   : > { %12294 = vst [vmem:[#allocation105_spill] sm:$0xff] %v10849_v54  ;;  %v10856_v53 = vpop.eup %7336  ;;  %v3464_v24 = vmul.f32 0.044677734, %v3336_v21  ;;  %v3465_v6 = vmul.f32 0.044677734, %v3337_v32  ;;  %v3018_v36 = vunpack.c.l.bf16 %v2912_v59  ;;  %v3019_v33 = vunpack.c.h.bf16 %v2912_v59  ;;  %v2258_v21 = vpop.f32.mrf.mxu0 }
 0x373   : > { %12296 = vst [vmem:[#allocation106_spill] sm:$0xff] %v10856_v53  ;;  %v10858_v15 = vunpack.c.l.bf16 %v2593_v49  ;;  %v10860_v13 = vunpack.c.h.bf16 %v2593_v49  ;;  %v4882_v62 = vunpack.c.l.bf16 %v4804_v41  ;;  %v4883_v17 = vunpack.c.h.bf16 %v4804_v41  ;;  %v2347_v32 = vpop.f32.mrf.mxu1 }
 0x374   : > { %v3551_v57 = vpack.c.bf16 %v3465_v6, %v3464_v24  ;;  %v3146_v25 = vmul.f32 %v3018_v36, %v10833_v18  ;;  %v3147_v23 = vmul.f32 %v3019_v33, %v10835_v30  ;;  %v2259_v49 = vadd.f32 %v2258_v21, %v9528_v19 }
 0x375   : > { %12297 = vst [vmem:[#allocation80_spill] sm:$0xff] %v10858_v15  ;;  %v2828_v34 = vmul.f32 %v10858_v15, %v10858_v15  ;;  %v2829_v4 = vmul.f32 %v10860_v13, %v10860_v13  ;;  %v2348_v50 = vadd.f32 %v2347_v32, %v9549_v38  ;;  %v5006_v6 = vmul.f32 0.5, %v4878_v60 }
 0x376   : > { %12298 = vst [vmem:[#allocation86_spill] sm:$0xff] %v10860_v13  ;;  %v3656_v48 = vunpack.c.l.bf16 %v3551_v57  ;;  %v3657_v59 = vunpack.c.h.bf16 %v3551_v57  ;;  %v3232_v58 = vpack.c.bf16 %v3147_v23, %v3146_v25  ;;  %v5007_v41 = vmul.f32 0.5, %v4879_v63 }
 0x377   : > { %v2913_v24 = vpack.c.bf16 %v2829_v4, %v2828_v34  ;;  %v2594_v31 = vpack.c.bf16 %v2348_v50, %v2259_v49  ;;  %v5010_v27 = vmul.f32 0.5, %v4882_v62  ;;  %v5011_v32 = vmul.f32 0.5, %v4883_v17 }
 0x378   : > { %v3784_v36 = vadd.f32 %v3656_v48, %v10811_v11  ;;  %v3785_v33 = vadd.f32 %v3657_v59, %v10813_v10  ;;  %v3338_v20 = vunpack.c.l.bf16 %v3232_v58  ;;  %v3339_v8 = vunpack.c.h.bf16 %v3232_v58 }
 0x379   : > { %v3020_v53 = vunpack.c.l.bf16 %v2913_v24  ;;  %v3021_v54 = vunpack.c.h.bf16 %v2913_v24  ;;  %v10872_v57 = vunpack.c.l.bf16 %v2594_v31  ;;  %v10874_v21 = vunpack.c.h.bf16 %v2594_v31 }
 0x37a   : > { %v3871_v51 = vpack.c.bf16 %v3785_v33, %v3784_v36  ;;  %v3466_v25 = vmul.f32 0.044677734, %v3338_v20  ;;  %v3467_v23 = vmul.f32 0.044677734, %v3339_v8  ;;  %v5122_v50 = vpack.c.bf16 %v5007_v41, %v5006_v6 }
 0x37b   : > { %12299 = vst [vmem:[#allocation90_spill] sm:$0xff] %v10872_v57  ;;  %v3148_v60 = vmul.f32 %v3020_v53, %v10858_v15  ;;  %v3149_v63 = vmul.f32 %v3021_v54, %v10860_v13  ;;  %v2830_v62 = vmul.f32 %v10872_v57, %v10872_v57  ;;  %v2831_v48 = vmul.f32 %v10874_v21, %v10874_v21 }
 0x37c   : > { %12300 = vst [vmem:[#allocation91_spill] sm:$0xff] %v10874_v21  ;;  %v3976_v34 = vunpack.c.l.bf16 %v3871_v51  ;;  %v3977_v4 = vunpack.c.h.bf16 %v3871_v51  ;;  %v3552_v59 = vpack.c.bf16 %v3467_v23, %v3466_v25  ;;  %v5124_v31 = vpack.c.bf16 %v5011_v32, %v5010_v27 }
 0x37d   : > { %v3233_v49 = vpack.c.bf16 %v3149_v63, %v3148_v60  ;;  %v2914_v20 = vpack.c.bf16 %v2831_v48, %v2830_v62  ;;  %v4561_v8 = vunpack.c.h.bf16 %v10843_v14  ;;  %v5198_v11 = vunpack.c.l.bf16 %v5122_v50  ;;  %v12301_v62 = vld [vmem:[#allocation95_spill] sm:$0xff] }
 0x37e   : > { %v4104_v58 = vmul.f32 0.796875, %v3976_v34  ;;  %v4105_v17 = vmul.f32 0.796875, %v3977_v4  ;;  %v3658_v53 = vunpack.c.l.bf16 %v3552_v59  ;;  %v3659_v24 = vunpack.c.h.bf16 %v3552_v59 }
 0x37f   : > { %v3340_v54 = vunpack.c.l.bf16 %v3233_v49  ;;  %v3341_v36 = vunpack.c.h.bf16 %v3233_v49  ;;  %v3022_v33 = vunpack.c.l.bf16 %v2914_v20  ;;  %v3023_v10 = vunpack.c.h.bf16 %v2914_v20 }
 0x380   : > { %v4191_v51 = vpack.c.bf16 %v4105_v17, %v4104_v58  ;;  %v3786_v55 = vadd.f32 %v3658_v53, %v10833_v18  ;;  %v3787_v25 = vadd.f32 %v3659_v24, %v10835_v30  ;;  %v5202_v4 = vunpack.c.l.bf16 %v5124_v31 }
 0x381   : > { %v3468_v23 = vmul.f32 0.044677734, %v3340_v54  ;;  %v3469_v6 = vmul.f32 0.044677734, %v3341_v36  ;;  %v3150_v32 = vmul.f32 %v3022_v33, %v10872_v57  ;;  %v3151_v60 = vmul.f32 %v3023_v10, %v10874_v21 }
 0x382   : > { %v4296_v27 = vunpack.c.l.bf16 %v4191_v51  ;;  %v4297_v41 = vunpack.c.h.bf16 %v4191_v51  ;;  %v3872_v63 = vpack.c.bf16 %v3787_v25, %v3786_v55  ;;  %v5326_v48 = vmul.f32 %v5198_v11, %v12301_v62  ;;  %v12302_v51 = vld [vmem:[#allocation101_spill] sm:$0xff]  ;;  %v12303_v25 = vld [vmem:[#allocation96_spill] sm:$0xff] }
 0x383   : > { %v3553_v34 = vpack.c.bf16 %v3469_v6, %v3468_v23  ;;  %v3234_v59 = vpack.c.bf16 %v3151_v60, %v3150_v32  ;;  %v5199_v49 = vunpack.c.h.bf16 %v5122_v50  ;;  %v5203_v58 = vunpack.c.h.bf16 %v5124_v31 }
 0x384   : > { %7338 = vtanh.f32 %v4296_v27  ;;  %v3978_v17 = vunpack.c.l.bf16 %v3872_v63  ;;  %v3979_v20 = vunpack.c.h.bf16 %v3872_v63  ;;  %v5330_v33 = vmul.f32 %v5202_v4, %v12302_v51 }
 0x385   : > { %7340 = vtanh.f32 %v4297_v41  ;;  %v3660_v53 = vunpack.c.l.bf16 %v3553_v34  ;;  %v3661_v24 = vunpack.c.h.bf16 %v3553_v34  ;;  %v3342_v54 = vunpack.c.l.bf16 %v3234_v59  ;;  %v12304_v41 = vld [vmem:[#allocation102_spill] sm:$0xff] }
 0x386   : > { %v3343_v36 = vunpack.c.h.bf16 %v3234_v59  ;;  %v4106_v30 = vmul.f32 0.796875, %v3978_v17  ;;  %v4107_v10 = vmul.f32 0.796875, %v3979_v20  ;;  %v5327_v23 = vmul.f32 %v5199_v49, %v12303_v25  ;;  %v2436_v20 = vpop.f32.mrf.mxu2 }
 0x387   : > { %v3788_v55 = vadd.f32 %v3660_v53, %v10858_v15  ;;  %v3789_v11 = vadd.f32 %v3661_v24, %v10860_v13  ;;  %v3470_v6 = vmul.f32 0.044677734, %v3342_v54  ;;  %v5442_v31 = vpack.c.bf16 %v5330_v33, %v5326_v48 }
 0x388   : > { %v3471_v50 = vmul.f32 0.044677734, %v3343_v36  ;;  %v4192_v27 = vpack.c.bf16 %v4107_v10, %v4106_v30  ;;  %v5331_v32 = vmul.f32 %v5203_v58, %v12304_v41  ;;  %v4564_v60 = vunpack.c.l.bf16 %v10853_v16 }
 0x389   : > { %v4565_v63 = vunpack.c.h.bf16 %v10853_v16  ;;  %v3873_v4 = vpack.c.bf16 %v3789_v11, %v3788_v55  ;;  %5777 = vmatmul.bf16.gmra.mxu0 %v5442_v31  ;;  %v12306_v59 = vunpack.c.l.bf16 %v10843_v14  ;;  %v4689_v17 = vadd.f32 1.0, %v4561_v8  ;;  %v2525_v14 = vpop.f32.mrf.mxu3 }
 0x38a   : > { %v10895_v34 = vpop.eup %7338  ;;  %v3554_v62 = vpack.c.bf16 %v3471_v50, %v3470_v6  ;;  %v4298_v48 = vunpack.c.l.bf16 %v4192_v27  ;;  %v4299_v30 = vunpack.c.h.bf16 %v4192_v27  ;;  %v5443_v24 = vpack.c.bf16 %v5331_v32, %v5327_v23  ;;  %v12308_v32 = vld [vmem:[#allocation118_spill] sm:$0xff] }
 0x38b   : > { %12305 = vst [vmem:[#allocation117_spill] sm:$0xff] %v10895_v34  ;;  %v4688_v49 = vadd.f32 1.0, %v12306_v59  ;;  %v10899_v53 = vpop.eup %7340  ;;  %v4692_v58 = vadd.f32 1.0, %v4564_v60  ;;  %v3980_v54 = vunpack.c.l.bf16 %v3873_v4  ;;  %v3981_v36 = vunpack.c.h.bf16 %v3873_v4  ;;  %v12309_v60 = vld [vmem:[#allocation119_spill] sm:$0xff]  ;;  %v12310_v4 = vld [vmem:[#allocation128_spill] sm:$0xff] }
 0x38c   : > { %12307 = vst [vmem:[#allocation95_spill] sm:$0xff] %v10899_v53  ;;  %v3662_v51 = vunpack.c.l.bf16 %v3554_v62  ;;  %v3663_v16 = vunpack.c.h.bf16 %v3554_v62  ;;  %7342 = vtanh.f32 %v4298_v48  ;;  %5866 = vmatmul.bf16.gmra.mxu1 %v5443_v24  ;;  %v4693_v33 = vadd.f32 1.0, %v4565_v63  ;;  %v12311_v62 = vld [vmem:[#allocation129_spill] sm:$0xff] }
 0x38d   : > { %v4803_v10 = vpack.c.bf16 %v4689_v17, %v4688_v49  ;;  %v2437_v55 = vadd.f32 %v2436_v20, %v9605_v29  ;;  %7344 = vtanh.f32 %v4299_v30  ;;  %v4108_v8 = vmul.f32 0.796875, %v3980_v54 }
 0x38e   : > { %v4109_v25 = vmul.f32 0.796875, %v3981_v36  ;;  %v3790_v11 = vadd.f32 %v3662_v51, %v10872_v57  ;;  %v3791_v6 = vadd.f32 %v3663_v16, %v10874_v21  ;;  %v4805_v23 = vpack.c.bf16 %v4693_v33, %v4692_v58 }
 0x38f   : > { %v4880_v50 = vunpack.c.l.bf16 %v4803_v10  ;;  %v4881_v31 = vunpack.c.h.bf16 %v4803_v10  ;;  %v2526_v41 = vadd.f32 %v2525_v14, %v9608_v22  ;;  %v10907_v63 = vpack.c.bf16 %v12309_v60, %v12308_v32 }
 0x390   : > { %v4193_v27 = vpack.c.bf16 %v4109_v25, %v4108_v8  ;;  %v10911_v59 = vpack.c.bf16 %v12311_v62, %v12310_v4  ;;  %v3874_v49 = vpack.c.bf16 %v3791_v6, %v3790_v11  ;;  %v4884_v17 = vunpack.c.l.bf16 %v4805_v23 }
 0x391   : > { %v4885_v20 = vunpack.c.h.bf16 %v4805_v23  ;;  %v5008_v48 = vmul.f32 0.5, %v4880_v50  ;;  %v5009_v58 = vmul.f32 0.5, %v4881_v31  ;;  %v2595_v54 = vpack.c.bf16 %v2526_v41, %v2437_v55  ;;  %v2260_v31 = vpop.f32.mrf.mxu0  ;;  %v2349_v55 = vpop.f32.mrf.mxu1 }
 0x392   : > { %v4300_v30 = vunpack.c.l.bf16 %v4193_v27  ;;  %v4301_v24 = vunpack.c.h.bf16 %v4193_v27  ;;  %v10913_v36 = vpop.eup %7342  ;;  %v3982_v51 = vunpack.c.l.bf16 %v3874_v49  ;;  %v3983_v16 = vunpack.c.h.bf16 %v3874_v49 }
 0x393   : > { %12312 = vst [vmem:[#allocation101_spill] sm:$0xff] %v10913_v36  ;;  %v5012_v33 = vmul.f32 0.5, %v4884_v17  ;;  %v5013_v10 = vmul.f32 0.5, %v4885_v20  ;;  %v10915_v14 = vpop.eup %7344  ;;  %v5123_v8 = vpack.c.bf16 %v5009_v58, %v5008_v48  ;;  %v10917_v25 = vunpack.c.l.bf16 %v2595_v54  ;;  %v12316_v20 = vld [vmem:[#allocation99_spill] sm:$0xff] }
 0x394   : > { %12313 = vst [vmem:[#allocation96_spill] sm:$0xff] %v10915_v14  ;;  %7346 = vtanh.f32 %v4300_v30  ;;  %v10919_v11 = vunpack.c.h.bf16 %v2595_v54  ;;  %v4110_v6 = vmul.f32 0.796875, %v3982_v51  ;;  %v4111_v23 = vmul.f32 0.796875, %v3983_v16  ;;  %v12317_v30 = vld [vmem:[#allocation100_spill] sm:$0xff] }
 0x395   : > { %12314 = vst [vmem:[#allocation102_spill] sm:$0xff] %v10917_v25  ;;  %7348 = vtanh.f32 %v4301_v24  ;;  %v5125_v50 = vpack.c.bf16 %v5013_v10, %v5012_v33  ;;  %v5200_v27 = vunpack.c.l.bf16 %v5123_v8  ;;  %v5201_v41 = vunpack.c.h.bf16 %v5123_v8  ;;  %v12318_v33 = vld [vmem:[#allocation103_spill] sm:$0xff]  ;;  %v12319_v8 = vld [vmem:[#allocation104_spill] sm:$0xff] }
 0x396   : > { %12315 = vst [vmem:[#allocation118_spill] sm:$0xff] %v10919_v11  ;;  %v2832_v32 = vmul.f32 %v10917_v25, %v10917_v25  ;;  %v2833_v60 = vmul.f32 %v10919_v11, %v10919_v11  ;;  %v4194_v4 = vpack.c.bf16 %v4111_v23, %v4110_v6  ;;  %v2261_v17 = vadd.f32 %v2260_v31, %v9528_v19 }
 0x397   : > { %v5204_v62 = vunpack.c.l.bf16 %v5125_v50  ;;  %v5205_v49 = vunpack.c.h.bf16 %v5125_v50  ;;  %v5328_v48 = vmul.f32 %v5200_v27, %v12316_v20  ;;  %v5329_v24 = vmul.f32 %v5201_v41, %v12317_v30  ;;  %v2527_v30 = vpop.f32.mrf.mxu3 }
 0x398   : > { %v2915_v58 = vpack.c.bf16 %v2833_v60, %v2832_v32  ;;  %v2350_v54 = vadd.f32 %v2349_v55, %v9549_v38  ;;  %v4302_v51 = vunpack.c.l.bf16 %v4194_v4  ;;  %v4303_v16 = vunpack.c.h.bf16 %v4194_v4 }
 0x399   : > { %v5332_v10 = vmul.f32 %v5204_v62, %v12318_v33  ;;  %v5333_v21 = vmul.f32 %v5205_v49, %v12319_v8  ;;  %v4566_v31 = vunpack.c.l.bf16 %v10907_v63  ;;  %v4567_v55 = vunpack.c.h.bf16 %v10907_v63  ;;  %v2438_v63 = vpop.f32.mrf.mxu2 }
 0x39a   : > { %v10931_v57 = vpop.eup %7346  ;;  %v3024_v6 = vunpack.c.l.bf16 %v2915_v58  ;;  %v3025_v23 = vunpack.c.h.bf16 %v2915_v58  ;;  %v2596_v50 = vpack.c.bf16 %v2350_v54, %v2261_v17  ;;  %7350 = vtanh.f32 %v4302_v51  ;;  %v12324_v58 = vld [vmem:[#allocation124_spill] sm:$0xff]  ;;  %v12325_v54 = vld [vmem:[#allocation125_spill] sm:$0xff] }
 0x39b   : > { %12320 = vst [vmem:[#allocation119_spill] sm:$0xff] %v10931_v57  ;;  %v10934_v13 = vpop.eup %7348  ;;  %v5444_v27 = vpack.c.bf16 %v5332_v10, %v5328_v48  ;;  %v5445_v41 = vpack.c.bf16 %v5333_v21, %v5329_v24  ;;  %7352 = vtanh.f32 %v4303_v16  ;;  %v4570_v49 = vunpack.c.l.bf16 %v10911_v59 }
 0x39c   : > { %12321 = vst [vmem:[#allocation128_spill] sm:$0xff] %v10934_v13  ;;  %v3152_v32 = vmul.f32 %v3024_v6, %v10917_v25  ;;  %v3153_v60 = vmul.f32 %v3025_v23, %v10919_v11  ;;  %v10939_v4 = vunpack.c.l.bf16 %v2596_v50  ;;  %v10941_v62 = vunpack.c.h.bf16 %v2596_v50 }
 0x39d   : > { %5955 = vmatmul.bf16.gmra.mxu2 %v5444_v27  ;;  %6044 = vmatmul.bf16.gmra.mxu3 %v5445_v41  ;;  %v4571_v17 = vunpack.c.h.bf16 %v10911_v59  ;;  %v4694_v20 = vadd.f32 1.0, %v4566_v31  ;;  %v4695_v24 = vadd.f32 1.0, %v4567_v55  ;;  %v10949_v51 = vpack.c.bf16 %v12325_v54, %v12324_v58  ;;  %v12327_v55 = vld [vmem:[#allocation131_spill] sm:$0xff] }
 0x39e   : > { %12322 = vst [vmem:[#allocation129_spill] sm:$0xff] %v10939_v4  ;;  %v3235_v48 = vpack.c.bf16 %v3153_v60, %v3152_v32  ;;  %v2834_v21 = vmul.f32 %v10939_v4, %v10939_v4  ;;  %v2835_v16 = vmul.f32 %v10941_v62, %v10941_v62  ;;  %v2439_v33 = vadd.f32 %v2438_v63, %v9605_v29  ;;  %v12328_v32 = vld [vmem:[#allocation132_spill] sm:$0xff] }
 0x39f   : > { %12323 = vst [vmem:[#allocation99_spill] sm:$0xff] %v10941_v62  ;;  %v2528_v10 = vadd.f32 %v2527_v30, %v9608_v22  ;;  %v4698_v59 = vadd.f32 1.0, %v4570_v49  ;;  %v4699_v23 = vadd.f32 1.0, %v4571_v17  ;;  %v4806_v50 = vpack.c.bf16 %v4695_v24, %v4694_v20 }
 0x3a0   : > { %v3344_v8 = vunpack.c.l.bf16 %v3235_v48  ;;  %v3345_v6 = vunpack.c.h.bf16 %v3235_v48  ;;  %v10955_v31 = vpop.eup %7350  ;;  %v2916_v27 = vpack.c.bf16 %v2835_v16, %v2834_v21  ;;  %v10959_v60 = vpack.c.bf16 %v12328_v32, %v12327_v55 }
 0x3a1   : > { %12326 = vst [vmem:[#allocation100_spill] sm:$0xff] %v10955_v31  ;;  %v2597_v41 = vpack.c.bf16 %v2528_v10, %v2439_v33  ;;  %v10962_v54 = vpop.eup %7352  ;;  %v4808_v30 = vpack.c.bf16 %v4699_v23, %v4698_v59  ;;  %v4886_v49 = vunpack.c.l.bf16 %v4806_v50  ;;  %v4887_v24 = vunpack.c.h.bf16 %v4806_v50  ;;  %v2352_v23 = vpop.f32.mrf.mxu1 }
 0x3a2   : > { %12329 = vst [vmem:[#allocation103_spill] sm:$0xff] %v10962_v54  ;;  %v3472_v63 = vmul.f32 0.044677734, %v3344_v8  ;;  %v3473_v15 = vmul.f32 0.044677734, %v3345_v6  ;;  %v3026_v18 = vunpack.c.l.bf16 %v2916_v27  ;;  %v3027_v48 = vunpack.c.h.bf16 %v2916_v27  ;;  %v2263_v6 = vpop.f32.mrf.mxu0 }
 0x3a3   : > { %v10964_v17 = vunpack.c.l.bf16 %v2597_v41  ;;  %v10966_v20 = vunpack.c.h.bf16 %v2597_v41  ;;  %v4890_v16 = vunpack.c.l.bf16 %v4808_v30  ;;  %v4891_v33 = vunpack.c.h.bf16 %v4808_v30 }
 0x3a4   : > { %v3555_v21 = vpack.c.bf16 %v3473_v15, %v3472_v63  ;;  %v3154_v10 = vmul.f32 %v3026_v18, %v10939_v4  ;;  %v3155_v55 = vmul.f32 %v3027_v48, %v10941_v62  ;;  %v2264_v41 = vadd.f32 %v2263_v6, %v9528_v19 }
 0x3a5   : > { %12330 = vst [vmem:[#allocation104_spill] sm:$0xff] %v10964_v17  ;;  %v2836_v8 = vmul.f32 %v10964_v17, %v10964_v17  ;;  %v2837_v59 = vmul.f32 %v10966_v20, %v10966_v20  ;;  %v2353_v15 = vadd.f32 %v2352_v23, %v9549_v38  ;;  %v5014_v30 = vmul.f32 0.5, %v4886_v49 }
 0x3a6   : > { %12331 = vst [vmem:[#allocation124_spill] sm:$0xff] %v10966_v20  ;;  %v3664_v27 = vunpack.c.l.bf16 %v3555_v21  ;;  %v3665_v32 = vunpack.c.h.bf16 %v3555_v21  ;;  %v3236_v50 = vpack.c.bf16 %v3155_v55, %v3154_v10  ;;  %v5015_v18 = vmul.f32 0.5, %v4887_v24 }
 0x3a7   : > { %v2917_v63 = vpack.c.bf16 %v2837_v59, %v2836_v8  ;;  %v2598_v54 = vpack.c.bf16 %v2353_v15, %v2264_v41  ;;  %v5018_v31 = vmul.f32 0.5, %v4890_v16  ;;  %v5019_v23 = vmul.f32 0.5, %v4891_v33 }
 0x3a8   : > { %v3792_v48 = vadd.f32 %v3664_v27, %v10917_v25  ;;  %v3793_v58 = vadd.f32 %v3665_v32, %v10919_v11  ;;  %v3346_v13 = vunpack.c.l.bf16 %v3236_v50  ;;  %v3347_v57 = vunpack.c.h.bf16 %v3236_v50 }
 0x3a9   : > { %v3028_v53 = vunpack.c.l.bf16 %v2917_v63  ;;  %v3029_v34 = vunpack.c.h.bf16 %v2917_v63  ;;  %v10978_v21 = vunpack.c.l.bf16 %v2598_v54  ;;  %v10980_v6 = vunpack.c.h.bf16 %v2598_v54 }
 0x3aa   : > { %v3875_v14 = vpack.c.bf16 %v3793_v58, %v3792_v48  ;;  %v3474_v10 = vmul.f32 0.044677734, %v3346_v13  ;;  %v3475_v55 = vmul.f32 0.044677734, %v3347_v57  ;;  %v5126_v41 = vpack.c.bf16 %v5015_v18, %v5014_v30 }
 0x3ab   : > { %12332 = vst [vmem:[#allocation125_spill] sm:$0xff] %v10978_v21  ;;  %v3156_v49 = vmul.f32 %v3028_v53, %v10964_v17  ;;  %v3157_v24 = vmul.f32 %v3029_v34, %v10966_v20  ;;  %v2838_v16 = vmul.f32 %v10978_v21, %v10978_v21  ;;  %v2839_v27 = vmul.f32 %v10980_v6, %v10980_v6 }
 0x3ac   : > { %12333 = vst [vmem:[#allocation131_spill] sm:$0xff] %v10980_v6  ;;  %v3984_v8 = vunpack.c.l.bf16 %v3875_v14  ;;  %v3985_v59 = vunpack.c.h.bf16 %v3875_v14  ;;  %v3556_v58 = vpack.c.bf16 %v3475_v55, %v3474_v10  ;;  %v5128_v54 = vpack.c.bf16 %v5019_v23, %v5018_v31 }
 0x3ad   : > { %v3237_v32 = vpack.c.bf16 %v3157_v24, %v3156_v49  ;;  %v2918_v13 = vpack.c.bf16 %v2839_v27, %v2838_v16  ;;  %v4569_v57 = vunpack.c.h.bf16 %v10949_v51  ;;  %v5206_v25 = vunpack.c.l.bf16 %v5126_v41  ;;  %v12334_v16 = vld [vmem:[#allocation107_spill] sm:$0xff] }
 0x3ae   : > { %v4112_v15 = vmul.f32 0.796875, %v3984_v8  ;;  %v4113_v33 = vmul.f32 0.796875, %v3985_v59  ;;  %v3666_v53 = vunpack.c.l.bf16 %v3556_v58  ;;  %v3667_v50 = vunpack.c.h.bf16 %v3556_v58 }
 0x3af   : > { %v3348_v34 = vunpack.c.l.bf16 %v3237_v32  ;;  %v3349_v63 = vunpack.c.h.bf16 %v3237_v32  ;;  %v3030_v48 = vunpack.c.l.bf16 %v2918_v13  ;;  %v3031_v11 = vunpack.c.h.bf16 %v2918_v13 }
 0x3b0   : > { %v4195_v14 = vpack.c.bf16 %v4113_v33, %v4112_v15  ;;  %v3794_v36 = vadd.f32 %v3666_v53, %v10939_v4  ;;  %v3795_v10 = vadd.f32 %v3667_v50, %v10941_v62  ;;  %v5210_v59 = vunpack.c.l.bf16 %v5128_v54 }
 0x3b1   : > { %v3476_v55 = vmul.f32 0.044677734, %v3348_v34  ;;  %v3477_v30 = vmul.f32 0.044677734, %v3349_v63  ;;  %v3158_v23 = vmul.f32 %v3030_v48, %v10978_v21  ;;  %v3159_v49 = vmul.f32 %v3031_v11, %v10980_v6 }
 0x3b2   : > { %v4304_v31 = vunpack.c.l.bf16 %v4195_v14  ;;  %v4305_v18 = vunpack.c.h.bf16 %v4195_v14  ;;  %v3876_v24 = vpack.c.bf16 %v3795_v10, %v3794_v36  ;;  %v5334_v27 = vmul.f32 %v5206_v25, %v12334_v16  ;;  %v12335_v14 = vld [vmem:[#allocation111_spill] sm:$0xff]  ;;  %v12336_v10 = vld [vmem:[#allocation108_spill] sm:$0xff] }
 0x3b3   : > { %v3557_v8 = vpack.c.bf16 %v3477_v30, %v3476_v55  ;;  %v3238_v58 = vpack.c.bf16 %v3159_v49, %v3158_v23  ;;  %v5207_v32 = vunpack.c.h.bf16 %v5126_v41  ;;  %v5211_v15 = vunpack.c.h.bf16 %v5128_v54 }
 0x3b4   : > { %7354 = vtanh.f32 %v4304_v31  ;;  %v3986_v33 = vunpack.c.l.bf16 %v3876_v24  ;;  %v3987_v13 = vunpack.c.h.bf16 %v3876_v24  ;;  %v5338_v48 = vmul.f32 %v5210_v59, %v12335_v14 }
 0x3b5   : > { %7356 = vtanh.f32 %v4305_v18  ;;  %v3668_v53 = vunpack.c.l.bf16 %v3557_v8  ;;  %v3669_v50 = vunpack.c.h.bf16 %v3557_v8  ;;  %v3350_v34 = vunpack.c.l.bf16 %v3238_v58  ;;  %v12337_v18 = vld [vmem:[#allocation112_spill] sm:$0xff] }
 0x3b6   : > { %v3351_v63 = vunpack.c.h.bf16 %v3238_v58  ;;  %v4114_v62 = vmul.f32 0.796875, %v3986_v33  ;;  %v4115_v11 = vmul.f32 0.796875, %v3987_v13  ;;  %v5335_v55 = vmul.f32 %v5207_v32, %v12336_v10  ;;  %v2441_v13 = vpop.f32.mrf.mxu2 }
 0x3b7   : > { %v3796_v36 = vadd.f32 %v3668_v53, %v10964_v17  ;;  %v3797_v25 = vadd.f32 %v3669_v50, %v10966_v20  ;;  %v3478_v30 = vmul.f32 0.044677734, %v3350_v34  ;;  %v5446_v54 = vpack.c.bf16 %v5338_v48, %v5334_v27 }
 0x3b8   : > { %v3479_v41 = vmul.f32 0.044677734, %v3351_v63  ;;  %v4196_v31 = vpack.c.bf16 %v4115_v11, %v4114_v62  ;;  %v5339_v23 = vmul.f32 %v5211_v15, %v12337_v18  ;;  %v4572_v49 = vunpack.c.l.bf16 %v10959_v60 }
 0x3b9   : > { %v4573_v24 = vunpack.c.h.bf16 %v10959_v60  ;;  %v3877_v59 = vpack.c.bf16 %v3797_v25, %v3796_v36  ;;  %5782 = vmatmul.bf16.gmra.mxu0 %v5446_v54  ;;  %v12338_v58 = vunpack.c.l.bf16 %v10949_v51  ;;  %v4697_v33 = vadd.f32 1.0, %v4569_v57  ;;  %v2530_v51 = vpop.f32.mrf.mxu3 }
 0x3ba   : > { %v11001_v8 = vpop.eup %7354  ;;  %v3558_v16 = vpack.c.bf16 %v3479_v41, %v3478_v30  ;;  %v4306_v27 = vunpack.c.l.bf16 %v4196_v31  ;;  %v4307_v62 = vunpack.c.h.bf16 %v4196_v31  ;;  %v5447_v50 = vpack.c.bf16 %v5339_v23, %v5335_v55  ;;  %v12339_v23 = vld [vmem:[#allocation134_spill] sm:$0xff] }
 0x3bb   : > { %v4696_v32 = vadd.f32 1.0, %v12338_v58  ;;  %v11005_v53 = vpop.eup %7356  ;;  %v4700_v15 = vadd.f32 1.0, %v4572_v49  ;;  %v3988_v34 = vunpack.c.l.bf16 %v3877_v59  ;;  %v3989_v63 = vunpack.c.h.bf16 %v3877_v59 }
 0x3bc   : > { %v3670_v14 = vunpack.c.l.bf16 %v3558_v16  ;;  %v3671_v60 = vunpack.c.h.bf16 %v3558_v16  ;;  %7358 = vtanh.f32 %v4306_v27  ;;  %5871 = vmatmul.bf16.gmra.mxu1 %v5447_v50  ;;  %v4701_v48 = vadd.f32 1.0, %v4573_v24 }
 0x3bd   : > { %v4807_v11 = vpack.c.bf16 %v4697_v33, %v4696_v32  ;;  %v2442_v36 = vadd.f32 %v2441_v13, %v9605_v29  ;;  %7360 = vtanh.f32 %v4307_v62  ;;  %v4116_v57 = vmul.f32 0.796875, %v3988_v34 }
 0x3be   : > { %v4117_v10 = vmul.f32 0.796875, %v3989_v63  ;;  %v3798_v25 = vadd.f32 %v3670_v14, %v10978_v21  ;;  %v3799_v30 = vadd.f32 %v3671_v60, %v10980_v6  ;;  %v4809_v55 = vpack.c.bf16 %v4701_v48, %v4700_v15 }
 0x3bf   : > { %v4888_v41 = vunpack.c.l.bf16 %v4807_v11  ;;  %v4889_v54 = vunpack.c.h.bf16 %v4807_v11  ;;  %v2531_v18 = vadd.f32 %v2530_v51, %v9608_v22  ;;  %v11013_v49 = vpack.c.bf16 %v12339_v23, %v10410_v0  ;;  %v12342_v23 = vld [vmem:[#allocation109_spill] sm:$0xff] }
 0x3c0   : > { %v4197_v31 = vpack.c.bf16 %v4117_v10, %v4116_v57  ;;  %v11017_v24 = vpack.c.bf16 %v10456_v47, %v10449_v45  ;;  %v3878_v59 = vpack.c.bf16 %v3799_v30, %v3798_v25  ;;  %v4892_v16 = vunpack.c.l.bf16 %v4809_v55  ;;  %v2265_v57 = vpop.f32.mrf.mxu0 }
 0x3c1   : > { %v4893_v58 = vunpack.c.h.bf16 %v4809_v55  ;;  %v5016_v32 = vmul.f32 0.5, %v4888_v41  ;;  %v5017_v27 = vmul.f32 0.5, %v4889_v54  ;;  %v2599_v62 = vpack.c.bf16 %v2531_v18, %v2442_v36  ;;  %v2354_v36 = vpop.f32.mrf.mxu1 }
 0x3c2   : > { %v4308_v33 = vunpack.c.l.bf16 %v4197_v31  ;;  %v4309_v13 = vunpack.c.h.bf16 %v4197_v31  ;;  %v11019_v50 = vpop.eup %7358  ;;  %v3990_v15 = vunpack.c.l.bf16 %v3878_v59  ;;  %v3991_v34 = vunpack.c.h.bf16 %v3878_v59 }
 0x3c3   : > { %v5020_v63 = vmul.f32 0.5, %v4892_v16  ;;  %v5021_v14 = vmul.f32 0.5, %v4893_v58  ;;  %v11021_v0 = vpop.eup %7360  ;;  %v5127_v60 = vpack.c.bf16 %v5017_v27, %v5016_v32  ;;  %v11023_v45 = vunpack.c.l.bf16 %v2599_v62  ;;  %v12343_v16 = vld [vmem:[#allocation110_spill] sm:$0xff] }
 0x3c4   : > { %7362 = vtanh.f32 %v4308_v33  ;;  %v11025_v47 = vunpack.c.h.bf16 %v2599_v62  ;;  %v4118_v48 = vmul.f32 0.796875, %v3990_v15  ;;  %v4119_v11 = vmul.f32 0.796875, %v3991_v34  ;;  %v12344_v62 = vld [vmem:[#allocation113_spill] sm:$0xff]  ;;  %v12345_v34 = vld [vmem:[#allocation114_spill] sm:$0xff] }
 0x3c5   : > { %12340 = vst [vmem:[#allocation132_spill] sm:$0xff] %v11023_v45  ;;  %7364 = vtanh.f32 %v4309_v13  ;;  %v5129_v51 = vpack.c.bf16 %v5021_v14, %v5020_v63  ;;  %v5208_v10 = vunpack.c.l.bf16 %v5127_v60  ;;  %v5209_v25 = vunpack.c.h.bf16 %v5127_v60 }
 0x3c6   : > { %12341 = vst [vmem:[#allocation107_spill] sm:$0xff] %v11025_v47  ;;  %v2840_v30 = vmul.f32 %v11023_v45, %v11023_v45  ;;  %v2841_v55 = vmul.f32 %v11025_v47, %v11025_v47  ;;  %v4198_v41 = vpack.c.bf16 %v4119_v11, %v4118_v48  ;;  %v2266_v18 = vadd.f32 %v2265_v57, %v9528_v19 }
 0x3c7   : > { %v5212_v54 = vunpack.c.l.bf16 %v5129_v51  ;;  %v5213_v31 = vunpack.c.h.bf16 %v5129_v51  ;;  %v5336_v59 = vmul.f32 %v5208_v10, %v12342_v23  ;;  %v5337_v58 = vmul.f32 %v5209_v25, %v12343_v16  ;;  %v2443_v16 = vpop.f32.mrf.mxu2 }
 0x3c8   : > { %v2919_v32 = vpack.c.bf16 %v2841_v55, %v2840_v30  ;;  %v2355_v33 = vadd.f32 %v2354_v36, %v9549_v38  ;;  %v4310_v13 = vunpack.c.l.bf16 %v4198_v41  ;;  %v4311_v27 = vunpack.c.h.bf16 %v4198_v41 }
 0x3c9   : > { %v5340_v15 = vmul.f32 %v5212_v54, %v12344_v62  ;;  %v5341_v63 = vmul.f32 %v5213_v31, %v12345_v34  ;;  %v4574_v51 = vunpack.c.l.bf16 %v11013_v49  ;;  %v4575_v36 = vunpack.c.h.bf16 %v11013_v49 }
 0x3ca   : > { %v11037_v14 = vpop.eup %7362  ;;  %v3032_v60 = vunpack.c.l.bf16 %v2919_v32  ;;  %v3033_v48 = vunpack.c.h.bf16 %v2919_v32  ;;  %v2600_v11 = vpack.c.bf16 %v2355_v33, %v2266_v18  ;;  %7366 = vtanh.f32 %v4310_v13  ;;  %v12350_v33 = vld [vmem:[#allocation137_spill] sm:$0xff] }
 0x3cb   : > { %12346 = vst [vmem:[#allocation111_spill] sm:$0xff] %v11037_v14  ;;  %v11040_v57 = vpop.eup %7364  ;;  %v5448_v10 = vpack.c.bf16 %v5340_v15, %v5336_v59  ;;  %v5449_v25 = vpack.c.bf16 %v5341_v63, %v5337_v58  ;;  %7368 = vtanh.f32 %v4311_v27  ;;  %v4578_v31 = vunpack.c.l.bf16 %v11017_v24  ;;  %v2532_v58 = vpop.f32.mrf.mxu3 }
 0x3cc   : > { %12347 = vst [vmem:[#allocation108_spill] sm:$0xff] %v11040_v57  ;;  %v3160_v30 = vmul.f32 %v3032_v60, %v11023_v45  ;;  %v3161_v55 = vmul.f32 %v3033_v48, %v11025_v47  ;;  %v11045_v41 = vunpack.c.l.bf16 %v2600_v11  ;;  %v11047_v54 = vunpack.c.h.bf16 %v2600_v11 }
 0x3cd   : > { %5960 = vmatmul.bf16.gmra.mxu2 %v5448_v10  ;;  %6049 = vmatmul.bf16.gmra.mxu3 %v5449_v25  ;;  %v4579_v18 = vunpack.c.h.bf16 %v11017_v24  ;;  %v4702_v23 = vadd.f32 1.0, %v4574_v51  ;;  %v4703_v32 = vadd.f32 1.0, %v4575_v36  ;;  %v11055_v13 = vpack.c.bf16 %v12350_v33, %v10432_v52  ;;  %v12352_v25 = vld [vmem:[#allocation142_spill] sm:$0xff]  ;;  %v12353_v36 = vld [vmem:[#allocation143_spill] sm:$0xff] }
 0x3ce   : > { %12348 = vst [vmem:[#allocation112_spill] sm:$0xff] %v11045_v41  ;;  %v3239_v59 = vpack.c.bf16 %v3161_v55, %v3160_v30  ;;  %v2842_v49 = vmul.f32 %v11045_v41, %v11045_v41  ;;  %v2843_v27 = vmul.f32 %v11047_v54, %v11047_v54  ;;  %v2444_v62 = vadd.f32 %v2443_v16, %v9605_v29 }
 0x3cf   : > { %12349 = vst [vmem:[#allocation134_spill] sm:$0xff] %v11047_v54  ;;  %v2533_v15 = vadd.f32 %v2532_v58, %v9608_v22  ;;  %v4706_v24 = vadd.f32 1.0, %v4578_v31  ;;  %v4707_v60 = vadd.f32 1.0, %v4579_v18  ;;  %v4810_v48 = vpack.c.bf16 %v4703_v32, %v4702_v23 }
 0x3d0   : > { %v3352_v34 = vunpack.c.l.bf16 %v3239_v59  ;;  %v3353_v63 = vunpack.c.h.bf16 %v3239_v59  ;;  %v11061_v11 = vpop.eup %7366  ;;  %v2920_v51 = vpack.c.bf16 %v2843_v27, %v2842_v49  ;;  %v11065_v52 = vpack.c.bf16 %v12353_v36, %v12352_v25 }
 0x3d1   : > { %12351 = vst [vmem:[#allocation109_spill] sm:$0xff] %v11061_v11  ;;  %v2601_v10 = vpack.c.bf16 %v2533_v15, %v2444_v62  ;;  %v11068_v55 = vpop.eup %7368  ;;  %v4812_v58 = vpack.c.bf16 %v4707_v60, %v4706_v24  ;;  %v4894_v31 = vunpack.c.l.bf16 %v4810_v48  ;;  %v4895_v32 = vunpack.c.h.bf16 %v4810_v48  ;;  %v2357_v60 = vpop.f32.mrf.mxu1 }
 0x3d2   : > { %12354 = vst [vmem:[#allocation110_spill] sm:$0xff] %v11068_v55  ;;  %v3480_v16 = vmul.f32 0.044677734, %v3352_v34  ;;  %v3481_v33 = vmul.f32 0.044677734, %v3353_v63  ;;  %v3034_v6 = vunpack.c.l.bf16 %v2920_v51  ;;  %v3035_v59 = vunpack.c.h.bf16 %v2920_v51  ;;  %v2268_v63 = vpop.f32.mrf.mxu0 }
 0x3d3   : > { %v11070_v18 = vunpack.c.l.bf16 %v2601_v10  ;;  %v11072_v23 = vunpack.c.h.bf16 %v2601_v10  ;;  %v4898_v27 = vunpack.c.l.bf16 %v4812_v58  ;;  %v4899_v62 = vunpack.c.h.bf16 %v4812_v58 }
 0x3d4   : > { %v3559_v49 = vpack.c.bf16 %v3481_v33, %v3480_v16  ;;  %v3162_v15 = vmul.f32 %v3034_v6, %v11045_v41  ;;  %v3163_v25 = vmul.f32 %v3035_v59, %v11047_v54  ;;  %v2269_v10 = vadd.f32 %v2268_v63, %v9528_v19 }
 0x3d5   : > { %12355 = vst [vmem:[#allocation113_spill] sm:$0xff] %v11070_v18  ;;  %v2844_v34 = vmul.f32 %v11070_v18, %v11070_v18  ;;  %v2845_v24 = vmul.f32 %v11072_v23, %v11072_v23  ;;  %v2358_v48 = vadd.f32 %v2357_v60, %v9549_v38  ;;  %v5022_v58 = vmul.f32 0.5, %v4894_v31 }
 0x3d6   : > { %12356 = vst [vmem:[#allocation114_spill] sm:$0xff] %v11072_v23  ;;  %v3672_v51 = vunpack.c.l.bf16 %v3559_v49  ;;  %v3673_v36 = vunpack.c.h.bf16 %v3559_v49  ;;  %v3240_v16 = vpack.c.bf16 %v3163_v25, %v3162_v15  ;;  %v5023_v6 = vmul.f32 0.5, %v4895_v32 }
 0x3d7   : > { %v2921_v33 = vpack.c.bf16 %v2845_v24, %v2844_v34  ;;  %v2602_v21 = vpack.c.bf16 %v2358_v48, %v2269_v10  ;;  %v5026_v20 = vmul.f32 0.5, %v4898_v27  ;;  %v5027_v60 = vmul.f32 0.5, %v4899_v62 }
 0x3d8   : > { %v3800_v59 = vadd.f32 %v3672_v51, %v11023_v45  ;;  %v3801_v30 = vadd.f32 %v3673_v36, %v11025_v47  ;;  %v3354_v17 = vunpack.c.l.bf16 %v3240_v16  ;;  %v3355_v55 = vunpack.c.h.bf16 %v3240_v16 }
 0x3d9   : > { %v3036_v11 = vunpack.c.l.bf16 %v2921_v33  ;;  %v3037_v4 = vunpack.c.h.bf16 %v2921_v33  ;;  %v11084_v49 = vunpack.c.l.bf16 %v2602_v21  ;;  %v11086_v63 = vunpack.c.h.bf16 %v2602_v21 }
 0x3da   : > { %v3879_v57 = vpack.c.bf16 %v3801_v30, %v3800_v59  ;;  %v3482_v15 = vmul.f32 0.044677734, %v3354_v17  ;;  %v3483_v25 = vmul.f32 0.044677734, %v3355_v55  ;;  %v5130_v10 = vpack.c.bf16 %v5023_v6, %v5022_v58 }
 0x3db   : > { %12357 = vst [vmem:[#allocation137_spill] sm:$0xff] %v11084_v49  ;;  %v3164_v31 = vmul.f32 %v3036_v11, %v11070_v18  ;;  %v3165_v32 = vmul.f32 %v3037_v4, %v11072_v23  ;;  %v2846_v27 = vmul.f32 %v11084_v49, %v11084_v49  ;;  %v2847_v51 = vmul.f32 %v11086_v63, %v11086_v63 }
 0x3dc   : > { %12358 = vst [vmem:[#allocation142_spill] sm:$0xff] %v11086_v63  ;;  %v3992_v34 = vunpack.c.l.bf16 %v3879_v57  ;;  %v3993_v24 = vunpack.c.h.bf16 %v3879_v57  ;;  %v3560_v30 = vpack.c.bf16 %v3483_v25, %v3482_v15  ;;  %v5132_v21 = vpack.c.bf16 %v5027_v60, %v5026_v20 }
 0x3dd   : > { %v3241_v36 = vpack.c.bf16 %v3165_v32, %v3164_v31  ;;  %v2922_v17 = vpack.c.bf16 %v2847_v51, %v2846_v27  ;;  %v4577_v55 = vunpack.c.h.bf16 %v11055_v13  ;;  %v5214_v45 = vunpack.c.l.bf16 %v5130_v10  ;;  %v12359_v27 = vld [vmem:[#allocation115_spill] sm:$0xff] }
 0x3de   : > { %v4120_v48 = vmul.f32 0.796875, %v3992_v34  ;;  %v4121_v62 = vmul.f32 0.796875, %v3993_v24  ;;  %v3674_v11 = vunpack.c.l.bf16 %v3560_v30  ;;  %v3675_v16 = vunpack.c.h.bf16 %v3560_v30 }
 0x3df   : > { %v3356_v4 = vunpack.c.l.bf16 %v3241_v36  ;;  %v3357_v33 = vunpack.c.h.bf16 %v3241_v36  ;;  %v3038_v59 = vunpack.c.l.bf16 %v2922_v17  ;;  %v3039_v47 = vunpack.c.h.bf16 %v2922_v17 }
 0x3e0   : > { %v4199_v57 = vpack.c.bf16 %v4121_v62, %v4120_v48  ;;  %v3802_v14 = vadd.f32 %v3674_v11, %v11045_v41  ;;  %v3803_v15 = vadd.f32 %v3675_v16, %v11047_v54  ;;  %v5218_v24 = vunpack.c.l.bf16 %v5132_v21 }
 0x3e1   : > { %v3484_v25 = vmul.f32 0.044677734, %v3356_v4  ;;  %v3485_v58 = vmul.f32 0.044677734, %v3357_v33  ;;  %v3166_v60 = vmul.f32 %v3038_v59, %v11084_v49  ;;  %v3167_v31 = vmul.f32 %v3039_v47, %v11086_v63 }
 0x3e2   : > { %v4312_v20 = vunpack.c.l.bf16 %v4199_v57  ;;  %v4313_v6 = vunpack.c.h.bf16 %v4199_v57  ;;  %v3880_v32 = vpack.c.bf16 %v3803_v15, %v3802_v14  ;;  %v5342_v51 = vmul.f32 %v5214_v45, %v12359_v27  ;;  %v12360_v57 = vld [vmem:[#allocation122_spill] sm:$0xff]  ;;  %v12361_v15 = vld [vmem:[#allocation116_spill] sm:$0xff] }
 0x3e3   : > { %v3561_v34 = vpack.c.bf16 %v3485_v58, %v3484_v25  ;;  %v3242_v30 = vpack.c.bf16 %v3167_v31, %v3166_v60  ;;  %v5215_v36 = vunpack.c.h.bf16 %v5130_v10  ;;  %v5219_v48 = vunpack.c.h.bf16 %v5132_v21 }
 0x3e4   : > { %7370 = vtanh.f32 %v4312_v20  ;;  %v3994_v62 = vunpack.c.l.bf16 %v3880_v32  ;;  %v3995_v17 = vunpack.c.h.bf16 %v3880_v32  ;;  %v5346_v59 = vmul.f32 %v5218_v24, %v12360_v57 }
 0x3e5   : > { %7372 = vtanh.f32 %v4313_v6  ;;  %v3676_v11 = vunpack.c.l.bf16 %v3561_v34  ;;  %v3677_v16 = vunpack.c.h.bf16 %v3561_v34  ;;  %v3358_v4 = vunpack.c.l.bf16 %v3242_v30  ;;  %v12362_v6 = vld [vmem:[#allocation123_spill] sm:$0xff] }
 0x3e6   : > { %v3359_v33 = vunpack.c.h.bf16 %v3242_v30  ;;  %v4122_v54 = vmul.f32 0.796875, %v3994_v62  ;;  %v4123_v47 = vmul.f32 0.796875, %v3995_v17  ;;  %v5343_v25 = vmul.f32 %v5215_v36, %v12361_v15  ;;  %v2446_v17 = vpop.f32.mrf.mxu2 }
 0x3e7   : > { %v3804_v14 = vadd.f32 %v3676_v11, %v11070_v18  ;;  %v3805_v45 = vadd.f32 %v3677_v16, %v11072_v23  ;;  %v3486_v58 = vmul.f32 0.044677734, %v3358_v4  ;;  %v5450_v21 = vpack.c.bf16 %v5346_v59, %v5342_v51 }
 0x3e8   : > { %v3487_v10 = vmul.f32 0.044677734, %v3359_v33  ;;  %v4200_v20 = vpack.c.bf16 %v4123_v47, %v4122_v54  ;;  %v5347_v60 = vmul.f32 %v5219_v48, %v12362_v6  ;;  %v4580_v31 = vunpack.c.l.bf16 %v11065_v52 }
 0x3e9   : > { %v4581_v32 = vunpack.c.h.bf16 %v11065_v52  ;;  %v3881_v24 = vpack.c.bf16 %v3805_v45, %v3804_v14  ;;  %5787 = vmatmul.bf16.gmra.mxu0 %v5450_v21  ;;  %v12364_v30 = vunpack.c.l.bf16 %v11055_v13  ;;  %v4705_v62 = vadd.f32 1.0, %v4577_v55  ;;  %v2535_v13 = vpop.f32.mrf.mxu3 }
 0x3ea   : > { %v11107_v34 = vpop.eup %7370  ;;  %v3562_v27 = vpack.c.bf16 %v3487_v10, %v3486_v58  ;;  %v4314_v51 = vunpack.c.l.bf16 %v4200_v20  ;;  %v4315_v54 = vunpack.c.h.bf16 %v4200_v20  ;;  %v5451_v16 = vpack.c.bf16 %v5347_v60, %v5343_v25 }
 0x3eb   : > { %12363 = vst [vmem:[#allocation143_spill] sm:$0xff] %v11107_v34  ;;  %v4704_v36 = vadd.f32 1.0, %v12364_v30  ;;  %v11111_v11 = vpop.eup %7372  ;;  %v4708_v48 = vadd.f32 1.0, %v4580_v31  ;;  %v3996_v4 = vunpack.c.l.bf16 %v3881_v24  ;;  %v3997_v33 = vunpack.c.h.bf16 %v3881_v24  ;;  %v12366_v31 = vld [vmem:[#allocation152_spill] sm:$0xff] }
 0x3ec   : > { %12365 = vst [vmem:[#allocation115_spill] sm:$0xff] %v11111_v11  ;;  %v3678_v57 = vunpack.c.l.bf16 %v3562_v27  ;;  %v3679_v52 = vunpack.c.h.bf16 %v3562_v27  ;;  %7374 = vtanh.f32 %v4314_v51  ;;  %5876 = vmatmul.bf16.gmra.mxu1 %v5451_v16  ;;  %v4709_v59 = vadd.f32 1.0, %v4581_v32  ;;  %v12367_v32 = vld [vmem:[#allocation155_spill] sm:$0xff] }
 0x3ed   : > { %v4811_v47 = vpack.c.bf16 %v4705_v62, %v4704_v36  ;;  %v2447_v14 = vadd.f32 %v2446_v17, %v9605_v29  ;;  %7376 = vtanh.f32 %v4315_v54  ;;  %v4124_v55 = vmul.f32 0.796875, %v3996_v4 }
 0x3ee   : > { %v4125_v15 = vmul.f32 0.796875, %v3997_v33  ;;  %v3806_v45 = vadd.f32 %v3678_v57, %v11084_v49  ;;  %v3807_v58 = vadd.f32 %v3679_v52, %v11086_v63  ;;  %v4813_v25 = vpack.c.bf16 %v4709_v59, %v4708_v48 }
 0x3ef   : > { %v4896_v10 = vunpack.c.l.bf16 %v4811_v47  ;;  %v4897_v21 = vunpack.c.h.bf16 %v4811_v47  ;;  %v2536_v6 = vadd.f32 %v2535_v13, %v9608_v22  ;;  %v11119_v60 = vpack.c.bf16 %v10495_v9, %v10489_v28 }
 0x3f0   : > { %v4201_v20 = vpack.c.bf16 %v4125_v15, %v4124_v55  ;;  %v11123_v24 = vpack.c.bf16 %v12367_v32, %v12366_v31  ;;  %v3882_v27 = vpack.c.bf16 %v3807_v58, %v3806_v45  ;;  %v4900_v30 = vunpack.c.l.bf16 %v4813_v25  ;;  %v2270_v45 = vpop.f32.mrf.mxu0 }
 0x3f1   : > { %v4901_v36 = vunpack.c.h.bf16 %v4813_v25  ;;  %v5024_v62 = vmul.f32 0.5, %v4896_v10  ;;  %v5025_v54 = vmul.f32 0.5, %v4897_v21  ;;  %v2603_v16 = vpack.c.bf16 %v2536_v6, %v2447_v14  ;;  %v2359_v14 = vpop.f32.mrf.mxu1 }
 0x3f2   : > { %v4316_v17 = vunpack.c.l.bf16 %v4201_v20  ;;  %v4317_v51 = vunpack.c.h.bf16 %v4201_v20  ;;  %v11125_v48 = vpop.eup %7374  ;;  %v3998_v4 = vunpack.c.l.bf16 %v3882_v27  ;;  %v3999_v33 = vunpack.c.h.bf16 %v3882_v27  ;;  %v12370_v27 = vld [vmem:[#allocation120_spill] sm:$0xff] }
 0x3f3   : > { %v5028_v57 = vmul.f32 0.5, %v4900_v30  ;;  %v5029_v52 = vmul.f32 0.5, %v4901_v36  ;;  %v11127_v28 = vpop.eup %7376  ;;  %v5131_v9 = vpack.c.bf16 %v5025_v54, %v5024_v62  ;;  %v11129_v59 = vunpack.c.l.bf16 %v2603_v16  ;;  %v12371_v36 = vld [vmem:[#allocation121_spill] sm:$0xff] }
 0x3f4   : > { %7378 = vtanh.f32 %v4316_v17  ;;  %v11131_v47 = vunpack.c.h.bf16 %v2603_v16  ;;  %v4126_v13 = vmul.f32 0.796875, %v3998_v4  ;;  %v4127_v55 = vmul.f32 0.796875, %v3999_v33  ;;  %v12372_v4 = vld [vmem:[#allocation126_spill] sm:$0xff] }
 0x3f5   : > { %12368 = vst [vmem:[#allocation122_spill] sm:$0xff] %v11129_v59  ;;  %7380 = vtanh.f32 %v4317_v51  ;;  %v5133_v15 = vpack.c.bf16 %v5029_v52, %v5028_v57  ;;  %v5216_v58 = vunpack.c.l.bf16 %v5131_v9  ;;  %v5217_v25 = vunpack.c.h.bf16 %v5131_v9  ;;  %v12373_v57 = vld [vmem:[#allocation127_spill] sm:$0xff] }
 0x3f6   : > { %12369 = vst [vmem:[#allocation116_spill] sm:$0xff] %v11131_v47  ;;  %v2848_v10 = vmul.f32 %v11129_v59, %v11129_v59  ;;  %v2849_v21 = vmul.f32 %v11131_v47, %v11131_v47  ;;  %v4202_v20 = vpack.c.bf16 %v4127_v55, %v4126_v13  ;;  %v2271_v32 = vadd.f32 %v2270_v45, %v9528_v19 }
 0x3f7   : > { %v5220_v6 = vunpack.c.l.bf16 %v5133_v15  ;;  %v5221_v31 = vunpack.c.h.bf16 %v5133_v15  ;;  %v5344_v30 = vmul.f32 %v5216_v58, %v12370_v27  ;;  %v5345_v62 = vmul.f32 %v5217_v25, %v12371_v36  ;;  %v2448_v36 = vpop.f32.mrf.mxu2 }
 0x3f8   : > { %v2923_v17 = vpack.c.bf16 %v2849_v21, %v2848_v10  ;;  %v2360_v51 = vadd.f32 %v2359_v14, %v9549_v38  ;;  %v4318_v54 = vunpack.c.l.bf16 %v4202_v20  ;;  %v4319_v16 = vunpack.c.h.bf16 %v4202_v20 }
 0x3f9   : > { %v5348_v33 = vmul.f32 %v5220_v6, %v12372_v4  ;;  %v5349_v52 = vmul.f32 %v5221_v31, %v12373_v57  ;;  %v4582_v45 = vunpack.c.l.bf16 %v11119_v60  ;;  %v4583_v14 = vunpack.c.h.bf16 %v11119_v60 }
 0x3fa   : > { %v11143_v9 = vpop.eup %7378  ;;  %v3040_v13 = vunpack.c.l.bf16 %v2923_v17  ;;  %v3041_v55 = vunpack.c.h.bf16 %v2923_v17  ;;  %v2604_v15 = vpack.c.bf16 %v2360_v51, %v2271_v32  ;;  %7382 = vtanh.f32 %v4318_v54  ;;  %v12377_v51 = vld [vmem:[#allocation148_spill] sm:$0xff]  ;;  %v12378_v54 = vld [vmem:[#allocation149_spill] sm:$0xff] }
 0x3fb   : > { %12374 = vst [vmem:[#allocation123_spill] sm:$0xff] %v11143_v9  ;;  %v11146_v63 = vpop.eup %7380  ;;  %v5452_v58 = vpack.c.bf16 %v5348_v33, %v5344_v30  ;;  %v5453_v25 = vpack.c.bf16 %v5349_v52, %v5345_v62  ;;  %7384 = vtanh.f32 %v4319_v16  ;;  %v4586_v31 = vunpack.c.l.bf16 %v11123_v24  ;;  %v2537_v62 = vpop.f32.mrf.mxu3 }
 0x3fc   : > { %12375 = vst [vmem:[#allocation152_spill] sm:$0xff] %v11146_v63  ;;  %v3168_v10 = vmul.f32 %v3040_v13, %v11129_v59  ;;  %v3169_v21 = vmul.f32 %v3041_v55, %v11131_v47  ;;  %v11151_v20 = vunpack.c.l.bf16 %v2604_v15  ;;  %v11153_v6 = vunpack.c.h.bf16 %v2604_v15 }
 0x3fd   : > { %5965 = vmatmul.bf16.gmra.mxu2 %v5452_v58  ;;  %6054 = vmatmul.bf16.gmra.mxu3 %v5453_v25  ;;  %v4587_v32 = vunpack.c.h.bf16 %v11123_v24  ;;  %v4710_v27 = vadd.f32 1.0, %v4582_v45  ;;  %v4711_v17 = vadd.f32 1.0, %v4583_v14  ;;  %v11161_v16 = vpack.c.bf16 %v12378_v54, %v12377_v51  ;;  %v12380_v14 = vld [vmem:[#allocation156_spill] sm:$0xff] }
 0x3fe   : > { %12376 = vst [vmem:[#allocation155_spill] sm:$0xff] %v11153_v6  ;;  %v3243_v30 = vpack.c.bf16 %v3169_v21, %v3168_v10  ;;  %v2850_v60 = vmul.f32 %v11151_v20, %v11151_v20  ;;  %v2851_v4 = vmul.f32 %v11153_v6, %v11153_v6  ;;  %v2449_v33 = vadd.f32 %v2448_v36, %v9605_v29  ;;  %v12381_v10 = vld [vmem:[#allocation157_spill] sm:$0xff] }
 0x3ff   : > { %v2538_v57 = vadd.f32 %v2537_v62, %v9608_v22  ;;  %v4714_v24 = vadd.f32 1.0, %v4586_v31  ;;  %v4715_v55 = vadd.f32 1.0, %v4587_v32  ;;  %v4814_v15 = vpack.c.bf16 %v4711_v17, %v4710_v27 }
 0x400   : > { %v3360_v52 = vunpack.c.l.bf16 %v3243_v30  ;;  %v3361_v13 = vunpack.c.h.bf16 %v3243_v30  ;;  %v11167_v45 = vpop.eup %7382  ;;  %v2924_v58 = vpack.c.bf16 %v2851_v4, %v2850_v60  ;;  %v11171_v21 = vpack.c.bf16 %v12381_v10, %v12380_v14 }
 0x401   : > { %12379 = vst [vmem:[#allocation120_spill] sm:$0xff] %v11167_v45  ;;  %v2605_v25 = vpack.c.bf16 %v2538_v57, %v2449_v33  ;;  %v11174_v54 = vpop.eup %7384  ;;  %v4816_v62 = vpack.c.bf16 %v4715_v55, %v4714_v24  ;;  %v4902_v31 = vunpack.c.l.bf16 %v4814_v15  ;;  %v4903_v17 = vunpack.c.h.bf16 %v4814_v15  ;;  %v2362_v55 = vpop.f32.mrf.mxu1 }
 0x402   : > { %12382 = vst [vmem:[#allocation121_spill] sm:$0xff] %v11174_v54  ;;  %v3488_v36 = vmul.f32 0.044677734, %v3360_v52  ;;  %v3489_v49 = vmul.f32 0.044677734, %v3361_v13  ;;  %v3042_v23 = vunpack.c.l.bf16 %v2924_v58  ;;  %v3043_v30 = vunpack.c.h.bf16 %v2924_v58  ;;  %v2273_v13 = vpop.f32.mrf.mxu0 }
 0x403   : > { %v11176_v32 = vunpack.c.l.bf16 %v2605_v25  ;;  %v11178_v27 = vunpack.c.h.bf16 %v2605_v25  ;;  %v4906_v4 = vunpack.c.l.bf16 %v4816_v62  ;;  %v4907_v33 = vunpack.c.h.bf16 %v4816_v62 }
 0x404   : > { %v3563_v60 = vpack.c.bf16 %v3489_v49, %v3488_v36  ;;  %v3170_v57 = vmul.f32 %v3042_v23, %v11151_v20  ;;  %v3171_v14 = vmul.f32 %v3043_v30, %v11153_v6  ;;  %v2274_v25 = vadd.f32 %v2273_v13, %v9528_v19 }
 0x405   : > { %12383 = vst [vmem:[#allocation126_spill] sm:$0xff] %v11176_v32  ;;  %v2852_v52 = vmul.f32 %v11176_v32, %v11176_v32  ;;  %v2853_v24 = vmul.f32 %v11178_v27, %v11178_v27  ;;  %v2363_v49 = vadd.f32 %v2362_v55, %v9549_v38  ;;  %v5030_v62 = vmul.f32 0.5, %v4902_v31 }
 0x406   : > { %12384 = vst [vmem:[#allocation127_spill] sm:$0xff] %v11178_v27  ;;  %v3680_v58 = vunpack.c.l.bf16 %v3563_v60  ;;  %v3681_v10 = vunpack.c.h.bf16 %v3563_v60  ;;  %v3244_v15 = vpack.c.bf16 %v3171_v14, %v3170_v57  ;;  %v5031_v23 = vmul.f32 0.5, %v4903_v17 }
 0x407   : > { %v2925_v36 = vpack.c.bf16 %v2853_v24, %v2852_v52  ;;  %v2606_v18 = vpack.c.bf16 %v2363_v49, %v2274_v25  ;;  %v5034_v54 = vmul.f32 0.5, %v4906_v4  ;;  %v5035_v55 = vmul.f32 0.5, %v4907_v33 }
 0x408   : > { %v3808_v30 = vadd.f32 %v3680_v58, %v11129_v59  ;;  %v3809_v51 = vadd.f32 %v3681_v10, %v11131_v47  ;;  %v3362_v45 = vunpack.c.l.bf16 %v3244_v15  ;;  %v3363_v41 = vunpack.c.h.bf16 %v3244_v15 }
 0x409   : > { %v3044_v63 = vunpack.c.l.bf16 %v2925_v36  ;;  %v3045_v9 = vunpack.c.h.bf16 %v2925_v36  ;;  %v11190_v60 = vunpack.c.l.bf16 %v2606_v18  ;;  %v11192_v13 = vunpack.c.h.bf16 %v2606_v18 }
 0x40a   : > { %v3883_v11 = vpack.c.bf16 %v3809_v51, %v3808_v30  ;;  %v3490_v57 = vmul.f32 0.044677734, %v3362_v45  ;;  %v3491_v14 = vmul.f32 0.044677734, %v3363_v41  ;;  %v5134_v25 = vpack.c.bf16 %v5031_v23, %v5030_v62 }
 0x40b   : > { %12385 = vst [vmem:[#allocation148_spill] sm:$0xff] %v11190_v60  ;;  %v3172_v31 = vmul.f32 %v3044_v63, %v11176_v32  ;;  %v3173_v17 = vmul.f32 %v3045_v9, %v11178_v27  ;;  %v2854_v4 = vmul.f32 %v11190_v60, %v11190_v60  ;;  %v2855_v58 = vmul.f32 %v11192_v13, %v11192_v13 }
 0x40c   : > { %12386 = vst [vmem:[#allocation149_spill] sm:$0xff] %v11192_v13  ;;  %v4000_v52 = vunpack.c.l.bf16 %v3883_v11  ;;  %v4001_v24 = vunpack.c.h.bf16 %v3883_v11  ;;  %v3564_v51 = vpack.c.bf16 %v3491_v14, %v3490_v57  ;;  %v5136_v18 = vpack.c.bf16 %v5035_v55, %v5034_v54 }
 0x40d   : > { %v3245_v10 = vpack.c.bf16 %v3173_v17, %v3172_v31  ;;  %v2926_v45 = vpack.c.bf16 %v2855_v58, %v2854_v4  ;;  %v4585_v41 = vunpack.c.h.bf16 %v11161_v16  ;;  %v5222_v59 = vunpack.c.l.bf16 %v5134_v25  ;;  %v12387_v4 = vld [vmem:[#allocation130_spill] sm:$0xff] }
 0x40e   : > { %v4128_v49 = vmul.f32 0.796875, %v4000_v52  ;;  %v4129_v33 = vmul.f32 0.796875, %v4001_v24  ;;  %v3682_v63 = vunpack.c.l.bf16 %v3564_v51  ;;  %v3683_v15 = vunpack.c.h.bf16 %v3564_v51 }
 0x40f   : > { %v3364_v9 = vunpack.c.l.bf16 %v3245_v10  ;;  %v3365_v36 = vunpack.c.h.bf16 %v3245_v10  ;;  %v3046_v30 = vunpack.c.l.bf16 %v2926_v45  ;;  %v3047_v47 = vunpack.c.h.bf16 %v2926_v45 }
 0x410   : > { %v4203_v11 = vpack.c.bf16 %v4129_v33, %v4128_v49  ;;  %v3810_v34 = vadd.f32 %v3682_v63, %v11151_v20  ;;  %v3811_v57 = vadd.f32 %v3683_v15, %v11153_v6  ;;  %v5226_v24 = vunpack.c.l.bf16 %v5136_v18 }
 0x411   : > { %v3492_v14 = vmul.f32 0.044677734, %v3364_v9  ;;  %v3493_v62 = vmul.f32 0.044677734, %v3365_v36  ;;  %v3174_v55 = vmul.f32 %v3046_v30, %v11190_v60  ;;  %v3175_v31 = vmul.f32 %v3047_v47, %v11192_v13 }
 0x412   : > { %v4320_v54 = vunpack.c.l.bf16 %v4203_v11  ;;  %v4321_v23 = vunpack.c.h.bf16 %v4203_v11  ;;  %v3884_v17 = vpack.c.bf16 %v3811_v57, %v3810_v34  ;;  %v5350_v58 = vmul.f32 %v5222_v59, %v12387_v4  ;;  %v12388_v11 = vld [vmem:[#allocation138_spill] sm:$0xff]  ;;  %v12389_v57 = vld [vmem:[#allocation133_spill] sm:$0xff] }
 0x413   : > { %v3565_v52 = vpack.c.bf16 %v3493_v62, %v3492_v14  ;;  %v3246_v51 = vpack.c.bf16 %v3175_v31, %v3174_v55  ;;  %v5223_v10 = vunpack.c.h.bf16 %v5134_v25  ;;  %v5227_v49 = vunpack.c.h.bf16 %v5136_v18 }
 0x414   : > { %7386 = vtanh.f32 %v4320_v54  ;;  %v4002_v33 = vunpack.c.l.bf16 %v3884_v17  ;;  %v4003_v45 = vunpack.c.h.bf16 %v3884_v17  ;;  %v5354_v30 = vmul.f32 %v5226_v24, %v12388_v11 }
 0x415   : > { %7388 = vtanh.f32 %v4321_v23  ;;  %v3684_v63 = vunpack.c.l.bf16 %v3565_v52  ;;  %v3685_v15 = vunpack.c.h.bf16 %v3565_v52  ;;  %v3366_v9 = vunpack.c.l.bf16 %v3246_v51  ;;  %v12390_v23 = vld [vmem:[#allocation139_spill] sm:$0xff] }
 0x416   : > { %v3367_v36 = vunpack.c.h.bf16 %v3246_v51  ;;  %v4130_v6 = vmul.f32 0.796875, %v4002_v33  ;;  %v4131_v47 = vmul.f32 0.796875, %v4003_v45  ;;  %v5351_v14 = vmul.f32 %v5223_v10, %v12389_v57 }
 0x417   : > { %v3812_v34 = vadd.f32 %v3684_v63, %v11176_v32  ;;  %v3813_v59 = vadd.f32 %v3685_v15, %v11178_v27  ;;  %v3494_v62 = vmul.f32 0.044677734, %v3366_v9  ;;  %v5454_v18 = vpack.c.bf16 %v5354_v30, %v5350_v58 }
 0x418   : > { %v3495_v25 = vmul.f32 0.044677734, %v3367_v36  ;;  %v4204_v54 = vpack.c.bf16 %v4131_v47, %v4130_v6  ;;  %v5355_v55 = vmul.f32 %v5227_v49, %v12390_v23  ;;  %v4588_v31 = vunpack.c.l.bf16 %v11171_v21  ;;  %v2451_v49 = vpop.f32.mrf.mxu2 }
 0x419   : > { %v4589_v17 = vunpack.c.h.bf16 %v11171_v21  ;;  %v3885_v24 = vpack.c.bf16 %v3813_v59, %v3812_v34  ;;  %5792 = vmatmul.bf16.gmra.mxu0 %v5454_v18  ;;  %v12391_v51 = vunpack.c.l.bf16 %v11161_v16  ;;  %v4713_v33 = vadd.f32 1.0, %v4585_v41  ;;  %v2540_v34 = vpop.f32.mrf.mxu3 }
 0x41a   : > { %v11213_v52 = vpop.eup %7386  ;;  %v3566_v4 = vpack.c.bf16 %v3495_v25, %v3494_v62  ;;  %v4322_v63 = vunpack.c.l.bf16 %v4204_v54  ;;  %v4323_v58 = vunpack.c.h.bf16 %v4204_v54  ;;  %v5455_v6 = vpack.c.bf16 %v5355_v55, %v5351_v14 }
 0x41b   : > { %v4712_v10 = vadd.f32 1.0, %v12391_v51  ;;  %v11217_v45 = vpop.eup %7388  ;;  %v4716_v15 = vadd.f32 1.0, %v4588_v31  ;;  %v4004_v9 = vunpack.c.l.bf16 %v3885_v24  ;;  %v4005_v36 = vunpack.c.h.bf16 %v3885_v24 }
 0x41c   : > { %v3686_v11 = vunpack.c.l.bf16 %v3566_v4  ;;  %v3687_v21 = vunpack.c.h.bf16 %v3566_v4  ;;  %7390 = vtanh.f32 %v4322_v63  ;;  %5881 = vmatmul.bf16.gmra.mxu1 %v5455_v6  ;;  %v4717_v30 = vadd.f32 1.0, %v4589_v17 }
 0x41d   : > { %v4815_v47 = vpack.c.bf16 %v4713_v33, %v4712_v10  ;;  %v4132_v57 = vmul.f32 0.796875, %v4004_v9  ;;  %v4133_v16 = vmul.f32 0.796875, %v4005_v36  ;;  %v2452_v59 = vadd.f32 %v2451_v49, %v9605_v29  ;;  %v12392_v10 = vld [vmem:[#allocation160_spill] sm:$0xff] }
 0x41e   : > { %v3814_v41 = vadd.f32 %v3686_v11, %v11190_v60  ;;  %v3815_v62 = vadd.f32 %v3687_v21, %v11192_v13  ;;  %v4817_v14 = vpack.c.bf16 %v4717_v30, %v4716_v15  ;;  %7392 = vtanh.f32 %v4323_v58 }
 0x41f   : > { %v4904_v25 = vunpack.c.l.bf16 %v4815_v47  ;;  %v4905_v18 = vunpack.c.h.bf16 %v4815_v47  ;;  %v4205_v54 = vpack.c.bf16 %v4133_v16, %v4132_v57  ;;  %v2541_v23 = vadd.f32 %v2540_v34, %v9608_v22  ;;  %v2275_v16 = vpop.f32.mrf.mxu0 }
 0x420   : > { %v3886_v55 = vpack.c.bf16 %v3815_v62, %v3814_v41  ;;  %v4908_v31 = vunpack.c.l.bf16 %v4817_v14  ;;  %v4909_v17 = vunpack.c.h.bf16 %v4817_v14  ;;  %v4498_v33 = vpack.c.bf16 %v10573_v46, %v12392_v10  ;;  %v2364_v41 = vpop.f32.mrf.mxu1 }
 0x421   : > { %v5032_v24 = vmul.f32 0.5, %v4904_v25  ;;  %v5033_v4 = vmul.f32 0.5, %v4905_v18  ;;  %v2607_v51 = vpack.c.bf16 %v2541_v23, %v2452_v59  ;;  %v11227_v63 = vpack.c.bf16 %v10597_v26, %v10595_v39 }
 0x422   : > { %v11229_v6 = vpop.eup %7390  ;;  %v4006_v15 = vunpack.c.l.bf16 %v3886_v55  ;;  %v4007_v58 = vunpack.c.h.bf16 %v3886_v55  ;;  %v5036_v49 = vmul.f32 0.5, %v4908_v31  ;;  %v5037_v9 = vmul.f32 0.5, %v4909_v17  ;;  %v12395_v55 = vld [vmem:[#allocation135_spill] sm:$0xff] }
 0x423   : > { %v4324_v36 = vunpack.c.l.bf16 %v4205_v54  ;;  %v5135_v11 = vpack.c.bf16 %v5033_v4, %v5032_v24  ;;  %v11231_v21 = vunpack.c.l.bf16 %v2607_v51  ;;  %v11233_v30 = vunpack.c.h.bf16 %v2607_v51  ;;  %v12396_v51 = vld [vmem:[#allocation140_spill] sm:$0xff] }
 0x424   : > { %v4325_v47 = vunpack.c.h.bf16 %v4205_v54  ;;  %v4134_v34 = vmul.f32 0.796875, %v4006_v15  ;;  %v4135_v57 = vmul.f32 0.796875, %v4007_v58  ;;  %v5137_v46 = vpack.c.bf16 %v5037_v9, %v5036_v49  ;;  %v11235_v39 = vpop.eup %7392  ;;  %v12397_v15 = vld [vmem:[#allocation136_spill] sm:$0xff]  ;;  %v12398_v49 = vld [vmem:[#allocation141_spill] sm:$0xff] }
 0x425   : > { %12393 = vst [vmem:[#allocation156_spill] sm:$0xff] %v11231_v21  ;;  %v5224_v26 = vunpack.c.l.bf16 %v5135_v11  ;;  %v5225_v59 = vunpack.c.h.bf16 %v5135_v11  ;;  %v2856_v62 = vmul.f32 %v11231_v21, %v11231_v21  ;;  %v2857_v14 = vmul.f32 %v11233_v30, %v11233_v30 }
 0x426   : > { %12394 = vst [vmem:[#allocation157_spill] sm:$0xff] %v11233_v30  ;;  %v4206_v25 = vpack.c.bf16 %v4135_v57, %v4134_v34  ;;  %v5228_v18 = vunpack.c.l.bf16 %v5137_v46  ;;  %v5229_v23 = vunpack.c.h.bf16 %v5137_v46  ;;  %v2276_v54 = vadd.f32 %v2275_v16, %v9528_v19 }
 0x427   : > { %7394 = vtanh.f32 %v4324_v36  ;;  %v5352_v31 = vmul.f32 %v5224_v26, %v12395_v55  ;;  %v2927_v17 = vpack.c.bf16 %v2857_v14, %v2856_v62  ;;  %v2365_v24 = vadd.f32 %v2364_v41, %v9549_v38 }
 0x428   : > { %v4326_v4 = vunpack.c.l.bf16 %v4206_v25  ;;  %v5356_v10 = vmul.f32 %v5228_v18, %v12396_v51  ;;  %v5353_v58 = vmul.f32 %v5225_v59, %v12397_v15  ;;  %v5357_v9 = vmul.f32 %v5229_v23, %v12398_v49 }
 0x429   : > { %v3048_v11 = vunpack.c.l.bf16 %v2927_v17  ;;  %v3049_v13 = vunpack.c.h.bf16 %v2927_v17  ;;  %v2608_v34 = vpack.c.bf16 %v2365_v24, %v2276_v54  ;;  %v4590_v57 = vunpack.c.l.bf16 %v4498_v33  ;;  %v2453_v54 = vpop.f32.mrf.mxu2 }
 0x42a   : > { %7396 = vtanh.f32 %v4325_v47  ;;  %v5456_v46 = vpack.c.bf16 %v5356_v10, %v5352_v31  ;;  %v5457_v16 = vpack.c.bf16 %v5357_v9, %v5353_v58  ;;  %v4591_v36 = vunpack.c.h.bf16 %v4498_v33 }
 0x42b   : > { %v4327_v60 = vunpack.c.h.bf16 %v4206_v25  ;;  %v3176_v26 = vmul.f32 %v3048_v11, %v11231_v21  ;;  %v3177_v41 = vmul.f32 %v3049_v13, %v11233_v30  ;;  %v11249_v62 = vunpack.c.l.bf16 %v2608_v34  ;;  %v2542_v13 = vpop.f32.mrf.mxu3 }
 0x42c   : > { %5970 = vmatmul.bf16.gmra.mxu2 %v5456_v46  ;;  %6059 = vmatmul.bf16.gmra.mxu3 %v5457_v16  ;;  %v11251_v59 = vunpack.c.h.bf16 %v2608_v34  ;;  %v4594_v14 = vunpack.c.l.bf16 %v11227_v63  ;;  %v4595_v18 = vunpack.c.h.bf16 %v11227_v63  ;;  %v4718_v23 = vadd.f32 1.0, %v4590_v57 }
 0x42d   : > { %12399 = vst [vmem:[#allocation130_spill] sm:$0xff] %v11249_v62  ;;  %v11255_v47 = vpop.eup %7394  ;;  %7398 = vtanh.f32 %v4326_v4  ;;  %v3247_v33 = vpack.c.bf16 %v3177_v41, %v3176_v26  ;;  %v2858_v25 = vmul.f32 %v11249_v62, %v11249_v62  ;;  %v4719_v55 = vadd.f32 1.0, %v4591_v36 }
 0x42e   : > { %12400 = vst [vmem:[#allocation138_spill] sm:$0xff] %v11251_v59  ;;  %v2859_v31 = vmul.f32 %v11251_v59, %v11251_v59  ;;  %v2454_v17 = vadd.f32 %v2453_v54, %v9605_v29  ;;  %v2543_v24 = vadd.f32 %v2542_v13, %v9608_v22  ;;  %v4722_v51 = vadd.f32 1.0, %v4594_v14 }
 0x42f   : > { %v3368_v63 = vunpack.c.l.bf16 %v3247_v33  ;;  %v3369_v10 = vunpack.c.h.bf16 %v3247_v33  ;;  %v4723_v15 = vadd.f32 1.0, %v4595_v18  ;;  %v4818_v58 = vpack.c.bf16 %v4719_v55, %v4718_v23  ;;  %v2278_v55 = vpop.f32.mrf.mxu0 }
 0x430   : > { %v11263_v4 = vpop.eup %7396  ;;  %7400 = vtanh.f32 %v4327_v60  ;;  %v2928_v49 = vpack.c.bf16 %v2859_v31, %v2858_v25  ;;  %v2609_v9 = vpack.c.bf16 %v2543_v24, %v2454_v17  ;;  %v11267_v11 = vpack.c.bf16 %v10585_v35, %v10581_v3  ;;  %v2367_v31 = vpop.f32.mrf.mxu1 }
 0x431   : > { %v3496_v34 = vmul.f32 0.044677734, %v3368_v63  ;;  %v3497_v57 = vmul.f32 0.044677734, %v3369_v10  ;;  %v4820_v46 = vpack.c.bf16 %v4723_v15, %v4722_v51  ;;  %v4910_v16 = vunpack.c.l.bf16 %v4818_v58 }
 0x432   : > { %v3050_v36 = vunpack.c.l.bf16 %v2928_v49  ;;  %v3051_v26 = vunpack.c.h.bf16 %v2928_v49  ;;  %v11269_v41 = vunpack.c.l.bf16 %v2609_v9  ;;  %v11271_v14 = vunpack.c.h.bf16 %v2609_v9 }
 0x433   : > { %v11273_v18 = vpop.eup %7398  ;;  %v3567_v23 = vpack.c.bf16 %v3497_v57, %v3496_v34  ;;  %v4911_v60 = vunpack.c.h.bf16 %v4818_v58  ;;  %v4914_v33 = vunpack.c.l.bf16 %v4820_v46  ;;  %v4915_v25 = vunpack.c.h.bf16 %v4820_v46 }
 0x434   : > { %12401 = vst [vmem:[#allocation133_spill] sm:$0xff] %v11269_v41  ;;  %v3178_v54 = vmul.f32 %v3050_v36, %v11249_v62  ;;  %v3179_v3 = vmul.f32 %v3051_v26, %v11251_v59  ;;  %v2860_v35 = vmul.f32 %v11269_v41, %v11269_v41  ;;  %v2861_v13 = vmul.f32 %v11271_v14, %v11271_v14 }
 0x435   : > { %12402 = vst [vmem:[#allocation139_spill] sm:$0xff] %v11271_v14  ;;  %v3688_v17 = vunpack.c.l.bf16 %v3567_v23  ;;  %v3689_v24 = vunpack.c.h.bf16 %v3567_v23  ;;  %v2279_v51 = vadd.f32 %v2278_v55, %v9528_v19  ;;  %v2368_v63 = vadd.f32 %v2367_v31, %v9549_v38 }
 0x436   : > { %12403 = vst [vmem:[#allocation160_spill] sm:$0xff] %v11273_v18  ;;  %v11283_v10 = vpop.eup %7400  ;;  %v3248_v15 = vpack.c.bf16 %v3179_v3, %v3178_v54  ;;  %v2929_v58 = vpack.c.bf16 %v2861_v13, %v2860_v35  ;;  %v5038_v49 = vmul.f32 0.5, %v4910_v16  ;;  %v5039_v9 = vmul.f32 0.5, %v4911_v60 }
 0x437   : > { %12404 = vst [vmem:[#allocation135_spill] sm:$0xff] %v11283_v10  ;;  %v3816_v34 = vadd.f32 %v3688_v17, %v11231_v21  ;;  %v3817_v57 = vadd.f32 %v3689_v24, %v11233_v30  ;;  %v2610_v46 = vpack.c.bf16 %v2368_v63, %v2279_v51  ;;  %v5042_v36 = vmul.f32 0.5, %v4914_v33 }
 0x438   : > { %v3370_v26 = vunpack.c.l.bf16 %v3248_v15  ;;  %v3371_v18 = vunpack.c.h.bf16 %v3248_v15  ;;  %v3052_v27 = vunpack.c.l.bf16 %v2929_v58  ;;  %v3053_v23 = vunpack.c.h.bf16 %v2929_v58 }
 0x439   : > { %v3887_v32 = vpack.c.bf16 %v3817_v57, %v3816_v34  ;;  %v11287_v55 = vunpack.c.l.bf16 %v2610_v46  ;;  %v11289_v31 = vunpack.c.h.bf16 %v2610_v46  ;;  %v5043_v10 = vmul.f32 0.5, %v4915_v25 }
 0x43a   : > { %v3498_v54 = vmul.f32 0.044677734, %v3370_v26  ;;  %v3499_v3 = vmul.f32 0.044677734, %v3371_v18  ;;  %v3180_v16 = vmul.f32 %v3052_v27, %v11269_v41  ;;  %v3181_v60 = vmul.f32 %v3053_v23, %v11271_v14 }
 0x43b   : > { %12405 = vst [vmem:[#allocation140_spill] sm:$0xff] %v11287_v55  ;;  %v4008_v35 = vunpack.c.l.bf16 %v3887_v32  ;;  %v4009_v13 = vunpack.c.h.bf16 %v3887_v32  ;;  %v2862_v33 = vmul.f32 %v11287_v55, %v11287_v55  ;;  %v2863_v17 = vmul.f32 %v11289_v31, %v11289_v31 }
 0x43c   : > { %12406 = vst [vmem:[#allocation136_spill] sm:$0xff] %v11289_v31  ;;  %v3568_v24 = vpack.c.bf16 %v3499_v3, %v3498_v54  ;;  %v3249_v51 = vpack.c.bf16 %v3181_v60, %v3180_v16  ;;  %v5138_v63 = vpack.c.bf16 %v5039_v9, %v5038_v49  ;;  %v11299_v25 = vpack.c.bf16 %v10615_v43, %v10609_v56 }
 0x43d   : > { %v4136_v18 = vmul.f32 0.796875, %v4008_v35  ;;  %v4137_v15 = vmul.f32 0.796875, %v4009_v13  ;;  %v2930_v27 = vpack.c.bf16 %v2863_v17, %v2862_v33  ;;  %v5140_v58 = vpack.c.bf16 %v5043_v10, %v5042_v36 }
 0x43e   : > { %v3690_v34 = vunpack.c.l.bf16 %v3568_v24  ;;  %v3691_v57 = vunpack.c.h.bf16 %v3568_v24  ;;  %v3372_v32 = vunpack.c.l.bf16 %v3249_v51  ;;  %v3373_v46 = vunpack.c.h.bf16 %v3249_v51  ;;  %v12407_v24 = vld [vmem:[#allocation144_spill] sm:$0xff] }
 0x43f   : > { %v4207_v26 = vpack.c.bf16 %v4137_v15, %v4136_v18  ;;  %v3054_v23 = vunpack.c.l.bf16 %v2930_v27  ;;  %v3055_v30 = vunpack.c.h.bf16 %v2930_v27  ;;  %v5230_v21 = vunpack.c.l.bf16 %v5138_v63 }
 0x440   : > { %v3818_v54 = vadd.f32 %v3690_v34, %v11249_v62  ;;  %v3819_v49 = vadd.f32 %v3691_v57, %v11251_v59  ;;  %v3500_v9 = vmul.f32 0.044677734, %v3372_v32  ;;  %v3501_v3 = vmul.f32 0.044677734, %v3373_v46 }
 0x441   : > { %v3182_v56 = vmul.f32 %v3054_v23, %v11287_v55  ;;  %v3183_v43 = vmul.f32 %v3055_v30, %v11289_v31  ;;  %v4592_v10 = vunpack.c.l.bf16 %v11267_v11  ;;  %v4593_v36 = vunpack.c.h.bf16 %v11267_v11  ;;  %v12408_v23 = vld [vmem:[#allocation150_spill] sm:$0xff] }
 0x442   : > { %v4328_v16 = vunpack.c.l.bf16 %v4207_v26  ;;  %v3888_v60 = vpack.c.bf16 %v3819_v49, %v3818_v54  ;;  %v3569_v35 = vpack.c.bf16 %v3501_v3, %v3500_v9  ;;  %v5234_v13 = vunpack.c.l.bf16 %v5140_v58  ;;  %v12409_v49 = vld [vmem:[#allocation145_spill] sm:$0xff] }
 0x443   : > { %v4329_v33 = vunpack.c.h.bf16 %v4207_v26  ;;  %v3250_v17 = vpack.c.bf16 %v3183_v43, %v3182_v56  ;;  %v5358_v51 = vmul.f32 %v5230_v21, %v12407_v24  ;;  %v5231_v18 = vunpack.c.h.bf16 %v5138_v63  ;;  %v12410_v43 = vld [vmem:[#allocation151_spill] sm:$0xff] }
 0x444   : > { %v4010_v15 = vunpack.c.l.bf16 %v3888_v60  ;;  %v4011_v27 = vunpack.c.h.bf16 %v3888_v60  ;;  %v3692_v34 = vunpack.c.l.bf16 %v3569_v35  ;;  %v5235_v57 = vunpack.c.h.bf16 %v5140_v58 }
 0x445   : > { %v3693_v32 = vunpack.c.h.bf16 %v3569_v35  ;;  %v3374_v46 = vunpack.c.l.bf16 %v3250_v17  ;;  %v3375_v30 = vunpack.c.h.bf16 %v3250_v17  ;;  %v5362_v59 = vmul.f32 %v5234_v13, %v12408_v23 }
 0x446   : > { %v4138_v62 = vmul.f32 0.796875, %v4010_v15  ;;  %v4139_v11 = vmul.f32 0.796875, %v4011_v27  ;;  %v3820_v54 = vadd.f32 %v3692_v34, %v11269_v41  ;;  %v5359_v9 = vmul.f32 %v5231_v18, %v12409_v49 }
 0x447   : > { %v3821_v26 = vadd.f32 %v3693_v32, %v11271_v14  ;;  %v3502_v3 = vmul.f32 0.044677734, %v3374_v46  ;;  %v3503_v21 = vmul.f32 0.044677734, %v3375_v30  ;;  %v5458_v63 = vpack.c.bf16 %v5362_v59, %v5358_v51  ;;  %v2456_v32 = vpop.f32.mrf.mxu2 }
 0x448   : > { %v4208_v56 = vpack.c.bf16 %v4139_v11, %v4138_v62  ;;  %v5363_v60 = vmul.f32 %v5235_v57, %v12410_v43  ;;  %v4596_v58 = vunpack.c.l.bf16 %v11299_v25  ;;  %v4597_v35 = vunpack.c.h.bf16 %v11299_v25  ;;  %v2545_v25 = vpop.f32.mrf.mxu3 }
 0x449   : > { %v3889_v17 = vpack.c.bf16 %v3821_v26, %v3820_v54  ;;  %v3570_v13 = vpack.c.bf16 %v3503_v21, %v3502_v3  ;;  %5797 = vmatmul.bf16.gmra.mxu0 %v5458_v63  ;;  %v4720_v24 = vadd.f32 1.0, %v4592_v10  ;;  %v4721_v15 = vadd.f32 1.0, %v4593_v36 }
 0x44a   : > { %7402 = vtanh.f32 %v4328_v16  ;;  %v4330_v27 = vunpack.c.l.bf16 %v4208_v56  ;;  %v5459_v18 = vpack.c.bf16 %v5363_v60, %v5359_v9  ;;  %v4724_v34 = vadd.f32 1.0, %v4596_v58 }
 0x44b   : > { %v4012_v46 = vunpack.c.l.bf16 %v3889_v17  ;;  %v4013_v30 = vunpack.c.h.bf16 %v3889_v17  ;;  %v3694_v59 = vunpack.c.l.bf16 %v3570_v13  ;;  %v3695_v62 = vunpack.c.h.bf16 %v3570_v13 }
 0x44c   : > { %7404 = vtanh.f32 %v4329_v33  ;;  %v4331_v51 = vunpack.c.h.bf16 %v4208_v56  ;;  %5886 = vmatmul.bf16.gmra.mxu1 %v5459_v18  ;;  %v4725_v57 = vadd.f32 1.0, %v4597_v35  ;;  %v4819_v23 = vpack.c.bf16 %v4721_v15, %v4720_v24 }
 0x44d   : > { %v4140_v11 = vmul.f32 0.796875, %v4012_v46  ;;  %v4141_v54 = vmul.f32 0.796875, %v4013_v30  ;;  %v3822_v10 = vadd.f32 %v3694_v59, %v11287_v55  ;;  %v2457_v36 = vadd.f32 %v2456_v32, %v9605_v29  ;;  %v12414_v46 = vld [vmem:[#allocation58_spill] sm:$0xff]  ;;  %v12415_v30 = vld [vmem:[#allocation65_spill] sm:$0xff] }
 0x44e   : > { %v3823_v16 = vadd.f32 %v3695_v62, %v11289_v31  ;;  %v4821_v49 = vpack.c.bf16 %v4725_v57, %v4724_v34  ;;  %v4912_v9 = vunpack.c.l.bf16 %v4819_v23  ;;  %v4913_v26 = vunpack.c.h.bf16 %v4819_v23  ;;  %v2280_v23 = vpop.f32.mrf.mxu0 }
 0x44f   : > { %7406 = vtanh.f32 %v4330_v27  ;;  %v2546_v3 = vadd.f32 %v2545_v25, %v9608_v22  ;;  %v4209_v60 = vpack.c.bf16 %v4141_v54, %v4140_v11  ;;  %v4502_v59 = vpack.c.bf16 %v12415_v30, %v12414_v46  ;;  %v2369_v25 = vpop.f32.mrf.mxu1 }
 0x450   : > { %v11319_v33 = vpop.eup %7402  ;;  %v3890_v21 = vpack.c.bf16 %v3823_v16, %v3822_v10  ;;  %v4916_v63 = vunpack.c.l.bf16 %v4821_v49  ;;  %v4917_v56 = vunpack.c.h.bf16 %v4821_v49  ;;  %v5040_v43 = vmul.f32 0.5, %v4912_v9 }
 0x451   : > { %7408 = vtanh.f32 %v4331_v51  ;;  %v5041_v58 = vmul.f32 0.5, %v4913_v26  ;;  %v2611_v35 = vpack.c.bf16 %v2546_v3, %v2457_v36  ;;  %v4504_v11 = vpack.c.bf16 %v10703_v42, %v10701_v2 }
 0x452   : > { %v11321_v17 = vpop.eup %7404  ;;  %v4014_v13 = vunpack.c.l.bf16 %v3890_v21  ;;  %v4015_v24 = vunpack.c.h.bf16 %v3890_v21  ;;  %v5044_v15 = vmul.f32 0.5, %v4916_v63  ;;  %v5045_v18 = vmul.f32 0.5, %v4917_v56 }
 0x453   : > { %12411 = vst [vmem:[#allocation141_spill] sm:$0xff] %v11321_v17  ;;  %v5139_v34 = vpack.c.bf16 %v5041_v58, %v5040_v43  ;;  %v11323_v27 = vunpack.c.l.bf16 %v2611_v35  ;;  %v11325_v32 = vunpack.c.h.bf16 %v2611_v35  ;;  %v4332_v9 = vunpack.c.l.bf16 %v4209_v60  ;;  %v12416_v58 = vld [vmem:[#allocation146_spill] sm:$0xff]  ;;  %v12426_v17 = vld [vmem:[#allocation159_spill] sm:$0xff] }
 0x454   : > { %v4142_v62 = vmul.f32 0.796875, %v4014_v13  ;;  %v4143_v57 = vmul.f32 0.796875, %v4015_v24  ;;  %v5141_v51 = vpack.c.bf16 %v5045_v18, %v5044_v15  ;;  %v2281_v21 = vadd.f32 %v2280_v23, %v9528_v19  ;;  %v12417_v13 = vld [vmem:[#allocation153_spill] sm:$0xff]  ;;  %v12418_v15 = vld [vmem:[#allocation147_spill] sm:$0xff] }
 0x455   : > { %12412 = vst [vmem:[#allocation144_spill] sm:$0xff] %v11323_v27  ;;  %v11331_v54 = vpop.eup %7406  ;;  %v5232_v10 = vunpack.c.l.bf16 %v5139_v34  ;;  %v5233_v36 = vunpack.c.h.bf16 %v5139_v34  ;;  %v2864_v16 = vmul.f32 %v11323_v27, %v11323_v27  ;;  %v2865_v49 = vmul.f32 %v11325_v32, %v11325_v32  ;;  %v12419_v34 = vld [vmem:[#allocation154_spill] sm:$0xff] }
 0x456   : > { %12413 = vst [vmem:[#allocation150_spill] sm:$0xff] %v11325_v32  ;;  %v5236_v26 = vunpack.c.l.bf16 %v5141_v51  ;;  %v5237_v3 = vunpack.c.h.bf16 %v5141_v51  ;;  %v4333_v56 = vunpack.c.h.bf16 %v4209_v60  ;;  %v11340_v43 = vpack.c.bf16 %v4143_v57, %v4142_v62 }
 0x457   : > { %v11338_v63 = vpop.eup %7408  ;;  %v2931_v2 = vpack.c.bf16 %v2865_v49, %v2864_v16  ;;  %v2370_v42 = vadd.f32 %v2369_v25, %v9549_v38  ;;  %v5360_v35 = vmul.f32 %v5232_v10, %v12416_v58  ;;  %v5361_v18 = vmul.f32 %v5233_v36, %v12418_v15 }
 0x458   : > { %v5364_v24 = vmul.f32 %v5236_v26, %v12417_v13  ;;  %v5365_v46 = vmul.f32 %v5237_v3, %v12419_v34  ;;  %v4598_v19 = vunpack.c.l.bf16 %v4502_v59  ;;  %7410 = vtanh.f32 %v4332_v9  ;;  %v2458_v3 = vpop.f32.mrf.mxu2 }
 0x459   : > { %v3056_v30 = vunpack.c.l.bf16 %v2931_v2  ;;  %v3057_v51 = vunpack.c.h.bf16 %v2931_v2  ;;  %v2612_v31 = vpack.c.bf16 %v2370_v42, %v2281_v21  ;;  %v4599_v62 = vunpack.c.h.bf16 %v4502_v59  ;;  %v2547_v21 = vpop.f32.mrf.mxu3 }
 0x45a   : > { %v5460_v23 = vpack.c.bf16 %v5364_v24, %v5360_v35  ;;  %v5461_v60 = vpack.c.bf16 %v5365_v46, %v5361_v18  ;;  %7412 = vtanh.f32 %v4333_v56  ;;  %v4602_v36 = vunpack.c.l.bf16 %v4504_v11 }
 0x45b   : > { %v3184_v57 = vmul.f32 %v3056_v30, %v11323_v27  ;;  %v3185_v38 = vmul.f32 %v3057_v51, %v11325_v32  ;;  %v11349_v25 = vunpack.c.l.bf16 %v2612_v31  ;;  %v11351_v10 = vunpack.c.h.bf16 %v2612_v31  ;;  %v12421_v30 = vld [vmem:[#allocation76_spill] sm:$0xff] }
 0x45c   : > { %5975 = vmatmul.bf16.gmra.mxu2 %v5460_v23  ;;  %6064 = vmatmul.bf16.gmra.mxu3 %v5461_v60  ;;  %v4603_v16 = vunpack.c.h.bf16 %v4504_v11  ;;  %v4726_v49 = vadd.f32 1.0, %v4598_v19  ;;  %v4727_v56 = vadd.f32 1.0, %v4599_v62  ;;  %v2459_v42 = vadd.f32 %v2458_v3, %v9605_v29 }
 0x45d   : > { %v3251_v9 = vpack.c.bf16 %v3185_v38, %v3184_v57  ;;  %v2866_v59 = vmul.f32 %v11349_v25, %v11349_v25  ;;  %v2867_v2 = vmul.f32 %v11351_v10, %v11351_v10  ;;  %v2548_v31 = vadd.f32 %v2547_v21, %v9608_v22  ;;  %v5763_v21 = vpop.f32.mrf.mxu0 }
 0x45e   : > { %v4730_v58 = vadd.f32 1.0, %v4602_v36  ;;  %v4731_v13 = vadd.f32 1.0, %v4603_v16  ;;  %v4822_v24 = vpack.c.bf16 %v4727_v56, %v4726_v49  ;;  %v11360_v15 = vpop.eup %7410  ;;  %v11364_v46 = vpack.c.bf16 %v10687_v1, %v10684_v61  ;;  %v5852_v56 = vpop.f32.mrf.mxu1 }
 0x45f   : > { %v3376_v35 = vunpack.c.l.bf16 %v3251_v9  ;;  %v3377_v11 = vunpack.c.h.bf16 %v3251_v9  ;;  %12420 = vst [vmem:[#allocation145_spill] sm:$0xff] %v11360_v15  ;;  %v2932_v18 = vpack.c.bf16 %v2867_v2, %v2866_v59  ;;  %v2613_v34 = vpack.c.bf16 %v2548_v31, %v2459_v42  ;;  %v11385_v31 = vld [vmem:[%s12423_s9] ss:$0 sm:$0xff] }
 0x460   : > { %v11368_v51 = vpack.c.bf16 %v12421_v30, %v10719_v5  ;;  %v11370_v29 = vpop.eup %7412  ;;  %v4824_v23 = vpack.c.bf16 %v4731_v13, %v4730_v58  ;;  %v4918_v60 = vunpack.c.l.bf16 %v4822_v24  ;;  %v4919_v49 = vunpack.c.h.bf16 %v4822_v24 }
 0x461   : > { %12422 = vst [vmem:[#allocation151_spill] sm:$0xff] %v11370_v29  ;;  %v3504_v22 = vmul.f32 0.044677734, %v3376_v35  ;;  %v3505_v19 = vmul.f32 0.044677734, %v3377_v11  ;;  %v3058_v62 = vunpack.c.l.bf16 %v2932_v18  ;;  %v3059_v57 = vunpack.c.h.bf16 %v2932_v18 }
 0x462   : > { %v11372_v38 = vunpack.c.l.bf16 %v2613_v34  ;;  %v11374_v36 = vunpack.c.h.bf16 %v2613_v34  ;;  %v4922_v61 = vunpack.c.l.bf16 %v4824_v23  ;;  %v4923_v1 = vunpack.c.h.bf16 %v4824_v23  ;;  %v5941_v23 = vpop.f32.mrf.mxu2 }
 0x463   : > { %v3571_v16 = vpack.c.bf16 %v3505_v19, %v3504_v22  ;;  %v3186_v9 = vmul.f32 %v3058_v62, %v11349_v25  ;;  %v3187_v5 = vmul.f32 %v3059_v57, %v11351_v10  ;;  %v5046_v58 = vmul.f32 0.5, %v4918_v60  ;;  %v11390_v62 = vpop.f32.mrf.mxu3 }
 0x464   : > { %v2868_v59 = vmul.f32 %v11372_v38, %v11372_v38  ;;  %v2869_v3 = vmul.f32 %v11374_v36, %v11374_v36  ;;  %v5047_v35 = vmul.f32 0.5, %v4919_v49  ;;  %v5050_v24 = vmul.f32 0.5, %v4922_v61 }
 0x465   : > { %v3696_v2 = vunpack.c.l.bf16 %v3571_v16  ;;  %v3697_v42 = vunpack.c.h.bf16 %v3571_v16  ;;  %v3252_v11 = vpack.c.bf16 %v3187_v5, %v3186_v9  ;;  %v4600_v18 = vunpack.c.l.bf16 %v11364_v46 }
 0x466   : > { %v2933_v13 = vpack.c.bf16 %v2869_v3, %v2868_v59  ;;  %v5051_v22 = vmul.f32 0.5, %v4923_v1  ;;  %v5142_v19 = vpack.c.bf16 %v5047_v35, %v5046_v58  ;;  %v5764_v49 = vadd.f32 %v11385_v31, %v5763_v21  ;;  %v12424_v35 = vld [vmem:[#allocation158_spill] sm:$0xff] }
 0x467   : > { %v3824_v34 = vadd.f32 %v3696_v2, %v11323_v27  ;;  %v3825_v30 = vadd.f32 %v3697_v42, %v11325_v32  ;;  %v3378_v57 = vunpack.c.l.bf16 %v3252_v11  ;;  %v3379_v16 = vunpack.c.h.bf16 %v3252_v11 }
 0x468   : > { %v3060_v26 = vunpack.c.l.bf16 %v2933_v13  ;;  %v3061_v55 = vunpack.c.h.bf16 %v2933_v13  ;;  %v5144_v9 = vpack.c.bf16 %v5051_v22, %v5050_v24  ;;  %v5238_v61 = vunpack.c.l.bf16 %v5142_v19  ;;  %v12425_v22 = vld [vmem:[#allocation63_spill] sm:$0xff] }
 0x469   : > { %v3891_v60 = vpack.c.bf16 %v3825_v30, %v3824_v34  ;;  %v3506_v5 = vmul.f32 0.044677734, %v3378_v57  ;;  %v3507_v59 = vmul.f32 0.044677734, %v3379_v16  ;;  %v5239_v14 = vunpack.c.h.bf16 %v5142_v19  ;;  %v5765_v34 = vpop.f32.mrf.mxu0  ;;  %v5854_v30 = vpop.f32.mrf.mxu1 }
 0x46a   : > { %v3188_v3 = vmul.f32 %v3060_v26, %v11372_v38  ;;  %v3189_v2 = vmul.f32 %v3061_v55, %v11374_v36  ;;  %v5242_v58 = vunpack.c.l.bf16 %v5144_v9  ;;  %v5366_v32 = vmul.f32 %v5238_v61, %v12424_v35 }
 0x46b   : > { %v4016_v1 = vunpack.c.l.bf16 %v3891_v60  ;;  %v4017_v42 = vunpack.c.h.bf16 %v3891_v60  ;;  %v3572_v27 = vpack.c.bf16 %v3507_v59, %v3506_v5  ;;  %v5243_v13 = vunpack.c.h.bf16 %v5144_v9  ;;  %v12427_v5 = vld [vmem:[#allocation83_spill] sm:$0xff]  ;;  %v6032_v35 = vpop.f32.mrf.mxu3 }
 0x46c   : > { %v3253_v11 = vpack.c.bf16 %v3189_v2, %v3188_v3  ;;  %v5370_v57 = vmul.f32 %v5242_v58, %v12425_v22  ;;  %v4601_v16 = vunpack.c.h.bf16 %v11364_v46  ;;  %v5367_v61 = vmul.f32 %v5239_v14, %v12426_v17  ;;  %v5943_v58 = vpop.f32.mrf.mxu2 }
 0x46d   : > { %v4144_v21 = vmul.f32 0.796875, %v4016_v1  ;;  %v4145_v24 = vmul.f32 0.796875, %v4017_v42  ;;  %v3698_v26 = vunpack.c.l.bf16 %v3572_v27  ;;  %v3699_v41 = vunpack.c.h.bf16 %v3572_v27 }
 0x46e   : > { %v3380_v55 = vunpack.c.l.bf16 %v3253_v11  ;;  %v3381_v29 = vunpack.c.h.bf16 %v3253_v11  ;;  %v5462_v15 = vpack.c.bf16 %v5370_v57, %v5366_v32  ;;  %v5371_v59 = vmul.f32 %v5243_v13, %v12427_v5 }
 0x46f   : > { %v4211_v60 = vpack.c.bf16 %v4145_v24, %v4144_v21  ;;  %v3826_v19 = vadd.f32 %v3698_v26, %v11349_v25  ;;  %v3827_v9 = vadd.f32 %v3699_v41, %v11351_v10  ;;  %v4335_v1 = vunpack.c.h.bf16 %v11340_v43 }
 0x470   : > { %v3508_v3 = vmul.f32 0.044677734, %v3380_v55  ;;  %v3509_v2 = vmul.f32 0.044677734, %v3381_v29  ;;  %v5853_v42 = vadd.f32 %v5852_v56, %v5764_v49  ;;  %5802 = vmatmul.bf16.gmra.mxu0 %v5462_v15  ;;  %v5463_v46 = vpack.c.bf16 %v5371_v59, %v5367_v61 }
 0x471   : > { %v4604_v27 = vunpack.c.l.bf16 %v11368_v51  ;;  %v3892_v32 = vpack.c.bf16 %v3827_v9, %v3826_v19  ;;  %v4605_v14 = vunpack.c.h.bf16 %v11368_v51  ;;  %v4728_v17 = vadd.f32 1.0, %v4600_v18  ;;  %v5768_v22 = vpop.f32.mrf.mxu0  ;;  %v5857_v57 = vpop.f32.mrf.mxu1 }
 0x472   : > { %v3573_v11 = vpack.c.bf16 %v3509_v2, %v3508_v3  ;;  %v12428_v13 = vunpack.c.l.bf16 %v11340_v43  ;;  %v4336_v41 = vunpack.c.l.bf16 %v4211_v60  ;;  %5891 = vmatmul.bf16.gmra.mxu1 %v5463_v46  ;;  %v4729_v29 = vadd.f32 1.0, %v4601_v16 }
 0x473   : > { %v4732_v21 = vadd.f32 1.0, %v4604_v27  ;;  %v4018_v24 = vunpack.c.l.bf16 %v3892_v32  ;;  %v4019_v56 = vunpack.c.h.bf16 %v3892_v32  ;;  %v5942_v49 = vadd.f32 %v5941_v23, %v5853_v42 }
 0x474   : > { %7414 = vtanh.f32 %v12428_v13  ;;  %v3700_v15 = vunpack.c.l.bf16 %v3573_v11  ;;  %v4337_v26 = vunpack.c.h.bf16 %v4211_v60  ;;  %v3701_v55 = vunpack.c.h.bf16 %v3573_v11 }
 0x475   : > { %v4733_v61 = vadd.f32 1.0, %v4605_v14  ;;  %v4823_v5 = vpack.c.bf16 %v4729_v29, %v4728_v17  ;;  %v4146_v59 = vmul.f32 0.796875, %v4018_v24  ;;  %v4147_v51 = vmul.f32 0.796875, %v4019_v56  ;;  %v11414_v24 = vpop.f32.mrf.mxu3 }
 0x476   : > { %v3828_v18 = vadd.f32 %v3700_v15, %v11372_v38  ;;  %v5766_v43 = vadd.f32 %v11385_v31, %v5765_v34  ;;  %v3829_v19 = vadd.f32 %v3701_v55, %v11374_v36  ;;  %7416 = vtanh.f32 %v4335_v1  ;;  %v5946_v1 = vpop.f32.mrf.mxu2 }
 0x477   : > { %v4825_v16 = vpack.c.bf16 %v4733_v61, %v4732_v21  ;;  %v4920_v9 = vunpack.c.l.bf16 %v4823_v5  ;;  %v4921_v3 = vunpack.c.h.bf16 %v4823_v5  ;;  %v4212_v2 = vpack.c.bf16 %v4147_v51, %v4146_v59  ;;  %v12429_v5 = vld [vmem:[#allocation35_spill] sm:$0xff] }
 0x478   : > { %v6031_v23 = vadd.f32 %v11390_v62, %v5942_v49  ;;  %v5855_v42 = vadd.f32 %v5854_v30, %v5766_v43  ;;  %v3893_v46 = vpack.c.bf16 %v3829_v19, %v3828_v18  ;;  %7418 = vtanh.f32 %v4336_v41  ;;  %v12431_v43 = vld [vmem:[#allocation94_spill] sm:$0xff]  ;;  %v12432_v19 = vld [vmem:[#allocation97_spill] sm:$0xff] }
 0x479   : > { %v4924_v27 = vunpack.c.l.bf16 %v4825_v16  ;;  %v4925_v32 = vunpack.c.h.bf16 %v4825_v16  ;;  %v5048_v11 = vmul.f32 0.5, %v4920_v9  ;;  %v4338_v14 = vunpack.c.l.bf16 %v4212_v2  ;;  %v5770_v49 = vpop.f32.mrf.mxu0  ;;  %v11416_v55 = vpop.f32.mrf.mxu1 }
 0x47a   : > { %v11411_v60 = vpop.eup %7414  ;;  %v5049_v17 = vmul.f32 0.5, %v4921_v3  ;;  %v5944_v34 = vadd.f32 %v5943_v58, %v5855_v42  ;;  %7420 = vtanh.f32 %v4337_v26  ;;  %v5769_v21 = vadd.f32 %v11385_v31, %v5768_v22  ;;  %v12430_v22 = vld [vmem:[#allocation36_spill] sm:$0xff] }
 0x47b   : > { %v5052_v13 = vmul.f32 0.5, %v4924_v27  ;;  %v5053_v29 = vmul.f32 0.5, %v4925_v32  ;;  %v4020_v62 = vunpack.c.l.bf16 %v3893_v46  ;;  %v4021_v30 = vunpack.c.h.bf16 %v3893_v46 }
 0x47c   : > { %v5143_v56 = vpack.c.bf16 %v5049_v17, %v5048_v11  ;;  %v6033_v15 = vadd.f32 %v6032_v35, %v5944_v34  ;;  %v4339_v61 = vunpack.c.h.bf16 %v4212_v2  ;;  %7422 = vtanh.f32 %v4338_v14  ;;  %v11419_v26 = vpop.eup %7416  ;;  %v12433_v14 = vld [vmem:[#allocation61_spill] sm:$0xff]  ;;  %v12434_v34 = vld [vmem:[#allocation60_spill] sm:$0xff] }
 0x47d   : > { %v5145_v41 = vpack.c.bf16 %v5053_v29, %v5052_v13  ;;  %v6110_v58 = vadd.f32 %v12429_v5, %v6031_v23  ;;  %v4506_v16 = vpack.c.bf16 %v12432_v19, %v12431_v43  ;;  %v5858_v3 = vadd.f32 %v5857_v57, %v5769_v21  ;;  %v12435_v29 = vld [vmem:[#allocation56_spill] sm:$0xff] }
 0x47e   : > { %v5240_v59 = vunpack.c.l.bf16 %v5143_v56  ;;  %v5241_v51 = vunpack.c.h.bf16 %v5143_v56  ;;  %v6111_v18 = vadd.f32 %v12430_v22, %v6033_v15  ;;  %v4508_v2 = vpack.c.bf16 %v10809_v40, %v10807_v12  ;;  %v11426_v42 = vpop.eup %7418  ;;  %v12436_v15 = vld [vmem:[#allocation66_spill] sm:$0xff]  ;;  %v12437_v19 = vld [vmem:[#allocation88_spill] sm:$0xff] }
 0x47f   : > { %v5244_v9 = vunpack.c.l.bf16 %v5145_v41  ;;  %v5245_v35 = vunpack.c.h.bf16 %v5145_v41  ;;  %v4148_v46 = vmul.f32 0.796875, %v4020_v62  ;;  %v4149_v23 = vmul.f32 0.796875, %v4021_v30 }
 0x480   : > { %v6823_v27 = vpack.c.bf16 %v6111_v18, %v6110_v58  ;;  %v4606_v32 = vunpack.c.l.bf16 %v4506_v16  ;;  %v11428_v11 = vpop.eup %7420  ;;  %v5368_v17 = vmul.f32 %v5240_v59, %v12433_v14  ;;  %v5369_v56 = vmul.f32 %v5241_v51, %v12435_v29 }
 0x481   : > { %v5372_v13 = vmul.f32 %v5244_v9, %v12434_v34  ;;  %v5373_v41 = vmul.f32 %v5245_v35, %v12436_v15  ;;  %v4607_v12 = vunpack.c.h.bf16 %v4506_v16  ;;  %v4610_v40 = vunpack.c.l.bf16 %v4508_v2  ;;  %v5773_v43 = vpop.f32.mrf.mxu0 }
 0x482   : > { %6824 = vst [vmem:[%s11436_s2] sm:$0xff] %v6823_v27   ;;  %v4611_v57 = vunpack.c.h.bf16 %v4508_v2  ;;  %v4734_v21 = vadd.f32 1.0, %v4606_v32  ;;  %v11439_v62 = vpop.eup %7422  ;;  %7424 = vtanh.f32 %v4339_v61  ;;  %v4507_v58 = vpack.c.bf16 %v10793_v7, %v10789_v44  ;;  %v5948_v61 = vpop.f32.mrf.mxu2 }
 0x483   : > { %v5464_v30 = vpack.c.bf16 %v5372_v13, %v5368_v17  ;;  %v5465_v5 = vpack.c.bf16 %v5373_v41, %v5369_v56  ;;  %v11443_v59 = vpack.c.bf16 %v4149_v23, %v4148_v46  ;;  %v4735_v51 = vadd.f32 1.0, %v4607_v12  ;;  %v5862_v27 = vpop.f32.mrf.mxu1  ;;  %v6037_v7 = vpop.f32.mrf.mxu3 }
 0x484   : > { %v4738_v22 = vadd.f32 1.0, %v4610_v40  ;;  %v4739_v18 = vadd.f32 1.0, %v4611_v57  ;;  %v4509_v16 = vpack.c.bf16 %v12437_v19, %v10825_v37  ;;  %v4608_v9 = vunpack.c.l.bf16 %v4507_v58 }
 0x485   : > { %5980 = vmatmul.bf16.gmra.mxu2 %v5464_v30  ;;  %6069 = vmatmul.bf16.gmra.mxu3 %v5465_v5  ;;  %v4609_v35 = vunpack.c.h.bf16 %v4507_v58  ;;  %v5947_v2 = vadd.f32 %v5946_v1, %v5858_v3  ;;  %v4826_v32 = vpack.c.bf16 %v4735_v51, %v4734_v21  ;;  %v5771_v44 = vadd.f32 %v11385_v31, %v5770_v49 }
 0x486   : > { %v4828_v14 = vpack.c.bf16 %v4739_v18, %v4738_v22  ;;  %v5774_v46 = vadd.f32 %v11385_v31, %v5773_v43  ;;  %v4612_v23 = vunpack.c.l.bf16 %v4509_v16  ;;  %v4613_v17 = vunpack.c.h.bf16 %v4509_v16  ;;  %v12438_v22 = vld [vmem:[#allocation38_spill] sm:$0xff] }
 0x487   : > { %v4736_v34 = vadd.f32 1.0, %v4608_v9  ;;  %v4737_v13 = vadd.f32 1.0, %v4609_v35  ;;  %v4926_v29 = vunpack.c.l.bf16 %v4826_v32  ;;  %v4927_v56 = vunpack.c.h.bf16 %v4826_v32 }
 0x488   : > { %v4930_v15 = vunpack.c.l.bf16 %v4828_v14  ;;  %v4931_v37 = vunpack.c.h.bf16 %v4828_v14  ;;  %v11449_v41 = vpop.eup %7424  ;;  %v4740_v1 = vadd.f32 1.0, %v4612_v23  ;;  %v4741_v3 = vadd.f32 1.0, %v4613_v17 }
 0x489   : > { %v4827_v12 = vpack.c.bf16 %v4737_v13, %v4736_v34  ;;  %v6036_v40 = vadd.f32 %v11414_v24, %v5947_v2  ;;  %v5054_v57 = vmul.f32 0.5, %v4926_v29  ;;  %v5055_v49 = vmul.f32 0.5, %v4927_v56  ;;  %v5775_v13 = vpop.f32.mrf.mxu0 }
 0x48a   : > { %v5058_v21 = vmul.f32 0.5, %v4930_v15  ;;  %v5059_v30 = vmul.f32 0.5, %v4931_v37  ;;  %v4829_v5 = vpack.c.bf16 %v4741_v3, %v4740_v1  ;;  %v5860_v16 = vadd.f32 %v11416_v55, %v5771_v44  ;;  %v5951_v1 = vpop.f32.mrf.mxu2  ;;  %v12440_v55 = vld [vmem:[#allocation71_spill] sm:$0xff]  ;;  %v12441_v44 = vld [vmem:[#allocation92_spill] sm:$0xff] }
 0x48b   : > { %v4928_v58 = vunpack.c.l.bf16 %v4827_v12  ;;  %v4929_v51 = vunpack.c.h.bf16 %v4827_v12  ;;  %v6112_v18 = vadd.f32 %v12438_v22, %v6036_v40  ;;  %v5146_v43 = vpack.c.bf16 %v5055_v49, %v5054_v57  ;;  %v11454_v3 = vpop.f32.mrf.mxu1  ;;  %v12439_v12 = vld [vmem:[#allocation87_spill] sm:$0xff]  ;;  %v12442_v57 = vld [vmem:[#allocation81_spill] sm:$0xff] }
 0x48c   : > { %v5148_v19 = vpack.c.bf16 %v5059_v30, %v5058_v21  ;;  %v5863_v9 = vadd.f32 %v5862_v27, %v5774_v46  ;;  %v4932_v35 = vunpack.c.l.bf16 %v4829_v5  ;;  %v4933_v32 = vunpack.c.h.bf16 %v4829_v5  ;;  %v6040_v21 = vpop.f32.mrf.mxu3 }
 0x48d   : > { %v5056_v14 = vmul.f32 0.5, %v4928_v58  ;;  %v5057_v23 = vmul.f32 0.5, %v4929_v51  ;;  %v5246_v17 = vunpack.c.l.bf16 %v5146_v43  ;;  %v5247_v2 = vunpack.c.h.bf16 %v5146_v43 }
 0x48e   : > { %v5250_v24 = vunpack.c.l.bf16 %v5148_v19  ;;  %v5251_v34 = vunpack.c.h.bf16 %v5148_v19  ;;  %v5060_v29 = vmul.f32 0.5, %v4932_v35  ;;  %v5061_v56 = vmul.f32 0.5, %v4933_v32  ;;  %v12443_v19 = vld [vmem:[#allocation105_spill] sm:$0xff]  ;;  %v12446_v32 = vld [vmem:[#allocation96_spill] sm:$0xff] }
 0x48f   : > { %v5147_v15 = vpack.c.bf16 %v5057_v23, %v5056_v14  ;;  %v5949_v37 = vadd.f32 %v5948_v61, %v5860_v16  ;;  %v5374_v40 = vmul.f32 %v5246_v17, %v12439_v12  ;;  %v5375_v46 = vmul.f32 %v5247_v2, %v12441_v44  ;;  %v12444_v61 = vld [vmem:[#allocation106_spill] sm:$0xff]  ;;  %v12445_v35 = vld [vmem:[#allocation101_spill] sm:$0xff] }
 0x490   : > { %v5378_v27 = vmul.f32 %v5250_v24, %v12440_v55  ;;  %v5379_v49 = vmul.f32 %v5251_v34, %v12442_v57  ;;  %v5149_v30 = vpack.c.bf16 %v5061_v56, %v5060_v29  ;;  %v4510_v16 = vpack.c.bf16 %v12444_v61, %v12443_v19  ;;  %v12447_v17 = vld [vmem:[#allocation93_spill] sm:$0xff]  ;;  %v12449_v34 = vld [vmem:[#allocation39_spill] sm:$0xff] }
 0x491   : > { %v5248_v5 = vunpack.c.l.bf16 %v5147_v15  ;;  %v5249_v58 = vunpack.c.h.bf16 %v5147_v15  ;;  %v6038_v51 = vadd.f32 %v6037_v7, %v5949_v37  ;;  %v4512_v14 = vpack.c.bf16 %v12446_v32, %v12445_v35  ;;  %v12448_v2 = vld [vmem:[#allocation69_spill] sm:$0xff]  ;;  %v12450_v37 = vld [vmem:[#allocation72_spill] sm:$0xff] }
 0x492   : > { %v5466_v22 = vpack.c.bf16 %v5378_v27, %v5374_v40  ;;  %v5467_v43 = vpack.c.bf16 %v5379_v49, %v5375_v46  ;;  %v5252_v23 = vunpack.c.l.bf16 %v5149_v30  ;;  %v5253_v12 = vunpack.c.h.bf16 %v5149_v30  ;;  %v12451_v27 = vld [vmem:[#allocation75_spill] sm:$0xff]  ;;  %v12452_v57 = vld [vmem:[#allocation117_spill] sm:$0xff]  ;;  %v12455_v32 = vld [vmem:[#allocation128_spill] sm:$0xff] }
 0x493   : > { %v5376_v24 = vmul.f32 %v5248_v5, %v12447_v17  ;;  %v5377_v55 = vmul.f32 %v5249_v58, %v12448_v2  ;;  %v6113_v29 = vadd.f32 %v12449_v34, %v6038_v51  ;;  %v4614_v7 = vunpack.c.l.bf16 %v4510_v16  ;;  %v12453_v49 = vld [vmem:[#allocation95_spill] sm:$0xff] }
 0x494   : > { %5807 = vmatmul.bf16.gmra.mxu0 %v5466_v22  ;;  %5896 = vmatmul.bf16.gmra.mxu1 %v5467_v43  ;;  %v4615_v56 = vunpack.c.h.bf16 %v4510_v16  ;;  %v4618_v15 = vunpack.c.l.bf16 %v4512_v14  ;;  %v5380_v40 = vmul.f32 %v5252_v23, %v12450_v37  ;;  %v5381_v44 = vmul.f32 %v5253_v12, %v12451_v27  ;;  %v12454_v51 = vld [vmem:[#allocation119_spill] sm:$0xff]  ;;  %v5778_v12 = vpop.f32.mrf.mxu0  ;;  %v6042_v27 = vpop.f32.mrf.mxu3 }
 0x495   : > { %v4619_v46 = vunpack.c.h.bf16 %v4512_v14  ;;  %v4511_v19 = vpack.c.bf16 %v12453_v49, %v12452_v57  ;;  %v6828_v5 = vpack.c.bf16 %v6113_v29, %v6112_v18  ;;  %v4742_v30 = vadd.f32 1.0, %v4614_v7  ;;  %v5953_v7 = vpop.f32.mrf.mxu2 }
 0x496   : > { %v4743_v61 = vadd.f32 1.0, %v4615_v56  ;;  %v4746_v58 = vadd.f32 1.0, %v4618_v15  ;;  %v5468_v22 = vpack.c.bf16 %v5380_v40, %v5376_v24  ;;  %v5469_v43 = vpack.c.bf16 %v5381_v44, %v5377_v55  ;;  %v5867_v24 = vpop.f32.mrf.mxu1 }
 0x497   : > { %v4747_v35 = vadd.f32 1.0, %v4619_v46  ;;  %v4513_v17 = vpack.c.bf16 %v12455_v32, %v12454_v51  ;;  %6915 = vst [vmem:[%s11436_s2 + $0x8] sm:$0xff] %v6828_v5   ;;  %v4616_v2 = vunpack.c.l.bf16 %v4511_v19  ;;  %v4617_v23 = vunpack.c.h.bf16 %v4511_v19  ;;  %v12456_v51 = vld [vmem:[#allocation40_spill] sm:$0xff] }
 0x498   : > { %v4830_v16 = vpack.c.bf16 %v4743_v61, %v4742_v30  ;;  %v5952_v34 = vadd.f32 %v5951_v1, %v5863_v9  ;;  %5985 = vmatmul.bf16.gmra.mxu2 %v5468_v22  ;;  %6074 = vmatmul.bf16.gmra.mxu3 %v5469_v43  ;;  %v5776_v29 = vadd.f32 %v11385_v31, %v5775_v13 }
 0x499   : > { %v4832_v14 = vpack.c.bf16 %v4747_v35, %v4746_v58  ;;  %v4620_v37 = vunpack.c.l.bf16 %v4513_v17  ;;  %v4621_v18 = vunpack.c.h.bf16 %v4513_v17  ;;  %v4744_v15 = vadd.f32 1.0, %v4616_v2 }
 0x49a   : > { %v4934_v55 = vunpack.c.l.bf16 %v4830_v16  ;;  %v4935_v56 = vunpack.c.h.bf16 %v4830_v16  ;;  %v4745_v40 = vadd.f32 1.0, %v4617_v23  ;;  %v6041_v5 = vadd.f32 %v6040_v21, %v5952_v34 }
 0x49b   : > { %v4938_v44 = vunpack.c.l.bf16 %v4832_v14  ;;  %v4939_v46 = vunpack.c.h.bf16 %v4832_v14  ;;  %v4748_v57 = vadd.f32 1.0, %v4620_v37  ;;  %v4749_v49 = vadd.f32 1.0, %v4621_v18 }
 0x49c   : > { %v5062_v9 = vmul.f32 0.5, %v4934_v55  ;;  %v5063_v1 = vmul.f32 0.5, %v4935_v56  ;;  %v4831_v19 = vpack.c.bf16 %v4745_v40, %v4744_v15  ;;  %v5865_v13 = vadd.f32 %v11454_v3, %v5776_v29  ;;  %v12457_v40 = vld [vmem:[#allocation79_spill] sm:$0xff]  ;;  %v12458_v3 = vld [vmem:[#allocation82_spill] sm:$0xff] }
 0x49d   : > { %v5066_v30 = vmul.f32 0.5, %v4938_v44  ;;  %v5067_v61 = vmul.f32 0.5, %v4939_v46  ;;  %v4833_v58 = vpack.c.bf16 %v4749_v49, %v4748_v57  ;;  %v6114_v32 = vadd.f32 %v12456_v51, %v6041_v5  ;;  %v5780_v49 = vpop.f32.mrf.mxu0  ;;  %v12462_v51 = vld [vmem:[#allocation100_spill] sm:$0xff] }
 0x49e   : > { %v5150_v22 = vpack.c.bf16 %v5063_v1, %v5062_v9  ;;  %v4936_v43 = vunpack.c.l.bf16 %v4831_v19  ;;  %v4937_v35 = vunpack.c.h.bf16 %v4831_v19  ;;  %v5954_v23 = vadd.f32 %v5953_v7, %v5865_v13  ;;  %v12459_v9 = vld [vmem:[#allocation85_spill] sm:$0xff] }
 0x49f   : > { %v5152_v17 = vpack.c.bf16 %v5067_v61, %v5066_v30  ;;  %v4940_v16 = vunpack.c.l.bf16 %v4833_v58  ;;  %v4941_v2 = vunpack.c.h.bf16 %v4833_v58  ;;  %v12460_v19 = vld [vmem:[#allocation89_spill] sm:$0xff]  ;;  %v5779_v30 = vadd.f32 %v11385_v31, %v5778_v12  ;;  %v5956_v61 = vpop.f32.mrf.mxu2  ;;  %v5869_v58 = vpop.f32.mrf.mxu1 }
 0x4a0   : > { %v5254_v14 = vunpack.c.l.bf16 %v5150_v22  ;;  %v5255_v37 = vunpack.c.h.bf16 %v5150_v22  ;;  %v5064_v18 = vmul.f32 0.5, %v4936_v43  ;;  %v5065_v55 = vmul.f32 0.5, %v4937_v35  ;;  %v12461_v43 = vld [vmem:[#allocation41_spill] sm:$0xff] }
 0x4a1   : > { %v5258_v56 = vunpack.c.l.bf16 %v5152_v17  ;;  %v5259_v21 = vunpack.c.h.bf16 %v5152_v17  ;;  %v5068_v34 = vmul.f32 0.5, %v4940_v16  ;;  %v5069_v15 = vmul.f32 0.5, %v4941_v2  ;;  %v12463_v17 = vld [vmem:[#allocation103_spill] sm:$0xff]  ;;  %v6045_v2 = vpop.f32.mrf.mxu3 }
 0x4a2   : > { %v5382_v44 = vmul.f32 %v5254_v14, %v12457_v40  ;;  %v5383_v29 = vmul.f32 %v5255_v37, %v12458_v3  ;;  %v5151_v46 = vpack.c.bf16 %v5065_v55, %v5064_v18  ;;  %v6043_v57 = vadd.f32 %v6042_v27, %v5954_v23  ;;  %v12464_v18 = vld [vmem:[#allocation98_spill] sm:$0xff] }
 0x4a3   : > { %v5386_v1 = vmul.f32 %v5258_v56, %v12459_v9  ;;  %v5387_v5 = vmul.f32 %v5259_v21, %v12460_v19  ;;  %v5153_v7 = vpack.c.bf16 %v5069_v15, %v5068_v34  ;;  %v4514_v16 = vpack.c.bf16 %v12463_v17, %v12462_v51  ;;  %v12465_v56 = vld [vmem:[#allocation84_spill] sm:$0xff]  ;;  %v12467_v3 = vld [vmem:[#allocation86_spill] sm:$0xff] }
 0x4a4   : > { %v5256_v13 = vunpack.c.l.bf16 %v5151_v46  ;;  %v5257_v22 = vunpack.c.h.bf16 %v5151_v46  ;;  %v6115_v35 = vadd.f32 %v12461_v43, %v6043_v57  ;;  %v5868_v34 = vadd.f32 %v5867_v24, %v5779_v30  ;;  %v12466_v15 = vld [vmem:[#allocation80_spill] sm:$0xff] }
 0x4a5   : > { %v5470_v27 = vpack.c.bf16 %v5386_v1, %v5382_v44  ;;  %v5471_v23 = vpack.c.bf16 %v5387_v5, %v5383_v29  ;;  %v5260_v14 = vunpack.c.l.bf16 %v5153_v7  ;;  %v5261_v37 = vunpack.c.h.bf16 %v5153_v7  ;;  %v12468_v1 = vld [vmem:[#allocation111_spill] sm:$0xff]  ;;  %v12469_v19 = vld [vmem:[#allocation108_spill] sm:$0xff] }
 0x4a6   : > { %v5384_v55 = vmul.f32 %v5256_v13, %v12464_v18  ;;  %v5385_v21 = vmul.f32 %v5257_v22, %v12465_v56  ;;  %v6833_v12 = vpack.c.bf16 %v6115_v35, %v6114_v32  ;;  %v4516_v57 = vpack.c.bf16 %v11021_v0, %v11019_v50 }
 0x4a7   : > { %5812 = vmatmul.bf16.gmra.mxu0 %v5470_v27  ;;  %5901 = vmatmul.bf16.gmra.mxu1 %v5471_v23  ;;  %v5388_v40 = vmul.f32 %v5260_v14, %v12466_v15  ;;  %v5389_v46 = vmul.f32 %v5261_v37, %v12467_v3  ;;  %v4622_v9 = vunpack.c.l.bf16 %v4514_v16  ;;  %v4623_v44 = vunpack.c.h.bf16 %v4514_v16  ;;  %v5783_v14 = vpop.f32.mrf.mxu0  ;;  %v5958_v56 = vpop.f32.mrf.mxu2 }
 0x4a8   : > { %6916 = vst [vmem:[%s11436_s2 + $0x10] sm:$0xff] %v6833_v12   ;;  %v4515_v29 = vpack.c.bf16 %v11005_v53, %v11001_v8  ;;  %v4517_v5 = vpack.c.bf16 %v12469_v19, %v12468_v1  ;;  %v5957_v32 = vadd.f32 %v5956_v61, %v5868_v34  ;;  %v4626_v30 = vunpack.c.l.bf16 %v4516_v57 }
 0x4a9   : > { %v5472_v24 = vpack.c.bf16 %v5388_v40, %v5384_v55  ;;  %v5473_v7 = vpack.c.bf16 %v5389_v46, %v5385_v21  ;;  %v4627_v13 = vunpack.c.h.bf16 %v4516_v57  ;;  %v4750_v22 = vadd.f32 1.0, %v4622_v9  ;;  %v5872_v21 = vpop.f32.mrf.mxu1  ;;  %v12470_v40 = vld [vmem:[#allocation42_spill] sm:$0xff]  ;;  %v6047_v46 = vpop.f32.mrf.mxu3 }
 0x4aa   : > { %v4751_v43 = vadd.f32 1.0, %v4623_v44  ;;  %v4624_v35 = vunpack.c.l.bf16 %v4515_v29  ;;  %v4625_v51 = vunpack.c.h.bf16 %v4515_v29  ;;  %v4754_v50 = vadd.f32 1.0, %v4626_v30 }
 0x4ab   : > { %5990 = vmatmul.bf16.gmra.mxu2 %v5472_v24  ;;  %6079 = vmatmul.bf16.gmra.mxu3 %v5473_v7  ;;  %v4755_v0 = vadd.f32 1.0, %v4627_v13  ;;  %v4628_v17 = vunpack.c.l.bf16 %v4517_v5  ;;  %v4629_v16 = vunpack.c.h.bf16 %v4517_v5  ;;  %v6046_v23 = vadd.f32 %v6045_v2, %v5957_v32 }
 0x4ac   : > { %v4834_v27 = vpack.c.bf16 %v4751_v43, %v4750_v22  ;;  %v4752_v8 = vadd.f32 1.0, %v4624_v35  ;;  %v4753_v53 = vadd.f32 1.0, %v4625_v51  ;;  %v5781_v55 = vadd.f32 %v11385_v31, %v5780_v49 }
 0x4ad   : > { %v4836_v61 = vpack.c.bf16 %v4755_v0, %v4754_v50  ;;  %v4756_v37 = vadd.f32 1.0, %v4628_v17  ;;  %v4757_v18 = vadd.f32 1.0, %v4629_v16  ;;  %v6116_v3 = vadd.f32 %v12470_v40, %v6046_v23  ;;  %v12473_v40 = vld [vmem:[#allocation129_spill] sm:$0xff] }
 0x4ae   : > { %v4942_v12 = vunpack.c.l.bf16 %v4834_v27  ;;  %v4943_v34 = vunpack.c.h.bf16 %v4834_v27  ;;  %v4835_v15 = vpack.c.bf16 %v4753_v53, %v4752_v8  ;;  %v5870_v29 = vadd.f32 %v5869_v58, %v5781_v55  ;;  %v12472_v55 = vld [vmem:[#allocation91_spill] sm:$0xff] }
 0x4af   : > { %v4946_v57 = vunpack.c.l.bf16 %v4836_v61  ;;  %v4947_v9 = vunpack.c.h.bf16 %v4836_v61  ;;  %v4837_v44 = vpack.c.bf16 %v4757_v18, %v4756_v37  ;;  %v5784_v0 = vadd.f32 %v11385_v31, %v5783_v14  ;;  %v12471_v37 = vld [vmem:[#allocation90_spill] sm:$0xff] }
 0x4b0   : > { %v5070_v1 = vmul.f32 0.5, %v4942_v12  ;;  %v5071_v2 = vmul.f32 0.5, %v4943_v34  ;;  %v4944_v19 = vunpack.c.l.bf16 %v4835_v15  ;;  %v4945_v5 = vunpack.c.h.bf16 %v4835_v15 }
 0x4b1   : > { %v5074_v32 = vmul.f32 0.5, %v4946_v57  ;;  %v5075_v24 = vmul.f32 0.5, %v4947_v9  ;;  %v4948_v7 = vunpack.c.l.bf16 %v4837_v44  ;;  %v4949_v49 = vunpack.c.h.bf16 %v4837_v44  ;;  %v12474_v9 = vld [vmem:[#allocation99_spill] sm:$0xff] }
 0x4b2   : > { %v5154_v30 = vpack.c.bf16 %v5071_v2, %v5070_v1  ;;  %v5072_v13 = vmul.f32 0.5, %v4944_v19  ;;  %v5073_v22 = vmul.f32 0.5, %v4945_v5  ;;  %v5959_v43 = vadd.f32 %v5958_v56, %v5870_v29  ;;  %v5785_v56 = vpop.f32.mrf.mxu0  ;;  %v5961_v1 = vpop.f32.mrf.mxu2  ;;  %v12476_v5 = vld [vmem:[#allocation118_spill] sm:$0xff] }
 0x4b3   : > { %v5156_v35 = vpack.c.bf16 %v5075_v24, %v5074_v32  ;;  %v5076_v51 = vmul.f32 0.5, %v4948_v7  ;;  %v5077_v50 = vmul.f32 0.5, %v4949_v49  ;;  %v5873_v61 = vadd.f32 %v5872_v21, %v5784_v0  ;;  %v5874_v2 = vpop.f32.mrf.mxu1  ;;  %v12477_v21 = vld [vmem:[#allocation43_spill] sm:$0xff]  ;;  %v12478_v7 = vld [vmem:[#allocation109_spill] sm:$0xff]  ;;  %v12479_v49 = vld [vmem:[#allocation110_spill] sm:$0xff] }
 0x4b4   : > { %v5262_v17 = vunpack.c.l.bf16 %v5154_v30  ;;  %v5263_v16 = vunpack.c.h.bf16 %v5154_v30  ;;  %v5155_v58 = vpack.c.bf16 %v5073_v22, %v5072_v13  ;;  %v6048_v27 = vadd.f32 %v6047_v46, %v5959_v43  ;;  %v12475_v46 = vld [vmem:[#allocation102_spill] sm:$0xff]  ;;  %v6050_v13 = vpop.f32.mrf.mxu3 }
 0x4b5   : > { %v5266_v8 = vunpack.c.l.bf16 %v5156_v35  ;;  %v5267_v53 = vunpack.c.h.bf16 %v5156_v35  ;;  %v5157_v23 = vpack.c.bf16 %v5077_v50, %v5076_v51  ;;  %v4518_v30 = vpack.c.bf16 %v12479_v49, %v12478_v7  ;;  %v12480_v35 = vld [vmem:[#allocation104_spill] sm:$0xff] }
 0x4b6   : > { %v5390_v18 = vmul.f32 %v5262_v17, %v12471_v37  ;;  %v5391_v12 = vmul.f32 %v5263_v16, %v12472_v55  ;;  %v5264_v34 = vunpack.c.l.bf16 %v5155_v58  ;;  %v5265_v15 = vunpack.c.h.bf16 %v5155_v58  ;;  %v12481_v50 = vld [vmem:[#allocation124_spill] sm:$0xff]  ;;  %v12482_v37 = vld [vmem:[#allocation143_spill] sm:$0xff] }
 0x4b7   : > { %v5394_v57 = vmul.f32 %v5266_v8, %v12473_v40  ;;  %v5395_v44 = vmul.f32 %v5267_v53, %v12474_v9  ;;  %v5268_v14 = vunpack.c.l.bf16 %v5157_v23  ;;  %v5269_v29 = vunpack.c.h.bf16 %v5157_v23  ;;  %v12483_v55 = vld [vmem:[#allocation115_spill] sm:$0xff] }
 0x4b8   : > { %v5392_v19 = vmul.f32 %v5264_v34, %v12475_v46  ;;  %v5393_v32 = vmul.f32 %v5265_v15, %v12476_v5  ;;  %v6117_v24 = vadd.f32 %v12477_v21, %v6048_v27  ;;  %v4520_v16 = vpack.c.bf16 %v11127_v28, %v11125_v48  ;;  %v12485_v48 = vld [vmem:[#allocation152_spill] sm:$0xff] }
 0x4b9   : > { %v5474_v22 = vpack.c.bf16 %v5394_v57, %v5390_v18  ;;  %v5475_v43 = vpack.c.bf16 %v5395_v44, %v5391_v12  ;;  %v5396_v51 = vmul.f32 %v5268_v14, %v12480_v35  ;;  %v5397_v0 = vmul.f32 %v5269_v29, %v12481_v50 }
 0x4ba   : > { %v6838_v17 = vpack.c.bf16 %v6117_v24, %v6116_v3  ;;  %v4630_v58 = vunpack.c.l.bf16 %v4518_v30  ;;  %v4631_v8 = vunpack.c.h.bf16 %v4518_v30  ;;  %v4340_v53 = vunpack.c.l.bf16 %v11443_v59  ;;  %v12484_v3 = vld [vmem:[#allocation123_spill] sm:$0xff] }
 0x4bb   : > { %5817 = vmatmul.bf16.gmra.mxu0 %v5474_v22  ;;  %5906 = vmatmul.bf16.gmra.mxu1 %v5475_v43  ;;  %v5476_v27 = vpack.c.bf16 %v5396_v51, %v5392_v19  ;;  %v5477_v23 = vpack.c.bf16 %v5397_v0, %v5393_v32  ;;  %v4519_v18 = vpack.c.bf16 %v12483_v55, %v12482_v37  ;;  %v4634_v12 = vunpack.c.l.bf16 %v4520_v16  ;;  %v5788_v43 = vpop.f32.mrf.mxu0  ;;  %v12486_v55 = vld [vmem:[#allocation44_spill] sm:$0xff] }
 0x4bc   : > { %6917 = vst [vmem:[%s11436_s2 + $0x18] sm:$0xff] %v6838_v17   ;;  %v4635_v34 = vunpack.c.h.bf16 %v4520_v16  ;;  %v4758_v15 = vadd.f32 1.0, %v4630_v58  ;;  %v4759_v40 = vadd.f32 1.0, %v4631_v8  ;;  %v4521_v28 = vpack.c.bf16 %v12485_v48, %v12484_v3  ;;  %v5963_v17 = vpop.f32.mrf.mxu2 }
 0x4bd   : > { %5995 = vmatmul.bf16.gmra.mxu2 %v5476_v27  ;;  %6084 = vmatmul.bf16.gmra.mxu3 %v5477_v23  ;;  %v4632_v57 = vunpack.c.l.bf16 %v4519_v18  ;;  %v4633_v9 = vunpack.c.h.bf16 %v4519_v18  ;;  %v5962_v44 = vadd.f32 %v5961_v1, %v5873_v61  ;;  %v4762_v14 = vadd.f32 1.0, %v4634_v12  ;;  %v5877_v61 = vpop.f32.mrf.mxu1 }
 0x4be   : > { %v4763_v29 = vadd.f32 1.0, %v4635_v34  ;;  %v4838_v46 = vpack.c.bf16 %v4759_v40, %v4758_v15  ;;  %v5786_v19 = vadd.f32 %v11385_v31, %v5785_v56  ;;  %v4636_v5 = vunpack.c.l.bf16 %v4521_v28  ;;  %v6052_v56 = vpop.f32.mrf.mxu3 }
 0x4bf   : > { %v4637_v32 = vunpack.c.h.bf16 %v4521_v28  ;;  %v4760_v21 = vadd.f32 1.0, %v4632_v57  ;;  %v4761_v24 = vadd.f32 1.0, %v4633_v9  ;;  %v6051_v22 = vadd.f32 %v6050_v13, %v5962_v44 }
 0x4c0   : > { %v4840_v7 = vpack.c.bf16 %v4763_v29, %v4762_v14  ;;  %v4950_v49 = vunpack.c.l.bf16 %v4838_v46  ;;  %v4951_v30 = vunpack.c.h.bf16 %v4838_v46  ;;  %v4764_v35 = vadd.f32 1.0, %v4636_v5 }
 0x4c1   : > { %v4765_v51 = vadd.f32 1.0, %v4637_v32  ;;  %v4839_v50 = vpack.c.bf16 %v4761_v24, %v4760_v21  ;;  %v5875_v0 = vadd.f32 %v5874_v2, %v5786_v19  ;;  %v6118_v18 = vadd.f32 %v12486_v55, %v6051_v22  ;;  %v12487_v32 = vld [vmem:[#allocation125_spill] sm:$0xff] }
 0x4c2   : > { %v4954_v1 = vunpack.c.l.bf16 %v4840_v7  ;;  %v4955_v16 = vunpack.c.h.bf16 %v4840_v7  ;;  %v5078_v58 = vmul.f32 0.5, %v4950_v49  ;;  %v5079_v8 = vmul.f32 0.5, %v4951_v30  ;;  %v12488_v7 = vld [vmem:[#allocation131_spill] sm:$0xff] }
 0x4c3   : > { %v4841_v27 = vpack.c.bf16 %v4765_v51, %v4764_v35  ;;  %v4952_v23 = vunpack.c.l.bf16 %v4839_v50  ;;  %v4953_v37 = vunpack.c.h.bf16 %v4839_v50  ;;  %v5964_v15 = vadd.f32 %v5963_v17, %v5875_v0  ;;  %v12489_v51 = vld [vmem:[#allocation45_spill] sm:$0xff]  ;;  %v12490_v0 = vld [vmem:[#allocation112_spill] sm:$0xff] }
 0x4c4   : > { %v5082_v12 = vmul.f32 0.5, %v4954_v1  ;;  %v5083_v34 = vmul.f32 0.5, %v4955_v16  ;;  %v5158_v13 = vpack.c.bf16 %v5079_v8, %v5078_v58  ;;  %v5789_v19 = vadd.f32 %v11385_v31, %v5788_v43  ;;  %v12491_v1 = vld [vmem:[#allocation134_spill] sm:$0xff]  ;;  %v12492_v8 = vld [vmem:[#allocation120_spill] sm:$0xff]  ;;  %v5790_v31 = vpop.f32.mrf.mxu0 }
 0x4c5   : > { %v4956_v40 = vunpack.c.l.bf16 %v4841_v27  ;;  %v4957_v3 = vunpack.c.h.bf16 %v4841_v27  ;;  %v5080_v48 = vmul.f32 0.5, %v4952_v23  ;;  %v5081_v2 = vmul.f32 0.5, %v4953_v37  ;;  %v12494_v23 = vld [vmem:[#allocation132_spill] sm:$0xff] }
 0x4c6   : > { %v5160_v28 = vpack.c.bf16 %v5083_v34, %v5082_v12  ;;  %v5270_v57 = vunpack.c.l.bf16 %v5158_v13  ;;  %v5271_v9 = vunpack.c.h.bf16 %v5158_v13  ;;  %v6053_v44 = vadd.f32 %v6052_v56, %v5964_v15  ;;  %v12493_v56 = vld [vmem:[#allocation121_spill] sm:$0xff]  ;;  %v12495_v12 = vld [vmem:[#allocation107_spill] sm:$0xff]  ;;  %v5966_v13 = vpop.f32.mrf.mxu2  ;;  %v5879_v15 = vpop.f32.mrf.mxu1 }
 0x4c7   : > { %v5084_v14 = vmul.f32 0.5, %v4956_v40  ;;  %v5085_v29 = vmul.f32 0.5, %v4957_v3  ;;  %v5159_v46 = vpack.c.bf16 %v5081_v2, %v5080_v48  ;;  %v5878_v58 = vadd.f32 %v5877_v61, %v5789_v19  ;;  %v6055_v61 = vpop.f32.mrf.mxu3 }
 0x4c8   : > { %v5274_v5 = vunpack.c.l.bf16 %v5160_v28  ;;  %v5398_v21 = vmul.f32 %v5270_v57, %v12487_v32  ;;  %v5275_v24 = vunpack.c.h.bf16 %v5160_v28  ;;  %v5399_v49 = vmul.f32 %v5271_v9, %v12488_v7  ;;  %v12496_v28 = vld [vmem:[#allocation113_spill] sm:$0xff]  ;;  %v12497_v9 = vld [vmem:[#allocation114_spill] sm:$0xff] }
 0x4c9   : > { %v5161_v30 = vpack.c.bf16 %v5085_v29, %v5084_v14  ;;  %v5272_v22 = vunpack.c.l.bf16 %v5159_v46  ;;  %v5273_v35 = vunpack.c.h.bf16 %v5159_v46  ;;  %v6119_v50 = vadd.f32 %v12489_v51, %v6053_v44 }
 0x4ca   : > { %v5402_v17 = vmul.f32 %v5274_v5, %v12490_v0  ;;  %v5403_v16 = vmul.f32 %v5275_v24, %v12491_v1  ;;  %v4522_v27 = vpack.c.bf16 %v12493_v56, %v12492_v8  ;;  %v4524_v2 = vpack.c.bf16 %v11235_v39, %v11229_v6 }
 0x4cb   : > { %v5276_v43 = vunpack.c.l.bf16 %v5161_v30  ;;  %v5400_v37 = vmul.f32 %v5272_v22, %v12494_v23  ;;  %v5277_v55 = vunpack.c.h.bf16 %v5161_v30  ;;  %v5401_v34 = vmul.f32 %v5273_v35, %v12495_v12 }
 0x4cc   : > { %v5478_v40 = vpack.c.bf16 %v5402_v17, %v5398_v21  ;;  %v5479_v3 = vpack.c.bf16 %v5403_v16, %v5399_v49  ;;  %v6843_v48 = vpack.c.bf16 %v6119_v50, %v6118_v18  ;;  %v4638_v14 = vunpack.c.l.bf16 %v4522_v27 }
 0x4cd   : > { %v5404_v57 = vmul.f32 %v5276_v43, %v12496_v28  ;;  %v5405_v44 = vmul.f32 %v5277_v55, %v12497_v9  ;;  %v4639_v29 = vunpack.c.h.bf16 %v4522_v27  ;;  %v4642_v46 = vunpack.c.l.bf16 %v4524_v2 }
 0x4ce   : > { %5822 = vmatmul.bf16.gmra.mxu0 %v5478_v40  ;;  %5911 = vmatmul.bf16.gmra.mxu1 %v5479_v3  ;;  %6918 = vst [vmem:[%s11436_s2 + $0x20] sm:$0xff] %v6843_v48   ;;  %v4643_v19 = vunpack.c.h.bf16 %v4524_v2  ;;  %v4523_v5 = vpack.c.bf16 %v11217_v45, %v11213_v52  ;;  %v4525_v18 = vpack.c.bf16 %v11263_v4, %v11255_v47  ;;  %v4766_v39 = vadd.f32 1.0, %v4638_v14  ;;  %v11542_v45 = vld [vmem:[%s12423_s9] ss:$0 sm:$0xff]  ;;  %v5882_v40 = vpop.f32.mrf.mxu1  ;;  %v12498_v14 = vld [vmem:[#allocation46_spill] sm:$0xff] }
 0x4cf   : > { %v5480_v32 = vpack.c.bf16 %v5404_v57, %v5400_v37  ;;  %v5481_v6 = vpack.c.bf16 %v5405_v44, %v5401_v34  ;;  %v4767_v21 = vadd.f32 1.0, %v4639_v29  ;;  %v4770_v24 = vadd.f32 1.0, %v4642_v46  ;;  %v5793_v37 = vpop.f32.mrf.mxu0 }
 0x4d0   : > { %v4771_v7 = vadd.f32 1.0, %v4643_v19  ;;  %v4640_v49 = vunpack.c.l.bf16 %v4523_v5  ;;  %v4641_v30 = vunpack.c.h.bf16 %v4523_v5  ;;  %v4644_v35 = vunpack.c.l.bf16 %v4525_v18 }
 0x4d1   : > { %6000 = vmatmul.bf16.gmra.mxu2 %v5480_v32  ;;  %6089 = vmatmul.bf16.gmra.mxu3 %v5481_v6  ;;  %v4842_v22 = vpack.c.bf16 %v4767_v21, %v4766_v39  ;;  %v4645_v51 = vunpack.c.h.bf16 %v4525_v18  ;;  %v5967_v50 = vadd.f32 %v5966_v13, %v5878_v58  ;;  %v5791_v47 = vadd.f32 %v11542_v45, %v5790_v31  ;;  %v5968_v13 = vpop.f32.mrf.mxu2  ;;  %v6057_v31 = vpop.f32.mrf.mxu3 }
 0x4d2   : > { %v4844_v0 = vpack.c.bf16 %v4771_v7, %v4770_v24  ;;  %v4768_v17 = vadd.f32 1.0, %v4640_v49  ;;  %v4769_v52 = vadd.f32 1.0, %v4641_v30  ;;  %v4772_v16 = vadd.f32 1.0, %v4644_v35  ;;  %v12499_v49 = vld [vmem:[#allocation137_spill] sm:$0xff] }
 0x4d3   : > { %v4958_v4 = vunpack.c.l.bf16 %v4842_v22  ;;  %v4959_v1 = vunpack.c.h.bf16 %v4842_v22  ;;  %v4773_v8 = vadd.f32 1.0, %v4645_v51  ;;  %v6056_v23 = vadd.f32 %v6055_v61, %v5967_v50  ;;  %v12500_v22 = vld [vmem:[#allocation142_spill] sm:$0xff] }
 0x4d4   : > { %v4962_v56 = vunpack.c.l.bf16 %v4844_v0  ;;  %v4963_v27 = vunpack.c.h.bf16 %v4844_v0  ;;  %v4843_v43 = vpack.c.bf16 %v4769_v52, %v4768_v17  ;;  %v5880_v34 = vadd.f32 %v5879_v15, %v5791_v47  ;;  %v12501_v17 = vld [vmem:[#allocation155_spill] sm:$0xff] }
 0x4d5   : > { %v5086_v58 = vmul.f32 0.5, %v4958_v4  ;;  %v5087_v55 = vmul.f32 0.5, %v4959_v1  ;;  %v4845_v12 = vpack.c.bf16 %v4773_v8, %v4772_v16  ;;  %v6120_v29 = vadd.f32 %v12498_v14, %v6056_v23  ;;  %v12502_v8 = vld [vmem:[#allocation47_spill] sm:$0xff]  ;;  %v12509_v14 = vld [vmem:[#allocation141_spill] sm:$0xff] }
 0x4d6   : > { %v5090_v3 = vmul.f32 0.5, %v4962_v56  ;;  %v5091_v48 = vmul.f32 0.5, %v4963_v27  ;;  %v4960_v2 = vunpack.c.l.bf16 %v4843_v43  ;;  %v4961_v28 = vunpack.c.h.bf16 %v4843_v43 }
 0x4d7   : > { %v5162_v57 = vpack.c.bf16 %v5087_v55, %v5086_v58  ;;  %v4964_v9 = vunpack.c.l.bf16 %v4845_v12  ;;  %v4965_v44 = vunpack.c.h.bf16 %v4845_v12  ;;  %v5969_v5 = vadd.f32 %v5968_v13, %v5880_v34  ;;  %v12503_v58 = vld [vmem:[#allocation122_spill] sm:$0xff]  ;;  %v12504_v12 = vld [vmem:[#allocation116_spill] sm:$0xff]  ;;  %v5795_v13 = vpop.f32.mrf.mxu0 }
 0x4d8   : > { %v5164_v46 = vpack.c.bf16 %v5091_v48, %v5090_v3  ;;  %v5088_v19 = vmul.f32 0.5, %v4960_v2  ;;  %v5089_v61 = vmul.f32 0.5, %v4961_v28  ;;  %v5794_v50 = vadd.f32 %v11542_v45, %v5793_v37  ;;  %v12505_v3 = vld [vmem:[#allocation126_spill] sm:$0xff]  ;;  %v12507_v28 = vld [vmem:[#allocation160_spill] sm:$0xff] }
 0x4d9   : > { %v5278_v18 = vunpack.c.l.bf16 %v5162_v57  ;;  %v5279_v32 = vunpack.c.h.bf16 %v5162_v57  ;;  %v5092_v6 = vmul.f32 0.5, %v4964_v9  ;;  %v5093_v15 = vmul.f32 0.5, %v4965_v44  ;;  %v11558_v9 = vpop.f32.mrf.mxu1 }
 0x4da   : > { %v5282_v39 = vunpack.c.l.bf16 %v5164_v46  ;;  %v5283_v21 = vunpack.c.h.bf16 %v5164_v46  ;;  %v5163_v24 = vpack.c.bf16 %v5089_v61, %v5088_v19  ;;  %v6058_v7 = vadd.f32 %v6057_v31, %v5969_v5  ;;  %v12508_v31 = vld [vmem:[#allocation135_spill] sm:$0xff]  ;;  %v12510_v19 = vld [vmem:[#allocation145_spill] sm:$0xff] }
 0x4db   : > { %v5406_v30 = vmul.f32 %v5278_v18, %v12499_v49  ;;  %v5407_v35 = vmul.f32 %v5279_v32, %v12500_v22  ;;  %v5165_v51 = vpack.c.bf16 %v5093_v15, %v5092_v6  ;;  %v5883_v27 = vadd.f32 %v5882_v40, %v5794_v50  ;;  %v12511_v61 = vld [vmem:[#allocation151_spill] sm:$0xff]  ;;  %v5971_v18 = vpop.f32.mrf.mxu2 }
 0x4dc   : > { %v5410_v0 = vmul.f32 %v5282_v39, %v11151_v20  ;;  %v5411_v52 = vmul.f32 %v5283_v21, %v12501_v17  ;;  %v5280_v47 = vunpack.c.l.bf16 %v5163_v24  ;;  %v5281_v4 = vunpack.c.h.bf16 %v5163_v24  ;;  %v12506_v20 = vld [vmem:[#allocation127_spill] sm:$0xff] }
 0x4dd   : > { %v5284_v1 = vunpack.c.l.bf16 %v5165_v51  ;;  %v5285_v16 = vunpack.c.h.bf16 %v5165_v51  ;;  %v6121_v56 = vadd.f32 %v12502_v8, %v6058_v7  ;;  %v4526_v57 = vpack.c.bf16 %v12508_v31, %v12507_v28 }
 0x4de   : > { %v5482_v43 = vpack.c.bf16 %v5410_v0, %v5406_v30  ;;  %v5483_v23 = vpack.c.bf16 %v5411_v52, %v5407_v35  ;;  %v5408_v55 = vmul.f32 %v5280_v47, %v12503_v58  ;;  %v5409_v34 = vmul.f32 %v5281_v4, %v12504_v12 }
 0x4df   : > { %v5412_v37 = vmul.f32 %v5284_v1, %v12505_v3  ;;  %v5413_v48 = vmul.f32 %v5285_v16, %v12506_v20  ;;  %v6848_v2 = vpack.c.bf16 %v6121_v56, %v6120_v29  ;;  %v4341_v40 = vunpack.c.h.bf16 %v11443_v59  ;;  %v6060_v29 = vpop.f32.mrf.mxu3 }
 0x4e0   : > { %5827 = vmatmul.bf16.gmra.mxu0 %v5482_v43  ;;  %5916 = vmatmul.bf16.gmra.mxu1 %v5483_v23  ;;  %v4528_v44 = vpack.c.bf16 %v11338_v63, %v11331_v54  ;;  %v4527_v46 = vpack.c.bf16 %v12509_v14, %v11319_v33  ;;  %v4529_v5 = vpack.c.bf16 %v12511_v61, %v12510_v19  ;;  %v4646_v15 = vunpack.c.l.bf16 %v4526_v57 }
 0x4e1   : > { %v5484_v32 = vpack.c.bf16 %v5412_v37, %v5408_v55  ;;  %v5485_v6 = vpack.c.bf16 %v5413_v48, %v5409_v34  ;;  %6919 = vst [vmem:[%s11436_s2 + $0x28] sm:$0xff] %v6848_v2   ;;  %v4647_v39 = vunpack.c.h.bf16 %v4526_v57  ;;  %7426 = vtanh.f32 %v4340_v53  ;;  %v5798_v34 = vpop.f32.mrf.mxu0  ;;  %v11571_v20 = vpop.f32.mrf.mxu1 }
 0x4e2   : > { %v4650_v21 = vunpack.c.l.bf16 %v4528_v44  ;;  %v4651_v24 = vunpack.c.h.bf16 %v4528_v44  ;;  %v4648_v7 = vunpack.c.l.bf16 %v4527_v46  ;;  %v4649_v49 = vunpack.c.h.bf16 %v4527_v46 }
 0x4e3   : > { %6005 = vmatmul.bf16.gmra.mxu2 %v5484_v32  ;;  %6094 = vmatmul.bf16.gmra.mxu3 %v5485_v6  ;;  %v4774_v54 = vadd.f32 1.0, %v4646_v15  ;;  %v4775_v63 = vadd.f32 1.0, %v4647_v39  ;;  %v4652_v30 = vunpack.c.l.bf16 %v4529_v5  ;;  %v4653_v33 = vunpack.c.h.bf16 %v4529_v5  ;;  %v5973_v31 = vpop.f32.mrf.mxu2 }
 0x4e4   : > { %v4778_v22 = vadd.f32 1.0, %v4650_v21  ;;  %v4779_v35 = vadd.f32 1.0, %v4651_v24  ;;  %v4776_v51 = vadd.f32 1.0, %v4648_v7  ;;  %v4777_v50 = vadd.f32 1.0, %v4649_v49 }
 0x4e5   : > { %v4846_v0 = vpack.c.bf16 %v4775_v63, %v4774_v54  ;;  %v4780_v17 = vadd.f32 1.0, %v4652_v30  ;;  %v4781_v52 = vadd.f32 1.0, %v4653_v33  ;;  %7428 = vtanh.f32 %v4341_v40  ;;  %v12512_v63 = vld [vmem:[#allocation148_spill] sm:$0xff]  ;;  %v12513_v33 = vld [vmem:[#allocation149_spill] sm:$0xff] }
 0x4e6   : > { %v4848_v47 = vpack.c.bf16 %v4779_v35, %v4778_v22  ;;  %v4847_v4 = vpack.c.bf16 %v4777_v50, %v4776_v51  ;;  %v5972_v1 = vadd.f32 %v5971_v18, %v5883_v27  ;;  %v5796_v43 = vadd.f32 %v11542_v45, %v5795_v13  ;;  %v12514_v50 = vld [vmem:[#allocation130_spill] sm:$0xff] }
 0x4e7   : > { %v4966_v16 = vunpack.c.l.bf16 %v4846_v0  ;;  %v4967_v8 = vunpack.c.h.bf16 %v4846_v0  ;;  %v4849_v56 = vpack.c.bf16 %v4781_v52, %v4780_v17  ;;  %v6062_v57 = vpop.f32.mrf.mxu3  ;;  %v7427_v40 = vpop.eup %7426  ;;  %v5799_v46 = vadd.f32 %v11542_v45, %v5798_v34  ;;  %v12515_v0 = vld [vmem:[#allocation138_spill] sm:$0xff]  ;;  %v12516_v17 = vld [vmem:[#allocation156_spill] sm:$0xff] }
 0x4e8   : > { %v4970_v23 = vunpack.c.l.bf16 %v4848_v47  ;;  %v4971_v58 = vunpack.c.h.bf16 %v4848_v47  ;;  %v4968_v55 = vunpack.c.l.bf16 %v4847_v4  ;;  %v4969_v12 = vunpack.c.h.bf16 %v4847_v4  ;;  %v12517_v47 = vld [vmem:[#allocation157_spill] sm:$0xff] }
 0x4e9   : > { %v5094_v3 = vmul.f32 0.5, %v4966_v16  ;;  %v5095_v59 = vmul.f32 0.5, %v4967_v8  ;;  %v4972_v53 = vunpack.c.l.bf16 %v4849_v56  ;;  %v4973_v37 = vunpack.c.h.bf16 %v4849_v56 }
 0x4ea   : > { %v5098_v48 = vmul.f32 0.5, %v4970_v23  ;;  %v5099_v2 = vmul.f32 0.5, %v4971_v58  ;;  %v5096_v28 = vmul.f32 0.5, %v4968_v55  ;;  %v5097_v27 = vmul.f32 0.5, %v4969_v12 }
 0x4eb   : > { %v5166_v44 = vpack.c.bf16 %v5095_v59, %v5094_v3  ;;  %v5100_v13 = vmul.f32 0.5, %v4972_v53  ;;  %v5101_v14 = vmul.f32 0.5, %v4973_v37  ;;  %v7429_v19 = vpop.eup %7428  ;;  %v6061_v18 = vadd.f32 %v6060_v29, %v5972_v1  ;;  %v12518_v1 = vld [vmem:[#allocation133_spill] sm:$0xff]  ;;  %v5800_v53 = vpop.f32.mrf.mxu0 }
 0x4ec   : > { %v5168_v61 = vpack.c.bf16 %v5099_v2, %v5098_v48  ;;  %v5167_v5 = vpack.c.bf16 %v5097_v27, %v5096_v28  ;;  %v5885_v32 = vadd.f32 %v11558_v9, %v5796_v43  ;;  %v4530_v21 = vpack.c.bf16 %v11419_v26, %v11411_v60  ;;  %v12519_v26 = vld [vmem:[#allocation139_spill] sm:$0xff]  ;;  %v5889_v37 = vpop.f32.mrf.mxu1 }
 0x4ed   : > { %v5286_v6 = vunpack.c.l.bf16 %v5166_v44  ;;  %v5287_v15 = vunpack.c.h.bf16 %v5166_v44  ;;  %v5169_v39 = vpack.c.bf16 %v5101_v14, %v5100_v13  ;;  %v4532_v56 = vpack.c.bf16 %v11449_v41, %v11439_v62  ;;  %v12520_v41 = vld [vmem:[#allocation48_spill] sm:$0xff]  ;;  %v12521_v13 = vld [vmem:[#allocation49_spill] sm:$0xff] }
 0x4ee   : > { %v5290_v24 = vunpack.c.l.bf16 %v5168_v61  ;;  %v5291_v7 = vunpack.c.h.bf16 %v5168_v61  ;;  %v5288_v49 = vunpack.c.l.bf16 %v5167_v5  ;;  %v5289_v54 = vunpack.c.h.bf16 %v5167_v5 }
 0x4ef   : > { %v5414_v30 = vmul.f32 %v5286_v6, %v12512_v63  ;;  %v5415_v22 = vmul.f32 %v5287_v15, %v12513_v33  ;;  %v5292_v35 = vunpack.c.l.bf16 %v5169_v39  ;;  %v5293_v51 = vunpack.c.h.bf16 %v5169_v39  ;;  %v6065_v62 = vpop.f32.mrf.mxu3 }
 0x4f0   : > { %v5418_v29 = vmul.f32 %v5290_v24, %v12514_v50  ;;  %v5419_v9 = vmul.f32 %v5291_v7, %v12515_v0  ;;  %v5416_v52 = vmul.f32 %v5288_v49, %v12516_v17  ;;  %v5417_v4 = vmul.f32 %v5289_v54, %v12517_v47 }
 0x4f1   : > { %v5420_v60 = vmul.f32 %v5292_v35, %v12518_v1  ;;  %v5421_v16 = vmul.f32 %v5293_v51, %v12519_v26  ;;  %v5974_v8 = vadd.f32 %v5973_v31, %v5885_v32  ;;  %v4654_v58 = vunpack.c.l.bf16 %v4530_v21  ;;  %v5976_v31 = vpop.f32.mrf.mxu2 }
 0x4f2   : > { %v5486_v43 = vpack.c.bf16 %v5418_v29, %v5414_v30  ;;  %v5487_v23 = vpack.c.bf16 %v5419_v9, %v5415_v22  ;;  %v4655_v55 = vunpack.c.h.bf16 %v4530_v21  ;;  %v4658_v59 = vunpack.c.l.bf16 %v4532_v56 }
 0x4f3   : > { %v5488_v12 = vpack.c.bf16 %v5420_v60, %v5416_v52  ;;  %v5489_v34 = vpack.c.bf16 %v5421_v16, %v5417_v4  ;;  %v6063_v3 = vadd.f32 %v6062_v57, %v5974_v8  ;;  %v4659_v48 = vunpack.c.h.bf16 %v4532_v56 }
 0x4f4   : > { %5832 = vmatmul.bf16.gmra.mxu0 %v5486_v43  ;;  %5921 = vmatmul.bf16.gmra.mxu1 %v5487_v23  ;;  %v4782_v2 = vadd.f32 1.0, %v4654_v58  ;;  %v4783_v28 = vadd.f32 1.0, %v4655_v55  ;;  %v4531_v27 = vpack.c.bf16 %v11428_v11, %v11426_v42  ;;  %v6122_v44 = vadd.f32 %v12520_v41, %v6061_v18  ;;  %v12523_v41 = vld [vmem:[#allocation136_spill] sm:$0xff] }
 0x4f5   : > { %6010 = vmatmul.bf16.gmra.mxu2 %v5488_v12  ;;  %6099 = vmatmul.bf16.gmra.mxu3 %v5489_v34  ;;  %v6123_v57 = vadd.f32 %v12521_v13, %v6063_v3  ;;  %v4786_v14 = vadd.f32 1.0, %v4658_v59  ;;  %v4533_v61 = vpack.c.bf16 %v7429_v19, %v7427_v40  ;;  %v4787_v5 = vadd.f32 1.0, %v4659_v48 }
 0x4f6   : > { %v4850_v32 = vpack.c.bf16 %v4783_v28, %v4782_v2  ;;  %v4656_v6 = vunpack.c.l.bf16 %v4531_v27  ;;  %v4657_v15 = vunpack.c.h.bf16 %v4531_v27  ;;  %v5888_v54 = vadd.f32 %v11571_v20, %v5799_v46  ;;  %v5803_v20 = vpop.f32.mrf.mxu0  ;;  %v5892_v46 = vpop.f32.mrf.mxu1  ;;  %v12522_v28 = vld [vmem:[#allocation140_spill] sm:$0xff] }
 0x4f7   : > { %v6853_v39 = vpack.c.bf16 %v6123_v57, %v6122_v44  ;;  %v4660_v21 = vunpack.c.l.bf16 %v4533_v61  ;;  %v4661_v24 = vunpack.c.h.bf16 %v4533_v61  ;;  %v4852_v7 = vpack.c.bf16 %v4787_v5, %v4786_v14  ;;  %v6067_v43 = vpop.f32.mrf.mxu3 }
 0x4f8   : > { %v4974_v42 = vunpack.c.l.bf16 %v4850_v32  ;;  %v4975_v11 = vunpack.c.h.bf16 %v4850_v32  ;;  %v4784_v49 = vadd.f32 1.0, %v4656_v6  ;;  %v4785_v63 = vadd.f32 1.0, %v4657_v15  ;;  %v12524_v15 = vld [vmem:[#allocation144_spill] sm:$0xff] }
 0x4f9   : > { %6920 = vst [vmem:[%s11436_s2 + $0x30] sm:$0xff] %v6853_v39   ;;  %v4788_v18 = vadd.f32 1.0, %v4660_v21  ;;  %v4789_v30 = vadd.f32 1.0, %v4661_v24  ;;  %v4978_v33 = vunpack.c.l.bf16 %v4852_v7  ;;  %v4979_v22 = vunpack.c.h.bf16 %v4852_v7  ;;  %v5978_v56 = vpop.f32.mrf.mxu2  ;;  %v12525_v21 = vld [vmem:[#allocation150_spill] sm:$0xff] }
 0x4fa   : > { %v5102_v40 = vmul.f32 0.5, %v4974_v42  ;;  %v5103_v19 = vmul.f32 0.5, %v4975_v11  ;;  %v4851_v35 = vpack.c.bf16 %v4785_v63, %v4784_v49  ;;  %v5801_v50 = vadd.f32 %v11542_v45, %v5800_v53  ;;  %v12526_v7 = vld [vmem:[#allocation50_spill] sm:$0xff]  ;;  %v12527_v42 = vld [vmem:[#allocation51_spill] sm:$0xff] }
 0x4fb   : > { %v4853_v51 = vpack.c.bf16 %v4789_v30, %v4788_v18  ;;  %v5106_v29 = vmul.f32 0.5, %v4978_v33  ;;  %v5107_v0 = vmul.f32 0.5, %v4979_v22  ;;  %v5977_v17 = vadd.f32 %v5976_v31, %v5888_v54 }
 0x4fc   : > { %v5170_v9 = vpack.c.bf16 %v5103_v19, %v5102_v40  ;;  %v4976_v52 = vunpack.c.l.bf16 %v4851_v35  ;;  %v4977_v47 = vunpack.c.h.bf16 %v4851_v35  ;;  %v5890_v8 = vadd.f32 %v5889_v37, %v5801_v50 }
 0x4fd   : > { %v4980_v4 = vunpack.c.l.bf16 %v4853_v51  ;;  %v4981_v1 = vunpack.c.h.bf16 %v4853_v51  ;;  %v5172_v60 = vpack.c.bf16 %v5107_v0, %v5106_v29  ;;  %v6066_v48 = vadd.f32 %v6065_v62, %v5977_v17 }
 0x4fe   : > { %v5294_v26 = vunpack.c.l.bf16 %v5170_v9  ;;  %v5295_v16 = vunpack.c.h.bf16 %v5170_v9  ;;  %v5104_v23 = vmul.f32 0.5, %v4976_v52  ;;  %v5105_v58 = vmul.f32 0.5, %v4977_v47  ;;  %v5805_v18 = vpop.f32.mrf.mxu0  ;;  %v5894_v30 = vpop.f32.mrf.mxu1  ;;  %v12528_v47 = vld [vmem:[#allocation52_spill] sm:$0xff] }
 0x4ff   : > { %v5108_v55 = vmul.f32 0.5, %v4980_v4  ;;  %v5109_v12 = vmul.f32 0.5, %v4981_v1  ;;  %v5298_v34 = vunpack.c.l.bf16 %v5172_v60  ;;  %v5299_v3 = vunpack.c.h.bf16 %v5172_v60  ;;  %v12529_v1 = vld [vmem:[#allocation53_spill] sm:$0xff] }
 0x500   : > { %v5171_v59 = vpack.c.bf16 %v5105_v58, %v5104_v23  ;;  %v5979_v2 = vadd.f32 %v5978_v56, %v5890_v8  ;;  %v5422_v27 = vmul.f32 %v5294_v26, %v12522_v28  ;;  %v5423_v44 = vmul.f32 %v5295_v16, %v12523_v41  ;;  %v12530_v28 = vld [vmem:[#allocation54_spill] sm:$0xff] }
 0x501   : > { %v5173_v53 = vpack.c.bf16 %v5109_v12, %v5108_v55  ;;  %v5426_v31 = vmul.f32 %v5298_v34, %v11349_v25  ;;  %v5427_v37 = vmul.f32 %v5299_v3, %v11351_v10  ;;  %v6124_v10 = vadd.f32 %v12526_v7, %v6066_v48 }
 0x502   : > { %v5296_v13 = vunpack.c.l.bf16 %v5171_v59  ;;  %v5297_v14 = vunpack.c.h.bf16 %v5171_v59  ;;  %v6068_v6 = vadd.f32 %v6067_v43, %v5979_v2  ;;  %v5804_v63 = vadd.f32 %v11542_v45, %v5803_v20 }
 0x503   : > { %v5300_v57 = vunpack.c.l.bf16 %v5173_v53  ;;  %v5301_v61 = vunpack.c.h.bf16 %v5173_v53  ;;  %v5490_v5 = vpack.c.bf16 %v5426_v31, %v5422_v27  ;;  %v5491_v32 = vpack.c.bf16 %v5427_v37, %v5423_v44  ;;  %v12531_v31 = vld [vmem:[#allocation55_spill] sm:$0xff] }
 0x504   : > { %v5424_v39 = vmul.f32 %v5296_v13, %v12524_v15  ;;  %v5425_v24 = vmul.f32 %v5297_v14, %v12525_v21  ;;  %v6125_v11 = vadd.f32 %v12527_v42, %v6068_v6  ;;  %v5806_v40 = vadd.f32 %v11542_v45, %v5805_v18  ;;  %v12532_v42 = vld [vmem:[#allocation57_spill] sm:$0xff] }
 0x505   : > { %v5428_v62 = vmul.f32 %v5300_v57, %v11372_v38  ;;  %v5429_v25 = vmul.f32 %v5301_v61, %v11374_v36  ;;  %5837 = vmatmul.bf16.gmra.mxu0 %v5490_v5  ;;  %5926 = vmatmul.bf16.gmra.mxu1 %v5491_v32  ;;  %v5893_v36 = vadd.f32 %v5892_v46, %v5804_v63 }
 0x506   : > { %v6858_v33 = vpack.c.bf16 %v6125_v11, %v6124_v10  ;;  %v5895_v35 = vadd.f32 %v5894_v30, %v5806_v40 }
 0x507   : > { %v5492_v49 = vpack.c.bf16 %v5428_v62, %v5424_v39  ;;  %v5493_v54 = vpack.c.bf16 %v5429_v25, %v5425_v24 }
 0x508   : > { %v5981_v22 = vpop.f32.mrf.mxu2  ;;  %v6070_v38 = vpop.f32.mrf.mxu3  ;;  %6921 = vst [vmem:[%s11436_s2 + $0x38] sm:$0xff] %v6858_v33  }
 0x509   : > { %6015 = vmatmul.bf16.gmra.mxu2 %v5492_v49  ;;  %6104 = vmatmul.bf16.gmra.mxu3 %v5493_v54  ;;  %v5982_v19 = vadd.f32 %v5981_v22, %v5893_v36  ;;  %v12533_v49 = vld [vmem:[#allocation59_spill] sm:$0xff] }
 0x50b   : > { %v6071_v50 = vadd.f32 %v6070_v38, %v5982_v19 }
 0x50d   : > { %v6126_v4 = vadd.f32 %v12528_v47, %v6071_v50  ;;  %v12534_v47 = vld [vmem:[#allocation62_spill] sm:$0xff] }
 0x510   : > { %v5983_v51 = vpop.f32.mrf.mxu2  ;;  %v6072_v17 = vpop.f32.mrf.mxu3 }
 0x511   : > { %v5984_v29 = vadd.f32 %v5983_v51, %v5895_v35  ;;  %v5808_v0 = vpop.f32.mrf.mxu0  ;;  %v5897_v9 = vpop.f32.mrf.mxu1 }
 0x512   : > { %v5809_v26 = vadd.f32 %v11542_v45, %v5808_v0 }
 0x513   : > { %v6073_v52 = vadd.f32 %v6072_v17, %v5984_v29 }
 0x514   : > { %v5898_v43 = vadd.f32 %v5897_v9, %v5809_v26 }
 0x515   : > { %v6127_v20 = vadd.f32 %v12529_v1, %v6073_v52  ;;  %v12535_v1 = vld [vmem:[#allocation64_spill] sm:$0xff] }
 0x517   : > { %v6863_v60 = vpack.c.bf16 %v6127_v20, %v6126_v4 }
 0x519   : > { %6922 = vst [vmem:[%s11436_s2 + $0x40] sm:$0xff] %v6863_v60   ;;  %v5810_v46 = vpop.f32.mrf.mxu0  ;;  %v5899_v16 = vpop.f32.mrf.mxu1 }
 0x51a   : > { %v5811_v23 = vadd.f32 %v11542_v45, %v5810_v46 }
 0x51b   : > { %v5986_v8 = vpop.f32.mrf.mxu2  ;;  %v6075_v56 = vpop.f32.mrf.mxu3 }
 0x51c   : > { %v5987_v58 = vadd.f32 %v5986_v8, %v5898_v43  ;;  %v5900_v55 = vadd.f32 %v5899_v16, %v5811_v23 }
 0x51e   : > { %v6076_v3 = vadd.f32 %v6075_v56, %v5987_v58 }
 0x520   : > { %v6128_v27 = vadd.f32 %v12530_v28, %v6076_v3  ;;  %v12536_v28 = vld [vmem:[#allocation67_spill] sm:$0xff] }
 0x523   : > { %v5988_v12 = vpop.f32.mrf.mxu2  ;;  %v6077_v34 = vpop.f32.mrf.mxu3 }
 0x524   : > { %v5989_v59 = vadd.f32 %v5988_v12, %v5900_v55  ;;  %v5813_v53 = vpop.f32.mrf.mxu0  ;;  %v5902_v48 = vpop.f32.mrf.mxu1 }
 0x525   : > { %v5814_v37 = vadd.f32 %v11542_v45, %v5813_v53 }
 0x526   : > { %v6078_v2 = vadd.f32 %v6077_v34, %v5989_v59 }
 0x527   : > { %v5903_v5 = vadd.f32 %v5902_v48, %v5814_v37 }
 0x528   : > { %v6129_v41 = vadd.f32 %v12531_v31, %v6078_v2  ;;  %v12537_v31 = vld [vmem:[#allocation68_spill] sm:$0xff] }
 0x52a   : > { %v6868_v44 = vpack.c.bf16 %v6129_v41, %v6128_v27 }
 0x52c   : > { %6923 = vst [vmem:[%s11436_s2 + $0x48] sm:$0xff] %v6868_v44   ;;  %v5815_v13 = vpop.f32.mrf.mxu0  ;;  %v5904_v57 = vpop.f32.mrf.mxu1 }
 0x52d   : > { %v5816_v32 = vadd.f32 %v11542_v45, %v5815_v13 }
 0x52e   : > { %v5991_v14 = vpop.f32.mrf.mxu2  ;;  %v6080_v61 = vpop.f32.mrf.mxu3 }
 0x52f   : > { %v5992_v6 = vadd.f32 %v5991_v14, %v5903_v5  ;;  %v5905_v15 = vadd.f32 %v5904_v57, %v5816_v32 }
 0x531   : > { %v6081_v21 = vadd.f32 %v6080_v61, %v5992_v6 }
 0x533   : > { %v6130_v11 = vadd.f32 %v12532_v42, %v6081_v21 }
 0x536   : > { %v5993_v39 = vpop.f32.mrf.mxu2  ;;  %v6082_v62 = vpop.f32.mrf.mxu3 }
 0x537   : > { %v5994_v24 = vadd.f32 %v5993_v39, %v5905_v15 }
 0x538   : > { %v5818_v25 = vpop.f32.mrf.mxu0  ;;  %v5907_v7 = vpop.f32.mrf.mxu1 }
 0x539   : > { %v6083_v10 = vadd.f32 %v6082_v62, %v5994_v24  ;;  %v5819_v18 = vadd.f32 %v11542_v45, %v5818_v25 }
 0x53b   : > { %v6131_v54 = vadd.f32 %v12533_v49, %v6083_v10  ;;  %v5908_v36 = vadd.f32 %v5907_v7, %v5819_v18  ;;  %v12538_v10 = vld [vmem:[#allocation70_spill] sm:$0xff] }
 0x53d   : > { %v6873_v63 = vpack.c.bf16 %v6131_v54, %v6130_v11  ;;  %v12539_v11 = vld [vmem:[#allocation73_spill] sm:$0xff] }
 0x53f   : > { %6924 = vst [vmem:[%s11436_s2 + $0x50] sm:$0xff] %v6873_v63  }
 0x540   : > { %v5996_v30 = vpop.f32.mrf.mxu2  ;;  %v6085_v33 = vpop.f32.mrf.mxu3 }
 0x541   : > { %v5820_v22 = vpop.f32.mrf.mxu0  ;;  %v5909_v38 = vpop.f32.mrf.mxu1  ;;  %v5997_v19 = vadd.f32 %v5996_v30, %v5908_v36 }
 0x542   : > { %v5821_v40 = vadd.f32 %v11542_v45, %v5820_v22 }
 0x543   : > { %v6086_v50 = vadd.f32 %v6085_v33, %v5997_v19 }
 0x544   : > { %v5910_v35 = vadd.f32 %v5909_v38, %v5821_v40 }
 0x545   : > { %v6132_v4 = vadd.f32 %v12534_v47, %v6086_v50 }
 0x548   : > { %v5998_v51 = vpop.f32.mrf.mxu2  ;;  %v6087_v0 = vpop.f32.mrf.mxu3 }
 0x549   : > { %v5999_v29 = vadd.f32 %v5998_v51, %v5910_v35 }
 0x54b   : > { %v6088_v9 = vadd.f32 %v6087_v0, %v5999_v29  ;;  %v5823_v17 = vpop.f32.mrf.mxu0  ;;  %v5912_v52 = vpop.f32.mrf.mxu1 }
 0x54c   : > { %v5824_v26 = vadd.f32 %v11542_v45, %v5823_v17 }
 0x54d   : > { %v6133_v20 = vadd.f32 %v12535_v1, %v6088_v9 }
 0x54e   : > { %v5913_v43 = vadd.f32 %v5912_v52, %v5824_v26  ;;  %v12541_v52 = vld [vmem:[#allocation74_spill] sm:$0xff] }
 0x54f   : > { %v6878_v60 = vpack.c.bf16 %v6133_v20, %v6132_v4  ;;  %v12542_v4 = vld [vmem:[#allocation77_spill] sm:$0xff] }
 0x551   : > { %6925 = vst [vmem:[%s11436_s2 + $0x58] sm:$0xff] %v6878_v60  }
 0x553   : > { %v5825_v46 = vpop.f32.mrf.mxu0  ;;  %v5914_v56 = vpop.f32.mrf.mxu1 }
 0x554   : > { %v6001_v16 = vpop.f32.mrf.mxu2  ;;  %v6090_v8 = vpop.f32.mrf.mxu3  ;;  %v5826_v23 = vadd.f32 %v11542_v45, %v5825_v46 }
 0x555   : > { %v6002_v58 = vadd.f32 %v6001_v16, %v5913_v43 }
 0x556   : > { %v5915_v55 = vadd.f32 %v5914_v56, %v5826_v23 }
 0x557   : > { %v6091_v3 = vadd.f32 %v6090_v8, %v6002_v58 }
 0x559   : > { %v6134_v27 = vadd.f32 %v12536_v28, %v6091_v3 }
 0x55c   : > { %v6003_v12 = vpop.f32.mrf.mxu2  ;;  %v6092_v34 = vpop.f32.mrf.mxu3 }
 0x55d   : > { %v6004_v59 = vadd.f32 %v6003_v12, %v5915_v55  ;;  %v5828_v53 = vpop.f32.mrf.mxu0  ;;  %v5917_v2 = vpop.f32.mrf.mxu1 }
 0x55e   : > { %v5829_v37 = vadd.f32 %v11542_v45, %v5828_v53 }
 0x55f   : > { %v6093_v48 = vadd.f32 %v6092_v34, %v6004_v59 }
 0x560   : > { %v5918_v61 = vadd.f32 %v5917_v2, %v5829_v37  ;;  %v12545_v2 = vld [vmem:[#allocation37_spill] sm:$0xff] }
 0x561   : > { %v6135_v41 = vadd.f32 %v12537_v31, %v6093_v48 }
 0x563   : > { %v6883_v44 = vpack.c.bf16 %v6135_v41, %v6134_v27 }
 0x565   : > { %6926 = vst [vmem:[%s11436_s2 + $0x60] sm:$0xff] %v6883_v44   ;;  %v5830_v13 = vpop.f32.mrf.mxu0  ;;  %v5919_v32 = vpop.f32.mrf.mxu1 }
 0x566   : > { %v6006_v57 = vpop.f32.mrf.mxu2  ;;  %v6095_v14 = vpop.f32.mrf.mxu3  ;;  %v5831_v5 = vadd.f32 %v11542_v45, %v5830_v13 }
 0x567   : > { %v6007_v6 = vadd.f32 %v6006_v57, %v5918_v61 }
 0x568   : > { %v5920_v15 = vadd.f32 %v5919_v32, %v5831_v5 }
 0x569   : > { %v6096_v21 = vadd.f32 %v6095_v14, %v6007_v6 }
 0x56b   : > { %v6136_v42 = vadd.f32 %v12538_v10, %v6096_v21 }
 0x56e   : > { %v6008_v39 = vpop.f32.mrf.mxu2  ;;  %v6097_v62 = vpop.f32.mrf.mxu3 }
 0x56f   : > { %v6009_v24 = vadd.f32 %v6008_v39, %v5920_v15 }
 0x571   : > { %v6098_v25 = vadd.f32 %v6097_v62, %v6009_v24  ;;  %v5833_v7 = vpop.f32.mrf.mxu0  ;;  %v5922_v54 = vpop.f32.mrf.mxu1 }
 0x572   : > { %v5834_v18 = vadd.f32 %v11542_v45, %v5833_v7 }
 0x573   : > { %v6137_v49 = vadd.f32 %v12539_v11, %v6098_v25 }
 0x574   : > { %v5923_v38 = vadd.f32 %v5922_v54, %v5834_v18 }
 0x575   : > { %v6888_v63 = vpack.c.bf16 %v6137_v49, %v6136_v42 }
 0x577   : > { %6927 = vst [vmem:[%s11436_s2 + $0x68] sm:$0xff] %v6888_v63  }
 0x578   : > { %v6011_v30 = vpop.f32.mrf.mxu2  ;;  %v6100_v33 = vpop.f32.mrf.mxu3 }
 0x579   : > { %v5835_v22 = vpop.f32.mrf.mxu0  ;;  %v6012_v40 = vadd.f32 %v6011_v30, %v5923_v38  ;;  %v5924_v19 = vpop.f32.mrf.mxu1 }
 0x57a   : > { %v5836_v36 = vadd.f32 %v11542_v45, %v5835_v22 }
 0x57b   : > { %v6101_v50 = vadd.f32 %v6100_v33, %v6012_v40 }
 0x57c   : > { %v5925_v35 = vadd.f32 %v5924_v19, %v5836_v36 }
 0x57d   : > { %v6138_v47 = vadd.f32 %v12541_v52, %v6101_v50 }
 0x580   : > { %v6013_v51 = vpop.f32.mrf.mxu2  ;;  %v6102_v0 = vpop.f32.mrf.mxu3 }
 0x581   : > { %v6014_v29 = vadd.f32 %v6013_v51, %v5925_v35 }
 0x582   : > { %v5838_v17 = vpop.f32.mrf.mxu0  ;;  %v5927_v60 = vpop.f32.mrf.mxu1 }
 0x583   : > { %v6103_v9 = vadd.f32 %v6102_v0, %v6014_v29  ;;  %v5839_v26 = vadd.f32 %v11542_v45, %v5838_v17 }
 0x585   : > { %v6139_v1 = vadd.f32 %v12542_v4, %v6103_v9  ;;  %v5928_v56 = vadd.f32 %v5927_v60, %v5839_v26 }
 0x587   : > { %v6893_v20 = vpack.c.bf16 %v6139_v1, %v6138_v47 }
 0x589   : > { %6928 = vst [vmem:[%s11436_s2 + $0x70] sm:$0xff] %v6893_v20  }
 0x58a   : > { %v5840_v46 = vpop.f32.mrf.mxu0  ;;  %v5929_v58 = vpop.f32.mrf.mxu1 }
 0x58b   : > { %v5841_v43 = vadd.f32 %v11542_v45, %v5840_v46  ;;  %v12544_v45 = vld [vmem:[#allocation78_spill] sm:$0xff] }
 0x58c   : > { %v6016_v16 = vpop.f32.mrf.mxu2  ;;  %v6105_v8 = vpop.f32.mrf.mxu3 }
 0x58d   : > { %v6017_v23 = vadd.f32 %v6016_v16, %v5928_v56  ;;  %v5930_v55 = vadd.f32 %v5929_v58, %v5841_v43 }
 0x58f   : > { %v6106_v34 = vadd.f32 %v6105_v8, %v6017_v23 }
 0x591   : > { %v6140_v48 = vadd.f32 %v12544_v45, %v6106_v34 }
 0x594   : > { %v6018_v12 = vpop.f32.mrf.mxu2  ;;  %v6107_v59 = vpop.f32.mrf.mxu3 }
 0x595   : > { %v6019_v3 = vadd.f32 %v6018_v12, %v5930_v55 }
 0x597   : > { %v6108_v53 = vadd.f32 %v6107_v59, %v6019_v3 }
 0x599   : > { %v6141_v28 = vadd.f32 %v12545_v2, %v6108_v53 }
 0x59b   : > { %v6898_v27 = vpack.c.bf16 %v6141_v28, %v6140_v48 }
 0x59d   : > { %6929 = vst [vmem:[%s11436_s2 + $0x78] sm:$0xff] %v6898_v27  }
 0x59e   : > { %7646 = shalt.err (!%p7643_p1)
}
 0x59f   : > { %s7791_s16 = smov 64   ;;  %s7792_s2 = smov 4  }
 0x5a0   : > { %6948 = dma.vmem_to_hbm [thread:$0]  (%p8045_p6), %s6222_s28, 2048, %s6224_s25, %s6207_s1, %s7791_s16, %s7791_s16, %s7792_s2  }
 0x5a1 PF: > { %p6981_p4 = scmp.ge.s32.totalorder %s7781_s30, 2  ;;  %s6238_s26 = sand.u32 1, %s7753_s23  }
 0x5a2   : > { %s6239_s15 = scalar_lea.sflag [#allocation4], %s6238_s26 }
 0x5a3   : > { %p6971_p7 = pnand %p6981_p4, %p8049_p13 }
 0x5a5   : > { %p6972_p11 = pneg %p6971_p7 }
 0x5a7   : > { %7724 = dma.done.wait (%p6972_p11), %s6239_s15, 2048  }
 0x5a8   : > { %7726 = vsyncadd (%p6972_p11), %s6239_s15, 4294965248  ;;  %s32_s30 = sadd.s32 1, %s7781_s30   ;;  %s12547_s17 = sld [smem:[#allocation21_spill]] }
 0x5a9   : > { %p11667_p12 = scmp.ge.s32.totalorder %s32_s30, 6   ;;  %s12548_s10 = sld [smem:[#allocation22_spill]] }
 0x5aa   : > { %s12549_s7 = sld [smem:[#allocation23_spill]]  ;;  %s12555_s18 = smov %s7737_s19 }
 0x5ab   : > { %s12550_s25 = sld [smem:[#allocation34_spill]]  ;;  %s12556_s19 = smov %s8086_s20 }
 0x5ac   : > { %s12551_s26 = sld [smem:[#allocation26_spill]]  ;;  %s12558_s21 = smov %s7749_s22 }
 0x5ad   : > { %s12552_s6 = sld [smem:[#allocation27_spill]]  ;;  %s12559_s22 = smov %s7997_s27 }
 0x5ae   : > { %s12553_s28 = sld [smem:[#allocation29_spill]]  ;;  %s12560_s23 = smov %s7757_s24 }
 0x5af   : > { %s12554_s29 = sld [smem:[#allocation30_spill]]  ;;  %s12557_s20 = smov %s12548_s10 }
 0x5b0   : > { %s12561_s24 = smov %s12549_s7  ;;  %31 = sbr.rel (!%p11667_p12) target bundleno = 27 (0x1b), region = 145 }
 0x5b3   : > { %s12562_s27 = smov %s12552_s6 }
 0x5b5   :  { %6245 = vsyncpa [#allocation3], 1 }
 0x5b6   :  { %6247 = vsyncpa [#allocation3 + $0x1], 1 }
 0x5b7   :  { %6248 = vsyncpa [#allocation6], 1 }
 0x5b8   :  { %6250 = vsyncpa [#allocation6 + $0x1], 1 }
 0x5b9   :  { %6251 = vsyncpa [#allocation9], 1 }
 0x5ba   :  { %6252 = vsyncpa [#allocation12], 1 }
 0x5bb   :  { %6253 = vsyncpa [#allocation4], 1 }
 0x5bc   :  { %6255 = vsyncpa [#allocation4 + $0x1], 1 }

</bundles_post_ra>
